<compile_context>
chip_gen: v5e
topology: v5e:2x2
jax: 0.10.0
libtpu: 0.0.40
codegen_flags: <defaults>
</compile_context>

<pallas_src>
import functools
import math

import jax
import jax.numpy as jnp
from jax import lax
from jax.experimental import pallas as pl
from jax.experimental.pallas import tpu as pltpu

EMBED_DIM = 128            # must be divisible by NUM_HEADS (module asserts this)
NUM_HEADS = 16
HEAD_DIM = EMBED_DIM // NUM_HEADS
MLP_HIDDEN = 4304          # fixed by VitBlock.__init__
LN_EPS = 1e-5


def _layernorm(v, gamma, beta):
    mu = jnp.mean(v, axis=-1, keepdims=True)
    var = jnp.mean(jnp.square(v - mu), axis=-1, keepdims=True)
    return (v - mu) * lax.rsqrt(var + LN_EPS) * gamma + beta


def _gelu_tanh(v):
    # nn.GELU(approximate='tanh'); dtype-preserving (bf16 in -> bf16 out).
    c = math.sqrt(2.0 / math.pi)
    return 0.5 * v * (1.0 + jnp.tanh(c * (v + 0.044715 * v * v * v)))


def _vit_block_kernel(x_ref, wq_ref, bq_ref, wkv_ref, bkv_ref,
                      wproj_ref, bproj_ref, g1_ref, be1_ref, g2_ref, be2_ref,
                      wfc1_ref, bfc1_ref, wfc2_ref, bfc2_ref,
                      o_ref, ks_ref, vs_ref,
                      *, n_tokens, n_pad, tq, kv_every_step, bf16_eup):
    C = EMBED_DIM
    H = NUM_HEADS
    D = HEAD_DIM
    bf16 = jnp.bfloat16
    t = pl.program_id(1)

    # ---- K/V for the whole token slab, head-major bf16 scratch -------------
    def compute_kv():
        xs = x_ref[0].astype(jnp.float32)                       # (n_pad, C)
        h = _layernorm(xs, g1_ref[...], be1_ref[...])
        kv = jnp.dot(h.astype(bf16), wkv_ref[...],
                     preferred_element_type=jnp.float32) + bkv_ref[...]  # (n_pad, 2C)
        k = kv[:, :C].astype(bf16)
        v = kv[:, C:].astype(bf16)
        ks_ref[...] = jnp.transpose(k.reshape(n_pad, H, D), (1, 0, 2))
        vs_ref[...] = jnp.transpose(v.reshape(n_pad, H, D), (1, 0, 2))

    if kv_every_step:
        compute_kv()                       # both grid axes "parallel" (v7x, B=1)
    else:
        pl.when(t == 0)(compute_kv)        # once per batch element

    row0 = pl.multiple_of(t * tq, tq)
    x_t = x_ref[0, pl.ds(row0, tq), :].astype(jnp.float32)       # (tq, C)

    # ---- attention branch: x + proj(attn(norm1(x))) -------------------------
    hq = _layernorm(x_t, g1_ref[...], be1_ref[...])
    # 1/sqrt(head_dim) already folded into wq/bq in the wrapper.
    q = jnp.dot(hq.astype(bf16), wq_ref[...],
                preferred_element_type=jnp.float32) + bq_ref[...]        # (tq, C)
    qh = jnp.transpose(q.astype(bf16).reshape(tq, H, D), (1, 0, 2))      # (H, tq, D)

    s = jnp.einsum('hqd,hkd->hqk', qh, ks_ref[...],
                   preferred_element_type=jnp.float32)           # (H, tq, n_pad) f32
    if n_pad != n_tokens:
        # Padded key tokens: LayerNorm of a zero row is beta-shaped, not zero,
        # so mask their scores before softmax.
        key_id = lax.broadcasted_iota(jnp.int32, (1, 1, n_pad), 2)
        s = jnp.where(key_id < n_tokens, s, -1e30)

    m = jnp.max(s, axis=-1, keepdims=True)
    if bf16_eup:
        p = jnp.exp((s - m).astype(bf16))                        # bf16 EUP exp
        l = jnp.sum(p.astype(jnp.float32), axis=-1, keepdims=True)
    else:
        p32 = jnp.exp(s - m)                                     # f32 path (v5e)
        l = jnp.sum(p32, axis=-1, keepdims=True)
        p = p32.astype(bf16)

    o = jnp.einsum('hqk,hkd->hqd', p, vs_ref[...],
                   preferred_element_type=jnp.float32)           # (H, tq, D) f32
    o = o * pl.reciprocal(l, approx=True)                        # normalize post-PV

    attn = jnp.transpose(o, (1, 0, 2)).reshape(tq, C)            # (tq, C)
    attn = jnp.dot(attn.astype(bf16), wproj_ref[...],
                   preferred_element_type=jnp.float32) + bproj_ref[...]
    x1 = x_t + attn

    # ---- MLP branch: x1 + fc2(gelu(fc1(norm2(x1)))) --------------------------
    h2 = _layernorm(x1, g2_ref[...], be2_ref[...])
    mlp = jnp.dot(h2.astype(bf16), wfc1_ref[...],
                  preferred_element_type=jnp.float32) + bfc1_ref[...]    # (tq, Hp)
    if bf16_eup:
        act = _gelu_tanh(mlp.astype(bf16))                       # bf16 EUP tanh
    else:
        act = _gelu_tanh(mlp).astype(bf16)                       # f32 tanh (v5e)
    mlp2 = jnp.dot(act, wfc2_ref[...],
                   preferred_element_type=jnp.float32) + bfc2_ref[...]   # (tq, C)

    o_ref[0] = (x1 + mlp2).astype(o_ref.dtype)


def _chip_kind():
    try:
        return jax.devices()[0].device_kind.lower()
    except Exception:
        return ""


def _round_up(a, m):
    return ((a + m - 1) // m) * m


def vit_block(x, params, tile_q=None):
    (wqkv, bqkv, wproj, bproj, g1, be1, g2, be2, wfc1, bfc1, wfc2, bfc2) = params
    B, N, C = x.shape
    assert C == EMBED_DIM

    kind = _chip_kind()
    is_v7x = "v7" in kind
    bf16_eup = is_v7x or ("v6" in kind)       # v5e keeps f32 EUP path

    # Query-token tile.  Multiple of 256 keeps the 256-wide MXU rows full on
    # v6e/v7x; 256 on v7x (64 MiB VMEM / 48 MiB scoped), 512 elsewhere.
    tq_target = tile_q if tile_q is not None else (256 if is_v7x else 512)
    tq_target = max(8, _round_up(int(tq_target), 8))
    if N <= tq_target:
        tq = _round_up(N, 8)
        n_pad = tq
    else:
        tq = tq_target
        n_pad = _round_up(N, tq)
    n_tiles = n_pad // tq

    if n_pad != N:
        x = jnp.pad(x, ((0, 0), (0, n_pad - N), (0, 0)))

    # Lane-dense pad of the MLP hidden dim (4304 -> 4352); padded cols/rows
    # are zero so they contribute exactly nothing.
    Hd = wfc1.shape[1]
    Hp = _round_up(Hd, 128)
    if Hp != Hd:
        wfc1 = jnp.pad(wfc1, ((0, 0), (0, Hp - Hd)))
        bfc1 = jnp.pad(bfc1, ((0, 0), (0, Hp - Hd)))
        wfc2 = jnp.pad(wfc2, ((0, Hp - Hd), (0, 0)))

    # Fold the softmax 1/sqrt(head_dim) scale into the q projection (in f32,
    # before the bf16 cast).  Split qkv into q and kv halves.
    bf16 = jnp.bfloat16
    scale = 1.0 / math.sqrt(HEAD_DIM)
    wq = (wqkv[:, :C] * scale).astype(bf16)
    bq = bqkv[:, :C] * scale
    wkv = wqkv[:, C:].astype(bf16)
    bkv = bqkv[:, C:]

    weights = (wq, bq, wkv, bkv, wproj.astype(bf16), bproj,
               g1, be1, g2, be2,
               wfc1.astype(bf16), bfc1, wfc2.astype(bf16), bfc2)

    # v7x single-image inference: recompute K/V per tile (cheap vs. the MLP)
    # so both grid axes are "parallel" and both TensorCores get work.
    kv_every_step = is_v7x and B == 1 and n_tiles > 1
    dim_sem = ("parallel", "parallel" if kv_every_step else "arbitrary")

    kernel = functools.partial(
        _vit_block_kernel,
        n_tokens=N, n_pad=n_pad, tq=tq,
        kv_every_step=kv_every_step, bf16_eup=bf16_eup)

    # Weights are grid-invariant -> single resident VMEM copy (no pipeline).
    w_spec = pl.BlockSpec(memory_space=pltpu.MemorySpace.VMEM)
    in_specs = ([pl.BlockSpec((1, n_pad, C), lambda b, t: (b, 0, 0))]
                + [w_spec] * len(weights))
    out_spec = pl.BlockSpec((1, tq, C), lambda b, t: (b, t, 0))

    # Generation-aware scoped-VMEM budget: 3/4 of physical, capped at 96 MiB
    # (v5e/v6e have 128 MiB physical, v7x has 64 MiB -> 48 MiB scoped).
    vmem_phys = (64 if is_v7x else 128) * 1024 * 1024
    vmem_limit = min(96 * 1024 * 1024, (vmem_phys * 3) // 4)

    out = pl.pallas_call(
        kernel,
        out_shape=jax.ShapeDtypeStruct((B, n_pad, C), x.dtype),
        grid_spec=pltpu.PrefetchScalarGridSpec(
            num_scalar_prefetch=0,
            grid=(B, n_tiles),
            in_specs=in_specs,
            out_specs=out_spec,
            scratch_shapes=[
                pltpu.VMEM((NUM_HEADS, n_pad, HEAD_DIM), jnp.bfloat16),  # K
                pltpu.VMEM((NUM_HEADS, n_pad, HEAD_DIM), jnp.bfloat16),  # V
            ],
        ),
        compiler_params=pltpu.CompilerParams(
            dimension_semantics=dim_sem,
            vmem_limit_bytes=vmem_limit,
        ),
    )(x, *weights)

    if n_pad != N:
        out = out[:, :N, :]
    return out


def vit_block_ref(x, params):
    # Pure-f32 reference with the exact PyTorch-module semantics.
    (wqkv, bqkv, wproj, bproj, g1, be1, g2, be2, wfc1, bfc1, wfc2, bfc2) = params

    def ln(v, g, b):
        mu = v.mean(-1, keepdims=True)
        var = ((v - mu) ** 2).mean(-1, keepdims=True)
        return (v - mu) / jnp.sqrt(var + LN_EPS) * g + b

    B, N, C = x.shape
    h = ln(x, g1, be1)
    qkv = h @ wqkv + bqkv
    q, k, v = jnp.split(qkv, 3, axis=-1)

    def heads(t):
        return t.reshape(B, N, NUM_HEADS, HEAD_DIM).transpose(0, 2, 1, 3)

    qh, kh, vh = heads(q), heads(k), heads(v)
    s = jnp.einsum('bhnd,bhmd->bhnm', qh, kh) / math.sqrt(HEAD_DIM)
    p = jax.nn.softmax(s, axis=-1)
    o = jnp.einsum('bhnm,bhmd->bhnd', p, vh)
    o = o.transpose(0, 2, 1, 3).reshape(B, N, C)
    x1 = x + (o @ wproj + bproj)

    h2 = ln(x1, g2, be2)
    m = h2 @ wfc1 + bfc1
    m = _gelu_tanh(m)
    m = m @ wfc2 + bfc2
    return x1 + m


def make_params(key):
    ks = jax.random.split(key, 12)
    f = jnp.float32
    wqkv = 0.02 * jax.random.normal(ks[0], (EMBED_DIM, 3 * EMBED_DIM), f)
    bqkv = 0.02 * jax.random.normal(ks[1], (1, 3 * EMBED_DIM), f)
    wproj = 0.02 * jax.random.normal(ks[2], (EMBED_DIM, EMBED_DIM), f)
    bproj = 0.02 * jax.random.normal(ks[3], (1, EMBED_DIM), f)
    g1 = 1.0 + 0.05 * jax.random.normal(ks[4], (1, EMBED_DIM), f)
    be1 = 0.02 * jax.random.normal(ks[5], (1, EMBED_DIM), f)
    g2 = 1.0 + 0.05 * jax.random.normal(ks[6], (1, EMBED_DIM), f)
    be2 = 0.02 * jax.random.normal(ks[7], (1, EMBED_DIM), f)
    wfc1 = 0.02 * jax.random.normal(ks[8], (EMBED_DIM, MLP_HIDDEN), f)
    bfc1 = 0.02 * jax.random.normal(ks[9], (1, MLP_HIDDEN), f)
    wfc2 = 0.02 * jax.random.normal(ks[10], (MLP_HIDDEN, EMBED_DIM), f)
    bfc2 = 0.02 * jax.random.normal(ks[11], (1, EMBED_DIM), f)
    return (wqkv, bqkv, wproj, bproj, g1, be1, g2, be2, wfc1, bfc1, wfc2, bfc2)


if __name__ == "__main__":
    key = jax.random.PRNGKey(0)
    kx, kp, kx2 = jax.random.split(key, 3)
    params = make_params(kp)

    # Case 1: small, single q tile (N <= TQ).
    B, N = 2, 8
    x = 0.5 * jax.random.normal(kx, (B, N, EMBED_DIM), jnp.float32)
    out = jax.block_until_ready(vit_block(x, params))
    ref = vit_block_ref(x, params)
    assert out.shape == (B, N, EMBED_DIM)
    err1 = float(jnp.max(jnp.abs(out - ref)))
    assert err1 < 5e-2, err1

    # Case 2: exercises the q-tiling path (3 tiles of 8) AND key padding/mask
    # (N=20 -> N_pad=24) at small scale.
    N2 = 20
    x2 = 0.5 * jax.random.normal(kx2, (B, N2, EMBED_DIM), jnp.float32)
    out2 = jax.block_until_ready(vit_block(x2, params, tile_q=8))
    ref2 = vit_block_ref(x2, params)
    assert out2.shape == (B, N2, EMBED_DIM)
    err2 = float(jnp.max(jnp.abs(out2 - ref2)))
    assert err2 < 5e-2, err2

    print("KERNEL_OK")
</pallas_src>

<mosaic_0001>
module attributes {stable_mosaic.version = 11 : i64} {
  func.func @_vit_block_kernel(%arg0: i32, %arg1: i32, %arg2: memref<1x8x128xf32, #tpu.memory_space<vmem>>, %arg3: memref<128x128xbf16, #tpu.memory_space<vmem>>, %arg4: memref<1x128xf32, #tpu.memory_space<vmem>>, %arg5: memref<128x256xbf16, #tpu.memory_space<vmem>>, %arg6: memref<1x256xf32, #tpu.memory_space<vmem>>, %arg7: memref<128x128xbf16, #tpu.memory_space<vmem>>, %arg8: memref<1x128xf32, #tpu.memory_space<vmem>>, %arg9: memref<1x128xf32, #tpu.memory_space<vmem>>, %arg10: memref<1x128xf32, #tpu.memory_space<vmem>>, %arg11: memref<1x128xf32, #tpu.memory_space<vmem>>, %arg12: memref<1x128xf32, #tpu.memory_space<vmem>>, %arg13: memref<128x4352xbf16, #tpu.memory_space<vmem>>, %arg14: memref<1x4352xf32, #tpu.memory_space<vmem>>, %arg15: memref<4352x128xbf16, #tpu.memory_space<vmem>>, %arg16: memref<1x128xf32, #tpu.memory_space<vmem>>, %arg17: memref<1x8x128xf32, #tpu.memory_space<vmem>>, %arg18: memref<16x8x8xbf16, #tpu.memory_space<vmem>>, %arg19: memref<16x8x8xbf16, #tpu.memory_space<vmem>>) attributes {dimension_semantics = [#tpu.dimension_semantics<parallel>, #tpu.dimension_semantics<arbitrary>], iteration_bounds = array<i64: 2, 1>, scalar_prefetch = 0 : i64, scratch_operands = 2 : i64, tpu.core_type = #tpu.core_type<tc>, window_params = [{transform_indices = @transform_0, window_bounds = array<i64: 1, 8, 128>}, {pipeline_mode = #tpu.pipeline_mode<synchronous>, transform_indices = @transform_1, window_bounds = array<i64: 128, 128>}, {pipeline_mode = #tpu.pipeline_mode<synchronous>, transform_indices = @transform_2, window_bounds = array<i64: 1, 128>}, {pipeline_mode = #tpu.pipeline_mode<synchronous>, transform_indices = @transform_3, window_bounds = array<i64: 128, 256>}, {pipeline_mode = #tpu.pipeline_mode<synchronous>, transform_indices = @transform_4, window_bounds = array<i64: 1, 256>}, {pipeline_mode = #tpu.pipeline_mode<synchronous>, transform_indices = @transform_5, window_bounds = array<i64: 128, 128>}, {pipeline_mode = #tpu.pipeline_mode<synchronous>, transform_indices = @transform_6, window_bounds = array<i64: 1, 128>}, {pipeline_mode = #tpu.pipeline_mode<synchronous>, transform_indices = @transform_7, window_bounds = array<i64: 1, 128>}, {pipeline_mode = #tpu.pipeline_mode<synchronous>, transform_indices = @transform_8, window_bounds = array<i64: 1, 128>}, {pipeline_mode = #tpu.pipeline_mode<synchronous>, transform_indices = @transform_9, window_bounds = array<i64: 1, 128>}, {pipeline_mode = #tpu.pipeline_mode<synchronous>, transform_indices = @transform_10, window_bounds = array<i64: 1, 128>}, {pipeline_mode = #tpu.pipeline_mode<synchronous>, transform_indices = @transform_11, window_bounds = array<i64: 128, 4352>}, {pipeline_mode = #tpu.pipeline_mode<synchronous>, transform_indices = @transform_12, window_bounds = array<i64: 1, 4352>}, {pipeline_mode = #tpu.pipeline_mode<synchronous>, transform_indices = @transform_13, window_bounds = array<i64: 4352, 128>}, {pipeline_mode = #tpu.pipeline_mode<synchronous>, transform_indices = @transform_14, window_bounds = array<i64: 1, 128>}, {transform_indices = @transform_15, window_bounds = array<i64: 1, 8, 128>}]} {
    %c0_i32 = arith.constant 0 : i32
    %0 = arith.cmpi eq, %arg1, %c0_i32 : i32
    %1 = arith.extui %0 : i1 to i32
    %c0_i32_0 = arith.constant 0 : i32
    %2 = arith.cmpi ne, %1, %c0_i32_0 : i32
    scf.if %2 {
      %c0_56 = arith.constant 0 : index
      %c0_57 = arith.constant 0 : index
      %c0_58 = arith.constant 0 : index
      %118 = vector.load %arg2[%c0_56, %c0_57, %c0_58] : memref<1x8x128xf32, #tpu.memory_space<vmem>>, vector<1x8x128xf32>
      %119 = vector.shape_cast %118 : vector<1x8x128xf32> to vector<8x128xf32>
      %c0_59 = arith.constant 0 : index
      %c0_60 = arith.constant 0 : index
      %120 = vector.load %arg9[%c0_59, %c0_60] : memref<1x128xf32, #tpu.memory_space<vmem>>, vector<1x128xf32>
      %c0_61 = arith.constant 0 : index
      %c0_62 = arith.constant 0 : index
      %121 = vector.load %arg10[%c0_61, %c0_62] : memref<1x128xf32, #tpu.memory_space<vmem>>, vector<1x128xf32>
      %cst_63 = arith.constant dense<0.000000e+00> : vector<8xf32>
      %122 = vector.multi_reduction <add>, %119, %cst_63 [1] : vector<8x128xf32> to vector<8xf32>
      %123 = vector.shape_cast %122 : vector<8xf32> to vector<8x1xf32>
      %cst_64 = arith.constant 1.280000e+02 : f32
      %124 = vector.broadcast %cst_64 : f32 to vector<8x1xf32>
      %125 = arith.divf %123, %124 : vector<8x1xf32>
      %126 = vector.broadcast %125 : vector<8x1xf32> to vector<8x128xf32>
      %127 = arith.subf %119, %126 : vector<8x128xf32>
      %128 = arith.mulf %127, %127 : vector<8x128xf32>
      %cst_65 = arith.constant dense<0.000000e+00> : vector<8xf32>
      %129 = vector.multi_reduction <add>, %128, %cst_65 [1] : vector<8x128xf32> to vector<8xf32>
      %130 = vector.shape_cast %129 : vector<8xf32> to vector<8x1xf32>
      %cst_66 = arith.constant 1.280000e+02 : f32
      %131 = vector.broadcast %cst_66 : f32 to vector<8x1xf32>
      %132 = arith.divf %130, %131 : vector<8x1xf32>
      %133 = vector.broadcast %125 : vector<8x1xf32> to vector<8x128xf32>
      %134 = arith.subf %119, %133 : vector<8x128xf32>
      %cst_67 = arith.constant 9.99999974E-6 : f32
      %135 = vector.broadcast %cst_67 : f32 to vector<8x1xf32>
      %136 = arith.addf %132, %135 : vector<8x1xf32>
      %137 = math.rsqrt %136 : vector<8x1xf32>
      %138 = vector.broadcast %137 : vector<8x1xf32> to vector<8x128xf32>
      %139 = arith.mulf %134, %138 : vector<8x128xf32>
      %140 = vector.broadcast %120 : vector<1x128xf32> to vector<8x128xf32>
      %141 = arith.mulf %139, %140 : vector<8x128xf32>
      %142 = vector.broadcast %121 : vector<1x128xf32> to vector<8x128xf32>
      %143 = arith.addf %141, %142 : vector<8x128xf32>
      %144 = arith.truncf %143 : vector<8x128xf32> to vector<8x128xbf16>
      %c0_68 = arith.constant 0 : index
      %c0_69 = arith.constant 0 : index
      %145 = vector.load %arg5[%c0_68, %c0_69] : memref<128x256xbf16, #tpu.memory_space<vmem>>, vector<128x256xbf16>
      %cst_70 = arith.constant dense<0.000000e+00> : vector<8x256xf32>
      %146 = tpu.matmul %144, %145, %cst_70 {dimension_numbers = #tpu.dot_dimension_numbers<[1], [0], [0], [1], [0, 0, 1, 1], [], []>} : vector<8x128xbf16>, vector<128x256xbf16>, vector<8x256xf32> -> vector<8x256xf32>
      %c0_71 = arith.constant 0 : index
      %c0_72 = arith.constant 0 : index
      %147 = vector.load %arg6[%c0_71, %c0_72] : memref<1x256xf32, #tpu.memory_space<vmem>>, vector<1x256xf32>
      %148 = vector.broadcast %147 : vector<1x256xf32> to vector<8x256xf32>
      %149 = arith.addf %146, %148 : vector<8x256xf32>
      %150 = vector.extract_strided_slice %149 {offsets = [0, 0], sizes = [8, 128], strides = [1, 1]} : vector<8x256xf32> to vector<8x128xf32>
      %151 = arith.truncf %150 : vector<8x128xf32> to vector<8x128xbf16>
      %152 = vector.extract_strided_slice %149 {offsets = [0, 128], sizes = [8, 128], strides = [1, 1]} : vector<8x256xf32> to vector<8x128xf32>
      %153 = arith.truncf %152 : vector<8x128xf32> to vector<8x128xbf16>
      %154 = vector.shape_cast %151 : vector<8x128xbf16> to vector<8x16x8xbf16>
      %155 = tpu.transpose %154, [1, 0, 2] : vector<8x16x8xbf16> -> vector<16x8x8xbf16>
      %c0_73 = arith.constant 0 : index
      %c0_74 = arith.constant 0 : index
      %c0_75 = arith.constant 0 : index
      %156 = vector.load %arg18[%c0_73, %c0_74, %c0_75] : memref<16x8x8xbf16, #tpu.memory_space<vmem>>, vector<16x8x8xbf16>
      tpu.vector_store %arg18[%c0_73, %c0_74, %c0_75], %155 {strides = array<i32>} : memref<16x8x8xbf16, #tpu.memory_space<vmem>>, vector<16x8x8xbf16>,
      %157 = vector.shape_cast %153 : vector<8x128xbf16> to vector<8x16x8xbf16>
      %158 = tpu.transpose %157, [1, 0, 2] : vector<8x16x8xbf16> -> vector<16x8x8xbf16>
      %c0_76 = arith.constant 0 : index
      %c0_77 = arith.constant 0 : index
      %c0_78 = arith.constant 0 : index
      %159 = vector.load %arg19[%c0_76, %c0_77, %c0_78] : memref<16x8x8xbf16, #tpu.memory_space<vmem>>, vector<16x8x8xbf16>
      tpu.vector_store %arg19[%c0_76, %c0_77, %c0_78], %158 {strides = array<i32>} : memref<16x8x8xbf16, #tpu.memory_space<vmem>>, vector<16x8x8xbf16>,
    } else {
    }
    %c8_i32 = arith.constant 8 : i32
    %3 = arith.muli %arg1, %c8_i32 : i32
    %4 = tpu.assume_multiple %3, 8 : i32
    %c0 = arith.constant 0 : index
    %5 = arith.index_cast %4 : i32 to index
    %c0_1 = arith.constant 0 : index
    %6 = vector.load %arg2[%c0, %5, %c0_1] : memref<1x8x128xf32, #tpu.memory_space<vmem>>, vector<1x8x128xf32>
    %7 = vector.shape_cast %6 : vector<1x8x128xf32> to vector<8x128xf32>
    %c0_2 = arith.constant 0 : index
    %c0_3 = arith.constant 0 : index
    %8 = vector.load %arg9[%c0_2, %c0_3] : memref<1x128xf32, #tpu.memory_space<vmem>>, vector<1x128xf32>
    %c0_4 = arith.constant 0 : index
    %c0_5 = arith.constant 0 : index
    %9 = vector.load %arg10[%c0_4, %c0_5] : memref<1x128xf32, #tpu.memory_space<vmem>>, vector<1x128xf32>
    %cst = arith.constant dense<0.000000e+00> : vector<8xf32>
    %10 = vector.multi_reduction <add>, %7, %cst [1] : vector<8x128xf32> to vector<8xf32>
    %11 = vector.shape_cast %10 : vector<8xf32> to vector<8x1xf32>
    %cst_6 = arith.constant 1.280000e+02 : f32
    %12 = vector.broadcast %cst_6 : f32 to vector<8x1xf32>
    %13 = arith.divf %11, %12 : vector<8x1xf32>
    %14 = vector.broadcast %13 : vector<8x1xf32> to vector<8x128xf32>
    %15 = arith.subf %7, %14 : vector<8x128xf32>
    %16 = arith.mulf %15, %15 : vector<8x128xf32>
    %cst_7 = arith.constant dense<0.000000e+00> : vector<8xf32>
    %17 = vector.multi_reduction <add>, %16, %cst_7 [1] : vector<8x128xf32> to vector<8xf32>
    %18 = vector.shape_cast %17 : vector<8xf32> to vector<8x1xf32>
    %cst_8 = arith.constant 1.280000e+02 : f32
    %19 = vector.broadcast %cst_8 : f32 to vector<8x1xf32>
    %20 = arith.divf %18, %19 : vector<8x1xf32>
    %21 = vector.broadcast %13 : vector<8x1xf32> to vector<8x128xf32>
    %22 = arith.subf %7, %21 : vector<8x128xf32>
    %cst_9 = arith.constant 9.99999974E-6 : f32
    %23 = vector.broadcast %cst_9 : f32 to vector<8x1xf32>
    %24 = arith.addf %20, %23 : vector<8x1xf32>
    %25 = math.rsqrt %24 : vector<8x1xf32>
    %26 = vector.broadcast %25 : vector<8x1xf32> to vector<8x128xf32>
    %27 = arith.mulf %22, %26 : vector<8x128xf32>
    %28 = vector.broadcast %8 : vector<1x128xf32> to vector<8x128xf32>
    %29 = arith.mulf %27, %28 : vector<8x128xf32>
    %30 = vector.broadcast %9 : vector<1x128xf32> to vector<8x128xf32>
    %31 = arith.addf %29, %30 : vector<8x128xf32>
    %32 = arith.truncf %31 : vector<8x128xf32> to vector<8x128xbf16>
    %c0_10 = arith.constant 0 : index
    %c0_11 = arith.constant 0 : index
    %33 = vector.load %arg3[%c0_10, %c0_11] : memref<128x128xbf16, #tpu.memory_space<vmem>>, vector<128x128xbf16>
    %cst_12 = arith.constant dense<0.000000e+00> : vector<8x128xf32>
    %34 = tpu.matmul %32, %33, %cst_12 {dimension_numbers = #tpu.dot_dimension_numbers<[1], [0], [0], [1], [0, 0, 1, 1], [], []>} : vector<8x128xbf16>, vector<128x128xbf16>, vector<8x128xf32> -> vector<8x128xf32>
    %c0_13 = arith.constant 0 : index
    %c0_14 = arith.constant 0 : index
    %35 = vector.load %arg4[%c0_13, %c0_14] : memref<1x128xf32, #tpu.memory_space<vmem>>, vector<1x128xf32>
    %36 = vector.broadcast %35 : vector<1x128xf32> to vector<8x128xf32>
    %37 = arith.addf %34, %36 : vector<8x128xf32>
    %38 = arith.truncf %37 : vector<8x128xf32> to vector<8x128xbf16>
    %39 = vector.shape_cast %38 : vector<8x128xbf16> to vector<8x16x8xbf16>
    %40 = tpu.transpose %39, [1, 0, 2] : vector<8x16x8xbf16> -> vector<16x8x8xbf16>
    %c0_15 = arith.constant 0 : index
    %c0_16 = arith.constant 0 : index
    %c0_17 = arith.constant 0 : index
    %41 = vector.load %arg18[%c0_15, %c0_16, %c0_17] : memref<16x8x8xbf16, #tpu.memory_space<vmem>>, vector<16x8x8xbf16>
    "tpu.trace_start"() <{level = 10 : i32, message = "hqd,hkd->hqk"}> : () -> ()
    %cst_18 = arith.constant dense<0.000000e+00> : vector<16x8x8xf32>
    %42 = tpu.matmul %40, %41, %cst_18 {dimension_numbers = #tpu.dot_dimension_numbers<[2], [2], [1], [1], [0, 0, 0, 1, 1, 1], [0], [0]>} : vector<16x8x8xbf16>, vector<16x8x8xbf16>, vector<16x8x8xf32> -> vector<16x8x8xf32>
    "tpu.trace_stop"() : () -> ()
    %cst_19 = arith.constant dense<0xFF800000> : vector<16x8xf32>
    %43 = vector.multi_reduction <maximumf>, %42, %cst_19 [2] : vector<16x8x8xf32> to vector<16x8xf32>
    %44 = vector.shape_cast %43 : vector<16x8xf32> to vector<16x8x1xf32>
    %45 = vector.broadcast %44 : vector<16x8x1xf32> to vector<16x8x8xf32>
    %46 = arith.subf %42, %45 : vector<16x8x8xf32>
    %47 = math.exp %46 : vector<16x8x8xf32>
    %cst_20 = arith.constant dense<0.000000e+00> : vector<16x8xf32>
    %48 = vector.multi_reduction <add>, %47, %cst_20 [2] : vector<16x8x8xf32> to vector<16x8xf32>
    %49 = vector.shape_cast %48 : vector<16x8xf32> to vector<16x8x1xf32>
    %50 = arith.truncf %47 : vector<16x8x8xf32> to vector<16x8x8xbf16>
    %c0_21 = arith.constant 0 : index
    %c0_22 = arith.constant 0 : index
    %c0_23 = arith.constant 0 : index
    %51 = vector.load %arg19[%c0_21, %c0_22, %c0_23] : memref<16x8x8xbf16, #tpu.memory_space<vmem>>, vector<16x8x8xbf16>
    "tpu.trace_start"() <{level = 10 : i32, message = "hqk,hkd->hqd"}> : () -> ()
    %cst_24 = arith.constant dense<0.000000e+00> : vector<16x8x8xf32>
    %52 = tpu.matmul %50, %51, %cst_24 {dimension_numbers = #tpu.dot_dimension_numbers<[2], [1], [1], [2], [0, 0, 0, 1, 1, 2], [0], [0]>} : vector<16x8x8xbf16>, vector<16x8x8xbf16>, vector<16x8x8xf32> -> vector<16x8x8xf32>
    "tpu.trace_stop"() : () -> ()
    %53 = tpu.reciprocal %49 {approx = true} : vector<16x8x1xf32> -> vector<16x8x1xf32>
    %54 = vector.broadcast %53 : vector<16x8x1xf32> to vector<16x8x8xf32>
    %55 = arith.mulf %52, %54 : vector<16x8x8xf32>
    %56 = tpu.transpose %55, [1, 0, 2] : vector<16x8x8xf32> -> vector<8x16x8xf32>
    %57 = vector.shape_cast %56 : vector<8x16x8xf32> to vector<8x128xf32>
    %58 = arith.truncf %57 : vector<8x128xf32> to vector<8x128xbf16>
    %c0_25 = arith.constant 0 : index
    %c0_26 = arith.constant 0 : index
    %59 = vector.load %arg7[%c0_25, %c0_26] : memref<128x128xbf16, #tpu.memory_space<vmem>>, vector<128x128xbf16>
    %cst_27 = arith.constant dense<0.000000e+00> : vector<8x128xf32>
    %60 = tpu.matmul %58, %59, %cst_27 {dimension_numbers = #tpu.dot_dimension_numbers<[1], [0], [0], [1], [0, 0, 1, 1], [], []>} : vector<8x128xbf16>, vector<128x128xbf16>, vector<8x128xf32> -> vector<8x128xf32>
    %c0_28 = arith.constant 0 : index
    %c0_29 = arith.constant 0 : index
    %61 = vector.load %arg8[%c0_28, %c0_29] : memref<1x128xf32, #tpu.memory_space<vmem>>, vector<1x128xf32>
    %62 = vector.broadcast %61 : vector<1x128xf32> to vector<8x128xf32>
    %63 = arith.addf %60, %62 : vector<8x128xf32>
    %64 = arith.addf %7, %63 : vector<8x128xf32>
    %c0_30 = arith.constant 0 : index
    %c0_31 = arith.constant 0 : index
    %65 = vector.load %arg11[%c0_30, %c0_31] : memref<1x128xf32, #tpu.memory_space<vmem>>, vector<1x128xf32>
    %c0_32 = arith.constant 0 : index
    %c0_33 = arith.constant 0 : index
    %66 = vector.load %arg12[%c0_32, %c0_33] : memref<1x128xf32, #tpu.memory_space<vmem>>, vector<1x128xf32>
    %cst_34 = arith.constant dense<0.000000e+00> : vector<8xf32>
    %67 = vector.multi_reduction <add>, %64, %cst_34 [1] : vector<8x128xf32> to vector<8xf32>
    %68 = vector.shape_cast %67 : vector<8xf32> to vector<8x1xf32>
    %cst_35 = arith.constant 1.280000e+02 : f32
    %69 = vector.broadcast %cst_35 : f32 to vector<8x1xf32>
    %70 = arith.divf %68, %69 : vector<8x1xf32>
    %71 = vector.broadcast %70 : vector<8x1xf32> to vector<8x128xf32>
    %72 = arith.subf %64, %71 : vector<8x128xf32>
    %73 = arith.mulf %72, %72 : vector<8x128xf32>
    %cst_36 = arith.constant dense<0.000000e+00> : vector<8xf32>
    %74 = vector.multi_reduction <add>, %73, %cst_36 [1] : vector<8x128xf32> to vector<8xf32>
    %75 = vector.shape_cast %74 : vector<8xf32> to vector<8x1xf32>
    %cst_37 = arith.constant 1.280000e+02 : f32
    %76 = vector.broadcast %cst_37 : f32 to vector<8x1xf32>
    %77 = arith.divf %75, %76 : vector<8x1xf32>
    %78 = vector.broadcast %70 : vector<8x1xf32> to vector<8x128xf32>
    %79 = arith.subf %64, %78 : vector<8x128xf32>
    %cst_38 = arith.constant 9.99999974E-6 : f32
    %80 = vector.broadcast %cst_38 : f32 to vector<8x1xf32>
    %81 = arith.addf %77, %80 : vector<8x1xf32>
    %82 = math.rsqrt %81 : vector<8x1xf32>
    %83 = vector.broadcast %82 : vector<8x1xf32> to vector<8x128xf32>
    %84 = arith.mulf %79, %83 : vector<8x128xf32>
    %85 = vector.broadcast %65 : vector<1x128xf32> to vector<8x128xf32>
    %86 = arith.mulf %84, %85 : vector<8x128xf32>
    %87 = vector.broadcast %66 : vector<1x128xf32> to vector<8x128xf32>
    %88 = arith.addf %86, %87 : vector<8x128xf32>
    %89 = arith.truncf %88 : vector<8x128xf32> to vector<8x128xbf16>
    %c0_39 = arith.constant 0 : index
    %c0_40 = arith.constant 0 : index
    %90 = vector.load %arg13[%c0_39, %c0_40] : memref<128x4352xbf16, #tpu.memory_space<vmem>>, vector<128x4352xbf16>
    %cst_41 = arith.constant dense<0.000000e+00> : vector<8x4352xf32>
    %91 = tpu.matmul %89, %90, %cst_41 {dimension_numbers = #tpu.dot_dimension_numbers<[1], [0], [0], [1], [0, 0, 1, 1], [], []>} : vector<8x128xbf16>, vector<128x4352xbf16>, vector<8x4352xf32> -> vector<8x4352xf32>
    %c0_42 = arith.constant 0 : index
    %c0_43 = arith.constant 0 : index
    %92 = vector.load %arg14[%c0_42, %c0_43] : memref<1x4352xf32, #tpu.memory_space<vmem>>, vector<1x4352xf32>
    %93 = vector.broadcast %92 : vector<1x4352xf32> to vector<8x4352xf32>
    %94 = arith.addf %91, %93 : vector<8x4352xf32>
    %cst_44 = arith.constant 5.000000e-01 : f32
    %95 = vector.broadcast %cst_44 : f32 to vector<8x4352xf32>
    %96 = arith.mulf %95, %94 : vector<8x4352xf32>
    %cst_45 = arith.constant 4.471500e-02 : f32
    %97 = vector.broadcast %cst_45 : f32 to vector<8x4352xf32>
    %98 = arith.mulf %97, %94 : vector<8x4352xf32>
    %99 = arith.mulf %98, %94 : vector<8x4352xf32>
    %100 = arith.mulf %99, %94 : vector<8x4352xf32>
    %101 = arith.addf %94, %100 : vector<8x4352xf32>
    %cst_46 = arith.constant 0.797884583 : f32
    %102 = vector.broadcast %cst_46 : f32 to vector<8x4352xf32>
    %103 = arith.mulf %102, %101 : vector<8x4352xf32>
    %104 = math.tanh %103 : vector<8x4352xf32>
    %cst_47 = arith.constant 1.000000e+00 : f32
    %105 = vector.broadcast %cst_47 : f32 to vector<8x4352xf32>
    %106 = arith.addf %105, %104 : vector<8x4352xf32>
    %107 = arith.mulf %96, %106 : vector<8x4352xf32>
    %108 = arith.truncf %107 : vector<8x4352xf32> to vector<8x4352xbf16>
    %c0_48 = arith.constant 0 : index
    %c0_49 = arith.constant 0 : index
    %109 = vector.load %arg15[%c0_48, %c0_49] : memref<4352x128xbf16, #tpu.memory_space<vmem>>, vector<4352x128xbf16>
    %cst_50 = arith.constant dense<0.000000e+00> : vector<8x128xf32>
    %110 = tpu.matmul %108, %109, %cst_50 {dimension_numbers = #tpu.dot_dimension_numbers<[1], [0], [0], [1], [0, 0, 1, 1], [], []>} : vector<8x4352xbf16>, vector<4352x128xbf16>, vector<8x128xf32> -> vector<8x128xf32>
    %c0_51 = arith.constant 0 : index
    %c0_52 = arith.constant 0 : index
    %111 = vector.load %arg16[%c0_51, %c0_52] : memref<1x128xf32, #tpu.memory_space<vmem>>, vector<1x128xf32>
    %112 = vector.broadcast %111 : vector<1x128xf32> to vector<8x128xf32>
    %113 = arith.addf %110, %112 : vector<8x128xf32>
    %114 = arith.addf %64, %113 : vector<8x128xf32>
    %c0_53 = arith.constant 0 : index
    %c0_54 = arith.constant 0 : index
    %c0_55 = arith.constant 0 : index
    %115 = vector.load %arg17[%c0_53, %c0_54, %c0_55] : memref<1x8x128xf32, #tpu.memory_space<vmem>>, vector<1x8x128xf32>
    %116 = vector.shape_cast %115 : vector<1x8x128xf32> to vector<8x128xf32>
    %117 = vector.shape_cast %114 : vector<8x128xf32> to vector<1x8x128xf32>
    tpu.vector_store %arg17[%c0_53, %c0_54, %c0_55], %117 {strides = array<i32>} : memref<1x8x128xf32, #tpu.memory_space<vmem>>, vector<1x8x128xf32>,
    return
  }
  func.func @transform_0(%arg0: i32, %arg1: i32) -> (i32, i32, i32) {
    %c0_i32 = arith.constant 0 : i32
    %c0_i32_0 = arith.constant 0 : i32
    %c0_i32_1 = arith.constant 0 : i32
    return %arg0, %c0_i32, %c0_i32_0 : i32, i32, i32
  }
  func.func @transform_1(%arg0: i32, %arg1: i32) -> (i32, i32) {
    %c0_i32 = arith.constant 0 : i32
    %c0_i32_0 = arith.constant 0 : i32
    %c0_i32_1 = arith.constant 0 : i32
    return %c0_i32, %c0_i32_0 : i32, i32
  }
  func.func @transform_2(%arg0: i32, %arg1: i32) -> (i32, i32) {
    %c0_i32 = arith.constant 0 : i32
    %c0_i32_0 = arith.constant 0 : i32
    %c0_i32_1 = arith.constant 0 : i32
    return %c0_i32, %c0_i32_0 : i32, i32
  }
  func.func @transform_3(%arg0: i32, %arg1: i32) -> (i32, i32) {
    %c0_i32 = arith.constant 0 : i32
    %c0_i32_0 = arith.constant 0 : i32
    %c0_i32_1 = arith.constant 0 : i32
    return %c0_i32, %c0_i32_0 : i32, i32
  }
  func.func @transform_4(%arg0: i32, %arg1: i32) -> (i32, i32) {
    %c0_i32 = arith.constant 0 : i32
    %c0_i32_0 = arith.constant 0 : i32
    %c0_i32_1 = arith.constant 0 : i32
    return %c0_i32, %c0_i32_0 : i32, i32
  }
  func.func @transform_5(%arg0: i32, %arg1: i32) -> (i32, i32) {
    %c0_i32 = arith.constant 0 : i32
    %c0_i32_0 = arith.constant 0 : i32
    %c0_i32_1 = arith.constant 0 : i32
    return %c0_i32, %c0_i32_0 : i32, i32
  }
  func.func @transform_6(%arg0: i32, %arg1: i32) -> (i32, i32) {
    %c0_i32 = arith.constant 0 : i32
    %c0_i32_0 = arith.constant 0 : i32
    %c0_i32_1 = arith.constant 0 : i32
    return %c0_i32, %c0_i32_0 : i32, i32
  }
  func.func @transform_7(%arg0: i32, %arg1: i32) -> (i32, i32) {
    %c0_i32 = arith.constant 0 : i32
    %c0_i32_0 = arith.constant 0 : i32
    %c0_i32_1 = arith.constant 0 : i32
    return %c0_i32, %c0_i32_0 : i32, i32
  }
  func.func @transform_8(%arg0: i32, %arg1: i32) -> (i32, i32) {
    %c0_i32 = arith.constant 0 : i32
    %c0_i32_0 = arith.constant 0 : i32
    %c0_i32_1 = arith.constant 0 : i32
    return %c0_i32, %c0_i32_0 : i32, i32
  }
  func.func @transform_9(%arg0: i32, %arg1: i32) -> (i32, i32) {
    %c0_i32 = arith.constant 0 : i32
    %c0_i32_0 = arith.constant 0 : i32
    %c0_i32_1 = arith.constant 0 : i32
    return %c0_i32, %c0_i32_0 : i32, i32
  }
  func.func @transform_10(%arg0: i32, %arg1: i32) -> (i32, i32) {
    %c0_i32 = arith.constant 0 : i32
    %c0_i32_0 = arith.constant 0 : i32
    %c0_i32_1 = arith.constant 0 : i32
    return %c0_i32, %c0_i32_0 : i32, i32
  }
  func.func @transform_11(%arg0: i32, %arg1: i32) -> (i32, i32) {
    %c0_i32 = arith.constant 0 : i32
    %c0_i32_0 = arith.constant 0 : i32
    %c0_i32_1 = arith.constant 0 : i32
    return %c0_i32, %c0_i32_0 : i32, i32
  }
  func.func @transform_12(%arg0: i32, %arg1: i32) -> (i32, i32) {
    %c0_i32 = arith.constant 0 : i32
    %c0_i32_0 = arith.constant 0 : i32
    %c0_i32_1 = arith.constant 0 : i32
    return %c0_i32, %c0_i32_0 : i32, i32
  }
  func.func @transform_13(%arg0: i32, %arg1: i32) -> (i32, i32) {
    %c0_i32 = arith.constant 0 : i32
    %c0_i32_0 = arith.constant 0 : i32
    %c0_i32_1 = arith.constant 0 : i32
    return %c0_i32, %c0_i32_0 : i32, i32
  }
  func.func @transform_14(%arg0: i32, %arg1: i32) -> (i32, i32) {
    %c0_i32 = arith.constant 0 : i32
    %c0_i32_0 = arith.constant 0 : i32
    %c0_i32_1 = arith.constant 0 : i32
    return %c0_i32, %c0_i32_0 : i32, i32
  }
  func.func @transform_15(%arg0: i32, %arg1: i32) -> (i32, i32, i32) {
    %c0_i32 = arith.constant 0 : i32
    %c0_i32_0 = arith.constant 0 : i32
    return %arg0, %arg1, %c0_i32 : i32, i32, i32
  }
}

</mosaic_0001>

<bundles_post_ra>
// kernel: tpu_custom_call.1
= control target key start
LH: loop header
LB: loop body
LE: loop exit
PB: predicated region body
PF: predicated region fallthrough
CT: control target
= control target key end

     0   :  { %s14804_s0 = inlined_call_operand.hbm [shape: f32[2,8,128], index: 0, kind: input, shape index: {}]   ;;  %s14805_s1 = inlined_call_operand.hbm [shape: bf16[128,128], index: 1, kind: input, shape index: {}]   ;;  %s14806_s2 = inlined_call_operand.hbm [shape: f32[1,128], index: 2, kind: input, shape index: {}]   ;;  %s14807_s3 = inlined_call_operand.hbm [shape: bf16[128,256], index: 3, kind: input, shape index: {}]   ;;  %s14808_s4 = inlined_call_operand.hbm [shape: f32[1,256], index: 4, kind: input, shape index: {}]   ;;  %s14809_s5 = inlined_call_operand.hbm [shape: bf16[128,128], index: 5, kind: input, shape index: {}]   ;;  %s14810_s6 = inlined_call_operand.hbm [shape: f32[1,128], index: 6, kind: input, shape index: {}]   ;;  %s14811_s7 = inlined_call_operand.hbm [shape: f32[1,128], index: 7, kind: input, shape index: {}]   ;;  %s14812_s8 = inlined_call_operand.hbm [shape: f32[1,128], index: 8, kind: input, shape index: {}]   ;;  %s14813_s9 = inlined_call_operand.hbm [shape: f32[1,128], index: 9, kind: input, shape index: {}]   ;;  %s14814_s10 = inlined_call_operand.hbm [shape: f32[1,128], index: 10, kind: input, shape index: {}]   ;;  %s14815_s11 = inlined_call_operand.hbm [shape: bf16[128,4352], index: 11, kind: input, shape index: {}]   ;;  %s14816_s12 = inlined_call_operand.hbm [shape: f32[1,4352], index: 12, kind: input, shape index: {}]   ;;  %s14817_s13 = inlined_call_operand.hbm [shape: bf16[4352,128], index: 13, kind: input, shape index: {}]   ;;  %s14818_s14 = inlined_call_operand.hbm [shape: f32[1,128], index: 14, kind: input, shape index: {}]   ;;  %s14819_s15 = inlined_call_operand.hbm [shape: f32[2,8,128], index: 15, kind: output, shape index: {}]  }
   0x1   :  { %14833 = sst [smem:[#allocation43_spill]] %s14804_s0 }
   0x2   :  { %14834 = sst [smem:[#allocation44_spill]] %s14805_s1 }
   0x3   :  { %14835 = sst [smem:[#allocation45_spill]] %s14806_s2 }
   0x4   :  { %14836 = sst [smem:[#allocation46_spill]] %s14807_s3 }
   0x5   :  { %14837 = sst [smem:[#allocation47_spill]] %s14808_s4 }
   0x6   :  { %14838 = sst [smem:[#allocation48_spill]] %s14818_s14 }
   0x7   :  { %14839 = sst [smem:[#allocation49_spill]] %s14819_s15 }
   0x8   :  { %20 = vsyncpa [#allocation5], 0 }
   0x9   :  { %22 = vsyncpa [#allocation5 + $0x1], 0 }
   0xa   :  { %23 = vsyncpa [#allocation8], 0 }
   0xb   :  { %24 = vsyncpa [#allocation11], 0 }
   0xc   :  { %25 = vsyncpa [#allocation14], 0 }
   0xd   :  { %26 = vsyncpa [#allocation17], 0 }
   0xe   :  { %27 = vsyncpa [#allocation20], 0 }
   0xf   :  { %28 = vsyncpa [#allocation23], 0 }
  0x10   :  { %29 = vsyncpa [#allocation26], 0 }
  0x11   :  { %30 = vsyncpa [#allocation6], 0 }
  0x12   :  { %32 = vsyncpa [#allocation6 + $0x1], 0  ;;  %s13092_s18 = smov 0   ;;  %s13094_s19 = smov 0  }
  0x13   :  { %s13096_s20 = smov 0   ;;  %s13098_s21 = smov 0  }
  0x14   :  { %s13100_s22 = smov 0   ;;  %s13102_s23 = smov 0  }
  0x15 LB: > { %14840 = sst [smem:[#allocation38_spill]] %s12952_s18  ;;  %s14820_s24 = sadd.s32 4294967295, %s12972_s23   ;;  %s12972_s23 = sphi %s13102_s23, %s38_s23   ;;  %s12968_s22 = sphi %s13100_s22, %s14878_s22   ;;  %s12964_s21 = sphi %s13098_s21, %s14877_s21   ;;  %s12960_s20 = sphi %s13096_s20, %s14876_s20   ;;  %s12956_s19 = sphi %s13094_s19, %s14875_s19   ;;  %s12952_s18 = sphi %s13092_s18, %s14874_s18  }
  0x16   : > { %14841 = sst [smem:[#allocation39_spill]] %s12956_s19  ;;  %p9084_p0 = scmp.ge.s32.totalorder %s12972_s23, 1 }
  0x17   : > { %14842 = sst [smem:[#allocation40_spill]] %s12964_s21  ;;  %p13126_p1 = scmp.eq.s32.totalorder %s14820_s24, 0 }
  0x18   : > { %p403_p2 = scmp.lt.s32.totalorder %s12972_s23, 3  ;;  %s14845_s1 = sld [smem:[#allocation44_spill]] }
  0x19   : > { %s14843_s25 = scalar_select %p13126_p1, 1, 0 }
  0x1a   : > { %p13134_p3 = pnand %p9084_p0, %p403_p2  ;;  %s12974_s30 = smov [#allocation7]  }
  0x1b   : > { %14844 = sst [smem:[#allocation41_spill]] %s14843_s25  ;;  %s416_s16 = sshll.u32 %s12974_s30, 4  ;;  %s417_s16 = int_to_ptr.vmem [resolvable:$true] %s416_s16 }
  0x1c   : > { %s14846_s29 = scalar_select %p13134_p3, 1, 0 }
  0x1d   : > { %p12095_p4 = pneg %p13134_p3  ;;  %p9099_p6 = scmp.ge.s32.totalorder %s12972_s23, 2 }
  0x1e   : > { %s414_s28 = sshll.u32 %s14845_s1, 4  ;;  %14847 = sst [smem:[#allocation42_spill]] %s14846_s29  ;;  %s415_s28 = int_to_ptr.hbm [resolvable:$true] %s414_s28 }
  0x1f   : > { %p13142_p5 = pnand %p12095_p4, %p13126_p1  ;;  %s14849_s3 = sld [smem:[#allocation46_spill]] }
  0x20   : > { %s12975_s1 = smov 64   ;;  %s12976_s15 = smov 4  }
  0x21   : > { %12098 = dma.hbm_to_vmem [thread:$0]  (!%p13142_p5), %s415_s28, 1024, %s417_s16, [#allocation8], %s12975_s1, %s12975_s1, %s12976_s15  }
  0x22   : > { %s12977_s30 = smov [#allocation10]   ;;  %s12978_s29 = smov 128  }
  0x23   : > { %s442_s21 = sshll.u32 %s12977_s30, 4  ;;  %s12979_s0 = smov 8   ;;  %s443_s21 = int_to_ptr.vmem [resolvable:$true] %s442_s21 }
  0x24   : > { %s466_s27 = sshll.u32 %s14809_s5, 4  ;;  %s493_s28 = sshll.u32 %s14811_s7, 4  ;;  %s467_s27 = int_to_ptr.hbm [resolvable:$true] %s466_s27  ;;  %s494_s28 = int_to_ptr.hbm [resolvable:$true] %s493_s28 }
  0x25   : > { %s440_s24 = sshll.u32 %s14849_s3, 4  ;;  %s12980_s3 = smov [#allocation13]   ;;  %s441_s24 = int_to_ptr.hbm [resolvable:$true] %s440_s24 }
  0x26   : > { %12104 = dma.hbm_to_vmem [thread:$0]  (!%p13142_p5), %s441_s24, 2048, %s443_s21, [#allocation11], %s12978_s29, %s12978_s29, %s12979_s0  }
  0x27   : > { %s468_s18 = sshll.u32 %s12980_s3, 4  ;;  %s12981_s0 = smov [#allocation16]   ;;  %s469_s18 = int_to_ptr.vmem [resolvable:$true] %s468_s18 }
  0x28   : > { %12110 = dma.hbm_to_vmem [thread:$0]  (!%p13142_p5), %s467_s27, 1024, %s469_s18, [#allocation14], %s12975_s1, %s12975_s1, %s12976_s15  }
  0x29   : > { %s495_s21 = sshll.u32 %s12981_s0, 4  ;;  %s517_s29 = sshll.u32 %s14813_s9, 4  ;;  %s496_s21 = int_to_ptr.vmem [resolvable:$true] %s495_s21  ;;  %s518_s29 = int_to_ptr.hbm [resolvable:$true] %s517_s29 }
  0x2a   : > { %12116 = dma.hbm_to_vmem [thread:$0]  (!%p13142_p5), %s494_s28, 16, %s496_s21, [#allocation17]  }
  0x2b   : > { %s540_s19 = sshll.u32 %s14815_s11, 4  ;;  %s12982_s16 = smov [#allocation19]   ;;  %s541_s19 = int_to_ptr.hbm [resolvable:$true] %s540_s19 }
  0x2c   : > { %s519_s30 = sshll.u32 %s12982_s16, 4  ;;  %s12983_s18 = smov [#allocation22]   ;;  %s520_s30 = int_to_ptr.vmem [resolvable:$true] %s519_s30 }
  0x2d   : > { %12122 = dma.hbm_to_vmem [thread:$0]  (!%p13142_p5), %s518_s29, 16, %s520_s30, [#allocation20]  }
  0x2e   : > { %s542_s26 = sshll.u32 %s12983_s18, 4  ;;  %s12984_s27 = smov 2176   ;;  %s543_s26 = int_to_ptr.vmem [resolvable:$true] %s542_s26 }
  0x2f   : > { %s12985_s0 = smov 136   ;;  %s566_s24 = sshll.u32 %s14817_s13, 4  ;;  %s567_s24 = int_to_ptr.hbm [resolvable:$true] %s566_s24 }
  0x30   : > { %12128 = dma.hbm_to_vmem [thread:$0]  (!%p13142_p5), %s541_s19, 34816, %s543_s26, [#allocation23], %s12984_s27, %s12984_s27, %s12985_s0  }
  0x31   : > { %s12986_s25 = smov [#allocation25]   ;;  %s14850_s2 = sld [smem:[#allocation45_spill]] }
  0x32   : > { %s568_s3 = sshll.u32 %s12986_s25, 4  ;;  %s12987_s19 = smov [#allocation9]   ;;  %s569_s3 = int_to_ptr.vmem [resolvable:$true] %s568_s3 }
  0x33   : > { %12134 = dma.hbm_to_vmem [thread:$0]  (!%p13142_p5), %s567_s24, 34816, %s569_s3, [#allocation26], %s12975_s1, %s12975_s1, %s12976_s15  }
  0x34   : > { %s431_s30 = sshll.u32 %s12987_s19, 4  ;;  %s14851_s4 = sld [smem:[#allocation47_spill]]  ;;  %s432_s30 = int_to_ptr.vmem [resolvable:$true] %s431_s30 }
  0x35   : > { %s481_s21 = sshll.u32 %s14810_s6, 4  ;;  %s12988_s25 = smov [#allocation12]   ;;  %s482_s21 = int_to_ptr.hbm [resolvable:$true] %s481_s21 }
  0x36   : > { %s457_s14 = sshll.u32 %s12988_s25, 4  ;;  %s12989_s1 = smov [#allocation15]   ;;  %s458_s14 = int_to_ptr.vmem [resolvable:$true] %s457_s14 }
  0x37   : > { %s429_s29 = sshll.u32 %s14850_s2, 4  ;;  %s483_s15 = sshll.u32 %s12989_s1, 4  ;;  %s430_s29 = int_to_ptr.hbm [resolvable:$true] %s429_s29  ;;  %s484_s15 = int_to_ptr.vmem [resolvable:$true] %s483_s15 }
  0x38   : > { %12101 = dma.hbm_to_vmem [thread:$0]  (!%p13142_p5), %s430_s29, 16, %s432_s30, [#allocation8]  }
  0x39   : > { %s505_s16 = sshll.u32 %s14812_s8, 4  ;;  %s529_s30 = sshll.u32 %s14814_s10, 4  ;;  %s506_s16 = int_to_ptr.hbm [resolvable:$true] %s505_s16  ;;  %s530_s30 = int_to_ptr.hbm [resolvable:$true] %s529_s30 }
  0x3a   : > { %s455_s27 = sshll.u32 %s14851_s4, 4  ;;  %s12990_s18 = smov [#allocation18]   ;;  %s456_s27 = int_to_ptr.hbm [resolvable:$true] %s455_s27 }
  0x3b   : > { %12107 = dma.hbm_to_vmem [thread:$0]  (!%p13142_p5), %s456_s27, 32, %s458_s14, [#allocation11]  }
  0x3c   : > { %12113 = dma.hbm_to_vmem [thread:$0]  (!%p13142_p5), %s482_s21, 16, %s484_s15, [#allocation14]  }
  0x3d   : > { %s507_s26 = sshll.u32 %s12990_s18, 4  ;;  %s12991_s27 = smov [#allocation21]   ;;  %s508_s26 = int_to_ptr.vmem [resolvable:$true] %s507_s26 }
  0x3e   : > { %12119 = dma.hbm_to_vmem [thread:$0]  (!%p13142_p5), %s506_s16, 16, %s508_s26, [#allocation17]  }
  0x3f   : > { %s531_s0 = sshll.u32 %s12991_s27, 4  ;;  %s555_s21 = sshll.u32 %s14816_s12, 4  ;;  %s532_s0 = int_to_ptr.vmem [resolvable:$true] %s531_s0  ;;  %s556_s21 = int_to_ptr.hbm [resolvable:$true] %s555_s21 }
  0x40   : > { %s14852_s14 = sld [smem:[#allocation39_spill]]  ;;  %s12992_s16 = smov [#allocation24]  }
  0x41   : > { %12125 = dma.hbm_to_vmem [thread:$0]  (!%p13142_p5), %s530_s30, 16, %s532_s0, [#allocation20]  }
  0x42   : > { %s14853_s24 = sld [smem:[#allocation48_spill]]  ;;  %s557_s19 = sshll.u32 %s12992_s16, 4  ;;  %s558_s19 = int_to_ptr.vmem [resolvable:$true] %s557_s19 }
  0x43   : > { %s14854_s29 = sld [smem:[#allocation38_spill]]  ;;  %s12993_s26 = smov [#allocation27]  }
  0x44   : > { %12131 = dma.hbm_to_vmem [thread:$0]  (!%p13142_p5), %s556_s21, 544, %s558_s19, [#allocation23]  }
  0x45   : > { %s583_s27 = sshll.u32 %s12993_s26, 4  ;;  %s50_s30 = sadd.s32 1, %s12968_s22  ;;  %s584_s27 = int_to_ptr.vmem [resolvable:$true] %s583_s27 }
  0x46   : > { %s9083_s0 = sadd.s32 4294967294, %s12972_s23   ;;  %p52_p7 = scmp.ge.s32.totalorder %s50_s30, 2 }
  0x47   : > { %s57_s28 = sadd.s32 1, %s12960_s20  ;;  %p64_p8 = scmp.ne.s32.totalorder %s12960_s20, %s14852_s14 }
  0x48   : > { %s581_s3 = sshll.u32 %s14853_s24, 4  ;;  %s14880_s30 = smov (%p52_p7, %s50_s30), 0  ;;  %s582_s3 = int_to_ptr.hbm [resolvable:$true] %s581_s3 }
  0x49   : > { %12137 = dma.hbm_to_vmem [thread:$0]  (!%p13142_p5), %s582_s3, 16, %s584_s27, [#allocation26]  }
  0x4a   : > { %p65_p9 = scmp.eq.s32.totalorder %s12972_s23, 0  ;;  %p70_p10 = scmp.ne.s32.totalorder %s14852_s14, %s14854_s29 }
  0x4b   : > { %s54_s25 = ssub.s32 %s12968_s22, %s14880_s30  ;;  %s14856_s21 = sadd.s32 4294967295, %s12972_s23  }
  0x4c   : > { %p390_p11 = scmp.eq.s32.totalorder %s14856_s21, 1  ;;  %p55_p12 = scmp.eq.s32.totalorder %s54_s25, 0 }
  0x4d   : > { %p13239_p13 = por %p13126_p1, %p70_p10  ;;  %p396_p2 = scmp.eq.s32.totalorder %s9083_s0, 1 }
  0x4e   : > { %p13243_p0 = por %p390_p11, %p64_p8  ;;  %p66_p4 = por %p65_p9, %p64_p8 }
  0x4f   : > { %s13248_s15 = scalar_select %p55_p12, %s12960_s20, %s57_s28  }
  0x50   : > { %p13250_p5 = por %p396_p2, %p70_p10  ;;  %s594_s14 = sand.u32 1, %s12960_s20  }
  0x51   : > { %s9101_s3 = sshll.u32 %s12968_s22, 3  ;;  %p12160_p7 = scmp.lt.s32.totalorder %s12972_s23, 2 }
  0x52   : > { %s9100_s16 = sshll.u32 %s594_s14, 3  ;;  %s14860_s18 = sld [smem:[#allocation43_spill]] }
  0x53   : > { %s598_s25 = scalar_lea.vmem [#allocation4], %s9100_s16  ;;  %p12139_p11 = pnand %p12160_p7, %p66_p4 }
  0x54   : > { %s606_s21 = sshll.u32 %s598_s25, 4  ;;  %s595_s0 = scalar_lea.sflag [#allocation5], %s594_s14  ;;  %s607_s21 = int_to_ptr.vmem [resolvable:$true] %s606_s21 }
  0x55   : > { %s14862_s2 = sld [smem:[#allocation39_spill]] (!%p13134_p3) }
  0x56   : > { %615 = sbr.rel (%p13134_p3) target bundleno = 2426 (0x97a), region = 80 }
  0x58   : > { %s602_s26 = scalar_lea.hbm %s14860_s18, %s9101_s3 }
  0x59   : > { %s604_s27 = sshll.u32 %s602_s26, 4  ;;  %s605_s27 = int_to_ptr.hbm [resolvable:$true] %s604_s27 }
  0x5a   : > { %12141 = dma.hbm_to_vmem [thread:$0]  (!%p12139_p11), %s605_s27, 128, %s607_s21, %s595_s0  }
  0x5b   : > { %s13263_s4 = sand.u32 1, %s14862_s2  }
  0x5c   : > { %s14826_s29 = sshll.u32 %s13263_s4, 3  ;;  %s618_s3 = scalar_lea.sflag [#allocation5], %s13263_s4 }
  0x5d   : > { %s13269_s16 = scalar_lea.vmem [#allocation4], %s14826_s29 }
  0x5e   : > { %12915 = dma.done.wait (%p13239_p13), %s618_s3, 128  }
  0x5f   : > { %12917 = vsyncadd (%p13239_p13), %s618_s3, 4294967168 }
  0x60   : > { %12919 = dma.done.wait (%p13126_p1), [#allocation8], 1040  }
  0x61   : > { %12921 = vsyncadd (%p13126_p1), [#allocation8], 4294966256 }
  0x62   : > { %12923 = dma.done.wait (%p13126_p1), [#allocation11], 2080  }
  0x63   : > { %12925 = vsyncadd (%p13126_p1), [#allocation11], 4294965216 }
  0x64   : > { %12927 = dma.done.wait (%p13126_p1), [#allocation14], 1040  }
  0x65   : > { %12929 = vsyncadd (%p13126_p1), [#allocation14], 4294966256 }
  0x66   : > { %12931 = dma.done.wait (%p13126_p1), [#allocation17], 32  }
  0x67   : > { %12933 = vsyncadd (%p13126_p1), [#allocation17], 4294967264 }
  0x68   : > { %12935 = dma.done.wait (%p13126_p1), [#allocation20], 32  }
  0x69   : > { %12937 = vsyncadd (%p13126_p1), [#allocation20], 4294967264 }
  0x6a   : > { %12939 = dma.done.wait (%p13126_p1), [#allocation23], 35360  }
  0x6b   : > { %12941 = vsyncadd (%p13126_p1), [#allocation23], 4294931936 }
  0x6c   : > { %12943 = dma.done.wait (%p13126_p1), [#allocation26], 34832  }
  0x6d   : > { %12945 = vsyncadd (%p13126_p1), [#allocation26], 4294932464  ;;  %v744_v0 = vld [vmem:[%s13269_s16] sm:$0xff]  ;;  %v12994_v1 = vmov 128.0   ;;  %v9169_v22 = vld [vmem:[#allocation10 + $0x60] sm:$0xf] }
  0x6e   : > { %747 = vadd.xlane.f32.xlu0 %v744_v0  ;;  %12271 = vrcp.f32 %v12994_v1  ;;  %v9177_v4 = vld [vmem:[#allocation10 + $0x70] sm:$0xf]  ;;  %v11474_v5 = vld [vmem:[#allocation10 + $0x74] sm:$0xf0]  ;;  %v11473_v6 = vld [vmem:[#allocation10 + $0x74] sm:$0xf] }
  0x6f   : > { %v9178_v7 = vor.u32 %v11474_v5, %v9177_v4  ;;  %v9179_v8 = vld [vmem:[#allocation10 + $0x78] sm:$0xf0]  ;;  %v11472_v23 = vld [vmem:[#allocation10 + $0x64] sm:$0xf0]  ;;  %v11471_v24 = vld [vmem:[#allocation10 + $0x64] sm:$0xf] }
  0x70   : > { %v9182_v9 = vor.u32 %v11473_v6, %v9179_v8  ;;  %v9170_v25 = vor.u32 %v11472_v23, %v9169_v22  ;;  %v9171_v26 = vld [vmem:[#allocation10 + $0x68] sm:$0xf0]  ;;  %v9161_v28 = vld [vmem:[#allocation10 + $0x50] sm:$0xf]  ;;  %v11470_v29 = vld [vmem:[#allocation10 + $0x54] sm:$0xf0] }
  0x71   : > { %885 = vmatpush.bf16.msra.mxu0 %v9178_v7  ;;  %v9174_v27 = vor.u32 %v11471_v24, %v9171_v26  ;;  %v11469_v30 = vld [vmem:[#allocation10 + $0x54] sm:$0xf]  ;;  %v9162_v31 = vor.u32 %v11470_v29, %v9161_v28  ;;  %v9163_v32 = vld [vmem:[#allocation10 + $0x58] sm:$0xf0]  ;;  %v9153_v35 = vld [vmem:[#allocation10 + $0x40] sm:$0xf] }
  0x72   : > { %898 = vmatpush.bf16.msra.mxu1 %v9182_v9  ;;  %v11482_v33 = vld [vmem:[#allocation7 + $0x38] sm:$0xff]  ;;  %v9166_v34 = vor.u32 %v11469_v30, %v9163_v32  ;;  %v11468_v36 = vld [vmem:[#allocation10 + $0x44] sm:$0xf0]  ;;  %v11467_v37 = vld [vmem:[#allocation10 + $0x44] sm:$0xf]  ;;  %s12995_s2 = smov 120  }
  0x73   : > { %1852 = vmatpush.bf16.msra.mxu2 %v11482_v33  ;;  %v9154_v38 = vor.u32 %v11468_v36, %v9153_v35  ;;  %v9155_v39 = vld [vmem:[#allocation10 + $0x48] sm:$0xf0]  ;;  %v9145_v42 = vld [vmem:[#allocation10 + $0x30] sm:$0xf]  ;;  %v11466_v43 = vld [vmem:[#allocation10 + $0x34] sm:$0xf0] }
  0x74   : > { %v12272_v2 = vpop.eup %12271  ;;  %v11481_v40 = vld [vmem:[#allocation7 + $0x30] sm:$0xff]  ;;  %v9158_v41 = vor.u32 %v11467_v37, %v9155_v39  ;;  %v9146_v45 = vor.u32 %v11466_v43, %v9145_v42  ;;  %v9147_v46 = vld [vmem:[#allocation10 + $0x38] sm:$0xf0]  ;;  %v11480_v47 = vld [vmem:[#allocation7 + $0x28] sm:$0xff]  ;;  %s12996_s17 = smov 96   ;;  %s12997_s19 = smov 80  }
  0x75   : > { %v750_v3 = vmul.f32 128.0, %v12272_v2  ;;  %vm754_vm0 = vweird.f32 %v12272_v2  ;;  %886 = vmatpush.bf16.msra.mxu0 %v9170_v25  ;;  %v11465_v44 = vld [vmem:[#allocation10 + $0x34] sm:$0xf]  ;;  %v9137_v49 = vld [vmem:[#allocation10 + $0x20] sm:$0xf]  ;;  %v11476_v6 = vld [vmem:[#allocation7 + $0x8] sm:$0xff] }
  0x76   : > { %1748 = vadd.xlane.f32.xlu0 %v744_v0  ;;  %899 = vmatpush.bf16.msra.mxu1 %v9174_v27  ;;  %v9150_v48 = vor.u32 %v11465_v44, %v9147_v46  ;;  %v11464_v50 = vld [vmem:[#allocation10 + $0x24] sm:$0xf0]  ;;  %v11463_v51 = vld [vmem:[#allocation10 + $0x24] sm:$0xf]  ;;  %v9139_v53 = vld [vmem:[#allocation10 + $0x28] sm:$0xf0] }
  0x77   : > { %v751_v10 = vsub.f32 1.0, %v750_v3  ;;  %1853 = vmatpush.bf16.msra.mxu2 %v11481_v40  ;;  %v9138_v52 = vor.u32 %v11464_v50, %v9137_v49  ;;  %v11479_v54 = vld [vmem:[#allocation7 + $0x20] sm:$0xff]  ;;  %v9142_v55 = vor.u32 %v11463_v51, %v9139_v53  ;;  %v9129_v56 = vld [vmem:[#allocation10 + $0x10] sm:$0xf]  ;;  %v11462_v57 = vld [vmem:[#allocation10 + $0x14] sm:$0xf0] }
  0x78   : > { %v11461_v58 = vld [vmem:[#allocation10 + $0x14] sm:$0xf]  ;;  %v9130_v59 = vor.u32 %v11462_v57, %v9129_v56  ;;  %v9131_v60 = vld [vmem:[#allocation10 + $0x18] sm:$0xf0]  ;;  %v9121_v63 = vld [vmem:[#allocation10] sm:$0xf] }
  0x79   : > { %v752_v11 = vmul.f32 %v12272_v2, %v751_v10  ;;  %887 = vmatpush.bf16.msra.mxu0 %v9162_v31  ;;  %v11478_v61 = vld [vmem:[#allocation7 + $0x18] sm:$0xff]  ;;  %v9134_v62 = vor.u32 %v11461_v58, %v9131_v60  ;;  %v11459_v1 = vld [vmem:[#allocation10 + $0x4] sm:$0xf]  ;;  %v9123_v3 = vld [vmem:[#allocation10 + $0x8] sm:$0xf0]  ;;  %s14832_s18 = smov 88  }
  0x7a   : > { %900 = vmatpush.bf16.msra.mxu1 %v9166_v34  ;;  %v11477_v4 = vld [vmem:[#allocation7 + $0x10] sm:$0xff]  ;;  %v9126_v5 = vor.u32 %v11459_v1, %v9123_v3  ;;  %v11475_v8 = vld [vmem:[#allocation7] sm:$0xff]  ;;  %v12263_v29 = vld [vmem:[#allocation18] ss:$0 sm:$0xff]  ;;  %s12999_s26 = smov 72   ;;  %s14827_s27 = smov 112  }
  0x7b   : > { %v753_v12 = vadd.f32 %v12272_v2, %v752_v11  ;;  %1854 = vmatpush.bf16.msra.mxu2 %v11480_v47  ;;  %v12262_v25 = vld [vmem:[#allocation16] ss:$0 sm:$0xff]  ;;  %v12265_v39 = vld [vmem:[#allocation18] ss:$0 sm:$0xff]  ;;  %v799_v42 = vld [vmem:[#allocation12] sm:$0x3] }
  0x7c   : > { %v12264_v36 = vld [vmem:[#allocation16] ss:$0 sm:$0xff]  ;;  %v801_v43 = vperm.slane %v799_v42, 0  ;;  %v12266_v49 = vld [vmem:[#allocation9] ss:$0 sm:$0xff]  ;;  %s13001_s25 = smov 24  }
  0x7d   : > { %v13304_v13 = vsel %vm754_vm0, %v12272_v2, %v753_v12  ;;  %888 = vmatpush.bf16.msra.mxu0 %v9154_v38  ;;  %s14831_s21 = smov 104   ;;  %s13003_s0 = smov 16   ;;  %v13010_v60 = vmov 1983009808   ;;  %vm960_vm7 = vcmask 1047556   ;;  %vm1312_vm8 = vcmask 60416  }
  0x7e   : > { %901 = vmatpush.bf16.msra.mxu1 %v9158_v41  ;;  %s14829_s28 = smov 64   ;;  %s13005_s3 = smov 40   ;;  %vm2265_vm9 = vcmask 64512   ;;  %vm2749_vm10 = vcmask 1043456   ;;  %vm3593_vm11 = vcmask 130048   ;;  %vm3595_vm12 = vcmask 195584  }
  0x7f   : > { %1855 = vmatpush.bf16.msra.mxu2 %v11479_v54  ;;  %s13006_s14 = smov 8   ;;  %s13007_s29 = smov 32   ;;  %v802_v54 = vperm.slane %v799_v42, 1  ;;  %vm3597_vm13 = vcmask 261120   ;;  %vm3599_vm14 = vcmask 326656   ;;  %vm3601_vm15 = vcmask 392192  }
  0x80   : > { %vm3603_vm0 = vcmask 457728  }
  0x81   : > { %889 = vmatpush.bf16.msra.mxu0 %v9146_v45 }
  0x82   : > { %902 = vmatpush.bf16.msra.mxu1 %v9150_v48 }
  0x83   : > { %1856 = vmatpush.bf16.msra.mxu2 %v11478_v61  ;;  %v963_v61 = vunpack.c.l.s4 %v13010_v60 }
  0x85   : > { %890 = vmatpush.bf16.msra.mxu0 %v9138_v52 }
  0x86   : > { %903 = vmatpush.bf16.msra.mxu1 %v9142_v55 }
  0x87   : > { %1857 = vmatpush.bf16.msra.mxu2 %v11477_v4 }
  0x89   : > { %891 = vmatpush.bf16.msra.mxu0 %v9130_v59 }
  0x8a   : > { %904 = vmatpush.bf16.msra.mxu1 %v9134_v62 }
  0x8b   : > { %1858 = vmatpush.bf16.msra.mxu2 %v11476_v6 }
  0x8e   : > { %905 = vmatpush.bf16.msra.mxu1 %v9126_v5 }
  0x8f   : > { %1859 = vmatpush.bf16.msra.mxu2 %v11475_v8 }
  0xe1   : > { %v748_v14 = vpop.xlane.xlu0 %747 }
  0xe2   : > { %v756_v15 = vmul.f32 %v13304_v13, %v748_v14 }
  0xe4   : > { %v13307_v16 = vsub.f32 %v744_v0, %v756_v15 }
  0xe6   : > { %v758_v17 = vmul.f32 %v13307_v16, %v13307_v16 }
  0xe8   : > { %759 = vadd.xlane.f32.xlu1 %v758_v17 }
  0xe9   : > { %v1749_v18 = vpop.xlane.xlu0 %1748 }
  0xea   : > { %v1757_v19 = vmul.f32 %v1749_v18, %v13304_v13 }
  0xec   : > { %v13312_v20 = vsub.f32 %v744_v0, %v1757_v19  ;;  %v11460_v0 = vld [vmem:[#allocation10 + $0x4] sm:$0xf0] }
  0xed   : > { %v9122_v2 = vor.u32 %v11460_v0, %v9121_v63  ;;  %v13406_v63 = vunpack.c.0.s8 %v963_v61 }
  0xee   : > { %v1759_v21 = vmul.f32 %v13312_v20, %v13312_v20 }
  0xef   : > { %892 = vmatpush.bf16.msra.mxu0 %v9122_v2  ;;  %v13011_v2 = vmov 1934713408  }
  0xf0   : > { %1760 = vadd.xlane.f32.xlu1 %v1759_v21  ;;  %v977_v3 = vunpack.c.l.s4 %v13011_v2 }
 0x15b   : > { %v760_v7 = vpop.xlane.xlu1 %759 }
 0x15c   : > { %v761_v9 = vmul.f32 %v760_v7, %v13304_v13 }
 0x15e   : > { %v762_v10 = vadd.f32 1e-05, %v761_v9  ;;  %v13413_v9 = vunpack.c.0.s8 %v977_v3 }
 0x160   : > { %12273 = vrsqrt.f32 %v762_v10  ;;  %vm769_vm2 = vweird.f32 %v762_v10 }
 0x163   : > { %v1761_v11 = vpop.xlane.xlu1 %1760 }
 0x164   : > { %v1762_v12 = vmul.f32 %v1761_v11, %v13304_v13 }
 0x166   : > { %v12274_v14 = vpop.eup %12273  ;;  %v1763_v15 = vadd.f32 1e-05, %v1762_v12 }
 0x167   : > { %v764_v17 = vmul.f32 %v12274_v14, %v762_v10  ;;  %vm770_vm1 = vweird.f32 %v12274_v14 }
 0x168   : > { %12275 = vrsqrt.f32 %v1763_v15  ;;  %vm771_vm3 = vmor %vm769_vm2, %vm770_vm1  ;;  %vm1770_vm5 = vweird.f32 %v1763_v15  ;;  %vm3605_vm1 = vcmask 523264   ;;  %vm3607_vm2 = vcmask 588800  }
 0x169   : > { %v765_v18 = vmul.f32 %v12274_v14, %v764_v17 }
 0x16b   : > { %v766_v19 = vmul.f32 0.5, %v765_v18 }
 0x16d   : > { %v767_v21 = vsub.f32 1.5, %v766_v19 }
 0x16e   : > { %v12276_v22 = vpop.eup %12275 }
 0x16f   : > { %v768_v23 = vmul.f32 %v12274_v14, %v767_v21  ;;  %v1765_v24 = vmul.f32 %v12276_v22, %v1763_v15  ;;  %vm1771_vm4 = vweird.f32 %v12276_v22 }
 0x170   : > { %vm1772_vm6 = vmor %vm1770_vm5, %vm1771_vm4  ;;  %vm3611_vm4 = vcmask 719872   ;;  %vm3613_vm5 = vcmask 785408  }
 0x171   : > { %v1766_v26 = vmul.f32 %v12276_v22, %v1765_v24  ;;  %v772_v27 = vsel %vm771_vm3, %v12274_v14, %v768_v23  ;;  %vm3609_vm3 = vcmask 654336  }
 0x172   : > { %v773_v28 = vmul.f32 %v772_v27, %v13307_v16 }
 0x173   : > { %v1767_v30 = vmul.f32 0.5, %v1766_v26 }
 0x174   : > { %v777_v31 = vmul.f32 %v12262_v25, %v773_v28 }
 0x175   : > { %v1768_v32 = vsub.f32 1.5, %v1767_v30 }
 0x176   : > { %v781_v33 = vadd.f32 %v12263_v29, %v777_v31 }
 0x177   : > { %v1769_v34 = vmul.f32 %v12276_v22, %v1768_v32 }
 0x178   : > { %v782_v35 = vpack.c.bf16 %v781_v33, %v781_v33 }
 0x179   : > { %v1773_v37 = vsel %vm1772_vm6, %v12276_v22, %v1769_v34  ;;  %vm3615_vm6 = vcmask 850944  }
 0x17a   : > { %893 = vmatmul.bf16.vlgmr.msra.gmra.mxu0 %v782_v35  ;;  %906 = vmatmul.bf16.vlgmr.msra.gmra.mxu1 %v782_v35  ;;  %v1774_v38 = vmul.f32 %v1773_v37, %v13312_v20 }
 0x17c   : > { %v1778_v40 = vmul.f32 %v12264_v36, %v1774_v38 }
 0x17e   : > { %v1782_v41 = vadd.f32 %v12265_v39, %v1778_v40 }
 0x180   : > { %v1783_v16 = vpack.c.bf16 %v1782_v41, %v1782_v41 }
 0x182   : > { %1860 = vmatmul.bf16.vlgmr.msra.gmra.mxu2 %v1783_v16 }
 0x1f7   : > { %v894_v44 = vpop.f32.mrf.mxu0  ;;  %v907_v45 = vpop.f32.mrf.mxu1 }
 0x1f8   : > { %v895_v46 = vadd.f32 %v894_v44, %v801_v43  ;;  %v908_v55 = vadd.f32 %v907_v45, %v802_v54 }
 0x1fa   : > { %v13320_v47 = vpack.c.bf16 %v895_v46, %v895_v46  ;;  %v13374_v56 = vpack.c.bf16 %v908_v55, %v908_v55 }
 0x1fc   : > { %914 = vrot.lane.b32.xlu0 %v13320_v47, %s12995_s2  ;;  %923 = vrot.lane.b32.xlu2 %v13320_v47, %s12996_s17 }
 0x1fd   : > { %929 = vrot.lane.b32.xlu1 %v13320_v47, %s12997_s19 }
 0x1ff   : > { %v896_v20 = vpop.f32.mrf.mxu0  ;;  %v909_v48 = vpop.f32.mrf.mxu1 }
 0x204   : > { %926 = vrot.lane.b32.xlu2 %v13320_v47, %s14832_s18 }
 0x205   : > { %v1861_v50 = vpop.f32.mrf.mxu2 }
 0x206   : > { %v1862_v51 = vadd.f32 %v12266_v49, %v1861_v50 }
 0x208   : > { %v13330_v52 = vpack.c.bf16 %v1862_v51, %v1862_v51 }
 0x20a   : > { %1867 = vrot.lane.b32.xlu1 %v13330_v52, %s12995_s2  ;;  %1876 = vrot.lane.b32.xlu0 %v13330_v52, %s12996_s17 }
 0x20c   : > { %932 = vrot.lane.b32.xlu2 %v13320_v47, %s12999_s26 }
 0x20d   : > { %v1863_v53 = vpop.f32.mrf.mxu2 }
 0x212   : > { %1870 = vrot.lane.b32.xlu1 %v13330_v52, %s14827_s27  ;;  %1882 = vrot.lane.b32.xlu0 %v13330_v52, %s12997_s19 }
 0x214   : > { %917 = vrot.lane.b32.xlu2 %v13320_v47, %s14827_s27  ;;  %s13008_s27 = smov 56  }
 0x21a   : > { %950 = vrot.lane.b32.xlu1 %v13320_v47, %s13001_s25  ;;  %1873 = vrot.lane.b32.xlu0 %v13330_v52, %s14831_s21 }
 0x21c   : > { %920 = vrot.lane.b32.xlu2 %v13320_v47, %s14831_s21 }
 0x222   : > { %953 = vrot.lane.b32.xlu1 %v13320_v47, %s13003_s0  ;;  %935 = vrot.lane.b32.xlu0 %v13320_v47, %s14829_s28 }
 0x224   : > { %1879 = vrot.lane.b32.xlu2 %v13330_v52, %s14832_s18 }
 0x22a   : > { %944 = vrot.lane.b32.xlu1 %v13320_v47, %s13005_s3  ;;  %956 = vrot.lane.b32.xlu0 %v13320_v47, %s13006_s14 }
 0x22c   : > { %1885 = vrot.lane.b32.xlu2 %v13330_v52, %s12999_s26 }
 0x232   : > { %1888 = vrot.lane.b32.xlu1 %v13330_v52, %s14829_s28  ;;  %1900 = vrot.lane.b32.xlu0 %v13330_v52, %s13007_s29  ;;  %s13009_s28 = smov 48  }
 0x234   : > { %947 = vrot.lane.b32.xlu2 %v13320_v47, %s13007_s29 }
 0x23a   : > { %1909 = vrot.lane.b32.xlu1 %v13330_v52, %s13006_s14  ;;  %1891 = vrot.lane.b32.xlu0 %v13330_v52, %s13008_s27 }
 0x23c   : > { %938 = vrot.lane.b32.xlu2 %v13320_v47, %s13008_s27 }
 0x242   : > { %1339 = vrot.lane.b32.xlu1 %v13374_v56, %s12996_s17  ;;  %1894 = vrot.lane.b32.xlu0 %v13330_v52, %s13009_s28 }
 0x244   : > { %941 = vrot.lane.b32.xlu2 %v13320_v47, %s13009_s28 }
 0x24a   : > { %1345 = vrot.lane.b32.xlu1 %v13374_v56, %s12997_s19  ;;  %1342 = vrot.lane.b32.xlu0 %v13374_v56, %s14832_s18  ;;  %s14865_s18 = smov 112  }
 0x24c   : > { %1903 = vrot.lane.b32.xlu2 %v13330_v52, %s13001_s25 }
 0x252   : > { %1336 = vrot.lane.b32.xlu1 %v13374_v56, %s14831_s21  ;;  %1348 = vrot.lane.b32.xlu0 %v13374_v56, %s12999_s26  ;;  %s14864_s21 = smov 64  }
 0x254   : > { %1906 = vrot.lane.b32.xlu2 %v13330_v52, %s13003_s0 }
 0x256   : > { %v924_v57 = vpop.permute.xlu2 %923 }
 0x257   : > { %v959_v62 = vrot.slane %v924_v57, 4 }
 0x259   : > { %v961_v0 = vsel %vm960_vm7, %v959_v62, %v13320_v47 }
 0x25a   : > { %1363 = vrot.lane.b32.xlu1 %v13374_v56, %s13007_s29  ;;  %1372 = vrot.lane.b32.xlu0 %v13374_v56, %s13006_s14  ;;  %v965_v4 = vperm.slane %v961_v0, %v13406_v63 }
 0x25c   : > { %1897 = vrot.lane.b32.xlu2 %v13330_v52, %s13005_s3  ;;  %v974_v12 = vrot.slane %v965_v4, 4 }
 0x25e   : > { %v927_v58 = vpop.permute.xlu2 %926 }
 0x25f   : > { %v988_v7 = vrot.slane %v927_v58, 4 }
 0x262   : > { %1366 = vrot.lane.b32.xlu1 %v13374_v56, %s13001_s25 }
 0x264   : > { %1330 = vrot.lane.b32.xlu2 %v13374_v56, %s12995_s2 }
 0x266   : > { %v933_v59 = vpop.permute.xlu2 %932 }
 0x267   : > { %v994_v15 = vrot.slane %v933_v59, 4 }
 0x26a   : > { %1351 = vrot.lane.b32.xlu1 %v13374_v56, %s14864_s21 }
 0x26c   : > { %1333 = vrot.lane.b32.xlu2 %v13374_v56, %s14865_s18 }
 0x26e   : > { %v918_v1 = vpop.permute.xlu2 %917  ;;  %v915_v6 = vpop.permute.xlu0 %914 }
 0x26f   : > { %v930_v5 = vpop.permute.xlu1 %929  ;;  %v989_v11 = vsel %vm960_vm7, %v988_v7, %v915_v6 }
 0x270   : > { %v966_v8 = vrot.slane %v930_v5, 4  ;;  %v993_v19 = vperm.slane %v989_v11, %v13406_v63 }
 0x272   : > { %v967_v10 = vsel %vm960_vm7, %v966_v8, %v918_v1  ;;  %1354 = vrot.lane.b32.xlu1 %v13374_v56, %s13008_s27  ;;  %v1002_v28 = vrot.slane %v993_v19, 4 }
 0x273   : > { %v971_v14 = vperm.slane %v967_v10, %v13406_v63 }
 0x274   : > { %1357 = vrot.lane.b32.xlu2 %v13374_v56, %s13009_s28 }
 0x275   : > { %v972_v17 = vrot.slane %v971_v14, 4  ;;  %v975_v18 = vsel %vm960_vm7, %v971_v14, %v974_v12 }
 0x276   : > { %v983_v21 = vperm.slane %v975_v18, %v13413_v9  ;;  %v921_v22 = vpop.permute.xlu2 %920 }
 0x277   : > { %v973_v23 = vsel %vm960_vm7, %v972_v17, %v965_v4  ;;  %v995_v24 = vsel %vm960_vm7, %v994_v15, %v921_v22 }
 0x278   : > { %v979_v25 = vperm.slane %v973_v23, %v13413_v9  ;;  %v986_v26 = vrot.slane %v983_v21, 4  ;;  %v999_v27 = vperm.slane %v995_v24, %v13406_v63  ;;  %v1092_v39 = vshrl.u32 %v983_v21, 16 }
 0x27a   : > { %v984_v29 = vrot.slane %v979_v25, 4  ;;  %v1000_v30 = vrot.slane %v999_v27, 4  ;;  %1369 = vrot.lane.b32.xlu1 %v13374_v56, %s13003_s0  ;;  %v987_v31 = vsel %vm960_vm7, 0, %v986_v26  ;;  %v1003_v32 = vsel %vm960_vm7, %v999_v27, %v1002_v28 }
 0x27b   : > { %v1011_v35 = vperm.slane %v1003_v32, %v13413_v9  ;;  %v1076_v38 = vshrl.u32 %v979_v25, 16  ;;  %v1100_v44 = vshrl.u32 %v987_v31, 16 }
 0x27c   : > { %v985_v33 = vsel %vm960_vm7, 0, %v984_v29  ;;  %v1001_v34 = vsel %vm960_vm7, %v1000_v30, %v993_v19  ;;  %v1868_v36 = vpop.permute.xlu1 %1867  ;;  %v1877_v37 = vpop.permute.xlu0 %1876 }
 0x27d   : > { %v1007_v40 = vperm.slane %v1001_v34, %v13413_v9  ;;  %v1912_v41 = vrot.slane %v1877_v37, 4  ;;  %v1014_v16 = vrot.slane %v1011_v35, 4  ;;  %v1090_v42 = vpack.i.b16 %v1011_v35, %v983_v21 }
 0x27e   : > { %v1093_v43 = vshrl.u32 %v1011_v35, 16  ;;  %v1880_v45 = vpop.permute.xlu2 %1879  ;;  %v1084_v48 = vshrl.u32 %v985_v33, 16 }
 0x27f   : > { %v1012_v46 = vrot.slane %v1007_v40, 4  ;;  %v1074_v47 = vpack.i.b16 %v1007_v40, %v979_v25  ;;  %v1077_v20 = vshrl.u32 %v1007_v40, 16  ;;  %v1015_v49 = vsel %vm960_vm7, 0, %v1014_v16 }
 0x280   : > { %v1094_v50 = vpack.i.b16 %v1093_v43, %v1092_v39  ;;  %v1136_v51 = vrot.slane %v1090_v42, 4  ;;  %v1914_v53 = vsel %vm960_vm7, %v1912_v41, %v13330_v52  ;;  %v1098_v57 = vpack.i.b16 %v1015_v49, %v987_v31 }
 0x281   : > { %v1013_v54 = vsel %vm960_vm7, 0, %v1012_v46  ;;  %v1078_v55 = vpack.i.b16 %v1077_v20, %v1076_v38  ;;  %v1101_v58 = vshrl.u32 %v1015_v49, 16  ;;  %v1918_v5 = vperm.slane %v1914_v53, %v13406_v63 }
 0x282   : > { %v1082_v59 = vpack.i.b16 %v1013_v54, %v985_v33  ;;  %v1085_v60 = vshrl.u32 %v1013_v54, 16  ;;  %v1137_v61 = vsel %vm960_vm7, %v1136_v51, %v1074_v47  ;;  %v1164_v62 = vrot.slane %v1094_v50, 4 }
 0x283   : > { %v1102_v0 = vpack.i.b16 %v1101_v58, %v1100_v44  ;;  %v1141_v1 = vperm.slane %v1137_v61, %v13406_v63  ;;  %v1142_v2 = vrot.slane %v1098_v57, 4  ;;  %v1941_v52 = vrot.slane %v1880_v45, 4 }
 0x284   : > { %v1086_v3 = vpack.i.b16 %v1085_v60, %v1084_v48  ;;  %v1165_v4 = vsel %vm960_vm7, %v1164_v62, %v1078_v55  ;;  %v1871_v6 = vpop.permute.xlu1 %1870  ;;  %v1883_v7 = vpop.permute.xlu0 %1882  ;;  %v1927_v27 = vrot.slane %v1918_v5, 4 }
 0x285   : > { %v1143_v8 = vsel %vm960_vm7, %v1142_v2, %v1082_v59  ;;  %v1150_v10 = vrot.slane %v1141_v1, 4  ;;  %v1169_v11 = vperm.slane %v1165_v4, %v13406_v63  ;;  %v1170_v12 = vrot.slane %v1102_v0, 4 }
 0x286   : > { %v1147_v14 = vperm.slane %v1143_v8, %v13406_v63  ;;  %v1919_v15 = vrot.slane %v1883_v7, 4  ;;  %v1886_v17 = vpop.permute.xlu2 %1885  ;;  %v1942_v21 = vsel %vm960_vm7, %v1941_v52, %v1868_v36 }
 0x287   : > { %v1171_v18 = vsel %vm960_vm7, %v1170_v12, %v1086_v3  ;;  %v1178_v19 = vrot.slane %v1169_v11, 4  ;;  %v13458_v32 = vperm.slane %v1942_v21, %v13406_v63  ;;  %v1947_v36 = vrot.slane %v1886_v17, 4 }
 0x288   : > { %v1148_v22 = vrot.slane %v1147_v14, 4  ;;  %v1151_v23 = vsel %vm960_vm7, %v1147_v14, %v1150_v10  ;;  %v1175_v24 = vperm.slane %v1171_v18, %v13406_v63  ;;  %v1920_v25 = vsel %vm960_vm7, %v1919_v15, %v1871_v6 }
 0x289   : > { %v1159_v26 = vperm.slane %v1151_v23, %v13413_v9  ;;  %v1924_v28 = vperm.slane %v1920_v25, %v13406_v63  ;;  %v1955_v12 = vrot.slane %v13458_v32, 4 }
 0x28a   : > { %v1149_v29 = vsel %vm960_vm7, %v1148_v22, %v1141_v1  ;;  %v1176_v30 = vrot.slane %v1175_v24, 4  ;;  %v1179_v31 = vsel %vm960_vm7, %v1175_v24, %v1178_v19 }
 0x28b   : > { %v1155_v33 = vperm.slane %v1149_v29, %v13413_v9  ;;  %v1162_v34 = vrot.slane %v1159_v26, 4  ;;  %v1187_v35 = vperm.slane %v1179_v31, %v13413_v9  ;;  %v1268_v38 = vshrl.u32 %v1159_v26, 16 }
 0x28c   : > { %v1177_v37 = vsel %vm960_vm7, %v1176_v30, %v1169_v11  ;;  %v1925_v39 = vrot.slane %v1924_v28, 4  ;;  %v1928_v40 = vsel %vm960_vm7, %v1924_v28, %v1927_v27  ;;  %v951_v41 = vpop.permute.xlu1 %950  ;;  %v1874_v16 = vpop.permute.xlu0 %1873 }
 0x28d   : > { %v1160_v42 = vrot.slane %v1155_v33, 4  ;;  %v1163_v43 = vsel %vm960_vm7, 0, %v1162_v34  ;;  %v1183_v44 = vperm.slane %v1177_v37, %v13413_v9  ;;  %v1190_v45 = vrot.slane %v1187_v35, 4 }
 0x28e   : > { %v1252_v46 = vshrl.u32 %v1155_v33, 16  ;;  %v1266_v47 = vpack.i.b16 %v1187_v35, %v1159_v26  ;;  %v1269_v20 = vshrl.u32 %v1187_v35, 16  ;;  %v1276_v48 = vshrl.u32 %v1163_v43, 16  ;;  %v948_v49 = vpop.permute.xlu2 %947 }
 0x28f   : > { %v1161_v50 = vsel %vm960_vm7, 0, %v1160_v42  ;;  %v1188_v51 = vrot.slane %v1183_v44, 4  ;;  %v1191_v53 = vsel %vm960_vm7, 0, %v1190_v45  ;;  %v1250_v54 = vpack.i.b16 %v1183_v44, %v1155_v33 }
 0x290   : > { %v1253_v55 = vshrl.u32 %v1183_v44, 16  ;;  %v1260_v57 = vshrl.u32 %v1161_v50, 16  ;;  %v1270_v58 = vpack.i.b16 %v1269_v20, %v1268_v38  ;;  %v1274_v59 = vpack.i.b16 %v1191_v53, %v1163_v43  ;;  %1317 = vst.msk [vmem:[#allocation2 + $0x10] sm:$0xf] %vm1312_vm8, %v1266_v47 }
 0x291   : > { %v1189_v60 = vsel %vm960_vm7, 0, %v1188_v51  ;;  %v1277_v61 = vshrl.u32 %v1191_v53, 16  ;;  %1313 = vst.msk [vmem:[#allocation2] sm:$0xf] %vm1312_vm8, %v1250_v54  ;;  %v1926_v62 = vsel %vm960_vm7, %v1925_v39, %v1918_v5  ;;  %v13473_v0 = vperm.slane %v1928_v40, %v13413_v9 }
 0x292   : > { %v1254_v1 = vpack.i.b16 %v1253_v55, %v1252_v46  ;;  %v1258_v2 = vpack.i.b16 %v1189_v60, %v1161_v50  ;;  %v1261_v3 = vshrl.u32 %v1189_v60, 16  ;;  %1318 = vst.msk [vmem:[#allocation2 + $0x14] sm:$0xf] %vm1312_vm8, %v1270_v58  ;;  %v13477_v4 = vperm.slane %v1926_v62, %v13413_v9 }
 0x293   : > { %v1278_v52 = vpack.i.b16 %v1277_v61, %v1276_v48  ;;  %1319 = vst.msk [vmem:[#allocation2 + $0x18] sm:$0xf] %vm1312_vm8, %v1274_v59  ;;  %v1939_v6 = vrot.slane %v13473_v0, 4  ;;  %v1948_v8 = vsel %vm960_vm7, %v1947_v36, %v1874_v16  ;;  %v2045_v14 = vshrl.u32 %v13473_v0, 16 }
 0x294   : > { %v1262_v7 = vpack.i.b16 %v1261_v3, %v1260_v57  ;;  %1315 = vst.msk [vmem:[#allocation2 + $0x8] sm:$0xf] %vm1312_vm8, %v1258_v2  ;;  %v1937_v5 = vrot.slane %v13477_v4, 4  ;;  %v13484_v10 = vpop.permute.xlu1 %953  ;;  %v936_v11 = vpop.permute.xlu0 %935  ;;  %v1952_v15 = vperm.slane %v1948_v8, %v13406_v63  ;;  %v1016_v17 = vrot.slane %v948_v49, 4 }
 0x295   : > { %1314 = vst.msk [vmem:[#allocation2 + $0x4] sm:$0xf] %vm1312_vm8, %v1254_v1  ;;  %v2029_v18 = vshrl.u32 %v13477_v4, 16  ;;  %v1044_v19 = vrot.slane %v951_v41, 4  ;;  %v1940_v21 = vsel %vm960_vm7, 0, %v1939_v6  ;;  %v1022_v22 = vrot.slane %v13484_v10, 4 }
 0x296   : > { %1316 = vst.msk [vmem:[#allocation2 + $0xc] sm:$0xf] %vm1312_vm8, %v1262_v7  ;;  %v939_v23 = vpop.permute.xlu2 %938  ;;  %v13496_v24 = vsel %vm960_vm7, 0, %v1937_v5  ;;  %v1953_v25 = vrot.slane %v1952_v15, 4  ;;  %v1956_v26 = vsel %vm960_vm7, %v1952_v15, %v1955_v12  ;;  %v1017_v27 = vsel %vm960_vm7, %v1016_v17, %v936_v11 }
 0x297   : > { %1320 = vst.msk [vmem:[#allocation2 + $0x1c] sm:$0xf] %vm1312_vm8, %v1278_v52  ;;  %v2253_v28 = vld [vmem:[#allocation2 + $0x10] sm:$0xf]  ;;  %v1964_v29 = vperm.slane %v1956_v26, %v13413_v9  ;;  %v13502_v30 = vperm.slane %v1017_v27, %v13406_v63  ;;  %v1045_v31 = vsel %vm960_vm7, %v1044_v19, %v939_v23  ;;  %v2053_v35 = vshrl.u32 %v1940_v21, 16 }
 0x298   : > { %v2346_v33 = vsel %vm2265_vm9, %v2253_v28, 0  ;;  %v2249_v34 = vld [vmem:[#allocation2] sm:$0xf]  ;;  %v1954_v36 = vsel %vm960_vm7, %v1953_v25, %v13458_v32  ;;  %v1049_v37 = vperm.slane %v1045_v31, %v13406_v63  ;;  %v2037_v43 = vshrl.u32 %v13496_v24, 16 }
 0x299   : > { %2355 = vmatpush.bf16.xpose.msrb.mxu2 %v2346_v33  ;;  %v2270_v38 = vsel %vm2265_vm9, %v2249_v34, 0  ;;  %v2254_v39 = vld [vmem:[#allocation2 + $0x14] sm:$0xf]  ;;  %v1960_v40 = vperm.slane %v1954_v36, %v13413_v9  ;;  %v1967_v41 = vrot.slane %v1964_v29, 4  ;;  %v2043_v16 = vpack.i.b16 %v1964_v29, %v13473_v0 }
 0x29a   : > { %v2046_v42 = vshrl.u32 %v1964_v29, 16  ;;  %2279 = vmatpush.bf16.xpose.msra.mxu3 %v2270_v38  ;;  %v1030_v44 = vrot.slane %v13502_v30, 4  ;;  %v1058_v45 = vrot.slane %v1049_v37, 4  ;;  %v2365_v32 = vsel %vm2265_vm9, %v2254_v39, 0 }
 0x29b   : > { %v1965_v46 = vrot.slane %v1960_v40, 4  ;;  %v1968_v47 = vsel %vm960_vm7, 0, %v1967_v41  ;;  %v2027_v20 = vpack.i.b16 %v1960_v40, %v13477_v4  ;;  %v2030_v48 = vshrl.u32 %v1960_v40, 16 }
 0x29c   : > { %v2250_v49 = vld [vmem:[#allocation2 + $0x4] sm:$0xf]  ;;  %v945_v50 = vpop.permute.xlu1 %944  ;;  %v957_v51 = vpop.permute.xlu0 %956  ;;  %v2047_v53 = vpack.i.b16 %v2046_v42, %v2045_v14  ;;  %v2051_v54 = vpack.i.b16 %v1968_v47, %v1940_v21  ;;  %v2054_v55 = vshrl.u32 %v1968_v47, 16  ;;  %v2089_v57 = vrot.slane %v2043_v16, 4 }
 0x29d   : > { %v1966_v58 = vsel %vm960_vm7, 0, %v1965_v46  ;;  %v2031_v59 = vpack.i.b16 %v2030_v48, %v2029_v18  ;;  %v2289_v60 = vsel %vm2265_vm9, %v2250_v49, 0  ;;  %v1050_v61 = vrot.slane %v957_v51, 4  ;;  %v2252_v4 = vld [vmem:[#allocation2 + $0xc] sm:$0xf] }
 0x29e   : > { %v942_v62 = vpop.permute.xlu2 %941  ;;  %v2035_v0 = vpack.i.b16 %v1966_v58, %v13496_v24  ;;  %v2038_v1 = vshrl.u32 %v1966_v58, 16  ;;  %v2055_v2 = vpack.i.b16 %v2054_v55, %v2053_v35  ;;  %v2090_v3 = vsel %vm960_vm7, %v2089_v57, %v2027_v20  ;;  %v2256_v52 = vld [vmem:[#allocation2 + $0x1c] sm:$0xf] }
 0x29f   : > { %v13522_v6 = vperm.slane %v2090_v3, %v13406_v63  ;;  %v2095_v7 = vrot.slane %v2051_v54, 4  ;;  %v2117_v5 = vrot.slane %v2047_v53, 4  ;;  %v1051_v8 = vsel %vm960_vm7, %v1050_v61, %v945_v50 }
 0x2a0   : > { %v2039_v10 = vpack.i.b16 %v2038_v1, %v2037_v43  ;;  %v2123_v11 = vrot.slane %v2055_v2, 4  ;;  %v1055_v12 = vperm.slane %v1051_v8, %v13406_v63  ;;  %v1023_v14 = vsel %vm960_vm7, %v1022_v22, %v942_v62 }
 0x2a1   : > { %2374 = vmatpush.bf16.xpose.msra.mxu2 %v2365_v32  ;;  %v2118_v15 = vsel %vm960_vm7, %v2117_v5, %v2031_v59  ;;  %v1027_v17 = vperm.slane %v1023_v14, %v13406_v63  ;;  %v2327_v18 = vsel %vm2265_vm9, %v2252_v4, 0  ;;  %v2403_v19 = vsel %vm2265_vm9, %v2256_v52, 0 }
 0x2a2   : > { %2298 = vmatpush.bf16.xpose.msrb.mxu3 %v2289_v60  ;;  %v1056_v21 = vrot.slane %v1055_v12, 4  ;;  %v1059_v23 = vsel %vm960_vm7, %v1055_v12, %v1058_v45  ;;  %2336 = vmatpush.bf16.xpose.msrb.mxu0 %v2327_v18  ;;  %v2096_v24 = vsel %vm960_vm7, %v2095_v7, %v2035_v0  ;;  %v2103_v25 = vrot.slane %v13522_v6, 4 }
 0x2a3   : > { %v1067_v26 = vperm.slane %v1059_v23, %v13413_v9  ;;  %v1028_v27 = vrot.slane %v1027_v17, 4  ;;  %v1031_v22 = vsel %vm960_vm7, %v1027_v17, %v1030_v44  ;;  %v13539_v29 = vperm.slane %v2096_v24, %v13406_v63  ;;  %v2255_v17 = vld [vmem:[#allocation2 + $0x18] sm:$0xf] }
 0x2a4   : > { %v13536_v28 = vpop.permute.xlu1 %1888  ;;  %v1057_v31 = vsel %vm960_vm7, %v1056_v21, %v1049_v37  ;;  %v1039_v33 = vperm.slane %v1031_v22, %v13413_v9  ;;  %v13544_v34 = vperm.slane %v2118_v15, %v13406_v63  ;;  %v2124_v35 = vsel %vm960_vm7, %v2123_v11, %v2039_v10  ;;  %v13550_v41 = vpop.permute.xlu0 %1900 }
 0x2a5   : > { %v1063_v36 = vperm.slane %v1057_v31, %v13413_v9  ;;  %v1070_v38 = vrot.slane %v1067_v26, 4  ;;  %v1125_v39 = vshrl.u32 %v1067_v26, 16  ;;  %v1029_v40 = vsel %vm960_vm7, %v1028_v27, %v13502_v30 }
 0x2a6   : > { %v1035_v16 = vperm.slane %v1029_v40, %v13413_v9  ;;  %v1042_v42 = vrot.slane %v1039_v33, 4  ;;  %v1122_v37 = vpack.i.b16 %v1067_v26, %v1039_v33  ;;  %v1124_v43 = vshrl.u32 %v1039_v33, 16  ;;  %v13553_v44 = vpop.permute.xlu2 %1903 }
 0x2a7   : > { %v1068_v45 = vrot.slane %v1063_v36, 4  ;;  %v1109_v32 = vshrl.u32 %v1063_v36, 16  ;;  %v1071_v46 = vsel %vm960_vm7, 0, %v1070_v38  ;;  %v2104_v47 = vsel %vm960_vm7, %v13539_v29, %v2103_v25 }
 0x2a8   : > { %v1040_v20 = vrot.slane %v1035_v16, 4  ;;  %v1043_v48 = vsel %vm960_vm7, 0, %v1042_v42  ;;  %v1106_v30 = vpack.i.b16 %v1063_v36, %v1035_v16  ;;  %v1108_v49 = vshrl.u32 %v1035_v16, 16 }
 0x2a9   : > { %v1069_v50 = vsel %vm960_vm7, 0, %v1068_v45  ;;  %v1126_v51 = vpack.i.b16 %v1125_v39, %v1124_v43  ;;  %v1130_v53 = vpack.i.b16 %v1071_v46, %v1043_v48  ;;  %v1132_v54 = vshrl.u32 %v1043_v48, 16 }
 0x2aa   : > { %2412 = vmatpush.bf16.xpose.msra.mxu0 %v2403_v19  ;;  %v1041_v55 = vsel %vm960_vm7, 0, %v1040_v20  ;;  %v1110_v57 = vpack.i.b16 %v1109_v32, %v1108_v49  ;;  %v1117_v58 = vshrl.u32 %v1069_v50, 16  ;;  %v1133_v59 = vshrl.u32 %v1071_v46, 16 }
 0x2ab   : > { %v1114_v60 = vpack.i.b16 %v1069_v50, %v1041_v55  ;;  %v1116_v61 = vshrl.u32 %v1041_v55, 16  ;;  %v1192_v62 = vrot.slane %v1122_v37, 4  ;;  %v1198_v0 = vrot.slane %v1130_v53, 4 }
 0x2ac   : > { %v13561_v1 = vpop.permute.xlu1 %1909  ;;  %v1134_v2 = vpack.i.b16 %v1133_v59, %v1132_v54  ;;  %v1220_v3 = vrot.slane %v1126_v51, 4  ;;  %v13564_v4 = vperm.slane %v2104_v47, %v13413_v9  ;;  %v13567_v52 = vperm.slane %v2124_v35, %v13406_v63  ;;  %v13579_v23 = vpop.permute.xlu0 %1891 }
 0x2ad   : > { %v1118_v7 = vpack.i.b16 %v1117_v58, %v1116_v61  ;;  %v1193_v5 = vsel %vm960_vm7, %v1192_v62, %v1106_v30  ;;  %v1199_v8 = vsel %vm960_vm7, %v1198_v0, %v1114_v60  ;;  %v2131_v10 = vrot.slane %v13544_v34, 4 }
 0x2ae   : > { %v1197_v11 = vperm.slane %v1193_v5, %v13406_v63  ;;  %v1203_v12 = vperm.slane %v1199_v8, %v13406_v63  ;;  %v1221_v14 = vsel %vm960_vm7, %v1220_v3, %v1110_v57  ;;  %v1226_v15 = vrot.slane %v1134_v2, 4  ;;  %v13585_v22 = vpop.permute.xlu2 %1906 }
 0x2af   : > { %v1225_v18 = vperm.slane %v1221_v14, %v13406_v63  ;;  %v2132_v19 = vsel %vm960_vm7, %v13567_v52, %v2131_v10  ;;  %v1969_v21 = vrot.slane %v13550_v41, 4  ;;  %v13589_v35 = vsel %vm2265_vm9, %v2255_v17, 0  ;;  %v2251_v17 = vld [vmem:[#allocation2 + $0x8] sm:$0xf] }
 0x2b0   : > { %v1204_v24 = vrot.slane %v1203_v12, 4  ;;  %v1206_v25 = vrot.slane %v1197_v11, 4  ;;  %v1227_v26 = vsel %vm960_vm7, %v1226_v15, %v1118_v7  ;;  %v13583_v27 = vperm.slane %v2132_v19, %v13413_v9 }
 0x2b1   : > { %v1231_v31 = vperm.slane %v1227_v26, %v13406_v63  ;;  %v1234_v33 = vrot.slane %v1225_v18, 4  ;;  %v2115_v39 = vrot.slane %v13564_v4, 4  ;;  %v1970_v32 = vsel %vm960_vm7, %v1969_v21, %v13536_v28 }
 0x2b2   : > { %v1205_v36 = vsel %vm960_vm7, %v1204_v24, %v1197_v11  ;;  %v1207_v38 = vsel %vm960_vm7, %v1203_v12, %v1206_v25  ;;  %v2215_v40 = vpack.i.b16 %v13583_v27, %v13564_v4  ;;  %v1997_v46 = vrot.slane %v13553_v44, 4 }
 0x2b3   : > { %v1211_v41 = vperm.slane %v1205_v36, %v13413_v9  ;;  %v1215_v16 = vperm.slane %v1207_v38, %v13413_v9  ;;  %v1232_v42 = vrot.slane %v1231_v31, 4  ;;  %v1235_v37 = vsel %vm960_vm7, %v1231_v31, %v1234_v33 }
 0x2b4   : > { %v13599_v43 = vpop.permute.xlu1 %1339  ;;  %v1243_v45 = vperm.slane %v1235_v37, %v13413_v9  ;;  %9219 = vmatmul.msk.bf16.vlgmr.msrb.gmra.mxu2 %vm2265_vm9, %v2215_v40  ;;  %v2101_v47 = vrot.slane %v13539_v29, 4  ;;  %v2129_v49 = vrot.slane %v13567_v52, 4  ;;  %v1895_v3 = vpop.permute.xlu0 %1894  ;;  %v2143_v21 = vrot.slane %v13583_v27, 4 }
 0x2b5   : > { %v1216_v20 = vrot.slane %v1211_v41, 4  ;;  %v1218_v48 = vrot.slane %v1215_v16, 4  ;;  %v1233_v30 = vsel %vm960_vm7, %v1232_v42, %v1225_v18  ;;  %v1284_v53 = vshrl.u32 %v1211_v41, 16 }
 0x2b6   : > { %v1239_v50 = vperm.slane %v1233_v30, %v13413_v9  ;;  %v1246_v51 = vrot.slane %v1243_v45, 4  ;;  %v1298_v54 = vpack.i.b16 %v1243_v45, %v1215_v16  ;;  %v1300_v28 = vshrl.u32 %v1215_v16, 16  ;;  %v1898_v10 = vpop.permute.xlu2 %1897 }
 0x2b7   : > { %v1217_v55 = vsel %vm960_vm7, 0, %v1216_v20  ;;  %v1219_v57 = vsel %vm960_vm7, 0, %v1218_v48  ;;  %v1301_v58 = vshrl.u32 %v1243_v45, 16  ;;  %v2102_v8 = vsel %vm960_vm7, %v2101_v47, %v13522_v6 }
 0x2b8   : > { %v1244_v44 = vrot.slane %v1239_v50, 4  ;;  %v1247_v29 = vsel %vm960_vm7, 0, %v1246_v51  ;;  %v1282_v59 = vpack.i.b16 %v1239_v50, %v1211_v41  ;;  %v1285_v60 = vshrl.u32 %v1239_v50, 16  ;;  %1325 = vst.msk [vmem:[#allocation2 + $0x30] sm:$0xf] %vm1312_vm8, %v1298_v54 }
 0x2b9   : > { %v1292_v61 = vshrl.u32 %v1217_v55, 16  ;;  %v1302_v62 = vpack.i.b16 %v1301_v58, %v1300_v28  ;;  %v1306_v0 = vpack.i.b16 %v1247_v29, %v1219_v57  ;;  %v1308_v2 = vshrl.u32 %v1219_v57, 16 }
 0x2ba   : > { %v1245_v52 = vsel %vm960_vm7, 0, %v1244_v44  ;;  %v1286_v7 = vpack.i.b16 %v1285_v60, %v1284_v53  ;;  %v1309_v5 = vshrl.u32 %v1247_v29, 16  ;;  %1321 = vst.msk [vmem:[#allocation2 + $0x20] sm:$0xf] %vm1312_vm8, %v1282_v59  ;;  %v2108_v14 = vperm.slane %v2102_v8, %v13413_v9 }
 0x2bb   : > { %v1290_v11 = vpack.i.b16 %v1245_v52, %v1217_v55  ;;  %v1293_v12 = vshrl.u32 %v1245_v52, 16  ;;  %1326 = vst.msk [vmem:[#allocation2 + $0x34] sm:$0xf] %vm1312_vm8, %v1302_v62  ;;  %v2130_v15 = vsel %vm960_vm7, %v2129_v49, %v13544_v34  ;;  %v1974_v6 = vperm.slane %v1970_v32, %v13406_v63 }
 0x2bc   : > { %v13622_v18 = vpop.permute.xlu1 %1345  ;;  %v1310_v19 = vpack.i.b16 %v1309_v5, %v1308_v2  ;;  %1322 = vst.msk [vmem:[#allocation2 + $0x24] sm:$0xf] %vm1312_vm8, %v1286_v7  ;;  %v2136_v24 = vperm.slane %v2130_v15, %v13413_v9  ;;  %v2113_v26 = vrot.slane %v2108_v14, 4  ;;  %v1998_v31 = vsel %vm960_vm7, %v1997_v46, %v13579_v23  ;;  %v13661_v54 = vpop.permute.xlu0 %1342 }
 0x2bd   : > { %v1294_v25 = vpack.i.b16 %v1293_v12, %v1292_v61  ;;  %1323 = vst.msk [vmem:[#allocation2 + $0x28] sm:$0xf] %vm1312_vm8, %v1290_v11  ;;  %v1975_v34 = vrot.slane %v13585_v22, 4  ;;  %v2308_v36 = vsel %vm2265_vm9, %v2251_v17, 0  ;;  %v1375_v40 = vrot.slane %v13599_v43, 4 }
 0x2be   : > { %1327 = vst.msk [vmem:[#allocation2 + $0x38] sm:$0xf] %vm1312_vm8, %v1306_v0  ;;  %v2203_v33 = vpack.i.b16 %v2136_v24, %v2108_v14  ;;  %v2141_v38 = vrot.slane %v2136_v24, 4  ;;  %v13637_v41 = vsel %vm960_vm7, 0, %v2113_v26  ;;  %v2002_v16 = vperm.slane %v1998_v31, %v13406_v63  ;;  %v1331_v44 = vpop.permute.xlu2 %1330 }
 0x2bf   : > { %1324 = vst.msk [vmem:[#allocation2 + $0x2c] sm:$0xf] %vm1312_vm8, %v1294_v25  ;;  %v2217_v42 = vshrl.u32 %v13583_v27, 16  ;;  %v1976_v23 = vsel %vm960_vm7, %v1975_v34, %v1895_v3  ;;  %v2003_v37 = vrot.slane %v13561_v1, 4  ;;  %v1376_v43 = vsel %vm960_vm7, %v1375_v40, %v13374_v56 }
 0x2c0   : > { %1328 = vst.msk [vmem:[#allocation2 + $0x3c] sm:$0xf] %vm1312_vm8, %v1310_v19  ;;  %9215 = vmatmul.msk.bf16.vlgmr.msra.gmra.mxu3 %vm2265_vm9, %v2203_v33  ;;  %v13645_v22 = vsel %vm960_vm7, 0, %v2141_v38  ;;  %v2216_v45 = vshrl.u32 %v13564_v4, 16  ;;  %v1983_v32 = vrot.slane %v1974_v6, 4  ;;  %v2210_v27 = vshrl.u32 %v13637_v41, 16 }
 0x2c1   : > { %2317 = vmatpush.bf16.xpose.msra.mxu3 %v2308_v36  ;;  %v2211_v46 = vshrl.u32 %v13645_v22, 16  ;;  %v13654_v47 = vperm.slane %v1376_v43, %v13406_v63  ;;  %v1980_v48 = vperm.slane %v1976_v23, %v13406_v63  ;;  %v2004_v30 = vsel %vm960_vm7, %v2003_v37, %v1898_v10  ;;  %v2257_v36 = vld [vmem:[#allocation2 + $0x20] sm:$0xf] }
 0x2c2   : > { %v2218_v20 = vpack.i.b16 %v2217_v42, %v2216_v45  ;;  %v2205_v1 = vshrl.u32 %v2136_v24, 16  ;;  %v2209_v49 = vpack.i.b16 %v13645_v22, %v13637_v41  ;;  %v2011_v51 = vrot.slane %v2002_v16, 4 }
 0x2c3   : > { %v2212_v50 = vpack.i.b16 %v2211_v46, %v2210_v27  ;;  %v2008_v53 = vperm.slane %v2004_v30, %v13406_v63  ;;  %v1981_v55 = vrot.slane %v1980_v48, 4  ;;  %v1984_v57 = vsel %vm960_vm7, %v1980_v48, %v1983_v32  ;;  %v2258_v23 = vld [vmem:[#allocation2 + $0x24] sm:$0xf]  ;;  %v2261_v27 = vld [vmem:[#allocation2 + $0x30] sm:$0xf] }
 0x2c4   : > { %9220 = vmatmul.msk.bf16.vlgmr.msra.gmra.mxu2 %vm2265_vm9, %v2218_v20  ;;  %v2204_v28 = vshrl.u32 %v2108_v14, 16  ;;  %v13668_v58 = vsel %vm960_vm7, 0, %v2115_v39  ;;  %v1389_v29 = vrot.slane %v13654_v47, 4  ;;  %v1992_v59 = vperm.slane %v1984_v57, %v13413_v9  ;;  %v13674_v62 = vpop.permute.xlu1 %1336  ;;  %v1349_v46 = vpop.permute.xlu0 %1348 }
 0x2c5   : > { %9218 = vmatmul.msk.bf16.vlgmr.msrb.gmra.mxu0 %vm2265_vm9, %v2212_v50  ;;  %v2009_v60 = vrot.slane %v2008_v53, 4  ;;  %v2012_v61 = vsel %vm960_vm7, %v2008_v53, %v2011_v51  ;;  %v1982_v0 = vsel %vm960_vm7, %v1981_v55, %v1974_v6  ;;  %v13679_v39 = vsel %vm960_vm7, 0, %v2143_v21  ;;  %v2262_v50 = vld [vmem:[#allocation2 + $0x34] sm:$0xf] }
 0x2c6   : > { %v2020_v2 = vperm.slane %v2012_v61, %v13413_v9  ;;  %v2206_v4 = vpack.i.b16 %v2205_v1, %v2204_v28  ;;  %v1988_v3 = vperm.slane %v1982_v0, %v13413_v9  ;;  %v1995_v52 = vrot.slane %v1992_v59, 4  ;;  %v1334_v51 = vpop.permute.xlu2 %1333  ;;  %v2260_v53 = vld [vmem:[#allocation2 + $0x2c] sm:$0xf] }
 0x2c7   : > { %v2010_v7 = vsel %vm960_vm7, %v2009_v60, %v2002_v16  ;;  %v2222_v5 = vshrl.u32 %v13668_v58, 16  ;;  %v2077_v17 = vshrl.u32 %v1992_v59, 16  ;;  %v2223_v19 = vshrl.u32 %v13679_v39, 16  ;;  %v2259_v60 = vld [vmem:[#allocation2 + $0x28] sm:$0xf] }
 0x2c8   : > { %v2016_v8 = vperm.slane %v2010_v7, %v13413_v9  ;;  %v2023_v10 = vrot.slane %v2020_v2, 4  ;;  %v2075_v11 = vpack.i.b16 %v2020_v2, %v1992_v59  ;;  %v2078_v12 = vshrl.u32 %v2020_v2, 16 }
 0x2c9   : > { %v1993_v14 = vrot.slane %v1988_v3, 4  ;;  %v1996_v15 = vsel %vm960_vm7, 0, %v1995_v52  ;;  %v2061_v21 = vshrl.u32 %v1988_v3, 16  ;;  %v2224_v45 = vpack.i.b16 %v2223_v19, %v2222_v5 }
 0x2ca   : > { %v2085_v6 = vshrl.u32 %v1996_v15, 16  ;;  %v2021_v24 = vrot.slane %v2016_v8, 4  ;;  %v2024_v25 = vsel %vm960_vm7, 0, %v2023_v10  ;;  %v2059_v31 = vpack.i.b16 %v2016_v8, %v1988_v3  ;;  %v2264_v3 = vld [vmem:[#allocation2 + $0x3c] sm:$0xf] }
 0x2cb   : > { %v1994_v26 = vsel %vm960_vm7, 0, %v1993_v14  ;;  %v2062_v34 = vshrl.u32 %v2016_v8, 16  ;;  %v2083_v33 = vpack.i.b16 %v2024_v25, %v1996_v15  ;;  %v2079_v40 = vpack.i.b16 %v2078_v12, %v2077_v17 }
 0x2cc   : > { %v2022_v38 = vsel %vm960_vm7, 0, %v2021_v24  ;;  %v2086_v16 = vshrl.u32 %v2024_v25, 16  ;;  %v2145_v42 = vrot.slane %v2075_v11, 4  ;;  %v2069_v37 = vshrl.u32 %v1994_v26, 16 }
 0x2cd   : > { %v2070_v43 = vshrl.u32 %v2022_v38, 16  ;;  %v1381_v32 = vrot.slane %v13622_v18, 4  ;;  %v2063_v20 = vpack.i.b16 %v2062_v34, %v2061_v21  ;;  %v2067_v48 = vpack.i.b16 %v2022_v38, %v1994_v26  ;;  %v13697_v18 = vpop.permute.xlu1 %1363 }
 0x2ce   : > { %v13691_v30 = vpack.i.b16 %v2086_v16, %v2085_v6  ;;  %v1403_v1 = vrot.slane %v13661_v54, 4  ;;  %v2146_v55 = vsel %vm960_vm7, %v2145_v42, %v2059_v31  ;;  %v2151_v57 = vrot.slane %v2083_v33, 4 }
 0x2cf   : > { %v2422_v28 = vsel %vm2265_vm9, %v2257_v36, 0  ;;  %v2441_v59 = vsel %vm2265_vm9, %v2258_v23, 0  ;;  %v2173_v61 = vrot.slane %v2079_v40, 4  ;;  %v2498_v54 = vsel %vm2265_vm9, %v2261_v27, 0 }
 0x2d0   : > { %9216 = vmatmul.msk.bf16.vlgmr.msrb.gmra.mxu3 %vm2265_vm9, %v2206_v4  ;;  %v1404_v0 = vsel %vm960_vm7, %v1403_v1, %v1331_v44  ;;  %2431 = vmatpush.bf16.xpose.msrb.mxu1 %v2422_v28  ;;  %v1409_v2 = vrot.slane %v1349_v46, 4  ;;  %v13702_v52 = vpack.i.b16 %v2070_v43, %v2069_v37  ;;  %v1382_v5 = vsel %vm960_vm7, %v1381_v32, %v1334_v51 }
 0x2d1   : > { %2393 = vmatpush.bf16.xpose.msrb.mxu3 %v13589_v35  ;;  %v1408_v7 = vperm.slane %v1404_v0, %v13406_v63  ;;  %v2479_v8 = vsel %vm2265_vm9, %v2260_v53, 0  ;;  %v2179_v4 = vrot.slane %v13691_v30, 4  ;;  %2450 = vmatpush.bf16.xpose.msrb.mxu2 %v2441_v59  ;;  %v2517_v44 = vsel %vm2265_vm9, %v2262_v50, 0 }
 0x2d2   : > { %v1410_v10 = vsel %vm960_vm7, %v1409_v2, %v13674_v62  ;;  %v1386_v11 = vperm.slane %v1382_v5, %v13406_v63  ;;  %2488 = vmatpush.bf16.xpose.msrb.mxu0 %v2479_v8  ;;  %v2460_v14 = vsel %vm2265_vm9, %v2259_v60, 0  ;;  %v2555_v15 = vsel %vm2265_vm9, %v2264_v3, 0 }
 0x2d3   : > { %v1417_v12 = vrot.slane %v1408_v7, 4  ;;  %v1414_v35 = vperm.slane %v1410_v10, %v13406_v63  ;;  %v2152_v21 = vsel %vm960_vm7, %v2151_v57, %v2067_v48  ;;  %v2174_v62 = vsel %vm960_vm7, %v2173_v61, %v2063_v20 }
 0x2d4   : > { %v1387_v17 = vrot.slane %v1386_v11, 4  ;;  %v1390_v19 = vsel %vm960_vm7, %v1386_v11, %v1389_v29  ;;  %v13725_v26 = vperm.slane %v2152_v21, %v13406_v63  ;;  %v13731_v29 = vperm.slane %v2146_v55, %v13406_v63 }
 0x2d5   : > { %9222 = vmatmul.msk.bf16.vlgmr.msra.gmra.mxu0 %vm2265_vm9, %v2224_v45  ;;  %v1415_v6 = vrot.slane %v1414_v35, 4  ;;  %v1418_v24 = vsel %vm960_vm7, %v1414_v35, %v1417_v12  ;;  %v1398_v25 = vperm.slane %v1390_v19, %v13413_v9  ;;  %v13734_v33 = vperm.slane %v2174_v62, %v13406_v63  ;;  %v13741_v46 = vpop.permute.xlu1 %1366 }
 0x2d6   : > { %v1426_v31 = vperm.slane %v1418_v24, %v13413_v9  ;;  %v1388_v34 = vsel %vm960_vm7, %v1387_v17, %v13654_v47  ;;  %v2157_v27 = vrot.slane %v13725_v26, 4  ;;  %v2180_v8 = vsel %vm960_vm7, %v2179_v4, %v13702_v52 }
 0x2d7   : > { %v1416_v36 = vsel %vm960_vm7, %v1415_v6, %v1408_v7  ;;  %v1394_v38 = vperm.slane %v1388_v34, %v13413_v9  ;;  %v1401_v40 = vrot.slane %v1398_v25, 4  ;;  %v1507_v16 = vshrl.u32 %v1398_v25, 16 }
 0x2d8   : > { %2507 = vmatpush.bf16.xpose.msra.mxu1 %v2498_v54  ;;  %v1422_v42 = vperm.slane %v1416_v36, %v13413_v9  ;;  %v1429_v23 = vrot.slane %v1426_v31, 4  ;;  %v1508_v37 = vshrl.u32 %v1426_v31, 16  ;;  %v1505_v43 = vpack.i.b16 %v1426_v31, %v1398_v25 }
 0x2d9   : > { %2526 = vmatpush.bf16.xpose.msra.mxu2 %v2517_v44  ;;  %v1399_v45 = vrot.slane %v1394_v38, 4  ;;  %v1402_v47 = vsel %vm960_vm7, 0, %v1401_v40  ;;  %v1491_v32 = vshrl.u32 %v1394_v38, 16  ;;  %v2158_v5 = vsel %vm960_vm7, %v2157_v27, %v13731_v29 }
 0x2da   : > { %2564 = vmatpush.bf16.xpose.msra.mxu0 %v2555_v15  ;;  %v1427_v20 = vrot.slane %v1422_v42, 4  ;;  %v1492_v48 = vshrl.u32 %v1422_v42, 16  ;;  %v1430_v30 = vsel %vm960_vm7, 0, %v1429_v23  ;;  %v1489_v1 = vpack.i.b16 %v1422_v42, %v1394_v38 }
 0x2db   : > { %v1400_v50 = vsel %vm960_vm7, 0, %v1399_v45  ;;  %v1509_v51 = vpack.i.b16 %v1508_v37, %v1507_v16  ;;  %v1513_v53 = vpack.i.b16 %v1430_v30, %v1402_v47  ;;  %v1515_v55 = vshrl.u32 %v1402_v47, 16 }
 0x2dc   : > { %v1428_v57 = vsel %vm960_vm7, 0, %v1427_v20  ;;  %v1493_v28 = vpack.i.b16 %v1492_v48, %v1491_v32  ;;  %v1499_v59 = vshrl.u32 %v1400_v50, 16  ;;  %v1516_v60 = vshrl.u32 %v1430_v30, 16 }
 0x2dd   : > { %v1497_v61 = vpack.i.b16 %v1428_v57, %v1400_v50  ;;  %v1500_v0 = vshrl.u32 %v1428_v57, 16  ;;  %v1551_v54 = vrot.slane %v1505_v43, 4  ;;  %v1557_v2 = vrot.slane %v1513_v53, 4 }
 0x2de   : > { %v1517_v3 = vpack.i.b16 %v1516_v60, %v1515_v55  ;;  %v1579_v7 = vrot.slane %v1509_v51, 4  ;;  %v13753_v12 = vperm.slane %v2158_v5, %v13413_v9  ;;  %v1431_v4 = vrot.slane %v13697_v18, 4 }
 0x2df   : > { %v1501_v44 = vpack.i.b16 %v1500_v0, %v1499_v59  ;;  %v1552_v10 = vsel %vm960_vm7, %v1551_v54, %v1489_v1  ;;  %v1558_v11 = vsel %vm960_vm7, %v1557_v2, %v1497_v61  ;;  %v13765_v21 = vperm.slane %v2180_v8, %v13406_v63 }
 0x2e0   : > { %v1556_v35 = vperm.slane %v1552_v10, %v13406_v63  ;;  %v1562_v15 = vperm.slane %v1558_v11, %v13406_v63  ;;  %v1580_v17 = vsel %vm960_vm7, %v1579_v7, %v1493_v28  ;;  %v1585_v19 = vrot.slane %v1517_v3, 4  ;;  %9217 = vmatmul.msk.bf16.vlgmr.msra.gmra.mxu3 %vm2265_vm9, %v2209_v49  ;;  %v1352_v49 = vpop.permute.xlu1 %1351 }
 0x2e1   : > { %v1584_v52 = vperm.slane %v1580_v17, %v13406_v63  ;;  %2469 = vmatpush.bf16.xpose.msra.mxu3 %v2460_v14  ;;  %v2169_v25 = vrot.slane %v13753_v12, 4  ;;  %v2159_v41 = vrot.slane %v13731_v29, 4  ;;  %v2185_v22 = vrot.slane %v13765_v21, 4 }
 0x2e2   : > { %v1563_v62 = vrot.slane %v1562_v15, 4  ;;  %v1565_v6 = vrot.slane %v1556_v35, 4  ;;  %v1586_v24 = vsel %vm960_vm7, %v1585_v19, %v1501_v44  ;;  %v2187_v36 = vrot.slane %v13734_v33, 4 }
 0x2e3   : > { %v1590_v31 = vperm.slane %v1586_v24, %v13406_v63  ;;  %v1593_v34 = vrot.slane %v1584_v52, 4  ;;  %v2228_v38 = vshrl.u32 %v13753_v12, 16  ;;  %v2186_v43 = vsel %vm960_vm7, %v2185_v22, %v13734_v33 }
 0x2e4   : > { %v1564_v14 = vsel %vm960_vm7, %v1563_v62, %v1556_v35  ;;  %v1566_v18 = vsel %vm960_vm7, %v1562_v15, %v1565_v6  ;;  %v1459_v45 = vrot.slane %v13741_v46, 4  ;;  %v13784_v47 = vsel %vm960_vm7, 0, %v2169_v25  ;;  %v2263_v15 = vld [vmem:[#allocation2 + $0x38] sm:$0xf] }
 0x2e5   : > { %v1570_v40 = vperm.slane %v1564_v14, %v13413_v9  ;;  %v1574_v16 = vperm.slane %v1566_v18, %v13413_v9  ;;  %v1591_v42 = vrot.slane %v1590_v31, 4  ;;  %v1594_v23 = vsel %vm960_vm7, %v1590_v31, %v1593_v34 }
 0x2e6   : > { %v1602_v37 = vperm.slane %v1594_v23, %v13413_v9  ;;  %v2192_v46 = vperm.slane %v2186_v43, %v13413_v9  ;;  %v2221_v62 = vpack.i.b16 %v13679_v39, %v13668_v58  ;;  %v13802_v6 = vsel %vm960_vm7, %v1431_v4, %v1352_v49 }
 0x2e7   : > { %v1575_v32 = vrot.slane %v1570_v40, 4  ;;  %v1577_v27 = vrot.slane %v1574_v16, 4  ;;  %v1592_v20 = vsel %vm960_vm7, %v1591_v42, %v1584_v52  ;;  %v1667_v48 = vshrl.u32 %v1570_v40, 16 }
 0x2e8   : > { %v1598_v30 = vperm.slane %v1592_v20, %v13413_v9  ;;  %v1605_v1 = vrot.slane %v1602_v37, 4  ;;  %v1681_v50 = vpack.i.b16 %v1602_v37, %v1574_v16  ;;  %v1683_v51 = vshrl.u32 %v1574_v16, 16  ;;  %v1355_v17 = vpop.permute.xlu1 %1354 }
 0x2e9   : > { %v1576_v53 = vsel %vm960_vm7, 0, %v1575_v32  ;;  %v1578_v55 = vsel %vm960_vm7, 0, %v1577_v27  ;;  %v1684_v33 = vshrl.u32 %v1602_v37, 16  ;;  %v2197_v8 = vrot.slane %v2192_v46, 4 }
 0x2ea   : > { %v1603_v57 = vrot.slane %v1598_v30, 4  ;;  %v1606_v28 = vsel %vm960_vm7, 0, %v1605_v1  ;;  %v1665_v59 = vpack.i.b16 %v1598_v30, %v1570_v40  ;;  %v1668_v60 = vshrl.u32 %v1598_v30, 16  ;;  %1731 = vst.msk [vmem:[#allocation3 + $0x10] sm:$0xf] %vm1312_vm8, %v1681_v50 }
 0x2eb   : > { %v1675_v61 = vshrl.u32 %v1576_v53, 16  ;;  %v1685_v0 = vpack.i.b16 %v1684_v33, %v1683_v51  ;;  %v1689_v54 = vpack.i.b16 %v1606_v28, %v1578_v55  ;;  %v1691_v2 = vshrl.u32 %v1578_v55, 16 }
 0x2ec   : > { %v1604_v3 = vsel %vm960_vm7, 0, %v1603_v57  ;;  %v1669_v7 = vpack.i.b16 %v1668_v60, %v1667_v48  ;;  %v1692_v5 = vshrl.u32 %v1606_v28, 16  ;;  %1727 = vst.msk [vmem:[#allocation3] sm:$0xf] %vm1312_vm8, %v1665_v59  ;;  %v2227_v11 = vpack.i.b16 %v2192_v46, %v13753_v12 }
 0x2ed   : > { %v1673_v44 = vpack.i.b16 %v1604_v3, %v1576_v53  ;;  %v1676_v10 = vshrl.u32 %v1604_v3, 16  ;;  %1732 = vst.msk [vmem:[#allocation3 + $0x14] sm:$0xf] %vm1312_vm8, %v1685_v0  ;;  %v2229_v35 = vshrl.u32 %v2192_v46, 16  ;;  %v2198_v52 = vsel %vm960_vm7, 0, %v2197_v8 }
 0x2ee   : > { %v1693_v19 = vpack.i.b16 %v1692_v5, %v1691_v2  ;;  %1728 = vst.msk [vmem:[#allocation3 + $0x4] sm:$0xf] %vm1312_vm8, %v1669_v7  ;;  %9223 = vmatmul.msk.bf16.vlgmr.msrb.gmra.mxu1 %vm2265_vm9, %v2227_v11  ;;  %v2234_v25 = vshrl.u32 %v13784_v47, 16  ;;  %v2235_v31 = vshrl.u32 %v2198_v52, 16  ;;  %v2536_v34 = vsel %vm2265_vm9, %v2263_v15, 0 }
 0x2ef   : > { %v1677_v24 = vpack.i.b16 %v1676_v10, %v1675_v61  ;;  %1729 = vst.msk [vmem:[#allocation3 + $0x8] sm:$0xf] %vm1312_vm8, %v1673_v44  ;;  %v2230_v12 = vpack.i.b16 %v2229_v35, %v2228_v38  ;;  %v2188_v58 = vsel %vm960_vm7, %v13765_v21, %v2187_v36  ;;  %v13813_v39 = vsel %vm960_vm7, %v1459_v45, %v1355_v17 }
 0x2f0   : > { %1733 = vst.msk [vmem:[#allocation3 + $0x18] sm:$0xf] %vm1312_vm8, %v1689_v54  ;;  %9221 = vmatmul.msk.bf16.vlgmr.msrb.gmra.mxu3 %vm2265_vm9, %v2221_v62  ;;  %v2236_v4 = vpack.i.b16 %v2235_v31, %v2234_v25  ;;  %v2160_v22 = vsel %vm960_vm7, %v13725_v26, %v2159_v41  ;;  %v2196_v49 = vperm.slane %v2188_v58, %v13413_v9 }
 0x2f1   : > { %1730 = vst.msk [vmem:[#allocation3 + $0xc] sm:$0xf] %vm1312_vm8, %v1677_v24  ;;  %9224 = vmatmul.msk.bf16.vlgmr.msrb.gmra.mxu2 %vm2265_vm9, %v2230_v12  ;;  %2545 = vmatpush.bf16.xpose.msrb.mxu3 %v2536_v34  ;;  %v2168_v14 = vperm.slane %v2160_v22, %v13413_v9  ;;  %v2734_v43 = vld [vmem:[#allocation3 + $0x10] sm:$0xf]  ;;  %v2233_v20 = vpack.i.b16 %v2198_v52, %v13784_v47 }
 0x2f2   : > { %1734 = vst.msk [vmem:[#allocation3 + $0x1c] sm:$0xf] %vm1312_vm8, %v1693_v19  ;;  %9226 = vmatmul.msk.bf16.vlgmr.msrb.gmra.mxu0 %vm2265_vm9, %v2236_v4  ;;  %v2199_v38 = vrot.slane %v2196_v49, 4  ;;  %v2241_v42 = vshrl.u32 %v2196_v49, 16  ;;  %v2827_v51 = vsel %vm2749_vm10, %v2734_v43, 0 }
 0x2f3   : > { %v2730_v21 = vld [vmem:[#allocation3] sm:$0xf]  ;;  %v2171_v40 = vrot.slane %v2168_v14, 4  ;;  %v2239_v45 = vpack.i.b16 %v2196_v49, %v2168_v14  ;;  %v2240_v32 = vshrl.u32 %v2168_v14, 16 }
 0x2f4   : > { %v2751_v18 = vsel %vm2749_vm10, %v2730_v21, 0  ;;  %v2200_v16 = vsel %vm960_vm7, 0, %v2199_v38  ;;  %v2735_v30 = vld [vmem:[#allocation3 + $0x14] sm:$0xf] }
 0x2f5   : > { %2760 = vmatpush.bf16.msrb.mxu1 %v2751_v18  ;;  %v2731_v36 = vld [vmem:[#allocation3 + $0x4] sm:$0xf]  ;;  %v2172_v37 = vsel %vm960_vm7, 0, %v2171_v40  ;;  %v2247_v27 = vshrl.u32 %v2200_v16, 16  ;;  %v2242_v1 = vpack.i.b16 %v2241_v42, %v2240_v32  ;;  %v2846_v33 = vsel %vm2749_vm10, %v2735_v30, 0 }
 0x2f6   : > { %v2770_v29 = vsel %vm2749_vm10, %v2731_v36, 0  ;;  %v2732_v23 = vld [vmem:[#allocation3 + $0x8] sm:$0xf]  ;;  %v2246_v50 = vshrl.u32 %v2172_v37, 16  ;;  %v2245_v57 = vpack.i.b16 %v2200_v16, %v2172_v37 }
 0x2f7   : > { %2779 = vmatpush.bf16.msrb.mxu2 %v2770_v29  ;;  %v2789_v48 = vsel %vm2749_vm10, %v2732_v23, 0  ;;  %v2736_v46 = vld [vmem:[#allocation3 + $0x18] sm:$0xf] }
 0x2f8   : > { %v2733_v26 = vld [vmem:[#allocation3 + $0xc] sm:$0xf]  ;;  %v2248_v55 = vpack.i.b16 %v2247_v27, %v2246_v50  ;;  %v2865_v28 = vsel %vm2749_vm10, %v2736_v46, 0 }
 0x2f9   : > { %v2808_v41 = vsel %vm2749_vm10, %v2733_v26, 0  ;;  %v2737_v53 = vld [vmem:[#allocation3 + $0x1c] sm:$0xf] }
 0x2fa   : > { %2817 = vmatpush.bf16.msrb.mxu0 %v2808_v41  ;;  %v2884_v47 = vsel %vm2749_vm10, %v2737_v53, 0  ;;  %v1358_v53 = vpop.permute.xlu2 %1357 }
 0x2fe   : > { %9227 = vmatmul.msk.bf16.vlgmr.msra.gmra.mxu1 %vm2265_vm9, %v2239_v45 }
 0x2ff   : > { %2836 = vmatpush.bf16.msra.mxu1 %v2827_v51 }
 0x300   : > { %9225 = vmatmul.msk.bf16.vlgmr.msra.gmra.mxu3 %vm2265_vm9, %v2233_v20 }
 0x301   : > { %9228 = vmatmul.msk.bf16.vlgmr.msra.gmra.mxu2 %vm2265_vm9, %v2242_v1  ;;  %2798 = vmatpush.bf16.msra.mxu3 %v2789_v48  ;;  %v1370_v48 = vpop.permute.xlu1 %1369 }
 0x302   : > { %2855 = vmatpush.bf16.msra.mxu2 %v2846_v33  ;;  %9230 = vmatmul.msk.bf16.vlgmr.msra.gmra.mxu0 %vm2265_vm9, %v2248_v55 }
 0x303   : > { %2893 = vmatpush.bf16.msra.mxu0 %v2884_v47 }
 0x310   : > { %9229 = vmatmul.msk.bf16.vlgmr.msrb.gmra.mxu3 %vm2265_vm9, %v2245_v57 }
 0x311   : > { %2874 = vmatpush.bf16.msrb.mxu3 %v2865_v28 }
 0x337   : > { %v13841_v59 = vpop.f32.mrf.mxu2 }
 0x338   : > { %v2582_v35 = vsel %vm2265_vm9, %v13841_v59, -inf }
 0x33f   : > { %v2359_v60 = vpop.f32.mrf.mxu2 }
 0x342   : > { %v13843_v61 = vpop.f32.mrf.mxu0 }
 0x343   : > { %v13845_v0 = vpop.f32.mrf.mxu3  ;;  %v2579_v19 = vsel %vm2265_vm9, %v13843_v61, -inf }
 0x344   : > { %v2570_v54 = vsel %vm2265_vm9, %v13845_v0, -inf }
 0x345   : > { %2571 = vmax.xlane.f32.xlu1 %v2570_v54 }
 0x347   : > { %v13849_v2 = vpop.f32.mrf.mxu2 }
 0x348   : > { %v2585_v7 = vsel %vm2265_vm9, %v13849_v2, -inf }
 0x34a   : > { %v2340_v3 = vpop.f32.mrf.mxu0 }
 0x34b   : > { %v2283_v5 = vpop.f32.mrf.mxu3 }
 0x34d   : > { %2586 = vmax.xlane.f32.xlu1 %v2585_v7 }
 0x34f   : > { %v2378_v8 = vpop.f32.mrf.mxu2 }
 0x352   : > { %v13853_v44 = vpop.f32.mrf.mxu0 }
 0x353   : > { %v13855_v10 = vpop.f32.mrf.mxu3  ;;  %v2591_v52 = vsel %vm2265_vm9, %v13853_v44, -inf }
 0x354   : > { %v2573_v11 = vsel %vm2265_vm9, %v13855_v10, -inf }
 0x355   : > { %2574 = vmax.xlane.f32.xlu2 %v2573_v11  ;;  %2583 = vmax.xlane.f32.xlu1 %v2582_v35 }
 0x35a   : > { %v2416_v15 = vpop.f32.mrf.mxu0 }
 0x35b   : > { %v2302_v17 = vpop.f32.mrf.mxu3 }
 0x35d   : > { %2580 = vmax.xlane.f32.xlu2 %v2579_v19  ;;  %2592 = vmax.xlane.f32.xlu1 %v2591_v52 }
 0x363   : > { %v13865_v62 = vpop.f32.mrf.mxu3 }
 0x364   : > { %v2576_v24 = vsel %vm2265_vm9, %v13865_v62, -inf }
 0x365   : > { %2577 = vmax.xlane.f32.xlu0 %v2576_v24 }
 0x36b   : > { %v2321_v12 = vpop.f32.mrf.mxu3  ;;  %v13869_v25 = vpop.f32.mrf.mxu1 }
 0x36c   : > { %v2594_v20 = vsel %vm2265_vm9, %v13869_v25, -inf }
 0x36f   : > { %v13871_v31 = vpop.f32.mrf.mxu0 }
 0x373   : > { %v13873_v34 = vpop.f32.mrf.mxu3  ;;  %v2435_v58 = vpop.f32.mrf.mxu1 }
 0x374   : > { %v13875_v4 = vpop.f32.mrf.mxu2  ;;  %v2588_v27 = vsel %vm2265_vm9, %v13873_v34, -inf }
 0x375   : > { %v2597_v22 = vsel %vm2265_vm9, %v13875_v4, -inf }
 0x376   : > { %2598 = vmax.xlane.f32.xlu1 %v2597_v22 }
 0x377   : > { %v2492_v49 = vpop.f32.mrf.mxu0 }
 0x379   : > { %1360 = vrot.lane.b32.xlu0 %v13374_v56, %s13005_s3  ;;  %v2603_v56 = vsel %vm2265_vm9, %v13871_v31, -inf }
 0x37b   : > { %v2397_v21 = vpop.f32.mrf.mxu3  ;;  %v13881_v18 = vpop.f32.mrf.mxu1 }
 0x37c   : > { %v2454_v14 = vpop.f32.mrf.mxu2  ;;  %v2606_v37 = vsel %vm2265_vm9, %v13881_v18, -inf }
 0x37f   : > { %v13883_v36 = vpop.f32.mrf.mxu0 }
 0x380   : > { %v2615_v32 = vsel %vm2265_vm9, %v13883_v36, -inf }
 0x383   : > { %v13885_v38 = vpop.f32.mrf.mxu3  ;;  %v2511_v29 = vpop.f32.mrf.mxu1 }
 0x384   : > { %v13887_v40 = vpop.f32.mrf.mxu2  ;;  %v2600_v26 = vsel %vm2265_vm9, %v13885_v38, -inf }
 0x385   : > { %2601 = vmax.xlane.f32.xlu2 %v2600_v26  ;;  %v2609_v30 = vsel %vm2265_vm9, %v13887_v40, -inf }
 0x387   : > { %v2568_v41 = vpop.f32.mrf.mxu0 }
 0x38b   : > { %v2473_v16 = vpop.f32.mrf.mxu3 }
 0x38c   : > { %v2530_v42 = vpop.f32.mrf.mxu2 }
 0x38d   : > { %2604 = vmax.xlane.f32.xlu2 %v2603_v56 }
 0x393   : > { %v13893_v23 = vpop.f32.mrf.mxu3 }
 0x394   : > { %v2612_v43 = vsel %vm2265_vm9, %v13893_v23, -inf }
 0x395   : > { %2607 = vmax.xlane.f32.xlu2 %v2606_v37  ;;  %2613 = vmax.xlane.f32.xlu1 %v2612_v43 }
 0x39b   : > { %v2549_v45 = vpop.f32.mrf.mxu3 }
 0x39d   : > { %2616 = vmax.xlane.f32.xlu1 %v2615_v32 }
 0x3a3   : > { %2589 = vmax.xlane.f32.xlu0 %v2588_v27 }
 0x3ab   : > { %2595 = vmax.xlane.f32.xlu0 %v2594_v20 }
 0x3b3   : > { %2610 = vmax.xlane.f32.xlu0 %v2609_v30 }
 0x3b8   : > { %v2572_v1 = vpop.xlane.xlu1 %2571 }
 0x3b9   : > { %v2618_v50 = vsub.f32 %v13845_v0, %v2572_v1  ;;  %v1373_v0 = vpop.permute.xlu0 %1372 }
 0x3bb   : > { %v2634_v51 = vmul.f32 1.442695, %v2618_v50  ;;  %v1465_v50 = vrot.slane %v1373_v0, 4 }
 0x3bd   : > { %12277 = vpow2.f32 %v2634_v51 }
 0x3c0   : > { %v2587_v55 = vpop.xlane.xlu1 %2586 }
 0x3c1   : > { %v2623_v15 = vsub.f32 %v13849_v2, %v2587_v55 }
 0x3c3   : > { %v13908_v33 = vpop.eup %12277 }
 0x3c4   : > { %v2714_v47 = vpack.c.bf16 %v13908_v33, %v13908_v33 }
 0x3c6   : > { %9231 = vmatmul.msk.bf16.vlgmr.msrb.gmra.mxu1 %vm2265_vm9, %v2714_v47 }
 0x3c8   : > { %v2575_v46 = vpop.xlane.xlu2 %2574  ;;  %v2584_v57 = vpop.xlane.xlu1 %2583 }
 0x3c9   : > { %v2619_v28 = vsub.f32 %v13855_v10, %v2575_v46  ;;  %v2622_v60 = vsub.f32 %v13841_v59, %v2584_v57 }
 0x3cb   : > { %v2636_v54 = vmul.f32 1.442695, %v2619_v28  ;;  %v2642_v3 = vmul.f32 1.442695, %v2622_v60 }
 0x3cd   : > { %12279 = vpow2.f32 %v2636_v54 }
 0x3ce   : > { %12281 = vpow2.f32 %v2642_v3 }
 0x3d0   : > { %v2581_v7 = vpop.xlane.xlu2 %2580  ;;  %v2593_v5 = vpop.xlane.xlu1 %2592 }
 0x3d1   : > { %v2621_v8 = vsub.f32 %v13843_v61, %v2581_v7  ;;  %v2625_v11 = vsub.f32 %v13853_v44, %v2593_v5  ;;  %v1437_v61 = vrot.slane %v1370_v48, 4  ;;  %v2644_v44 = vmul.f32 1.442695, %v2623_v15 }
 0x3d2   : > { %v1464_v48 = vperm.slane %v13813_v39, %v13406_v63 }
 0x3d3   : > { %v13917_v35 = vpop.eup %12279  ;;  %v2640_v17 = vmul.f32 1.442695, %v2621_v8  ;;  %v2648_v19 = vmul.f32 1.442695, %v2625_v11  ;;  %v1438_v22 = vsel %vm960_vm7, %v1437_v61, %v1358_v53 }
 0x3d4   : > { %v12282_v10 = vpop.eup %12281  ;;  %v2715_v59 = vpack.c.bf16 %v13917_v35, %v13917_v35  ;;  %v1442_v41 = vperm.slane %v1438_v22, %v13406_v63  ;;  %v1473_v28 = vrot.slane %v1464_v48, 4 }
 0x3d5   : > { %v2718_v52 = vpack.c.bf16 %v12282_v10, %v12282_v10  ;;  %12283 = vpow2.f32 %v2640_v17  ;;  %v2678_v24 = vsel %vm2265_vm9, %v12282_v10, 0.0 }
 0x3d6   : > { %12285 = vpow2.f32 %v2648_v19  ;;  %9232 = vmatmul.msk.bf16.vlgmr.msrb.gmra.mxu2 %vm2265_vm9, %v2715_v59  ;;  %2679 = vadd.xlane.f32.xlu2 %v2678_v24  ;;  %v1443_v42 = vrot.slane %v1442_v41, 4 }
 0x3d7   : > { %9235 = vmatmul.msk.bf16.vlgmr.msra.gmra.mxu1 %vm2265_vm9, %v2718_v52  ;;  %12287 = vpow2.f32 %v2644_v44 }
 0x3d8   : > { %v2578_v12 = vpop.xlane.xlu0 %2577 }
 0x3d9   : > { %v2620_v2 = vsub.f32 %v13865_v62, %v2578_v12  ;;  %v1436_v62 = vperm.slane %v13802_v6, %v13406_v63 }
 0x3db   : > { %v12284_v58 = vpop.eup %12283  ;;  %v2638_v49 = vmul.f32 1.442695, %v2620_v2  ;;  %v1445_v37 = vrot.slane %v1436_v62, 4  ;;  %v1444_v20 = vsel %vm960_vm7, %v1443_v42, %v1436_v62 }
 0x3dc   : > { %v12286_v21 = vpop.eup %12285  ;;  %v2717_v14 = vpack.c.bf16 %v12284_v58, %v12284_v58  ;;  %v2675_v29 = vsel %vm2265_vm9, %v12284_v58, 0.0  ;;  %v1450_v30 = vperm.slane %v1444_v20, %v13413_v9 }
 0x3dd   : > { %12289 = vpow2.f32 %v2638_v49  ;;  %2676 = vadd.xlane.f32.xlu0 %v2675_v29  ;;  %v2687_v26 = vsel %vm2265_vm9, %v12286_v21, 0.0  ;;  %v12288_v16 = vpop.eup %12287  ;;  %v1446_v27 = vsel %vm960_vm7, %v1442_v41, %v1445_v37  ;;  %v2721_v47 = vpack.c.bf16 %v12286_v21, %v12286_v21 }
 0x3de   : > { %9234 = vmatmul.msk.bf16.vlgmr.msrb.gmra.mxu0 %vm2265_vm9, %v2717_v14  ;;  %2688 = vadd.xlane.f32.xlu2 %v2687_v26  ;;  %v2719_v43 = vpack.c.bf16 %v12288_v16, %v12288_v16  ;;  %v2681_v32 = vsel %vm2265_vm9, %v12288_v16, 0.0  ;;  %v1454_v6 = vperm.slane %v1446_v27, %v13413_v9  ;;  %v1455_v60 = vrot.slane %v1450_v30, 4 }
 0x3df   : > { %v1523_v19 = vshrl.u32 %v1450_v30, 16 }
 0x3e0   : > { %v1457_v55 = vrot.slane %v1454_v6, 4  ;;  %v1456_v7 = vsel %vm960_vm7, 0, %v1455_v60  ;;  %v1539_v10 = vshrl.u32 %v1454_v6, 16 }
 0x3e1   : > { %v1531_v2 = vshrl.u32 %v1456_v7, 16 }
 0x3e2   : > { %v1458_v0 = vsel %vm960_vm7, 0, %v1457_v55 }
 0x3e3   : > { %v13933_v56 = vpop.eup %12289  ;;  %v1547_v59 = vshrl.u32 %v1458_v0, 16 }
 0x3e4   : > { %v2716_v45 = vpack.c.bf16 %v13933_v56, %v13933_v56 }
 0x3e5   : > { %2682 = vadd.xlane.f32.xlu0 %v2681_v32 }
 0x3e6   : > { %9233 = vmatmul.msk.bf16.vlgmr.msra.gmra.mxu3 %vm2265_vm9, %v2716_v45  ;;  %9236 = vmatmul.msk.bf16.vlgmr.msra.gmra.mxu2 %vm2265_vm9, %v2719_v43 }
 0x3e9   : > { %v2599_v1 = vpop.xlane.xlu1 %2598 }
 0x3ea   : > { %v2627_v51 = vsub.f32 %v13875_v4, %v2599_v1 }
 0x3eb   : > { %v1361_v53 = vpop.permute.xlu0 %1360 }
 0x3ec   : > { %v2652_v46 = vmul.f32 1.442695, %v2627_v51  ;;  %v1466_v57 = vsel %vm960_vm7, %v1465_v50, %v1361_v53 }
 0x3ed   : > { %v1470_v54 = vperm.slane %v1466_v57, %v13406_v63 }
 0x3ee   : > { %12291 = vpow2.f32 %v2652_v46  ;;  %9238 = vmatmul.msk.bf16.vlgmr.msra.gmra.mxu0 %vm2265_vm9, %v2721_v47 }
 0x3ef   : > { %v1471_v39 = vrot.slane %v1470_v54, 4  ;;  %v1474_v3 = vsel %vm960_vm7, %v1470_v54, %v1473_v28 }
 0x3f0   : > { %v1482_v4 = vperm.slane %v1474_v3, %v13413_v9 }
 0x3f1   : > { %v1472_v5 = vsel %vm960_vm7, %v1471_v39, %v1464_v48 }
 0x3f2   : > { %v1478_v8 = vperm.slane %v1472_v5, %v13413_v9  ;;  %v1485_v11 = vrot.slane %v1482_v4, 4  ;;  %v1537_v15 = vpack.i.b16 %v1482_v4, %v1454_v6  ;;  %v1540_v17 = vshrl.u32 %v1482_v4, 16 }
 0x3f4   : > { %v13956_v52 = vpop.eup %12291  ;;  %v1483_v24 = vrot.slane %v1478_v8, 4  ;;  %v1486_v61 = vsel %vm960_vm7, 0, %v1485_v11  ;;  %v1521_v44 = vpack.i.b16 %v1478_v8, %v1450_v30  ;;  %v1524_v12 = vshrl.u32 %v1478_v8, 16 }
 0x3f5   : > { %v1541_v58 = vpack.i.b16 %v1540_v17, %v1539_v10  ;;  %v1545_v22 = vpack.i.b16 %v1486_v61, %v1458_v0  ;;  %v1548_v49 = vshrl.u32 %v1486_v61, 16  ;;  %v1607_v29 = vrot.slane %v1537_v15, 4 }
 0x3f6   : > { %v1484_v21 = vsel %vm960_vm7, 0, %v1483_v24  ;;  %v1525_v14 = vpack.i.b16 %v1524_v12, %v1523_v19  ;;  %v2693_v26 = vsel %vm2265_vm9, %v13956_v52, 0.0 }
 0x3f7   : > { %v1529_v41 = vpack.i.b16 %v1484_v21, %v1456_v7  ;;  %v1532_v62 = vshrl.u32 %v1484_v21, 16  ;;  %v1549_v16 = vpack.i.b16 %v1548_v49, %v1547_v59  ;;  %v1613_v42 = vrot.slane %v1545_v22, 4  ;;  %2694 = vadd.xlane.f32.xlu2 %v2693_v26 }
 0x3f8   : > { %v1608_v37 = vsel %vm960_vm7, %v1607_v29, %v1521_v44  ;;  %v1635_v43 = vrot.slane %v1541_v58, 4  ;;  %v13963_v45 = vpop.xlane.xlu2 %2601 }
 0x3f9   : > { %v1533_v32 = vpack.i.b16 %v1532_v62, %v1531_v2  ;;  %v1612_v27 = vperm.slane %v1608_v37, %v13406_v63  ;;  %v1614_v20 = vsel %vm960_vm7, %v1613_v42, %v1529_v41  ;;  %v1641_v6 = vrot.slane %v1549_v16, 4 }
 0x3fa   : > { %v1618_v48 = vperm.slane %v1614_v20, %v13406_v63  ;;  %v1636_v30 = vsel %vm960_vm7, %v1635_v43, %v1525_v14 }
 0x3fb   : > { %v1621_v1 = vrot.slane %v1612_v27, 4  ;;  %v1640_v50 = vperm.slane %v1636_v30, %v13406_v63  ;;  %v1642_v51 = vsel %vm960_vm7, %v1641_v6, %v1533_v32  ;;  %v2628_v30 = vsub.f32 %v13885_v38, %v13963_v45 }
 0x3fc   : > { %v1619_v53 = vrot.slane %v1618_v48, 4  ;;  %v1646_v55 = vperm.slane %v1642_v51, %v13406_v63  ;;  %v2723_v38 = vpack.c.bf16 %v13956_v52, %v13956_v52 }
 0x3fd   : > { %v1622_v47 = vsel %vm960_vm7, %v1618_v48, %v1621_v1  ;;  %v1649_v46 = vrot.slane %v1640_v50, 4 }
 0x3fe   : > { %v1620_v57 = vsel %vm960_vm7, %v1619_v53, %v1612_v27  ;;  %v1630_v28 = vperm.slane %v1622_v47, %v13413_v9  ;;  %v1647_v60 = vrot.slane %v1646_v55, 4 }
 0x3ff   : > { %v1626_v54 = vperm.slane %v1620_v57, %v13413_v9  ;;  %v1650_v39 = vsel %vm960_vm7, %v1646_v55, %v1649_v46 }
 0x400   : > { %v1633_v3 = vrot.slane %v1630_v28, 4  ;;  %v1648_v0 = vsel %vm960_vm7, %v1647_v60, %v1640_v50  ;;  %v1658_v4 = vperm.slane %v1650_v39, %v13413_v9  ;;  %v1715_v7 = vshrl.u32 %v1630_v28, 16  ;;  %v2605_v5 = vpop.xlane.xlu2 %2604 }
 0x401   : > { %v1631_v8 = vrot.slane %v1626_v54, 4  ;;  %v1654_v11 = vperm.slane %v1648_v0, %v13413_v9  ;;  %v1699_v15 = vshrl.u32 %v1626_v54, 16  ;;  %v2629_v17 = vsub.f32 %v13871_v31, %v2605_v5 }
 0x402   : > { %v1634_v19 = vsel %vm960_vm7, 0, %v1633_v3  ;;  %v1661_v10 = vrot.slane %v1658_v4, 4  ;;  %v1713_v59 = vpack.i.b16 %v1658_v4, %v1630_v28  ;;  %v1716_v24 = vshrl.u32 %v1658_v4, 16 }
 0x403   : > { %v1632_v61 = vsel %vm960_vm7, 0, %v1631_v8  ;;  %v1659_v44 = vrot.slane %v1654_v11, 4  ;;  %v1697_v12 = vpack.i.b16 %v1654_v11, %v1626_v54  ;;  %v1700_v2 = vshrl.u32 %v1654_v11, 16 }
 0x404   : > { %v1662_v58 = vsel %vm960_vm7, 0, %v1661_v10  ;;  %v1717_v22 = vpack.i.b16 %v1716_v24, %v1715_v7  ;;  %v1723_v49 = vshrl.u32 %v1634_v19, 16  ;;  %1739 = vst.msk [vmem:[#allocation3 + $0x30] sm:$0xf] %vm1312_vm8, %v1713_v59  ;;  %v1707_v41 = vshrl.u32 %v1632_v61, 16 }
 0x405   : > { %v1660_v21 = vsel %vm960_vm7, 0, %v1659_v44  ;;  %v1701_v14 = vpack.i.b16 %v1700_v2, %v1699_v15  ;;  %v1721_v31 = vpack.i.b16 %v1662_v58, %v1634_v19  ;;  %v1724_v29 = vshrl.u32 %v1662_v58, 16  ;;  %1735 = vst.msk [vmem:[#allocation3 + $0x20] sm:$0xf] %vm1312_vm8, %v1697_v12 }
 0x406   : > { %v1705_v26 = vpack.i.b16 %v1660_v21, %v1632_v61  ;;  %v1708_v62 = vshrl.u32 %v1660_v21, 16  ;;  %1740 = vst.msk [vmem:[#allocation3 + $0x34] sm:$0xf] %vm1312_vm8, %v1717_v22  ;;  %v2656_v16 = vmul.f32 1.442695, %v2629_v17  ;;  %v2672_v7 = vsel %vm2265_vm9, %v13933_v56, 0.0 }
 0x407   : > { %v1725_v42 = vpack.i.b16 %v1724_v29, %v1723_v49  ;;  %1736 = vst.msk [vmem:[#allocation3 + $0x24] sm:$0xf] %vm1312_vm8, %v1701_v14  ;;  %v2654_v28 = vmul.f32 1.442695, %v2628_v30 }
 0x408   : > { %v1709_v37 = vpack.i.b16 %v1708_v62, %v1707_v41  ;;  %1737 = vst.msk [vmem:[#allocation3 + $0x28] sm:$0xf] %vm1312_vm8, %v1705_v26  ;;  %12293 = vpow2.f32 %v2656_v16  ;;  %v2614_v43 = vpop.xlane.xlu1 %2613  ;;  %v2608_v2 = vpop.xlane.xlu2 %2607 }
 0x409   : > { %1741 = vst.msk [vmem:[#allocation3 + $0x38] sm:$0xf] %vm1312_vm8, %v1721_v31  ;;  %12295 = vpow2.f32 %v2654_v28  ;;  %v2632_v5 = vsub.f32 %v13893_v23, %v2614_v43  ;;  %v2630_v14 = vsub.f32 %v13881_v18, %v2608_v2 }
 0x40a   : > { %1738 = vst.msk [vmem:[#allocation3 + $0x2c] sm:$0xf] %vm1312_vm8, %v1709_v37  ;;  %v2666_v37 = vsel %vm2265_vm9, %v13908_v33, 0.0 }
 0x40b   : > { %1742 = vst.msk [vmem:[#allocation3 + $0x3c] sm:$0xf] %vm1312_vm8, %v1725_v42  ;;  %v2742_v27 = vld [vmem:[#allocation3 + $0x30] sm:$0xf]  ;;  %v2662_v15 = vmul.f32 1.442695, %v2632_v5 }
 0x40c   : > { %v2738_v32 = vld [vmem:[#allocation3 + $0x20] sm:$0xf]  ;;  %v2979_v1 = vsel %vm2749_vm10, %v2742_v27, 0  ;;  %v2658_v62 = vmul.f32 1.442695, %v2630_v14  ;;  %vm3619_vm8 = vcmask 982016  }
 0x40d   : > { %v2903_v20 = vsel %vm2749_vm10, %v2738_v32, 0  ;;  %v2743_v6 = vld [vmem:[#allocation3 + $0x34] sm:$0xf] }
 0x40e   : > { %v12294_v48 = vpop.eup %12293  ;;  %2912 = vmatpush.bf16.msrb.mxu1 %v2903_v20  ;;  %v2739_v50 = vld [vmem:[#allocation3 + $0x24] sm:$0xf]  ;;  %v2998_v57 = vsel %vm2749_vm10, %v2743_v6, 0  ;;  %v2669_v20 = vsel %vm2265_vm9, %v13917_v35, 0.0 }
 0x40f   : > { %v2699_v51 = vsel %vm2265_vm9, %v12294_v48, 0.0  ;;  %v2922_v53 = vsel %vm2749_vm10, %v2739_v50, 0  ;;  %v2740_v55 = vld [vmem:[#allocation3 + $0x28] sm:$0xf]  ;;  %v2725_v0 = vpack.c.bf16 %v12294_v48, %v12294_v48  ;;  %v12296_v11 = vpop.eup %12295 }
 0x410   : > { %2700 = vadd.xlane.f32.xlu0 %v2699_v51  ;;  %v2617_v47 = vpop.xlane.xlu1 %2616  ;;  %2931 = vmatpush.bf16.msrb.mxu2 %v2922_v53  ;;  %v2941_v46 = vsel %vm2749_vm10, %v2740_v55, 0  ;;  %v2696_v19 = vsel %vm2265_vm9, %v12296_v11, 0.0  ;;  %v2744_v61 = vld [vmem:[#allocation3 + $0x38] sm:$0xf]  ;;  %v2724_v42 = vpack.c.bf16 %v12296_v11, %v12296_v11 }
 0x411   : > { %2950 = vmatpush.bf16.msra.mxu3 %v2941_v46  ;;  %v2741_v45 = vld [vmem:[#allocation3 + $0x2c] sm:$0xf]  ;;  %v2633_v60 = vsub.f32 %v13883_v36, %v2617_v47  ;;  %v3017_v12 = vsel %vm2749_vm10, %v2744_v61, 0 }
 0x412   : > { %2988 = vmatpush.bf16.msra.mxu1 %v2979_v1  ;;  %v2960_v54 = vsel %vm2749_vm10, %v2741_v45, 0  ;;  %v2745_v39 = vld [vmem:[#allocation3 + $0x3c] sm:$0xf] }
 0x413   : > { %9240 = vmatmul.msk.bf16.vlgmr.msrb.gmra.mxu2 %vm2265_vm9, %v2723_v38  ;;  %2969 = vmatpush.bf16.msrb.mxu0 %v2960_v54  ;;  %v3036_v3 = vsel %vm2749_vm10, %v2745_v39, 0  ;;  %v2664_v4 = vmul.f32 1.442695, %v2633_v60 }
 0x414   : > { %3007 = vmatpush.bf16.msra.mxu2 %v2998_v57 }
 0x415   : > { %12297 = vpow2.f32 %v2664_v4 }
 0x416   : > { %9242 = vmatmul.msk.bf16.vlgmr.msrb.gmra.mxu0 %vm2265_vm9, %v2725_v0  ;;  %v2590_v52 = vpop.xlane.xlu0 %2589 }
 0x417   : > { %3045 = vmatpush.bf16.msra.mxu0 %v3036_v3  ;;  %v2624_v36 = vsub.f32 %v13873_v34, %v2590_v52 }
 0x418   : > { %2673 = vadd.xlane.f32.xlu0 %v2672_v7 }
 0x419   : > { %v2646_v8 = vmul.f32 1.442695, %v2624_v36 }
 0x41b   : > { %12299 = vpow2.f32 %v2646_v8  ;;  %v12298_v59 = vpop.eup %12297 }
 0x41c   : > { %12301 = vpow2.f32 %v2662_v15  ;;  %v2729_v23 = vpack.c.bf16 %v12298_v59, %v12298_v59  ;;  %v2711_v22 = vsel %vm2265_vm9, %v12298_v59, 0.0 }
 0x41e   : > { %v2596_v17 = vpop.xlane.xlu0 %2595 }
 0x41f   : > { %v2626_v10 = vsub.f32 %v13869_v25, %v2596_v17 }
 0x420   : > { %2697 = vadd.xlane.f32.xlu0 %v2696_v19 }
 0x421   : > { %v12300_v24 = vpop.eup %12299  ;;  %v2650_v56 = vmul.f32 1.442695, %v2626_v10 }
 0x422   : > { %v2720_v34 = vpack.c.bf16 %v12300_v24, %v12300_v24  ;;  %v2684_v44 = vsel %vm2265_vm9, %v12300_v24, 0.0  ;;  %v12302_v58 = vpop.eup %12301 }
 0x423   : > { %12303 = vpow2.f32 %v2650_v56  ;;  %2685 = vadd.xlane.f32.xlu2 %v2684_v44  ;;  %v2708_v26 = vsel %vm2265_vm9, %v12302_v58, 0.0  ;;  %v2728_v27 = vpack.c.bf16 %v12302_v58, %v12302_v58 }
 0x424   : > { %9237 = vmatmul.msk.bf16.vlgmr.msrb.gmra.mxu3 %vm2265_vm9, %v2720_v34 }
 0x425   : > { %3026 = vmatpush.bf16.msrb.mxu3 %v3017_v12 }
 0x426   : > { %9246 = vmatmul.msk.bf16.vlgmr.msra.gmra.mxu0 %vm2265_vm9, %v2729_v23  ;;  %v2611_v25 = vpop.xlane.xlu0 %2610 }
 0x427   : > { %v2631_v49 = vsub.f32 %v13887_v40, %v2611_v25 }
 0x428   : > { %2712 = vadd.xlane.f32.xlu0 %v2711_v22 }
 0x429   : > { %v12304_v21 = vpop.eup %12303  ;;  %v2660_v31 = vmul.f32 1.442695, %v2631_v49 }
 0x42a   : > { %v2722_v29 = vpack.c.bf16 %v12304_v21, %v12304_v21  ;;  %v2690_v41 = vsel %vm2265_vm9, %v12304_v21, 0.0 }
 0x42b   : > { %12305 = vpow2.f32 %v2660_v31  ;;  %2709 = vadd.xlane.f32.xlu2 %v2708_v26  ;;  %2691 = vadd.xlane.f32.xlu1 %v2690_v41 }
 0x42c   : > { %9239 = vmatmul.msk.bf16.vlgmr.msrb.gmra.mxu1 %vm2265_vm9, %v2722_v29  ;;  %12307 = vpow2.f32 %v2658_v62 }
 0x431   : > { %v12306_v16 = vpop.eup %12305 }
 0x432   : > { %v2727_v40 = vpack.c.bf16 %v12306_v16, %v12306_v16  ;;  %v12308_v18 = vpop.eup %12307  ;;  %v2705_v33 = vsel %vm2265_vm9, %v12306_v16, 0.0 }
 0x433   : > { %2667 = vadd.xlane.f32.xlu1 %v2666_v37  ;;  %v2726_v43 = vpack.c.bf16 %v12308_v18, %v12308_v18  ;;  %v2702_v32 = vsel %vm2265_vm9, %v12308_v18, 0.0 }
 0x434   : > { %9241 = vmatmul.msk.bf16.vlgmr.msra.gmra.mxu3 %vm2265_vm9, %v2724_v42  ;;  %9244 = vmatmul.msk.bf16.vlgmr.msra.gmra.mxu2 %vm2265_vm9, %v2727_v40 }
 0x43b   : > { %2703 = vadd.xlane.f32.xlu1 %v2702_v32 }
 0x43c   : > { %9243 = vmatmul.msk.bf16.vlgmr.msra.gmra.mxu1 %vm2265_vm9, %v2726_v43 }
 0x443   : > { %v14032_v6 = vpop.f32.mrf.mxu1  ;;  %2670 = vadd.xlane.f32.xlu1 %v2669_v20 }
 0x444   : > { %9245 = vmatmul.msk.bf16.vlgmr.msrb.gmra.mxu3 %vm2265_vm9, %v2728_v27 }
 0x449   : > { %v2680_v50 = vpop.xlane.xlu2 %2679 }
 0x44b   : > { %v2764_v48 = vpop.f32.mrf.mxu1  ;;  %2706 = vadd.xlane.f32.xlu1 %v2705_v33 }
 0x450   : > { %v14036_v1 = vpop.xlane.xlu0 %2676 }
 0x451   : > { %v2689_v46 = vpop.xlane.xlu2 %2688 }
 0x454   : > { %v2838_v30 = vpop.f32.mrf.mxu1 }
 0x458   : > { %v2683_v47 = vpop.xlane.xlu0 %2682 }
 0x459   : > { %v14038_v51 = vpop.f32.mrf.mxu2  ;;  %12309 = vrcp.f32 %v2683_v47 }
 0x45a   : > { %12311 = vrcp.f32 %v2689_v46 }
 0x45b   : > { %v14040_v53 = vpop.f32.mrf.mxu0  ;;  %12313 = vrcp.f32 %v2680_v50 }
 0x45c   : > { %v2840_v55 = vpop.f32.mrf.mxu1 }
 0x45f   : > { %v12310_v38 = vpop.eup %12309 }
 0x460   : > { %v12312_v54 = vpop.eup %12311 }
 0x461   : > { %v2783_v35 = vpop.f32.mrf.mxu2  ;;  %v12314_v34 = vpop.eup %12313 }
 0x462   : > { %v3071_v23 = vmul.f32 %v12314_v34, %v2838_v30 }
 0x463   : > { %v2821_v57 = vpop.f32.mrf.mxu0 }
 0x464   : > { %v3110_v21 = vrot.slane %v3071_v23, 4 }
 0x469   : > { %v14042_v45 = vpop.f32.mrf.mxu3  ;;  %v2857_v28 = vpop.f32.mrf.mxu2 }
 0x46a   : > { %v3072_v60 = vmul.f32 %v12310_v38, %v2857_v28  ;;  %v2695_v17 = vpop.xlane.xlu2 %2694 }
 0x46b   : > { %v2895_v39 = vpop.f32.mrf.mxu0 }
 0x46c   : > { %v3122_v3 = vrot.slane %v3072_v60, 4  ;;  %v3074_v0 = vmul.f32 %v12312_v54, %v2895_v39 }
 0x46e   : > { %v3120_v4 = vrot.slane %v3074_v0, 4  ;;  %v3123_v52 = vsel %vm960_vm7, %v3074_v0, %v3122_v3 }
 0x46f   : > { %v3131_v58 = vperm.slane %v3123_v52, %v13406_v63 }
 0x470   : > { %v3121_v7 = vsel %vm960_vm7, %v3120_v4, %v3072_v60 }
 0x471   : > { %v2802_v36 = vpop.f32.mrf.mxu3  ;;  %v2859_v5 = vpop.f32.mrf.mxu2  ;;  %v3127_v25 = vperm.slane %v3121_v7, %v13406_v63  ;;  %v3168_v42 = vrot.slane %v3131_v58, 4 }
 0x473   : > { %v2897_v8 = vpop.f32.mrf.mxu0  ;;  %v3156_v16 = vrot.slane %v3127_v25, 4 }
 0x483   : > { %v2701_v11 = vpop.xlane.xlu0 %2700 }
 0x48b   : > { %v2674_v10 = vpop.xlane.xlu0 %2673 }
 0x493   : > { %v2971_v15 = vpop.f32.mrf.mxu0  ;;  %v2698_v12 = vpop.xlane.xlu0 %2697 }
 0x496   : > { %v2933_v19 = vpop.f32.mrf.mxu2  ;;  %v2686_v24 = vpop.xlane.xlu2 %2685 }
 0x497   : > { %12315 = vrcp.f32 %v2686_v24 }
 0x498   : > { %12317 = vrcp.f32 %v2695_v17 }
 0x499   : > { %12319 = vrcp.f32 %v2701_v11 }
 0x49a   : > { %12321 = vrcp.f32 %v2674_v10 }
 0x49b   : > { %v2973_v59 = vpop.f32.mrf.mxu0  ;;  %v2713_v48 = vpop.xlane.xlu0 %2712 }
 0x49d   : > { %v12316_v2 = vpop.eup %12315 }
 0x49e   : > { %v2935_v56 = vpop.f32.mrf.mxu2  ;;  %v2692_v61 = vpop.xlane.xlu1 %2691 }
 0x49f   : > { %v12318_v29 = vpop.eup %12317 }
 0x4a0   : > { %v12320_v62 = vpop.eup %12319  ;;  %v3076_v43 = vmul.f32 %v12318_v29, %v2933_v19 }
 0x4a1   : > { %v3078_v18 = vmul.f32 %v12320_v62, %v2971_v15  ;;  %v12322_v38 = vpop.eup %12321 }
 0x4a2   : > { %v3210_v57 = vrot.slane %v3076_v43, 4  ;;  %v3069_v52 = vmul.f32 %v12322_v38, %v14042_v45 }
 0x4a3   : > { %v3047_v44 = vpop.f32.mrf.mxu0  ;;  %v3208_v46 = vrot.slane %v3078_v18, 4 }
 0x4a4   : > { %v3083_v45 = vrot.slane %v3069_v52, 4 }
 0x4a5   : > { %v3209_v3 = vsel %vm960_vm7, %v3208_v46, %v3076_v43 }
 0x4a6   : > { %v2668_v22 = vpop.xlane.xlu1 %2667  ;;  %v3215_v11 = vperm.slane %v3209_v3, %v13406_v63 }
 0x4a7   : > { %v2876_v49 = vpop.f32.mrf.mxu3  ;;  %12323 = vrcp.f32 %v2668_v22 }
 0x4a8   : > { %v3073_v14 = vmul.f32 %v12316_v2, %v2876_v49  ;;  %12325 = vrcp.f32 %v2692_v61  ;;  %v2710_v61 = vpop.xlane.xlu2 %2709 }
 0x4a9   : > { %v2914_v31 = vpop.f32.mrf.mxu1  ;;  %12327 = vrcp.f32 %v14036_v1  ;;  %v3211_v1 = vsel %vm960_vm7, %v3078_v18, %v3210_v57 }
 0x4aa   : > { %v3108_v26 = vrot.slane %v3073_v14, 4  ;;  %v3111_v41 = vsel %vm960_vm7, %v3073_v14, %v3110_v21  ;;  %12329 = vrcp.f32 %v2698_v12  ;;  %v3219_v15 = vperm.slane %v3211_v1, %v13406_v63 }
 0x4ab   : > { %v3119_v40 = vperm.slane %v3111_v41, %v13406_v63  ;;  %v3049_v37 = vpop.f32.mrf.mxu0  ;;  %12331 = vrcp.f32 %v2713_v48 }
 0x4ac   : > { %v3109_v32 = vsel %vm960_vm7, %v3108_v26, %v3071_v23 }
 0x4ad   : > { %v3115_v27 = vperm.slane %v3109_v32, %v13406_v63  ;;  %v3169_v20 = vsel %vm960_vm7, %v3168_v42, %v3119_v40  ;;  %v3170_v33 = vrot.slane %v3119_v40, 4  ;;  %v12324_v54 = vpop.eup %12323 }
 0x4ae   : > { %v2704_v47 = vpop.xlane.xlu1 %2703  ;;  %v12326_v39 = vpop.eup %12325  ;;  %v3067_v7 = vmul.f32 %v12324_v54, %v14032_v6  ;;  %v14069_v23 = vperm.slane %v3169_v20, %v13413_v9 }
 0x4af   : > { %v3157_v30 = vsel %vm960_vm7, %v3156_v16, %v3115_v27  ;;  %v3158_v50 = vrot.slane %v3115_v27, 4  ;;  %v3171_v55 = vsel %vm960_vm7, %v3131_v58, %v3170_v33  ;;  %v2878_v35 = vpop.f32.mrf.mxu3  ;;  %v3075_v0 = vmul.f32 %v12326_v39, %v2914_v31  ;;  %v12328_v4 = vpop.eup %12327 }
 0x4b0   : > { %v12330_v36 = vpop.eup %12329  ;;  %v3070_v5 = vmul.f32 %v12328_v4, %v14040_v53  ;;  %v3086_v6 = vrot.slane %v3067_v7, 4  ;;  %v3085_v58 = vsel %vm960_vm7, %v3083_v45, %v3067_v7  ;;  %v14076_v21 = vperm.slane %v3157_v30, %v13413_v9 }
 0x4b1   : > { %v3159_v28 = vsel %vm960_vm7, %v3127_v25, %v3158_v50  ;;  %v2916_v60 = vpop.f32.mrf.mxu1  ;;  %v12332_v8 = vpop.eup %12331  ;;  %v3198_v59 = vrot.slane %v3075_v0, 4  ;;  %v3244_v25 = vrot.slane %v3215_v11, 4  ;;  %v3091_v16 = vperm.slane %v3085_v58, %v13406_v63 }
 0x4b2   : > { %v14064_v10 = vmul.f32 %v12332_v8, %v3047_v44  ;;  %v3096_v53 = vrot.slane %v3070_v5, 4  ;;  %v3256_v44 = vrot.slane %v3219_v15, 4  ;;  %v3087_v31 = vsel %vm960_vm7, %v3069_v52, %v3086_v6 }
 0x4b3   : > { %v14084_v42 = vperm.slane %v3159_v28, %v13413_v9  ;;  %v14087_v40 = vperm.slane %v3171_v55, %v13413_v9  ;;  %v3188_v37 = vrot.slane %v14069_v23, 4  ;;  %v3095_v30 = vperm.slane %v3087_v31, %v13406_v63 }
 0x4b4   : > { %v3232_v49 = vrot.slane %v14064_v10, 4  ;;  %v3134_v60 = vrot.slane %v3091_v16, 4  ;;  %v3180_v54 = vrot.slane %v14076_v21, 4 }
 0x4b5   : > { %v3184_v1 = vrot.slane %v14084_v42, 4  ;;  %v3146_v7 = vrot.slane %v3095_v30, 4 }
 0x4b6   : > { %v2671_v17 = vpop.xlane.xlu1 %2670 }
 0x4b7   : > { %v2952_v19 = vpop.f32.mrf.mxu3  ;;  %12333 = vrcp.f32 %v2671_v17  ;;  %v14066_v56 = vpop.f32.mrf.mxu2 }
 0x4b8   : > { %v3077_v24 = vmul.f32 %v12330_v36, %v2952_v19  ;;  %12335 = vrcp.f32 %v2704_v47 }
 0x4b9   : > { %v2990_v34 = vpop.f32.mrf.mxu1  ;;  %12337 = vrcp.f32 %v2710_v61 }
 0x4ba   : > { %v3196_v12 = vrot.slane %v3077_v24, 4  ;;  %v3199_v2 = vsel %vm960_vm7, %v3077_v24, %v3198_v59 }
 0x4bb   : > { %v3207_v22 = vperm.slane %v3199_v2, %v13406_v63 }
 0x4bc   : > { %v3197_v14 = vsel %vm960_vm7, %v3196_v12, %v3075_v0  ;;  %v3192_v0 = vrot.slane %v14087_v40, 4 }
 0x4bd   : > { %v3203_v29 = vperm.slane %v3197_v14, %v13406_v63  ;;  %v3257_v26 = vsel %vm960_vm7, %v3256_v44, %v3207_v22  ;;  %v3258_v41 = vrot.slane %v3207_v22, 4  ;;  %v12334_v62 = vpop.eup %12333 }
 0x4be   : > { %v12336_v18 = vpop.eup %12335  ;;  %v3068_v43 = vmul.f32 %v12334_v62, %v14038_v51  ;;  %v2707_v33 = vpop.xlane.xlu1 %2706  ;;  %v14095_v50 = vperm.slane %v3257_v26, %v13413_v9 }
 0x4bf   : > { %v3245_v32 = vsel %vm960_vm7, %v3244_v25, %v3203_v29  ;;  %v3246_v27 = vrot.slane %v3203_v29, 4  ;;  %v3259_v20 = vsel %vm960_vm7, %v3219_v15, %v3258_v41  ;;  %v2954_v48 = vpop.f32.mrf.mxu3  ;;  %v3079_v47 = vmul.f32 %v12336_v18, %v2990_v34  ;;  %v3011_v55 = vpop.f32.mrf.mxu2 }
 0x4c0   : > { %12339 = vrcp.f32 %v2707_v33  ;;  %v3097_v35 = vsel %vm960_vm7, %v3096_v53, %v3068_v43  ;;  %v3098_v46 = vrot.slane %v3068_v43, 4  ;;  %v14100_v57 = vperm.slane %v3245_v32, %v13413_v9  ;;  %v12338_v28 = vpop.eup %12337 }
 0x4c1   : > { %v3247_v51 = vsel %vm960_vm7, %v3215_v11, %v3246_v27  ;;  %v2992_v38 = vpop.f32.mrf.mxu1  ;;  %v3103_v39 = vperm.slane %v3097_v35, %v13406_v63  ;;  %v14105_v3 = vperm.slane %v3259_v20, %v13413_v9  ;;  %v3302_v19 = vrot.slane %v14095_v50, 4 }
 0x4c2   : > { %v3099_v4 = vsel %vm960_vm7, %v3070_v5, %v3098_v46  ;;  %v14111_v52 = vperm.slane %v3247_v51, %v13413_v9  ;;  %v3294_v17 = vrot.slane %v14100_v57, 4  ;;  %v3222_v59 = vrot.slane %v3079_v47, 4 }
 0x4c3   : > { %v3107_v36 = vperm.slane %v3099_v4, %v13406_v63  ;;  %v3132_v8 = vrot.slane %v3103_v39, 4  ;;  %v3135_v11 = vsel %vm960_vm7, %v3103_v39, %v3134_v60  ;;  %v3306_v6 = vrot.slane %v14105_v3, 4 }
 0x4c4   : > { %v3143_v15 = vperm.slane %v3135_v11, %v13413_v9  ;;  %v3298_v53 = vrot.slane %v14111_v52, 4 }
 0x4c5   : > { %v3133_v45 = vsel %vm960_vm7, %v3132_v8, %v3091_v16  ;;  %v3144_v5 = vrot.slane %v3107_v36, 4  ;;  %v3147_v61 = vsel %vm960_vm7, %v3107_v36, %v3146_v7 }
 0x4c6   : > { %v12340_v24 = vpop.eup %12339  ;;  %v3139_v34 = vperm.slane %v3133_v45, %v13413_v9  ;;  %v14125_v25 = vsel %vm960_vm7, %v3184_v1, %v3143_v15  ;;  %v3155_v58 = vperm.slane %v3147_v61, %v13413_v9  ;;  %v3186_v14 = vrot.slane %v3143_v15, 4 }
 0x4c7   : > { %v3080_v12 = vmul.f32 %v12340_v24, %v14066_v56  ;;  %v3028_v2 = vpop.f32.mrf.mxu3  ;;  %v3145_v44 = vsel %vm960_vm7, %v3144_v5, %v3095_v30  ;;  %v3308_v39 = vrot.slane %v14125_v25, 4 }
 0x4c8   : > { %v3081_v22 = vmul.f32 %v12338_v28, %v3028_v2  ;;  %v3151_v31 = vperm.slane %v3145_v44, %v13413_v9  ;;  %v3182_v29 = vrot.slane %v3139_v34, 4  ;;  %v3181_v18 = vsel %vm960_vm7, %v3180_v54, %v3139_v34 }
 0x4c9   : > { %v3233_v26 = vsel %vm960_vm7, %v3232_v49, %v3080_v12  ;;  %v3234_v41 = vrot.slane %v3080_v12, 4  ;;  %v3187_v30 = vsel %vm960_vm7, %v14084_v42, %v3186_v14  ;;  %v3194_v38 = vrot.slane %v3155_v58, 4 }
 0x4ca   : > { %v3239_v56 = vperm.slane %v3233_v26, %v13406_v63  ;;  %v3220_v62 = vrot.slane %v3081_v22, 4  ;;  %v3223_v16 = vsel %vm960_vm7, %v3081_v22, %v3222_v59  ;;  %v3190_v43 = vrot.slane %v3151_v31, 4 }
 0x4cb   : > { %v3235_v32 = vsel %vm960_vm7, %v14064_v10, %v3234_v41  ;;  %v3231_v27 = vperm.slane %v3223_v16, %v13406_v63  ;;  %v3183_v20 = vsel %vm960_vm7, %v14076_v21, %v3182_v29  ;;  %v3189_v10 = vsel %vm960_vm7, %v3188_v37, %v3151_v31 }
 0x4cc   : > { %v3243_v33 = vperm.slane %v3235_v32, %v13406_v63  ;;  %v3268_v49 = vrot.slane %v3239_v56, 4  ;;  %v3221_v48 = vsel %vm960_vm7, %v3220_v62, %v3079_v47  ;;  %v3191_v46 = vsel %vm960_vm7, %v14069_v23, %v3190_v43 }
 0x4cd   : > { %v3227_v55 = vperm.slane %v3221_v48, %v13406_v63  ;;  %v3282_v35 = vrot.slane %v3231_v27, 4  ;;  %v3193_v21 = vsel %vm960_vm7, %v3192_v0, %v3155_v58  ;;  %v3310_v28 = vrot.slane %v3181_v18, 4 }
 0x4ce   : > { %v3280_v51 = vrot.slane %v3243_v33, 4  ;;  %v3195_v0 = vsel %vm960_vm7, %v14087_v40, %v3194_v38  ;;  %v3322_v8 = vrot.slane %v3183_v20, 4  ;;  %v3320_v24 = vrot.slane %v3187_v30, 4 }
 0x4cf   : > { %v3269_v47 = vsel %vm960_vm7, %v3268_v49, %v3227_v55  ;;  %v3270_v60 = vrot.slane %v3227_v55, 4  ;;  %v3283_v42 = vsel %vm960_vm7, %v3243_v33, %v3282_v35  ;;  %v3030_v54 = vpop.f32.mrf.mxu3  ;;  %v3311_v36 = vsel %vm960_vm7, %v14125_v25, %v3310_v28 }
 0x4d0   : > { %v14156_v1 = vperm.slane %v3269_v47, %v13413_v9  ;;  %v3281_v37 = vsel %vm960_vm7, %v3280_v51, %v3231_v27  ;;  %v14160_v23 = vperm.slane %v3283_v42, %v13413_v9  ;;  %v3332_v44 = vrot.slane %v3193_v21, 4 }
 0x4d1   : > { %v3271_v4 = vsel %vm960_vm7, %v3239_v56, %v3270_v60  ;;  %v3287_v7 = vperm.slane %v3281_v37, %v13413_v9  ;;  %v3334_v58 = vrot.slane %v3189_v10, 4  ;;  %v3344_v14 = vrot.slane %v3195_v0, 4 }
 0x4d2   : > { %v14169_v11 = vperm.slane %v3271_v4, %v13413_v9  ;;  %v3292_v15 = vrot.slane %v14156_v1, 4  ;;  %v14174_v59 = vsel %vm960_vm7, %v14156_v1, %v3294_v17  ;;  %v3304_v5 = vrot.slane %v14160_v23, 4 }
 0x4d3   : > { %v3300_v45 = vrot.slane %v3287_v7, 4  ;;  %v14177_v40 = vsel %vm960_vm7, %v3287_v7, %v3302_v19  ;;  %v14182_v61 = vsel %vm960_vm7, %v14160_v23, %v3306_v6  ;;  %v3434_v12 = vrot.slane %v14174_v59, 4 }
 0x4d4   : > { %v3296_v34 = vrot.slane %v14169_v11, 4  ;;  %v3458_v2 = vrot.slane %v14177_v40, 4  ;;  %v3319_v17 = vperm.slane %v3311_v36, %v13406_v63  ;;  %v3323_v19 = vsel %vm960_vm7, %v3187_v30, %v3322_v8 }
 0x4d5   : > { %v14190_v25 = vsel %vm960_vm7, %v3300_v45, %v14095_v50  ;;  %v3331_v6 = vperm.slane %v3323_v19, %v13406_v63  ;;  %v3346_v31 = vrot.slane %v3191_v46, 4  ;;  %v3335_v29 = vsel %vm960_vm7, %v3193_v21, %v3334_v58 }
 0x4d6   : > { %v3446_v22 = vrot.slane %v14190_v25, 4  ;;  %v3370_v26 = vrot.slane %v3319_v17, 4  ;;  %v3309_v41 = vsel %vm960_vm7, %v3308_v39, %v3181_v18  ;;  %v3321_v56 = vsel %vm960_vm7, %v3320_v24, %v3183_v20 }
 0x4d7   : > { %v3343_v50 = vperm.slane %v3335_v29, %v13406_v63  ;;  %v3347_v62 = vsel %vm960_vm7, %v3195_v0, %v3346_v31  ;;  %v3368_v16 = vrot.slane %v3331_v6, 4  ;;  %v3315_v43 = vperm.slane %v3309_v41, %v13406_v63 }
 0x4d8   : > { %v3355_v32 = vperm.slane %v3347_v62, %v13406_v63  ;;  %v3371_v27 = vsel %vm960_vm7, %v3331_v6, %v3370_v26  ;;  %v3327_v33 = vperm.slane %v3321_v56, %v13406_v63  ;;  %v3333_v49 = vsel %vm960_vm7, %v3332_v44, %v3189_v10 }
 0x4d9   : > { %v3379_v48 = vperm.slane %v3371_v27, %v13413_v9  ;;  %v3394_v18 = vrot.slane %v3343_v50, 4  ;;  %v3369_v20 = vsel %vm960_vm7, %v3368_v16, %v3319_v17  ;;  %v3339_v30 = vperm.slane %v3333_v49, %v13406_v63 }
 0x4da   : > { %v3375_v55 = vperm.slane %v3369_v20, %v13413_v9  ;;  %v3392_v35 = vrot.slane %v3355_v32, 4  ;;  %v3345_v51 = vsel %vm960_vm7, %v3344_v14, %v3191_v46  ;;  %v3358_v21 = vrot.slane %v3315_v43, 4 }
 0x4db   : > { %v3395_v38 = vsel %vm960_vm7, %v3355_v32, %v3394_v18  ;;  %v3351_v28 = vperm.slane %v3345_v51, %v13406_v63  ;;  %v3382_v47 = vrot.slane %v3339_v30, 4  ;;  %v3356_v60 = vrot.slane %v3327_v33, 4 }
 0x4dc   : > { %v3403_v10 = vperm.slane %v3395_v38, %v13413_v9  ;;  %v3393_v42 = vsel %vm960_vm7, %v3392_v35, %v3343_v50  ;;  %v3414_v54 = vrot.slane %v3375_v55, 4  ;;  %v3359_v39 = vsel %vm960_vm7, %v3327_v33, %v3358_v21 }
 0x4dd   : > { %v3399_v1 = vperm.slane %v3393_v42, %v13413_v9  ;;  %v3367_v37 = vperm.slane %v3359_v39, %v13413_v9  ;;  %v3383_v46 = vsel %vm960_vm7, %v3351_v28, %v3382_v47  ;;  %v3357_v0 = vsel %vm960_vm7, %v3356_v60, %v3315_v43 }
 0x4de   : > { %v3416_v4 = vrot.slane %v3403_v10, 4  ;;  %v3391_v7 = vperm.slane %v3383_v46, %v13413_v9  ;;  %v14221_v36 = vperm.slane %v3357_v0, %v13413_v9  ;;  %v3380_v8 = vrot.slane %v3351_v28, 4 }
 0x4df   : > { %v3415_v24 = vsel %vm960_vm7, %v3399_v1, %v3414_v54  ;;  %v3412_v45 = vrot.slane %v3399_v1, 4  ;;  %v3418_v17 = vrot.slane %v3379_v48, 4  ;;  %v3293_v19 = vsel %vm960_vm7, %v3292_v15, %v14100_v57 }
 0x4e0   : > { %v3417_v44 = vsel %vm960_vm7, %v3416_v4, %v3379_v48  ;;  %3549 = vrot.lane.b32.xlu2 %v3415_v24, %s13005_s3  ;;  %v3408_v58 = vrot.slane %v3391_v7, 4  ;;  %v3381_v6 = vsel %vm960_vm7, %v3380_v8, %v3339_v30  ;;  %v3406_v14 = vrot.slane %v14221_v36, 4  ;;  %s8852_s3 = scalar_lea.sflag [#allocation6], %s13263_s4 }
 0x4e1   : > { %3553 = vrot.lane.b32.xlu1 %v3417_v44, %s13009_s28  ;;  %v3413_v31 = vsel %vm960_vm7, %v3412_v45, %v3375_v55  ;;  %v3387_v29 = vperm.slane %v3381_v6, %v13413_v9  ;;  %v3419_v26 = vsel %vm960_vm7, %v3403_v10, %v3418_v17  ;;  %v3297_v57 = vsel %vm960_vm7, %v3296_v34, %v14111_v52 }
 0x4e2   : > { %3545 = vrot.lane.b32.xlu0 %v3413_v31, %s13007_s29  ;;  %v3409_v15 = vsel %vm960_vm7, %v3408_v58, %v3367_v37  ;;  %v3299_v41 = vsel %vm960_vm7, %v14169_v11, %v3298_v53  ;;  %v3305_v56 = vsel %vm960_vm7, %v3304_v5, %v14105_v3  ;;  %v3420_v50 = vrot.slane %v3297_v57, 4  ;;  %s14866_s29 = smov 88  }
 0x4e3   : > { %v3456_v62 = vrot.slane %v14182_v61, 4  ;;  %v3407_v16 = vsel %vm960_vm7, %v3387_v29, %v3406_v14  ;;  %v3422_v34 = vrot.slane %v3293_v19, 4  ;;  %v3432_v43 = vrot.slane %v3299_v41, 4 }
 0x4e4   : > { %v3435_v32 = vsel %vm960_vm7, %v3299_v41, %v3434_v12  ;;  %v3444_v52 = vrot.slane %v3305_v56, 4  ;;  %v3447_v53 = vsel %vm960_vm7, %v3305_v56, %v3446_v22  ;;  %v3459_v3 = vsel %vm960_vm7, %v14182_v61, %v3458_v2 }
 0x4e5   : > { %v3423_v23 = vsel %vm960_vm7, %v3297_v57, %v3422_v34  ;;  %v3443_v11 = vperm.slane %v3435_v32, %v13406_v63  ;;  %v3455_v5 = vperm.slane %v3447_v53, %v13406_v63  ;;  %v3467_v27 = vperm.slane %v3459_v3, %v13406_v63  ;;  %v11488_v32 = vld [vmem:[#allocation13 + $0x28] sm:$0xff]  ;;  %v11486_v53 = vld [vmem:[#allocation13 + $0x18] sm:$0xff] }
 0x4e6   : > { %v3431_v12 = vperm.slane %v3423_v23, %v13406_v63  ;;  %v3421_v33 = vsel %vm960_vm7, %v3420_v50, %v3293_v19  ;;  %v3433_v22 = vsel %vm960_vm7, %v3432_v43, %v14174_v59  ;;  %v3445_v49 = vsel %vm960_vm7, %v3444_v52, %v14190_v25  ;;  %v11490_v43 = vld [vmem:[#allocation13 + $0x38] sm:$0xff]  ;;  %v11487_v52 = vld [vmem:[#allocation13 + $0x20] sm:$0xff]  ;;  %v11485_v23 = vld [vmem:[#allocation13 + $0x10] sm:$0xff] }
 0x4e7   : > { %v3480_v48 = vrot.slane %v3443_v11, 4  ;;  %v3504_v61 = vrot.slane %v3467_v27, 4  ;;  %v3427_v2 = vperm.slane %v3421_v33, %v13406_v63  ;;  %v3439_v18 = vperm.slane %v3433_v22, %v13406_v63  ;;  %3690 = vmatpush.bf16.msrb.mxu1 %v11490_v43  ;;  %v11483_v33 = vld [vmem:[#allocation13] sm:$0xff]  ;;  %v10105_v43 = vld [vmem:[#allocation22 + $0x668] sm:$0xf] }
 0x4e8   : > { %3533 = vrot.lane.b32.xlu2 %v3407_v16, %s13006_s14  ;;  %v3451_v20 = vperm.slane %v3445_v49, %v13406_v63  ;;  %v3457_v30 = vsel %vm960_vm7, %v3456_v62, %v14177_v40  ;;  %v3410_v55 = vrot.slane %v3367_v37, 4  ;;  %v3404_v42 = vrot.slane %v3387_v29, 4 }
 0x4e9   : > { %3537 = vrot.lane.b32.xlu1 %v3409_v15, %s13003_s0  ;;  %v3505_v59 = vsel %vm960_vm7, %v3504_v61, %v3455_v5  ;;  %v3463_v25 = vperm.slane %v3457_v30, %v13406_v63  ;;  %v3468_v35 = vrot.slane %v3439_v18, 4  ;;  %v3481_v51 = vsel %vm960_vm7, %v3480_v48, %v3431_v12 }
 0x4ea   : > { %3557 = vrot.lane.b32.xlu0 %v3419_v26, %s13008_s27  ;;  %v3511_v21 = vperm.slane %v3505_v59, %v13413_v9  ;;  %v3411_v38 = vsel %vm960_vm7, %v3391_v7, %v3410_v55  ;;  %v3470_v40 = vrot.slane %v3427_v2, 4  ;;  %v3494_v60 = vrot.slane %v3451_v20, 4 }
 0x4eb   : > { %v3469_v28 = vsel %vm960_vm7, %v3468_v35, %v3427_v2  ;;  %v3492_v47 = vrot.slane %v3463_v25, 4  ;;  %v3487_v63 = vperm.slane %v3481_v51, %v13413_v9  ;;  %v3482_v8 = vrot.slane %v3431_v12, 4 }
 0x4ec   : > { %v3524_v10 = vrot.slane %v3511_v21, 4  ;;  %v3475_v39 = vperm.slane %v3469_v28, %v13413_v9  ;;  %v3495_v37 = vsel %vm960_vm7, %v3463_v25, %v3494_v60  ;;  %v3471_v46 = vsel %vm960_vm7, %v3439_v18, %v3470_v40 }
 0x4ed   : > { %v3493_v54 = vsel %vm960_vm7, %v3492_v47, %v3451_v20  ;;  %v3503_v7 = vperm.slane %v3495_v37, %v13413_v9  ;;  %v3405_v24 = vsel %vm960_vm7, %v3404_v42, %v14221_v36  ;;  %v3479_v17 = vperm.slane %v3471_v46, %v13413_v9 }
 0x4ee   : > { %v3499_v1 = vperm.slane %v3493_v54, %v13413_v9  ;;  %v3525_v0 = vsel %vm960_vm7, %v3524_v10, %v3487_v63  ;;  %v3506_v19 = vrot.slane %v3455_v5, 4  ;;  %v3518_v44 = vrot.slane %v3475_v39, 4  ;;  %v11484_v5 = vld [vmem:[#allocation13 + $0x8] sm:$0xff] }
 0x4ef   : > { %v3520_v58 = vrot.slane %v3503_v7, 4  ;;  %v3483_v6 = vsel %vm960_vm7, %v3443_v11, %v3482_v8  ;;  %v3522_v14 = vrot.slane %v3479_v17, 4  ;;  %v3526_v56 = vrot.slane %v3487_v63, 4  ;;  %v12411_v8 = vld [vmem:[%s13269_s16] sm:$0xff]  ;;  %s14870_s16 = sld [smem:[#allocation40_spill]] }
 0x4f0   : > { %v3516_v4 = vrot.slane %v3499_v1, 4  ;;  %v3507_v31 = vsel %vm960_vm7, %v3467_v27, %v3506_v19  ;;  %v3519_v29 = vsel %vm960_vm7, %v3499_v1, %v3518_v44  ;;  %v3491_v36 = vperm.slane %v3483_v6, %v13413_v9  ;;  %v11746_v19 = vld [vmem:[#allocation22 + $0x7f4] sm:$0xf0]  ;;  %v11729_v44 = vld [vmem:[#allocation22 + $0x774] sm:$0xf] }
 0x4f1   : > { %3577 = vrot.lane.b32.xlu1 %v3525_v0, %s12996_s17  ;;  %v3521_v26 = vsel %vm960_vm7, %v3520_v58, %v3479_v17  ;;  %v3523_v57 = vsel %vm960_vm7, %v3503_v7, %v3522_v14  ;;  %v3515_v15 = vperm.slane %v3507_v31, %v13413_v9  ;;  %v3527_v16 = vsel %vm960_vm7, %v3511_v21, %v3526_v56  ;;  %s14867_s17 = smov 104   ;;  %v11489_v9 = vld [vmem:[#allocation13 + $0x30] sm:$0xff]  ;;  %v12267_v0 = vld [vmem:[#allocation15] ss:$0 sm:$0xff]  ;;  %v10233_v17 = vld [vmem:[#allocation22 + $0x770] sm:$0xf] }
 0x4f2   : > { %v3517_v45 = vsel %vm960_vm7, %v3516_v4, %v3475_v39  ;;  %3541 = vrot.lane.b32.xlu0 %v3411_v38, %s13001_s25  ;;  %v3530_v41 = vrot.slane %v3491_v36, 4  ;;  %3691 = vmatpush.bf16.msrb.mxu1 %v11489_v9  ;;  %v10234_v58 = vor.u32 %v11746_v19, %v10233_v17  ;;  %v10235_v6 = vld [vmem:[#allocation22 + $0x7f8] sm:$0xf0]  ;;  %v10241_v14 = vld [vmem:[#allocation22 + $0x778] sm:$0xf]  ;;  %s14872_s25 = sshll.u32 %s13263_s4, 3 }
 0x4f3   : > { %3561 = vrot.lane.b32.xlu2 %v3517_v45, %s14864_s21  ;;  %v3528_v50 = vrot.slane %v3515_v15, 4  ;;  %v11747_v31 = vld [vmem:[#allocation22 + $0x7fc] sm:$0xf0]  ;;  %v11712_v56 = vld [vmem:[#allocation22 + $0x6e4] sm:$0xf0]  ;;  %s738_s21 = scalar_lea.vmem [#allocation28], %s14872_s25 }
 0x4f4   : > { %v3531_v62 = vsel %vm960_vm7, %v3515_v15, %v3530_v41  ;;  %v10097_v15 = vld [vmem:[#allocation22 + $0x660] sm:$0xf]  ;;  %5445 = vmatpush.bf16.msrb.mxu2 %v10234_v58  ;;  %v11713_v9 = vld [vmem:[#allocation22 + $0x6ec] sm:$0xf0]  ;;  %v9555_v19 = vld [vmem:[#allocation22 + $0x2a8] sm:$0xf0] }
 0x4f5   : > { %v3529_v34 = vsel %vm960_vm7, %v3528_v50, %v3491_v36  ;;  %vm3617_vm7 = vcmask 916480   ;;  %v10242_v36 = vor.u32 %v11747_v31, %v10241_v14  ;;  %v11695_v50 = vld [vmem:[#allocation22 + $0x664] sm:$0xf]  ;;  %v11577_v58 = vld [vmem:[#allocation22 + $0x2ac] sm:$0xf0]  ;;  %s8865_s0 = sshll.u32 %s738_s21, 4  ;;  %s8866_s0 = int_to_ptr.vmem [resolvable:$true] %s8865_s0 }
 0x4f6   : > { %3692 = vmatpush.bf16.msrb.mxu1 %v11488_v32  ;;  %v11696_v32 = vld [vmem:[#allocation22 + $0x66c] sm:$0xf]  ;;  %v9563_v14 = vld [vmem:[#allocation22 + $0x2b0] sm:$0xf0] }
 0x4f7   : > { %5471 = vmatpush.bf16.msrb.mxu0 %v10242_v36 }
 0x4f9   : > { %3565 = vrot.lane.b32.xlu1 %v3519_v29, %s12999_s26  ;;  %v10238_v29 = vor.u32 %v11729_v44, %v10235_v6  ;;  %v9561_v44 = vld [vmem:[#allocation22 + $0x228] sm:$0xf]  ;;  %v11560_v6 = vld [vmem:[#allocation22 + $0x22c] sm:$0xf]  ;;  %s14871_s26 = sld [smem:[#allocation49_spill]] }
 0x4fa   : > { %3569 = vrot.lane.b32.xlu0 %v3521_v26, %s12997_s19  ;;  %3693 = vmatpush.bf16.msrb.mxu1 %v11487_v52  ;;  %v11730_v26 = vld [vmem:[#allocation22 + $0x77c] sm:$0xf]  ;;  %v10106_v52 = vor.u32 %v11713_v9, %v10105_v43  ;;  %v9562_v36 = vor.u32 %v11577_v58, %v9561_v44  ;;  %v9977_v44 = vld [vmem:[#allocation22 + $0x560] sm:$0xf]  ;;  %v11680_v58 = vld [vmem:[#allocation22 + $0x5e4] sm:$0xf0] }
 0x4fb   : > { %3573 = vrot.lane.b32.xlu2 %v3523_v57, %s14866_s29  ;;  %v10243_v57 = vld [vmem:[#allocation22 + $0x800] sm:$0xf0]  ;;  %5458 = vmatpush.bf16.msra.mxu3 %v10238_v29 }
 0x4fc   : > { %v10246_v41 = vor.u32 %v11730_v26, %v10243_v57  ;;  %5472 = vmatpush.bf16.msrb.mxu0 %v10106_v52  ;;  %v9417_v26 = vld [vmem:[#allocation22 + $0x110] sm:$0xf]  ;;  %v11542_v57 = vld [vmem:[#allocation22 + $0x194] sm:$0xf0] }
 0x4fd   : > { %v9418_v43 = vor.u32 %v11542_v57, %v9417_v26  ;;  %v11664_v57 = vld [vmem:[#allocation22 + $0x56c] sm:$0xf] }
 0x4fe   : > { %3694 = vmatpush.bf16.msrb.mxu1 %v11486_v53  ;;  %v10107_v53 = vld [vmem:[#allocation22 + $0x6f0] sm:$0xf0] }
 0x501   : > { %3589 = vrot.lane.b32.xlu1 %v3531_v62, %s12995_s2  ;;  %v10099_v62 = vld [vmem:[#allocation22 + $0x6e8] sm:$0xf0]  ;;  %s11456_s2 = sshll.u32 %s14870_s16, 3 }
 0x502   : > { %3581 = vrot.lane.b32.xlu0 %v3527_v16, %s14867_s17  ;;  %3695 = vmatpush.bf16.msrb.mxu1 %v11485_v23  ;;  %v10098_v16 = vor.u32 %v11712_v56, %v10097_v15  ;;  %v11678_v23 = vld [vmem:[#allocation22 + $0x5d4] sm:$0xf0]  ;;  %v11525_v15 = vld [vmem:[#allocation22 + $0x114] sm:$0xf]  ;;  %v9419_v56 = vld [vmem:[#allocation22 + $0x198] sm:$0xf0]  ;;  %s8863_s27 = scalar_lea.hbm %s14871_s26, %s11456_s2 }
 0x503   : > { %3585 = vrot.lane.b32.xlu2 %v3529_v34, %s14865_s18  ;;  %v10102_v34 = vor.u32 %v11695_v50, %v10099_v62  ;;  %v9425_v50 = vld [vmem:[#allocation22 + $0x118] sm:$0xf]  ;;  %v11543_v62 = vld [vmem:[#allocation22 + $0x19c] sm:$0xf0]  ;;  %v9422_v9 = vor.u32 %v11525_v15, %v9419_v56  ;;  %v9987_v15 = vld [vmem:[#allocation22 + $0x5f0] sm:$0xf0] }
 0x504   : > { %5446 = vmatpush.bf16.msrb.mxu2 %v10098_v16  ;;  %v11526_v16 = vld [vmem:[#allocation22 + $0x11c] sm:$0xf]  ;;  %v9841_v56 = vld [vmem:[#allocation22 + $0x450] sm:$0xf]  ;;  %s8867_s28 = sshll.u32 %s8863_s27, 4  ;;  %s12882_s2 = scalar_lea.hbm %s14871_s26, 16  ;;  %s8868_s28 = int_to_ptr.hbm [resolvable:$true] %s8867_s28 }
 0x505   : > { %5459 = vmatpush.bf16.msra.mxu3 %v10102_v34  ;;  %v9427_v34 = vld [vmem:[#allocation22 + $0x1a0] sm:$0xf0]  ;;  %s12876_s14 = sshra.s32 %s8868_s28, 4  ;;  %s12877_s14 = int_to_ptr.hbm [resolvable:$true] %s12876_s14 }
 0x506   : > { %3696 = vmatpush.bf16.msrb.mxu1 %v11484_v5  ;;  %v11661_v5 = vld [vmem:[#allocation22 + $0x554] sm:$0xf]  ;;  %s12878_s29 = scalar_lea.hbm %s12877_s14, 8  ;;  %p12883_p9 = scmp.lt.s32.totalorder %s12877_s14, %s14871_s26 }
 0x507   : > { %p12879_p1 = scmp.ne.s32.totalorder %s12877_s14, %s12878_s29  ;;  %p12884_p10 = scmp.lt.s32.totalorder %s12882_s2, %s12878_s29 }
 0x509   : > { %p12880_p3 = pnand %p12879_p1, %p13243_p0  ;;  %p12885_p12 = por %p12884_p10, %p12883_p9 }
 0x50a   : > { %3697 = vmatpush.bf16.msrb.mxu1 %v11483_v33 }
 0x50b   : > { %p12881_p8 = pneg %p12880_p3 }
 0x50d   : > { %p12886_p13 = pnand %p12885_p12, %p12881_p8 }
 0x50e   : > { %5484 = vmatpush.bf16.msra.mxu1 %v10246_v41  ;;  %v9566_v41 = vor.u32 %v11560_v6, %v9563_v14  ;;  %v11663_v6 = vld [vmem:[#allocation22 + $0x564] sm:$0xf] }
 0x53a   : > { %v3550_v3 = vpop.permute.xlu2 %3549 }
 0x542   : > { %v3534_v12 = vpop.permute.xlu2 %3533 }
 0x543   : > { %v3592_v61 = vsel %vm2265_vm9, %v3405_v24, %v3534_v12  ;;  %v9969_v12 = vld [vmem:[#allocation22 + $0x558] sm:$0xf] }
 0x54d   : > { %v3562_v48 = vpop.permute.xlu2 %3561 }
 0x553   : > { %v3554_v11 = vpop.permute.xlu1 %3553 }
 0x554   : > { %v3546_v27 = vpop.permute.xlu0 %3545 }
 0x555   : > { %v3574_v21 = vpop.permute.xlu2 %3573 }
 0x55b   : > { %v3538_v22 = vpop.permute.xlu1 %3537 }
 0x55c   : > { %v3558_v49 = vpop.permute.xlu0 %3557  ;;  %v3594_v18 = vsel %vm3593_vm11, %v3592_v61, %v3538_v22  ;;  %v11679_v22 = vld [vmem:[#allocation22 + $0x5dc] sm:$0xf0] }
 0x55d   : > { %v3586_v54 = vpop.permute.xlu2 %3585 }
 0x563   : > { %v3578_v2 = vpop.permute.xlu1 %3577 }
 0x564   : > { %v3542_v20 = vpop.permute.xlu0 %3541 }
 0x565   : > { %v3596_v30 = vsel %vm3595_vm12, %v3594_v18, %v3542_v20  ;;  %v9825_v18 = vld [vmem:[#allocation22 + $0x440] sm:$0xf]  ;;  %v11644_v20 = vld [vmem:[#allocation22 + $0x4c4] sm:$0xf0] }
 0x566   : > { %v3598_v55 = vsel %vm3597_vm13, %v3596_v30, %v3546_v27  ;;  %v9963_v27 = vld [vmem:[#allocation22 + $0x5d8] sm:$0xf0]  ;;  %v11627_v30 = vld [vmem:[#allocation22 + $0x444] sm:$0xf] }
 0x567   : > { %v3600_v59 = vsel %vm3599_vm14, %v3598_v55, %v3550_v3  ;;  %v9961_v3 = vld [vmem:[#allocation22 + $0x550] sm:$0xf]  ;;  %v9966_v61 = vor.u32 %v11661_v5, %v9963_v27  ;;  %v9281_v5 = vld [vmem:[#allocation22] sm:$0xf]  ;;  %v11508_v27 = vld [vmem:[#allocation22 + $0x84] sm:$0xf0] }
 0x568   : > { %v3602_v25 = vsel %vm3601_vm15, %v3600_v59, %v3554_v11  ;;  %v10110_v11 = vor.u32 %v11696_v32, %v10107_v53  ;;  %v9962_v33 = vor.u32 %v11678_v23, %v9961_v3  ;;  %v9827_v59 = vld [vmem:[#allocation22 + $0x4c8] sm:$0xf0]  ;;  %v9426_v32 = vor.u32 %v11543_v62, %v9425_v50  ;;  %v11646_v50 = vld [vmem:[#allocation22 + $0x4d4] sm:$0xf0]  ;;  %v11629_v62 = vld [vmem:[#allocation22 + $0x454] sm:$0xf] }
 0x569   : > { %v3604_v35 = vsel %vm3603_vm0, %v3602_v25, %v3558_v49  ;;  %v11662_v49 = vld [vmem:[#allocation22 + $0x55c] sm:$0xf]  ;;  %v9833_v25 = vld [vmem:[#allocation22 + $0x448] sm:$0xf]  ;;  %5460 = vmatpush.bf16.msra.mxu3 %v9966_v61  ;;  %v9430_v53 = vor.u32 %v11526_v16, %v9427_v34  ;;  %v9990_v16 = vor.u32 %v11664_v57, %v9987_v15  ;;  %v11493_v57 = vld [vmem:[#allocation22 + $0x14] sm:$0xf] }
 0x56a   : > { %v3606_v51 = vsel %vm3605_vm1, %v3604_v35, %v3562_v48  ;;  %v9971_v48 = vld [vmem:[#allocation22 + $0x5e0] sm:$0xf0]  ;;  %5485 = vmatpush.bf16.msra.mxu1 %v10110_v11  ;;  %v11645_v35 = vld [vmem:[#allocation22 + $0x4cc] sm:$0xf0]  ;;  %5447 = vmatpush.bf16.msrb.mxu2 %v9962_v33  ;;  %v9282_v33 = vor.u32 %v11508_v27, %v9281_v5  ;;  %v9843_v34 = vld [vmem:[#allocation22 + $0x4d8] sm:$0xf0] }
 0x56b   : > { %v3566_v38 = vpop.permute.xlu1 %3565  ;;  %v9974_v55 = vor.u32 %v11662_v49, %v9971_v48  ;;  %v9289_v49 = vld [vmem:[#allocation22 + $0x8] sm:$0xf]  ;;  %v11509_v48 = vld [vmem:[#allocation22 + $0x8c] sm:$0xf0]  ;;  %v9299_v15 = vld [vmem:[#allocation22 + $0x98] sm:$0xf0] }
 0x56c   : > { %v3608_v28 = vsel %vm3607_vm2, %v3606_v51, %v3566_v38  ;;  %v3570_v47 = vpop.permute.xlu0 %3569  ;;  %v11628_v51 = vld [vmem:[#allocation22 + $0x44c] sm:$0xf]  ;;  %v9826_v38 = vor.u32 %v11644_v20, %v9825_v18  ;;  %v9291_v20 = vld [vmem:[#allocation22 + $0x90] sm:$0xf0]  ;;  %v11612_v27 = vld [vmem:[#allocation22 + $0x3c4] sm:$0xf0] }
 0x56d   : > { %v3610_v40 = vsel %vm3609_vm3, %v3608_v28, %v3570_v47  ;;  %v9830_v28 = vor.u32 %v11627_v30, %v9827_v59  ;;  %v9834_v47 = vor.u32 %v11645_v35, %v9833_v25  ;;  %v11492_v18 = vld [vmem:[#allocation22 + $0xc] sm:$0xf]  ;;  %v10249_v30 = vld [vmem:[#allocation22 + $0x780] sm:$0xf]  ;;  %v11748_v59 = vld [vmem:[#allocation22 + $0x804] sm:$0xf0] }
 0x56e   : > { %v3612_v60 = vsel %vm3611_vm4, %v3610_v40, %v3574_v21  ;;  %v9835_v21 = vld [vmem:[#allocation22 + $0x4d0] sm:$0xf0]  ;;  %v9689_v40 = vld [vmem:[#allocation22 + $0x330] sm:$0xf]  ;;  %5486 = vmatpush.bf16.msra.mxu1 %v9974_v55  ;;  %5448 = vmatpush.bf16.msrb.mxu2 %v9826_v38  ;;  %v9294_v55 = vor.u32 %v11492_v18, %v9291_v20  ;;  %v11731_v25 = vld [vmem:[#allocation22 + $0x784] sm:$0xf] }
 0x56f   : > { %v3614_v10 = vsel %vm3613_vm5, %v3612_v60, %v3578_v2  ;;  %v9970_v2 = vor.u32 %v11679_v22, %v9969_v12  ;;  %v11610_v60 = vld [vmem:[#allocation22 + $0x3b4] sm:$0xf0]  ;;  %5461 = vmatpush.bf16.msra.mxu3 %v9830_v28  ;;  %v11491_v12 = vld [vmem:[#allocation22 + $0x4] sm:$0xf]  ;;  %v9283_v22 = vld [vmem:[#allocation22 + $0x88] sm:$0xf0] }
 0x570   : > { %v9286_v61 = vor.u32 %v11491_v12, %v9283_v22  ;;  %v10251_v35 = vld [vmem:[#allocation22 + $0x808] sm:$0xf0]  ;;  %v10257_v38 = vld [vmem:[#allocation22 + $0x788] sm:$0xf]  ;;  %v11749_v28 = vld [vmem:[#allocation22 + $0x80c] sm:$0xf0] }
 0x571   : > { %5473 = vmatpush.bf16.msrb.mxu0 %v9970_v2  ;;  %v9290_v2 = vor.u32 %v11509_v48, %v9289_v49  ;;  %v11595_v12 = vld [vmem:[#allocation22 + $0x344] sm:$0xf]  ;;  %v9713_v49 = vld [vmem:[#allocation22 + $0x348] sm:$0xf]  ;;  %v11613_v48 = vld [vmem:[#allocation22 + $0x3cc] sm:$0xf0] }
 0x572   : > { %v9715_v18 = vld [vmem:[#allocation22 + $0x3d0] sm:$0xf0] }
 0x573   : > { %v3590_v39 = vpop.permute.xlu1 %3589 }
 0x574   : > { %v3582_v42 = vpop.permute.xlu0 %3581 }
 0x575   : > { %v3616_v63 = vsel %vm3615_vm6, %v3614_v10, %v3582_v42  ;;  %v11593_v10 = vld [vmem:[#allocation22 + $0x334] sm:$0xf]  ;;  %v9838_v42 = vor.u32 %v11628_v51, %v9835_v21  ;;  %5474 = vmatpush.bf16.msrb.mxu0 %v9834_v47  ;;  %v10250_v51 = vor.u32 %v11748_v59, %v10249_v30  ;;  %v10254_v21 = vor.u32 %v11731_v25, %v10251_v35  ;;  %v11732_v47 = vld [vmem:[#allocation22 + $0x78c] sm:$0xf]  ;;  %v9569_v59 = vld [vmem:[#allocation22 + $0x230] sm:$0xf] }
 0x576   : > { %v3618_v1 = vsel %vm3617_vm7, %v3616_v63, %v3586_v54  ;;  %v9691_v54 = vld [vmem:[#allocation22 + $0x3b8] sm:$0xf0]  ;;  %v9697_v63 = vld [vmem:[#allocation22 + $0x338] sm:$0xf]  ;;  %v9714_v25 = vor.u32 %v11613_v48, %v9713_v49  ;;  %v11751_v49 = vld [vmem:[#allocation22 + $0x81c] sm:$0xf0] }
 0x577   : > { %v3620_v37 = vsel %vm3619_vm8, %v3618_v1, %v3590_v39  ;;  %v11611_v39 = vld [vmem:[#allocation22 + $0x3bc] sm:$0xf0]  ;;  %v11594_v1 = vld [vmem:[#allocation22 + $0x33c] sm:$0xf]  ;;  %5487 = vmatpush.bf16.msra.mxu1 %v9838_v42  ;;  %v11714_v42 = vld [vmem:[#allocation22 + $0x6f4] sm:$0xf0] }
 0x578   : > { %v3621_v46 = vpack.c.bf16 %v3620_v37, %v3620_v37  ;;  %v9699_v37 = vld [vmem:[#allocation22 + $0x3c0] sm:$0xf0]  ;;  %v11578_v35 = vld [vmem:[#allocation22 + $0x2b4] sm:$0xf0]  ;;  %v11734_v48 = vld [vmem:[#allocation22 + $0x79c] sm:$0xf] }
 0x579   : > { %v9702_v17 = vor.u32 %v11594_v1, %v9699_v37  ;;  %v11697_v1 = vld [vmem:[#allocation22 + $0x674] sm:$0xf]  ;;  %v10115_v37 = vld [vmem:[#allocation22 + $0x6f8] sm:$0xf0] }
 0x57a   : > { %3698 = vmatmul.bf16.vlgmr.msrb.gmra.mxu1 %v3621_v46  ;;  %v9690_v46 = vor.u32 %v11610_v60, %v9689_v40  ;;  %v10258_v40 = vor.u32 %v11749_v28, %v10257_v38  ;;  %v10259_v60 = vld [vmem:[#allocation22 + $0x810] sm:$0xf0] }
 0x57b   : > { %5488 = vmatpush.bf16.msra.mxu1 %v9702_v17 }
 0x57c   : > { %5449 = vmatpush.bf16.msrb.mxu2 %v9690_v46  ;;  %v10121_v46 = vld [vmem:[#allocation22 + $0x678] sm:$0xf] }
 0x57f   : > { %5489 = vmatpush.bf16.msra.mxu1 %v9566_v41 }
 0x583   : > { %5490 = vmatpush.bf16.msra.mxu1 %v9430_v53  ;;  %v9842_v53 = vor.u32 %v11646_v50, %v9841_v56  ;;  %v9305_v56 = vld [vmem:[#allocation22 + $0x18] sm:$0xf]  ;;  %v11511_v50 = vld [vmem:[#allocation22 + $0x9c] sm:$0xf0] }
 0x587   : > { %5491 = vmatpush.bf16.msra.mxu1 %v9294_v55 }
 0x5f7   : > { %v3699_v4 = vpop.f32.mrf.mxu1 }
 0x5f8   : > { %v3700_v7 = vadd.f32 %v12267_v0, %v3699_v4  ;;  %v9694_v0 = vor.u32 %v11593_v10, %v9691_v54  ;;  %v9698_v4 = vor.u32 %v11611_v39, %v9697_v63  ;;  %v10113_v10 = vld [vmem:[#allocation22 + $0x670] sm:$0xf]  ;;  %v10262_v63 = vor.u32 %v11732_v47, %v10259_v60  ;;  %v9577_v47 = vld [vmem:[#allocation22 + $0x238] sm:$0xf]  ;;  %v11562_v60 = vld [vmem:[#allocation22 + $0x23c] sm:$0xf] }
 0x5f9   : > { %v10114_v39 = vor.u32 %v11714_v42, %v10113_v10  ;;  %v9579_v10 = vld [vmem:[#allocation22 + $0x2c0] sm:$0xf0] }
 0x5fa   : > { %v14315_v24 = vadd.f32 %v12411_v8, %v3700_v7  ;;  %v9553_v7 = vld [vmem:[#allocation22 + $0x220] sm:$0xf]  ;;  %v11576_v8 = vld [vmem:[#allocation22 + $0x2a4] sm:$0xf0]  ;;  %5462 = vmatpush.bf16.msra.mxu3 %v9694_v0  ;;  %5475 = vmatpush.bf16.msrb.mxu0 %v9698_v4  ;;  %v10118_v4 = vor.u32 %v11697_v1, %v10115_v37 }
 0x5fb   : > { %v9554_v31 = vor.u32 %v11576_v8, %v9553_v7  ;;  %v11715_v7 = vld [vmem:[#allocation22 + $0x6fc] sm:$0xf0]  ;;  %v11698_v8 = vld [vmem:[#allocation22 + $0x67c] sm:$0xf]  ;;  %5536 = vmatpush.bf16.msrb.mxu1 %v10262_v63  ;;  %v11544_v37 = vld [vmem:[#allocation22 + $0x1a4] sm:$0xf0] }
 0x5fc   : > { %3706 = vadd.xlane.f32.xlu0 %v14315_v24  ;;  %v10122_v17 = vor.u32 %v11715_v7, %v10121_v46  ;;  %v11527_v46 = vld [vmem:[#allocation22 + $0x124] sm:$0xf]  ;;  %v9582_v7 = vor.u32 %v11562_v60, %v9579_v10  ;;  %v9993_v60 = vld [vmem:[#allocation22 + $0x570] sm:$0xf]  ;;  %v11682_v10 = vld [vmem:[#allocation22 + $0x5f4] sm:$0xf0] }
 0x5fd   : > { %5450 = vmatpush.bf16.msrb.mxu2 %v9554_v31  ;;  %v9979_v31 = vld [vmem:[#allocation22 + $0x5e8] sm:$0xf0] }
 0x5fe   : > { %5476 = vmatpush.bf16.msrb.mxu0 %v9562_v36  ;;  %v9978_v36 = vor.u32 %v11680_v58, %v9977_v44  ;;  %v9982_v26 = vor.u32 %v11663_v6, %v9979_v31  ;;  %v12268_v44 = vld [vmem:[#allocation19] ss:$0 sm:$0xff]  ;;  %v9865_v6 = vld [vmem:[#allocation22 + $0x468] sm:$0xf] }
 0x5ff   : > { %v3701_v45 = vpop.f32.mrf.mxu1 }
 0x600   : > { %v11559_v45 = vld [vmem:[#allocation22 + $0x224] sm:$0xf] }
 0x601   : > { %v9558_v29 = vor.u32 %v11559_v45, %v9555_v19  ;;  %5451 = vmatpush.bf16.msrb.mxu2 %v9418_v43  ;;  %v10123_v45 = vld [vmem:[#allocation22 + $0x700] sm:$0xf0]  ;;  %v9849_v43 = vld [vmem:[#allocation22 + $0x458] sm:$0xf] }
 0x602   : > { %5477 = vmatpush.bf16.msrb.mxu0 %v9426_v32  ;;  %v10126_v19 = vor.u32 %v11698_v8, %v10123_v45  ;;  %v11630_v32 = vld [vmem:[#allocation22 + $0x45c] sm:$0xf]  ;;  %v9441_v8 = vld [vmem:[#allocation22 + $0x128] sm:$0xf]  ;;  %v11545_v45 = vld [vmem:[#allocation22 + $0x1ac] sm:$0xf0] }
 0x603   : > { %5463 = vmatpush.bf16.msra.mxu3 %v9558_v29  ;;  %v9985_v29 = vld [vmem:[#allocation22 + $0x568] sm:$0xf] }
 0x604   : > { %5537 = vmatpush.bf16.msrb.mxu1 %v10126_v19  ;;  %v9443_v19 = vld [vmem:[#allocation22 + $0x1b0] sm:$0xf0] }
 0x605   : > { %5452 = vmatpush.bf16.msrb.mxu2 %v9282_v33  ;;  %v9707_v33 = vld [vmem:[#allocation22 + $0x3c8] sm:$0xf0] }
 0x606   : > { %5478 = vmatpush.bf16.msrb.mxu0 %v9290_v2  ;;  %v11596_v2 = vld [vmem:[#allocation22 + $0x34c] sm:$0xf]  ;;  %v9710_v55 = vor.u32 %v11595_v12, %v9707_v33  ;;  %v10267_v12 = vld [vmem:[#allocation22 + $0x818] sm:$0xf0]  ;;  %v10273_v33 = vld [vmem:[#allocation22 + $0x798] sm:$0xf] }
 0x607   : > { %5464 = vmatpush.bf16.msra.mxu3 %v9422_v9  ;;  %v11647_v9 = vld [vmem:[#allocation22 + $0x4dc] sm:$0xf0]  ;;  %v9718_v28 = vor.u32 %v11596_v2, %v9715_v18 }
 0x608   : > { %v9850_v5 = vor.u32 %v11647_v9, %v9849_v43  ;;  %5538 = vmatpush.bf16.msrb.mxu1 %v9990_v16  ;;  %v9307_v43 = vld [vmem:[#allocation22 + $0xa0] sm:$0xf0] }
 0x609   : > { %5497 = vmatpush.bf16.msra.mxu2 %v10250_v51  ;;  %v11561_v51 = vld [vmem:[#allocation22 + $0x234] sm:$0xf] }
 0x60a   : > { %5523 = vmatpush.bf16.msra.mxu0 %v10258_v40  ;;  %v11579_v40 = vld [vmem:[#allocation22 + $0x2bc] sm:$0xf0] }
 0x60b   : > { %5465 = vmatpush.bf16.msra.mxu3 %v9286_v61  ;;  %v9578_v1 = vor.u32 %v11579_v40, %v9577_v47 }
 0x60d   : > { %5498 = vmatpush.bf16.msra.mxu2 %v10114_v39  ;;  %v9433_v39 = vld [vmem:[#allocation22 + $0x120] sm:$0xf] }
 0x60e   : > { %5524 = vmatpush.bf16.msra.mxu0 %v10122_v17  ;;  %v11528_v17 = vld [vmem:[#allocation22 + $0x12c] sm:$0xf]  ;;  %v9434_v31 = vor.u32 %v11544_v37, %v9433_v39  ;;  %v9995_v39 = vld [vmem:[#allocation22 + $0x5f8] sm:$0xf0]  ;;  %v11683_v37 = vld [vmem:[#allocation22 + $0x5fc] sm:$0xf0] }
 0x60f   : > { %5510 = vmatpush.bf16.msrb.mxu3 %v10254_v21  ;;  %v9571_v21 = vld [vmem:[#allocation22 + $0x2b8] sm:$0xf0] }
 0x610   : > { %v9574_v63 = vor.u32 %v11561_v51, %v9571_v21  ;;  %v10137_v51 = vld [vmem:[#allocation22 + $0x688] sm:$0xf]  ;;  %v11717_v21 = vld [vmem:[#allocation22 + $0x70c] sm:$0xf0] }
 0x611   : > { %5499 = vmatpush.bf16.msra.mxu2 %v9978_v36  ;;  %v9297_v36 = vld [vmem:[#allocation22 + $0x10] sm:$0xf] }
 0x613   : > { %5511 = vmatpush.bf16.msrb.mxu3 %v10118_v4 }
 0x615   : > { %5500 = vmatpush.bf16.msra.mxu2 %v9842_v53  ;;  %v9306_v53 = vor.u32 %v11511_v50, %v9305_v56  ;;  %v11597_v56 = vld [vmem:[#allocation22 + $0x354] sm:$0xf]  ;;  %v9723_v50 = vld [vmem:[#allocation22 + $0x3d8] sm:$0xf0] }
 0x617   : > { %5512 = vmatpush.bf16.msrb.mxu3 %v9982_v26  ;;  %v9442_v26 = vor.u32 %v11545_v45, %v9441_v8  ;;  %v9857_v8 = vld [vmem:[#allocation22 + $0x460] sm:$0xf]  ;;  %v11648_v45 = vld [vmem:[#allocation22 + $0x4e4] sm:$0xf0] }
 0x66f   : > { %v3707_v52 = vpop.xlane.xlu0 %3706 }
 0x670   : > { %v3708_v3 = vmul.f32 %v3707_v52, %v13304_v13  ;;  %v9851_v52 = vld [vmem:[#allocation22 + $0x4e0] sm:$0xf0] }
 0x671   : > { %v9854_v22 = vor.u32 %v11630_v32, %v9851_v52  ;;  %v9302_v32 = vor.u32 %v11493_v57, %v9299_v15  ;;  %v9721_v57 = vld [vmem:[#allocation22 + $0x350] sm:$0xf]  ;;  %v11614_v15 = vld [vmem:[#allocation22 + $0x3d4] sm:$0xf0] }
 0x672   : > { %v14320_v23 = vsub.f32 %v14315_v24, %v3708_v3  ;;  %v9846_v3 = vor.u32 %v11629_v62, %v9843_v34  ;;  %v12269_v62 = vld [vmem:[#allocation21] ss:$0 sm:$0xff] }
 0x673   : > { %5539 = vmatpush.bf16.msrb.mxu1 %v9854_v22  ;;  %v11494_v34 = vld [vmem:[#allocation22 + $0x1c] sm:$0xf] }
 0x674   : > { %v3710_v11 = vmul.f32 %v14320_v23, %v14320_v23  ;;  %5513 = vmatpush.bf16.msrb.mxu3 %v9846_v3  ;;  %v10265_v3 = vld [vmem:[#allocation22 + $0x790] sm:$0xf] }
 0x676   : > { %3711 = vadd.xlane.f32.xlu2 %v3710_v11  ;;  %v9705_v11 = vld [vmem:[#allocation22 + $0x340] sm:$0xf] }
 0x677   : > { %v9706_v30 = vor.u32 %v11612_v27, %v9705_v11  ;;  %5540 = vmatpush.bf16.msrb.mxu1 %v9718_v28  ;;  %v11750_v11 = vld [vmem:[#allocation22 + $0x814] sm:$0xf0]  ;;  %v11733_v27 = vld [vmem:[#allocation22 + $0x794] sm:$0xf] }
 0x678   : > { %5514 = vmatpush.bf16.msrb.mxu3 %v9710_v55  ;;  %v10266_v2 = vor.u32 %v11750_v11, %v10265_v3  ;;  %v10270_v18 = vor.u32 %v11733_v27, %v10267_v12  ;;  %v10274_v55 = vor.u32 %v11751_v49, %v10273_v33  ;;  %v10139_v28 = vld [vmem:[#allocation22 + $0x710] sm:$0xf0]  ;;  %v9587_v27 = vld [vmem:[#allocation22 + $0x2c8] sm:$0xf0]  ;;  %v9593_v12 = vld [vmem:[#allocation22 + $0x248] sm:$0xf] }
 0x679   : > { %5501 = vmatpush.bf16.msra.mxu2 %v9706_v30  ;;  %v11716_v30 = vld [vmem:[#allocation22 + $0x704] sm:$0xf0]  ;;  %v11581_v33 = vld [vmem:[#allocation22 + $0x2cc] sm:$0xf0]  ;;  %v9595_v49 = vld [vmem:[#allocation22 + $0x2d0] sm:$0xf0] }
 0x67b   : > { %5541 = vmatpush.bf16.msrb.mxu1 %v9582_v7 }
 0x67c   : > { %5515 = vmatpush.bf16.msrb.mxu3 %v9574_v63  ;;  %v11665_v63 = vld [vmem:[#allocation22 + $0x574] sm:$0xf] }
 0x67d   : > { %v9998_v7 = vor.u32 %v11665_v63, %v9995_v39  ;;  %v9321_v63 = vld [vmem:[#allocation22 + $0x28] sm:$0xf]  ;;  %v11513_v39 = vld [vmem:[#allocation22 + $0xac] sm:$0xf0] }
 0x6e9   : > { %v3712_v54 = vpop.xlane.xlu2 %3711 }
 0x6ea   : > { %v3713_v0 = vmul.f32 %v3712_v54, %v13304_v13  ;;  %v11681_v13 = vld [vmem:[#allocation22 + $0x5ec] sm:$0xf0]  ;;  %v9570_v54 = vor.u32 %v11578_v35, %v9569_v59  ;;  %v10131_v35 = vld [vmem:[#allocation22 + $0x708] sm:$0xf0] }
 0x6eb   : > { %v9986_v41 = vor.u32 %v11681_v13, %v9985_v29  ;;  %v11510_v13 = vld [vmem:[#allocation22 + $0x94] sm:$0xf0] }
 0x6ec   : > { %v14325_v14 = vadd.f32 1e-05, %v3713_v0  ;;  %v9435_v0 = vld [vmem:[#allocation22 + $0x1a8] sm:$0xf0]  ;;  %5502 = vmatpush.bf16.msra.mxu2 %v9570_v54  ;;  %v9298_v9 = vor.u32 %v11510_v13, %v9297_v36  ;;  %v9867_v36 = vld [vmem:[#allocation22 + $0x4f0] sm:$0xf0] }
 0x6ed   : > { %5525 = vmatpush.bf16.msra.mxu0 %v9986_v41  ;;  %v9438_v29 = vor.u32 %v11527_v46, %v9435_v0  ;;  %v9446_v41 = vor.u32 %v11528_v17, %v9443_v19  ;;  %v11666_v46 = vld [vmem:[#allocation22 + $0x57c] sm:$0xf]  ;;  %v10003_v0 = vld [vmem:[#allocation22 + $0x600] sm:$0xf0] }
 0x6ee   : > { %12341 = vrsqrt.f32 %v14325_v14  ;;  %vm3721_vm10 = vweird.f32 %v14325_v14  ;;  %v10006_v19 = vor.u32 %v11666_v46, %v10003_v0  ;;  %v10281_v46 = vld [vmem:[#allocation22 + $0x7a0] sm:$0xf]  ;;  %v11752_v0 = vld [vmem:[#allocation22 + $0x824] sm:$0xf0] }
 0x6ef   : > { %5516 = vmatpush.bf16.msrb.mxu3 %v9438_v29  ;;  %5542 = vmatpush.bf16.msrb.mxu1 %v9446_v41  ;;  %v11632_v29 = vld [vmem:[#allocation22 + $0x46c] sm:$0xf] }
 0x6f0   : > { %5503 = vmatpush.bf16.msra.mxu2 %v9434_v31  ;;  %v11649_v31 = vld [vmem:[#allocation22 + $0x4ec] sm:$0xf0]  ;;  %v9870_v41 = vor.u32 %v11632_v29, %v9867_v36  ;;  %v10282_v29 = vor.u32 %v11752_v0, %v10281_v46  ;;  %v11582_v0 = vld [vmem:[#allocation22 + $0x2d4] sm:$0xf0] }
 0x6f1   : > { %5526 = vmatpush.bf16.msra.mxu0 %v9850_v5  ;;  %v9310_v5 = vor.u32 %v11494_v34, %v9307_v43  ;;  %v11598_v34 = vld [vmem:[#allocation22 + $0x35c] sm:$0xf]  ;;  %v9731_v43 = vld [vmem:[#allocation22 + $0x3e0] sm:$0xf0]  ;;  %v9601_v46 = vld [vmem:[#allocation22 + $0x250] sm:$0xf] }
 0x6f2   : > { %v9734_v11 = vor.u32 %v11598_v34, %v9731_v43 }
 0x6f3   : > { %5517 = vmatpush.bf16.msrb.mxu3 %v9302_v32  ;;  %5543 = vmatpush.bf16.msrb.mxu1 %v9310_v5  ;;  %v9726_v32 = vor.u32 %v11597_v56, %v9723_v50  ;;  %v11563_v5 = vld [vmem:[#allocation22 + $0x244] sm:$0xf]  ;;  %v10153_v56 = vld [vmem:[#allocation22 + $0x698] sm:$0xf]  ;;  %v11719_v50 = vld [vmem:[#allocation22 + $0x71c] sm:$0xf0] }
 0x6f4   : > { %v12342_v61 = vpop.eup %12341  ;;  %5504 = vmatpush.bf16.msra.mxu2 %v9298_v9  ;;  %v9722_v9 = vor.u32 %v11614_v15, %v9721_v57 }
 0x6f5   : > { %v3716_v20 = vmul.f32 %v12342_v61, %v14325_v14  ;;  %vm3722_vm9 = vweird.f32 %v12342_v61  ;;  %5527 = vmatpush.bf16.msra.mxu0 %v9714_v25  ;;  %v11699_v25 = vld [vmem:[#allocation22 + $0x684] sm:$0xf] }
 0x6f6   : > { %vm14331_vm11 = vmor %vm3721_vm10, %vm3722_vm9  ;;  %v10134_v40 = vor.u32 %v11699_v25, %v10131_v35  ;;  %v9457_v25 = vld [vmem:[#allocation22 + $0x138] sm:$0xf]  ;;  %v11547_v35 = vld [vmem:[#allocation22 + $0x1bc] sm:$0xf0] }
 0x6f7   : > { %v3717_v38 = vmul.f32 %v12342_v61, %v3716_v20  ;;  %v10129_v20 = vld [vmem:[#allocation22 + $0x680] sm:$0xf] }
 0x6f8   : > { %v10130_v47 = vor.u32 %v11716_v30, %v10129_v20  ;;  %v9594_v20 = vor.u32 %v11581_v33, %v9593_v12  ;;  %v11668_v12 = vld [vmem:[#allocation22 + $0x58c] sm:$0xf]  ;;  %v10019_v33 = vld [vmem:[#allocation22 + $0x610] sm:$0xf0] }
 0x6f9   : > { %v3718_v42 = vmul.f32 0.5, %v3717_v38  ;;  %5528 = vmatpush.bf16.msra.mxu0 %v9578_v1  ;;  %v11700_v38 = vld [vmem:[#allocation22 + $0x68c] sm:$0xf]  ;;  %v10001_v1 = vld [vmem:[#allocation22 + $0x578] sm:$0xf] }
 0x6fa   : > { %v10142_v54 = vor.u32 %v11700_v38, %v10139_v28  ;;  %v10002_v17 = vor.u32 %v11683_v37, %v10001_v1  ;;  %v9313_v38 = vld [vmem:[#allocation22 + $0x20] sm:$0xf]  ;;  %v11496_v1 = vld [vmem:[#allocation22 + $0x2c] sm:$0xf]  ;;  %v9323_v37 = vld [vmem:[#allocation22 + $0xb0] sm:$0xf0] }
 0x6fb   : > { %v3719_v4 = vsub.f32 1.5, %v3718_v42  ;;  %v10138_v42 = vor.u32 %v11717_v21, %v10137_v51  ;;  %v11530_v51 = vld [vmem:[#allocation22 + $0x13c] sm:$0xf]  ;;  %v9459_v21 = vld [vmem:[#allocation22 + $0x1c0] sm:$0xf0] }
 0x6fd   : > { %v3720_v58 = vmul.f32 %v12342_v61, %v3719_v4  ;;  %5529 = vmatpush.bf16.msra.mxu0 %v9442_v26  ;;  %v9994_v4 = vor.u32 %v11682_v10, %v9993_v60  ;;  %v9858_v26 = vor.u32 %v11648_v45, %v9857_v8  ;;  %v11495_v60 = vld [vmem:[#allocation22 + $0x24] sm:$0xf]  ;;  %v9315_v10 = vld [vmem:[#allocation22 + $0xa8] sm:$0xf0]  ;;  %v10289_v8 = vld [vmem:[#allocation22 + $0x7a8] sm:$0xf] }
 0x6ff   : > { %v3724_v14 = vsel %vm14331_vm11, %v12342_v61, %v3720_v58  ;;  %v9859_v58 = vld [vmem:[#allocation22 + $0x4e8] sm:$0xf0] }
 0x700   : > { %v3725_v16 = vmul.f32 %v3724_v14, %v14320_v23  ;;  %v10275_v23 = vld [vmem:[#allocation22 + $0x820] sm:$0xf0]  ;;  %v9866_v14 = vor.u32 %v11649_v31, %v9865_v6  ;;  %v9322_v6 = vor.u32 %v11513_v39, %v9321_v63  ;;  %v9326_v31 = vor.u32 %v11496_v1, %v9323_v37  ;;  %v11600_v63 = vld [vmem:[#allocation22 + $0x36c] sm:$0xf]  ;;  %v9747_v39 = vld [vmem:[#allocation22 + $0x3f0] sm:$0xf0] }
 0x701   : > { %5530 = vmatpush.bf16.msra.mxu0 %v9306_v53  ;;  %v10278_v59 = vor.u32 %v11734_v48, %v10275_v23  ;;  %v11580_v53 = vld [vmem:[#allocation22 + $0x2c4] sm:$0xf0]  ;;  %v9590_v23 = vor.u32 %v11563_v5, %v9587_v27  ;;  %v11685_v27 = vld [vmem:[#allocation22 + $0x60c] sm:$0xf0] }
 0x702   : > { %v3729_v52 = vmul.f32 %v12268_v44, %v3725_v16  ;;  %v11631_v44 = vld [vmem:[#allocation22 + $0x464] sm:$0xf]  ;;  %v11615_v16 = vld [vmem:[#allocation22 + $0x3dc] sm:$0xf0]  ;;  %v10017_v5 = vld [vmem:[#allocation22 + $0x588] sm:$0xf] }
 0x703   : > { %v9862_v13 = vor.u32 %v11631_v44, %v9859_v58  ;;  %v11736_v44 = vld [vmem:[#allocation22 + $0x7ac] sm:$0xf]  ;;  %v10291_v58 = vld [vmem:[#allocation22 + $0x830] sm:$0xf0] }
 0x704   : > { %v3733_v22 = vadd.f32 %v12269_v62, %v3729_v52  ;;  %v9729_v62 = vld [vmem:[#allocation22 + $0x358] sm:$0xf]  ;;  %v9585_v52 = vld [vmem:[#allocation22 + $0x240] sm:$0xf]  ;;  %v10294_v15 = vor.u32 %v11736_v44, %v10291_v58  ;;  %v11566_v44 = vld [vmem:[#allocation22 + $0x25c] sm:$0xf] }
 0x705   : > { %v9730_v3 = vor.u32 %v11615_v16, %v9729_v62  ;;  %v9586_v48 = vor.u32 %v11580_v53, %v9585_v52  ;;  %v11702_v62 = vld [vmem:[#allocation22 + $0x69c] sm:$0xf]  ;;  %v10155_v16 = vld [vmem:[#allocation22 + $0x720] sm:$0xf0]  ;;  %v10154_v52 = vor.u32 %v11719_v50, %v10153_v56  ;;  %v11532_v56 = vld [vmem:[#allocation22 + $0x14c] sm:$0xf] }
 0x706   : > { %v14338_v61 = vpack.c.bf16 %v3733_v22, %v3733_v22  ;;  %v11564_v22 = vld [vmem:[#allocation22 + $0x24c] sm:$0xf]  ;;  %v10158_v53 = vor.u32 %v11702_v62, %v10155_v16  ;;  %v9611_v58 = vld [vmem:[#allocation22 + $0x2e0] sm:$0xf0]  ;;  %v9475_v50 = vld [vmem:[#allocation22 + $0x1d0] sm:$0xf0] }
 0x707   : > { %v9598_v30 = vor.u32 %v11564_v22, %v9595_v49  ;;  %v9329_v62 = vld [vmem:[#allocation22 + $0x30] sm:$0xf] }
 0x708   : > { %5453 = vmatmul.bf16.vlgmr.msrb.gmra.mxu2 %v14338_v61  ;;  %5466 = vmatmul.bf16.vlgmr.msra.gmra.mxu3 %v14338_v61 }
 0x709   : > { %5479 = vmatmul.bf16.vlgmr.msrb.gmra.mxu0 %v14338_v61  ;;  %5492 = vmatmul.bf16.vlgmr.msra.gmra.mxu1 %v14338_v61 }
 0x70a   : > { %5549 = vmatpush.bf16.msrb.mxu2 %v10266_v2  ;;  %5562 = vmatpush.bf16.msra.mxu3 %v10270_v18  ;;  %v9449_v2 = vld [vmem:[#allocation22 + $0x130] sm:$0xf]  ;;  %v11546_v18 = vld [vmem:[#allocation22 + $0x1b4] sm:$0xf0] }
 0x70b   : > { %5575 = vmatpush.bf16.msrb.mxu0 %v10274_v55  ;;  %5588 = vmatpush.bf16.msra.mxu1 %v10278_v59  ;;  %v11529_v55 = vld [vmem:[#allocation22 + $0x134] sm:$0xf]  ;;  %v9451_v59 = vld [vmem:[#allocation22 + $0x1b8] sm:$0xf0]  ;;  %v9450_v28 = vor.u32 %v11546_v18, %v9449_v2  ;;  %v10018_v2 = vor.u32 %v11685_v27, %v10017_v5  ;;  %v10022_v18 = vor.u32 %v11668_v12, %v10019_v33  ;;  %v9339_v27 = vld [vmem:[#allocation22 + $0xc0] sm:$0xf0] }
 0x70c   : > { %v11498_v5 = vld [vmem:[#allocation22 + $0x3c] sm:$0xf]  ;;  %v10297_v12 = vld [vmem:[#allocation22 + $0x7b0] sm:$0xf]  ;;  %v11754_v33 = vld [vmem:[#allocation22 + $0x834] sm:$0xf0] }
 0x70e   : > { %5550 = vmatpush.bf16.msrb.mxu2 %v10130_v47  ;;  %5563 = vmatpush.bf16.msra.mxu3 %v10134_v40  ;;  %v9454_v47 = vor.u32 %v11529_v55, %v9451_v59  ;;  %v11512_v40 = vld [vmem:[#allocation22 + $0xa4] sm:$0xf0]  ;;  %v9881_v55 = vld [vmem:[#allocation22 + $0x478] sm:$0xf]  ;;  %v11651_v59 = vld [vmem:[#allocation22 + $0x4fc] sm:$0xf0] }
 0x70f   : > { %5576 = vmatpush.bf16.msrb.mxu0 %v10138_v42  ;;  %5589 = vmatpush.bf16.msra.mxu1 %v10142_v54  ;;  %v9458_v42 = vor.u32 %v11547_v35, %v9457_v25  ;;  %v9462_v54 = vor.u32 %v11530_v51, %v9459_v21  ;;  %v9314_v45 = vor.u32 %v11512_v40, %v9313_v38  ;;  %v11634_v25 = vld [vmem:[#allocation22 + $0x47c] sm:$0xf]  ;;  %v9883_v35 = vld [vmem:[#allocation22 + $0x500] sm:$0xf0]  ;;  %v9737_v38 = vld [vmem:[#allocation22 + $0x360] sm:$0xf] }
 0x710   : > { %v9886_v40 = vor.u32 %v11634_v25, %v9883_v35  ;;  %v10298_v25 = vor.u32 %v11754_v33, %v10297_v12  ;;  %v9617_v12 = vld [vmem:[#allocation22 + $0x260] sm:$0xf]  ;;  %v11584_v33 = vld [vmem:[#allocation22 + $0x2e4] sm:$0xf0] }
 0x712   : > { %5551 = vmatpush.bf16.msrb.mxu2 %v9994_v4  ;;  %5564 = vmatpush.bf16.msra.mxu3 %v9998_v7  ;;  %v11735_v4 = vld [vmem:[#allocation22 + $0x7a4] sm:$0xf]  ;;  %v10283_v7 = vld [vmem:[#allocation22 + $0x828] sm:$0xf0] }
 0x713   : > { %5577 = vmatpush.bf16.msrb.mxu0 %v10002_v17  ;;  %5590 = vmatpush.bf16.msra.mxu1 %v10006_v19  ;;  %v9318_v17 = vor.u32 %v11495_v60, %v9315_v10  ;;  %v11753_v19 = vld [vmem:[#allocation22 + $0x82c] sm:$0xf0]  ;;  %v10286_v36 = vor.u32 %v11735_v4, %v10283_v7  ;;  %v11599_v60 = vld [vmem:[#allocation22 + $0x364] sm:$0xf]  ;;  %v9739_v10 = vld [vmem:[#allocation22 + $0x3e8] sm:$0xf0]  ;;  %v9750_v7 = vor.u32 %v11600_v63, %v9747_v39 }
 0x714   : > { %v10290_v57 = vor.u32 %v11753_v19, %v10289_v8  ;;  %v9742_v37 = vor.u32 %v11599_v60, %v9739_v10  ;;  %v11565_v8 = vld [vmem:[#allocation22 + $0x254] sm:$0xf]  ;;  %v11583_v19 = vld [vmem:[#allocation22 + $0x2dc] sm:$0xf0]  ;;  %v10169_v60 = vld [vmem:[#allocation22 + $0x6a8] sm:$0xf] }
 0x715   : > { %v11721_v10 = vld [vmem:[#allocation22 + $0x72c] sm:$0xf0] }
 0x716   : > { %5552 = vmatpush.bf16.msrb.mxu2 %v9858_v26  ;;  %5565 = vmatpush.bf16.msra.mxu3 %v9862_v13  ;;  %v10145_v26 = vld [vmem:[#allocation22 + $0x690] sm:$0xf]  ;;  %v11718_v13 = vld [vmem:[#allocation22 + $0x714] sm:$0xf0] }
 0x717   : > { %5578 = vmatpush.bf16.msrb.mxu0 %v9866_v14  ;;  %5591 = vmatpush.bf16.msra.mxu1 %v9870_v41  ;;  %v11701_v14 = vld [vmem:[#allocation22 + $0x694] sm:$0xf]  ;;  %v10147_v41 = vld [vmem:[#allocation22 + $0x718] sm:$0xf0]  ;;  %v10146_v34 = vor.u32 %v11718_v13, %v10145_v26  ;;  %v9614_v13 = vor.u32 %v11566_v44, %v9611_v58 }
 0x718   : > { %5505 = vmatmul.bf16.vlgmr.msra.gmra.mxu2 %v14338_v61  ;;  %5518 = vmatmul.bf16.vlgmr.msrb.gmra.mxu3 %v14338_v61  ;;  %v10150_v43 = vor.u32 %v11701_v14, %v10147_v41  ;;  %v9473_v14 = vld [vmem:[#allocation22 + $0x148] sm:$0xf]  ;;  %v11549_v41 = vld [vmem:[#allocation22 + $0x1cc] sm:$0xf0] }
 0x719   : > { %5531 = vmatmul.bf16.vlgmr.msra.gmra.mxu0 %v14338_v61  ;;  %5544 = vmatmul.bf16.vlgmr.msrb.gmra.mxu1 %v14338_v61 }
 0x71a   : > { %5553 = vmatpush.bf16.msrb.mxu2 %v9722_v9  ;;  %5566 = vmatpush.bf16.msra.mxu3 %v9726_v32  ;;  %v10009_v9 = vld [vmem:[#allocation22 + $0x580] sm:$0xf]  ;;  %v11684_v32 = vld [vmem:[#allocation22 + $0x604] sm:$0xf0] }
 0x71b   : > { %5579 = vmatpush.bf16.msrb.mxu0 %v9730_v3  ;;  %5592 = vmatpush.bf16.msra.mxu1 %v9734_v11  ;;  %v11667_v3 = vld [vmem:[#allocation22 + $0x584] sm:$0xf]  ;;  %v10011_v11 = vld [vmem:[#allocation22 + $0x608] sm:$0xf0]  ;;  %v10010_v22 = vor.u32 %v11684_v32, %v10009_v9  ;;  %v11497_v9 = vld [vmem:[#allocation22 + $0x34] sm:$0xf] }
 0x71c   : > { %v10014_v49 = vor.u32 %v11667_v3, %v10011_v11  ;;  %v9331_v32 = vld [vmem:[#allocation22 + $0xb8] sm:$0xf0]  ;;  %v9337_v3 = vld [vmem:[#allocation22 + $0x38] sm:$0xf]  ;;  %v11515_v11 = vld [vmem:[#allocation22 + $0xbc] sm:$0xf0] }
 0x71e   : > { %5554 = vmatpush.bf16.msrb.mxu2 %v9586_v48  ;;  %5567 = vmatpush.bf16.msra.mxu3 %v9590_v23  ;;  %v9873_v48 = vld [vmem:[#allocation22 + $0x470] sm:$0xf]  ;;  %v11650_v23 = vld [vmem:[#allocation22 + $0x4f4] sm:$0xf0] }
 0x71f   : > { %5580 = vmatpush.bf16.msrb.mxu0 %v9594_v20  ;;  %5593 = vmatpush.bf16.msra.mxu1 %v9598_v30  ;;  %v11633_v20 = vld [vmem:[#allocation22 + $0x474] sm:$0xf]  ;;  %v9875_v30 = vld [vmem:[#allocation22 + $0x4f8] sm:$0xf0]  ;;  %v9874_v51 = vor.u32 %v11650_v23, %v9873_v48  ;;  %v10305_v48 = vld [vmem:[#allocation22 + $0x7b8] sm:$0xf] }
 0x720   : > { %v9878_v21 = vor.u32 %v11633_v20, %v9875_v30  ;;  %v11738_v20 = vld [vmem:[#allocation22 + $0x7bc] sm:$0xf]  ;;  %v10307_v30 = vld [vmem:[#allocation22 + $0x840] sm:$0xf0] }
 0x722   : > { %5555 = vmatpush.bf16.msrb.mxu2 %v9450_v28  ;;  %5568 = vmatpush.bf16.msra.mxu3 %v9454_v47  ;;  %v11616_v28 = vld [vmem:[#allocation22 + $0x3e4] sm:$0xf0]  ;;  %v9882_v47 = vor.u32 %v11651_v59, %v9881_v55  ;;  %v9338_v55 = vor.u32 %v11515_v11, %v9337_v3  ;;  %v9342_v59 = vor.u32 %v11498_v5, %v9339_v27  ;;  %v11602_v3 = vld [vmem:[#allocation22 + $0x37c] sm:$0xf]  ;;  %v9763_v11 = vld [vmem:[#allocation22 + $0x400] sm:$0xf0] }
 0x723   : > { %5581 = vmatpush.bf16.msrb.mxu0 %v9458_v42  ;;  %5594 = vmatpush.bf16.msra.mxu1 %v9462_v54  ;;  %v9745_v42 = vld [vmem:[#allocation22 + $0x368] sm:$0xf]  ;;  %v11617_v54 = vld [vmem:[#allocation22 + $0x3ec] sm:$0xf0]  ;;  %v9738_v1 = vor.u32 %v11616_v28, %v9737_v38  ;;  %v10310_v28 = vor.u32 %v11738_v20, %v10307_v30  ;;  %v11568_v20 = vld [vmem:[#allocation22 + $0x26c] sm:$0xf] }
 0x724   : > { %v9746_v4 = vor.u32 %v11617_v54, %v9745_v42  ;;  %v11704_v42 = vld [vmem:[#allocation22 + $0x6ac] sm:$0xf]  ;;  %v10171_v54 = vld [vmem:[#allocation22 + $0x730] sm:$0xf0] }
 0x725   : > { %v9627_v30 = vld [vmem:[#allocation22 + $0x2f0] sm:$0xf0] }
 0x726   : > { %5556 = vmatpush.bf16.msrb.mxu2 %v9314_v45  ;;  %5569 = vmatpush.bf16.msra.mxu3 %v9318_v17  ;;  %v9603_v45 = vld [vmem:[#allocation22 + $0x2d8] sm:$0xf0]  ;;  %v9609_v17 = vld [vmem:[#allocation22 + $0x258] sm:$0xf] }
 0x727   : > { %5582 = vmatpush.bf16.msrb.mxu0 %v9322_v6  ;;  %5595 = vmatpush.bf16.msra.mxu1 %v9326_v31  ;;  %v9602_v6 = vor.u32 %v11582_v0, %v9601_v46  ;;  %v9606_v31 = vor.u32 %v11565_v8, %v9603_v45  ;;  %v9610_v26 = vor.u32 %v11583_v19, %v9609_v17  ;;  %v10033_v8 = vld [vmem:[#allocation22 + $0x598] sm:$0xf]  ;;  %v11687_v45 = vld [vmem:[#allocation22 + $0x61c] sm:$0xf0]  ;;  %v11670_v17 = vld [vmem:[#allocation22 + $0x59c] sm:$0xf] }
 0x728   : > { %v10170_v46 = vor.u32 %v11721_v10, %v10169_v60  ;;  %v10174_v0 = vor.u32 %v11704_v42, %v10171_v54  ;;  %v10035_v19 = vld [vmem:[#allocation22 + $0x620] sm:$0xf0]  ;;  %v11534_v60 = vld [vmem:[#allocation22 + $0x15c] sm:$0xf]  ;;  %v9345_v42 = vld [vmem:[#allocation22 + $0x40] sm:$0xf] }
 0x729   : > { %5557 = vmatmul.bf16.vlgmr.msrb.gmra.mxu2 %v14338_v61  ;;  %5570 = vmatmul.bf16.vlgmr.msra.gmra.mxu3 %v14338_v61  ;;  %v9491_v10 = vld [vmem:[#allocation22 + $0x1e0] sm:$0xf0] }
 0x72a   : > { %5601 = vmatpush.bf16.msra.mxu2 %v10282_v29  ;;  %5614 = vmatpush.bf16.msrb.mxu3 %v10286_v36  ;;  %v9465_v29 = vld [vmem:[#allocation22 + $0x140] sm:$0xf]  ;;  %v11548_v36 = vld [vmem:[#allocation22 + $0x1c4] sm:$0xf0] }
 0x72b   : > { %5627 = vmatpush.bf16.msra.mxu0 %v10290_v57  ;;  %5640 = vmatpush.bf16.msrb.mxu1 %v10294_v15  ;;  %v11531_v57 = vld [vmem:[#allocation22 + $0x144] sm:$0xf]  ;;  %v9467_v15 = vld [vmem:[#allocation22 + $0x1c8] sm:$0xf0]  ;;  %v9466_v16 = vor.u32 %v11548_v36, %v9465_v29  ;;  %v10034_v29 = vor.u32 %v11687_v45, %v10033_v8  ;;  %v10038_v36 = vor.u32 %v11670_v17, %v10035_v19  ;;  %v9355_v45 = vld [vmem:[#allocation22 + $0xd0] sm:$0xf0] }
 0x72c   : > { %5583 = vmatmul.bf16.vlgmr.msrb.gmra.mxu0 %v14338_v61  ;;  %5596 = vmatmul.bf16.vlgmr.msra.gmra.mxu1 %v14338_v61  ;;  %v11500_v8 = vld [vmem:[#allocation22 + $0x4c] sm:$0xf]  ;;  %v10313_v17 = vld [vmem:[#allocation22 + $0x7c0] sm:$0xf]  ;;  %v11756_v19 = vld [vmem:[#allocation22 + $0x844] sm:$0xf0] }
 0x72e   : > { %5602 = vmatpush.bf16.msra.mxu2 %v10146_v34  ;;  %5615 = vmatpush.bf16.msrb.mxu3 %v10150_v43  ;;  %v9470_v34 = vor.u32 %v11531_v57, %v9467_v15  ;;  %v11514_v43 = vld [vmem:[#allocation22 + $0xb4] sm:$0xf0]  ;;  %v9897_v57 = vld [vmem:[#allocation22 + $0x488] sm:$0xf]  ;;  %v11653_v15 = vld [vmem:[#allocation22 + $0x50c] sm:$0xf0] }
 0x72f   : > { %5628 = vmatpush.bf16.msra.mxu0 %v10154_v52  ;;  %5641 = vmatpush.bf16.msrb.mxu1 %v10158_v53  ;;  %v9474_v52 = vor.u32 %v11549_v41, %v9473_v14  ;;  %v9478_v53 = vor.u32 %v11532_v56, %v9475_v50  ;;  %v9330_v23 = vor.u32 %v11514_v43, %v9329_v62  ;;  %v11636_v14 = vld [vmem:[#allocation22 + $0x48c] sm:$0xf]  ;;  %v9899_v41 = vld [vmem:[#allocation22 + $0x510] sm:$0xf0]  ;;  %v9753_v62 = vld [vmem:[#allocation22 + $0x370] sm:$0xf] }
 0x730   : > { %v9902_v43 = vor.u32 %v11636_v14, %v9899_v41  ;;  %v10314_v14 = vor.u32 %v11756_v19, %v10313_v17  ;;  %v9633_v17 = vld [vmem:[#allocation22 + $0x270] sm:$0xf]  ;;  %v11586_v19 = vld [vmem:[#allocation22 + $0x2f4] sm:$0xf0] }
 0x732   : > { %5603 = vmatpush.bf16.msra.mxu2 %v10010_v22  ;;  %5616 = vmatpush.bf16.msrb.mxu3 %v10014_v49  ;;  %v11737_v22 = vld [vmem:[#allocation22 + $0x7b4] sm:$0xf]  ;;  %v10299_v49 = vld [vmem:[#allocation22 + $0x838] sm:$0xf0] }
 0x733   : > { %5629 = vmatpush.bf16.msra.mxu0 %v10018_v2  ;;  %5642 = vmatpush.bf16.msrb.mxu1 %v10022_v18  ;;  %v9334_v2 = vor.u32 %v11497_v9, %v9331_v32  ;;  %v11755_v18 = vld [vmem:[#allocation22 + $0x83c] sm:$0xf0]  ;;  %v10302_v35 = vor.u32 %v11737_v22, %v10299_v49  ;;  %v11601_v9 = vld [vmem:[#allocation22 + $0x374] sm:$0xf]  ;;  %v9755_v32 = vld [vmem:[#allocation22 + $0x3f8] sm:$0xf0]  ;;  %v9766_v49 = vor.u32 %v11602_v3, %v9763_v11 }
 0x734   : > { %v10306_v38 = vor.u32 %v11755_v18, %v10305_v48  ;;  %v9758_v27 = vor.u32 %v11601_v9, %v9755_v32  ;;  %v11567_v48 = vld [vmem:[#allocation22 + $0x264] sm:$0xf]  ;;  %v11585_v18 = vld [vmem:[#allocation22 + $0x2ec] sm:$0xf0]  ;;  %v10185_v9 = vld [vmem:[#allocation22 + $0x6b8] sm:$0xf] }
 0x735   : > { %v11723_v32 = vld [vmem:[#allocation22 + $0x73c] sm:$0xf0] }
 0x736   : > { %5604 = vmatpush.bf16.msra.mxu2 %v9874_v51  ;;  %5617 = vmatpush.bf16.msrb.mxu3 %v9878_v21  ;;  %v10161_v51 = vld [vmem:[#allocation22 + $0x6a0] sm:$0xf]  ;;  %v11720_v21 = vld [vmem:[#allocation22 + $0x724] sm:$0xf0] }
 0x737   : > { %5630 = vmatpush.bf16.msra.mxu0 %v9882_v47  ;;  %5643 = vmatpush.bf16.msrb.mxu1 %v9886_v40  ;;  %v11703_v47 = vld [vmem:[#allocation22 + $0x6a4] sm:$0xf]  ;;  %v10163_v40 = vld [vmem:[#allocation22 + $0x728] sm:$0xf0]  ;;  %v10162_v63 = vor.u32 %v11720_v21, %v10161_v51  ;;  %v9630_v21 = vor.u32 %v11568_v20, %v9627_v30 }
 0x738   : > { %v10166_v39 = vor.u32 %v11703_v47, %v10163_v40  ;;  %v9489_v47 = vld [vmem:[#allocation22 + $0x158] sm:$0xf]  ;;  %v11551_v40 = vld [vmem:[#allocation22 + $0x1dc] sm:$0xf0] }
 0x73a   : > { %5605 = vmatpush.bf16.msra.mxu2 %v9738_v1  ;;  %5618 = vmatpush.bf16.msrb.mxu3 %v9742_v37  ;;  %v10025_v1 = vld [vmem:[#allocation22 + $0x590] sm:$0xf]  ;;  %v11686_v37 = vld [vmem:[#allocation22 + $0x614] sm:$0xf0] }
 0x73b   : > { %5631 = vmatpush.bf16.msra.mxu0 %v9746_v4  ;;  %5644 = vmatpush.bf16.msrb.mxu1 %v9750_v7  ;;  %v11669_v4 = vld [vmem:[#allocation22 + $0x594] sm:$0xf]  ;;  %v10027_v7 = vld [vmem:[#allocation22 + $0x618] sm:$0xf0]  ;;  %v10026_v44 = vor.u32 %v11686_v37, %v10025_v1  ;;  %v11499_v1 = vld [vmem:[#allocation22 + $0x44] sm:$0xf] }
 0x73c   : > { %v10030_v58 = vor.u32 %v11669_v4, %v10027_v7  ;;  %v9347_v37 = vld [vmem:[#allocation22 + $0xc8] sm:$0xf0]  ;;  %v9353_v4 = vld [vmem:[#allocation22 + $0x48] sm:$0xf]  ;;  %v11517_v7 = vld [vmem:[#allocation22 + $0xcc] sm:$0xf0] }
 0x73e   : > { %5606 = vmatpush.bf16.msra.mxu2 %v9602_v6  ;;  %5619 = vmatpush.bf16.msrb.mxu3 %v9606_v31  ;;  %v9889_v6 = vld [vmem:[#allocation22 + $0x480] sm:$0xf]  ;;  %v11652_v31 = vld [vmem:[#allocation22 + $0x504] sm:$0xf0] }
 0x73f   : > { %5632 = vmatpush.bf16.msra.mxu0 %v9610_v26  ;;  %5645 = vmatpush.bf16.msrb.mxu1 %v9614_v13  ;;  %v11635_v26 = vld [vmem:[#allocation22 + $0x484] sm:$0xf]  ;;  %v9891_v13 = vld [vmem:[#allocation22 + $0x508] sm:$0xf0]  ;;  %v9890_v56 = vor.u32 %v11652_v31, %v9889_v6  ;;  %v10321_v6 = vld [vmem:[#allocation22 + $0x7c8] sm:$0xf] }
 0x740   : > { %v9894_v50 = vor.u32 %v11635_v26, %v9891_v13  ;;  %v11740_v26 = vld [vmem:[#allocation22 + $0x7cc] sm:$0xf]  ;;  %v10323_v13 = vld [vmem:[#allocation22 + $0x850] sm:$0xf0] }
 0x742   : > { %5607 = vmatpush.bf16.msra.mxu2 %v9466_v16  ;;  %5620 = vmatpush.bf16.msrb.mxu3 %v9470_v34  ;;  %v11618_v16 = vld [vmem:[#allocation22 + $0x3f4] sm:$0xf0]  ;;  %v9898_v34 = vor.u32 %v11653_v15, %v9897_v57  ;;  %v9354_v57 = vor.u32 %v11517_v7, %v9353_v4  ;;  %v9358_v15 = vor.u32 %v11500_v8, %v9355_v45  ;;  %v11604_v4 = vld [vmem:[#allocation22 + $0x38c] sm:$0xf]  ;;  %v9779_v7 = vld [vmem:[#allocation22 + $0x410] sm:$0xf0] }
 0x743   : > { %5633 = vmatpush.bf16.msra.mxu0 %v9474_v52  ;;  %5646 = vmatpush.bf16.msrb.mxu1 %v9478_v53  ;;  %v9761_v52 = vld [vmem:[#allocation22 + $0x378] sm:$0xf]  ;;  %v11619_v53 = vld [vmem:[#allocation22 + $0x3fc] sm:$0xf0]  ;;  %v9754_v5 = vor.u32 %v11618_v16, %v9753_v62  ;;  %v10326_v16 = vor.u32 %v11740_v26, %v10323_v13  ;;  %v11570_v26 = vld [vmem:[#allocation22 + $0x27c] sm:$0xf] }
 0x744   : > { %v9762_v22 = vor.u32 %v11619_v53, %v9761_v52  ;;  %v11706_v52 = vld [vmem:[#allocation22 + $0x6bc] sm:$0xf]  ;;  %v10187_v53 = vld [vmem:[#allocation22 + $0x740] sm:$0xf0] }
 0x745   : > { %v9643_v13 = vld [vmem:[#allocation22 + $0x300] sm:$0xf0] }
 0x746   : > { %5608 = vmatpush.bf16.msra.mxu2 %v9330_v23  ;;  %5621 = vmatpush.bf16.msrb.mxu3 %v9334_v2  ;;  %v9619_v23 = vld [vmem:[#allocation22 + $0x2e8] sm:$0xf0]  ;;  %v9625_v2 = vld [vmem:[#allocation22 + $0x268] sm:$0xf] }
 0x747   : > { %5634 = vmatpush.bf16.msra.mxu0 %v9338_v55  ;;  %5647 = vmatpush.bf16.msrb.mxu1 %v9342_v59  ;;  %v9618_v55 = vor.u32 %v11584_v33, %v9617_v12  ;;  %v9622_v59 = vor.u32 %v11567_v48, %v9619_v23  ;;  %v9626_v51 = vor.u32 %v11585_v18, %v9625_v2  ;;  %v10049_v48 = vld [vmem:[#allocation22 + $0x5a8] sm:$0xf]  ;;  %v11689_v23 = vld [vmem:[#allocation22 + $0x62c] sm:$0xf0]  ;;  %v11672_v2 = vld [vmem:[#allocation22 + $0x5ac] sm:$0xf] }
 0x748   : > { %v10186_v12 = vor.u32 %v11723_v32, %v10185_v9  ;;  %v10190_v33 = vor.u32 %v11706_v52, %v10187_v53  ;;  %v10051_v18 = vld [vmem:[#allocation22 + $0x630] sm:$0xf0]  ;;  %v11536_v9 = vld [vmem:[#allocation22 + $0x16c] sm:$0xf]  ;;  %v9361_v52 = vld [vmem:[#allocation22 + $0x50] sm:$0xf] }
 0x749   : > { %5609 = vmatmul.bf16.vlgmr.msra.gmra.mxu2 %v14338_v61  ;;  %5622 = vmatmul.bf16.vlgmr.msrb.gmra.mxu3 %v14338_v61  ;;  %v9507_v32 = vld [vmem:[#allocation22 + $0x1f0] sm:$0xf0] }
 0x74a   : > { %5653 = vmatpush.bf16.msrb.mxu2 %v10298_v25  ;;  %5666 = vmatpush.bf16.msra.mxu3 %v10302_v35  ;;  %v9481_v25 = vld [vmem:[#allocation22 + $0x150] sm:$0xf]  ;;  %v11550_v35 = vld [vmem:[#allocation22 + $0x1d4] sm:$0xf0] }
 0x74b   : > { %5679 = vmatpush.bf16.msrb.mxu0 %v10306_v38  ;;  %5692 = vmatpush.bf16.msra.mxu1 %v10310_v28  ;;  %v11533_v38 = vld [vmem:[#allocation22 + $0x154] sm:$0xf]  ;;  %v9483_v28 = vld [vmem:[#allocation22 + $0x1d8] sm:$0xf0]  ;;  %v9482_v54 = vor.u32 %v11550_v35, %v9481_v25  ;;  %v10050_v25 = vor.u32 %v11689_v23, %v10049_v48  ;;  %v10054_v35 = vor.u32 %v11672_v2, %v10051_v18  ;;  %v9371_v23 = vld [vmem:[#allocation22 + $0xe0] sm:$0xf0] }
 0x74c   : > { %5635 = vmatmul.bf16.vlgmr.msra.gmra.mxu0 %v14338_v61  ;;  %5648 = vmatmul.bf16.vlgmr.msrb.gmra.mxu1 %v14338_v61  ;;  %v11502_v48 = vld [vmem:[#allocation22 + $0x5c] sm:$0xf]  ;;  %v10329_v2 = vld [vmem:[#allocation22 + $0x7d0] sm:$0xf]  ;;  %v11758_v18 = vld [vmem:[#allocation22 + $0x854] sm:$0xf0] }
 0x74e   : > { %5654 = vmatpush.bf16.msrb.mxu2 %v10162_v63  ;;  %5667 = vmatpush.bf16.msra.mxu3 %v10166_v39  ;;  %v9486_v63 = vor.u32 %v11533_v38, %v9483_v28  ;;  %v11516_v39 = vld [vmem:[#allocation22 + $0xc4] sm:$0xf0]  ;;  %v9913_v38 = vld [vmem:[#allocation22 + $0x498] sm:$0xf]  ;;  %v11655_v28 = vld [vmem:[#allocation22 + $0x51c] sm:$0xf0] }
 0x74f   : > { %5680 = vmatpush.bf16.msrb.mxu0 %v10170_v46  ;;  %5693 = vmatpush.bf16.msra.mxu1 %v10174_v0  ;;  %v9490_v46 = vor.u32 %v11551_v40, %v9489_v47  ;;  %v9494_v0 = vor.u32 %v11534_v60, %v9491_v10  ;;  %v9346_v31 = vor.u32 %v11516_v39, %v9345_v42  ;;  %v11638_v47 = vld [vmem:[#allocation22 + $0x49c] sm:$0xf]  ;;  %v9915_v40 = vld [vmem:[#allocation22 + $0x520] sm:$0xf0]  ;;  %v9769_v42 = vld [vmem:[#allocation22 + $0x380] sm:$0xf] }
 0x750   : > { %v9918_v39 = vor.u32 %v11638_v47, %v9915_v40  ;;  %v10330_v47 = vor.u32 %v11758_v18, %v10329_v2  ;;  %v11606_v2 = vld [vmem:[#allocation22 + $0x39c] sm:$0xf]  ;;  %v9795_v18 = vld [vmem:[#allocation22 + $0x420] sm:$0xf0] }
 0x752   : > { %5655 = vmatpush.bf16.msrb.mxu2 %v10026_v44  ;;  %5668 = vmatpush.bf16.msra.mxu3 %v10030_v58  ;;  %v11739_v44 = vld [vmem:[#allocation22 + $0x7c4] sm:$0xf]  ;;  %v10315_v58 = vld [vmem:[#allocation22 + $0x848] sm:$0xf0] }
 0x753   : > { %5681 = vmatpush.bf16.msrb.mxu0 %v10034_v29  ;;  %5694 = vmatpush.bf16.msra.mxu1 %v10038_v36  ;;  %v9350_v29 = vor.u32 %v11499_v1, %v9347_v37  ;;  %v11757_v36 = vld [vmem:[#allocation22 + $0x84c] sm:$0xf0]  ;;  %v10318_v41 = vor.u32 %v11739_v44, %v10315_v58  ;;  %v11603_v1 = vld [vmem:[#allocation22 + $0x384] sm:$0xf]  ;;  %v9771_v37 = vld [vmem:[#allocation22 + $0x408] sm:$0xf0]  ;;  %v9782_v58 = vor.u32 %v11604_v4, %v9779_v7 }
 0x754   : > { %v10322_v62 = vor.u32 %v11757_v36, %v10321_v6  ;;  %v9774_v45 = vor.u32 %v11603_v1, %v9771_v37  ;;  %v11569_v6 = vld [vmem:[#allocation22 + $0x274] sm:$0xf]  ;;  %v11587_v36 = vld [vmem:[#allocation22 + $0x2fc] sm:$0xf0]  ;;  %v10201_v1 = vld [vmem:[#allocation22 + $0x6c8] sm:$0xf] }
 0x755   : > { %v11725_v37 = vld [vmem:[#allocation22 + $0x74c] sm:$0xf0] }
 0x756   : > { %5656 = vmatpush.bf16.msrb.mxu2 %v9890_v56  ;;  %5669 = vmatpush.bf16.msra.mxu3 %v9894_v50  ;;  %v10177_v56 = vld [vmem:[#allocation22 + $0x6b0] sm:$0xf]  ;;  %v11722_v50 = vld [vmem:[#allocation22 + $0x734] sm:$0xf0] }
 0x757   : > { %5682 = vmatpush.bf16.msrb.mxu0 %v9898_v34  ;;  %5695 = vmatpush.bf16.msra.mxu1 %v9902_v43  ;;  %v11705_v34 = vld [vmem:[#allocation22 + $0x6b4] sm:$0xf]  ;;  %v10179_v43 = vld [vmem:[#allocation22 + $0x738] sm:$0xf0]  ;;  %v10178_v3 = vor.u32 %v11722_v50, %v10177_v56  ;;  %v9646_v50 = vor.u32 %v11570_v26, %v9643_v13 }
 0x758   : > { %v10182_v11 = vor.u32 %v11705_v34, %v10179_v43  ;;  %v9505_v34 = vld [vmem:[#allocation22 + $0x168] sm:$0xf]  ;;  %v11553_v43 = vld [vmem:[#allocation22 + $0x1ec] sm:$0xf0] }
 0x75a   : > { %5657 = vmatpush.bf16.msrb.mxu2 %v9754_v5  ;;  %5670 = vmatpush.bf16.msra.mxu3 %v9758_v27  ;;  %v10041_v5 = vld [vmem:[#allocation22 + $0x5a0] sm:$0xf]  ;;  %v11688_v27 = vld [vmem:[#allocation22 + $0x624] sm:$0xf0] }
 0x75b   : > { %5683 = vmatpush.bf16.msrb.mxu0 %v9762_v22  ;;  %5696 = vmatpush.bf16.msra.mxu1 %v9766_v49  ;;  %v11671_v22 = vld [vmem:[#allocation22 + $0x5a4] sm:$0xf]  ;;  %v10043_v49 = vld [vmem:[#allocation22 + $0x628] sm:$0xf0]  ;;  %v10042_v20 = vor.u32 %v11688_v27, %v10041_v5  ;;  %v11501_v5 = vld [vmem:[#allocation22 + $0x54] sm:$0xf] }
 0x75c   : > { %v10046_v30 = vor.u32 %v11671_v22, %v10043_v49  ;;  %v9363_v27 = vld [vmem:[#allocation22 + $0xd8] sm:$0xf0]  ;;  %v9369_v22 = vld [vmem:[#allocation22 + $0x58] sm:$0xf]  ;;  %v11519_v49 = vld [vmem:[#allocation22 + $0xdc] sm:$0xf0] }
 0x75e   : > { %5658 = vmatpush.bf16.msrb.mxu2 %v9618_v55  ;;  %5671 = vmatpush.bf16.msra.mxu3 %v9622_v59  ;;  %v9905_v55 = vld [vmem:[#allocation22 + $0x490] sm:$0xf]  ;;  %v11654_v59 = vld [vmem:[#allocation22 + $0x514] sm:$0xf0] }
 0x75f   : > { %5684 = vmatpush.bf16.msrb.mxu0 %v9626_v51  ;;  %5697 = vmatpush.bf16.msra.mxu1 %v9630_v21  ;;  %v11637_v51 = vld [vmem:[#allocation22 + $0x494] sm:$0xf]  ;;  %v9907_v21 = vld [vmem:[#allocation22 + $0x518] sm:$0xf0]  ;;  %v9906_v60 = vor.u32 %v11654_v59, %v9905_v55  ;;  %v10337_v55 = vld [vmem:[#allocation22 + $0x7d8] sm:$0xf] }
 0x760   : > { %v9910_v10 = vor.u32 %v11637_v51, %v9907_v21  ;;  %v11742_v51 = vld [vmem:[#allocation22 + $0x7dc] sm:$0xf]  ;;  %v10339_v21 = vld [vmem:[#allocation22 + $0x860] sm:$0xf0] }
 0x762   : > { %5659 = vmatpush.bf16.msrb.mxu2 %v9482_v54  ;;  %5672 = vmatpush.bf16.msra.mxu3 %v9486_v63  ;;  %v11620_v54 = vld [vmem:[#allocation22 + $0x404] sm:$0xf0]  ;;  %v9914_v63 = vor.u32 %v11655_v28, %v9913_v38  ;;  %v9370_v38 = vor.u32 %v11519_v49, %v9369_v22  ;;  %v9374_v28 = vor.u32 %v11502_v48, %v9371_v23  ;;  %v11605_v22 = vld [vmem:[#allocation22 + $0x394] sm:$0xf]  ;;  %v9787_v49 = vld [vmem:[#allocation22 + $0x418] sm:$0xf0] }
 0x763   : > { %5685 = vmatpush.bf16.msrb.mxu0 %v9490_v46  ;;  %5698 = vmatpush.bf16.msra.mxu1 %v9494_v0  ;;  %v9777_v46 = vld [vmem:[#allocation22 + $0x388] sm:$0xf]  ;;  %v11621_v0 = vld [vmem:[#allocation22 + $0x40c] sm:$0xf0]  ;;  %v9770_v8 = vor.u32 %v11620_v54, %v9769_v42  ;;  %v10342_v54 = vor.u32 %v11742_v51, %v10339_v21  ;;  %v9793_v48 = vld [vmem:[#allocation22 + $0x398] sm:$0xf]  ;;  %v9798_v21 = vor.u32 %v11606_v2, %v9795_v18 }
 0x764   : > { %v9778_v44 = vor.u32 %v11621_v0, %v9777_v46  ;;  %v11708_v46 = vld [vmem:[#allocation22 + $0x6cc] sm:$0xf]  ;;  %v10203_v0 = vld [vmem:[#allocation22 + $0x750] sm:$0xf0]  ;;  %v11623_v23 = vld [vmem:[#allocation22 + $0x41c] sm:$0xf0] }
 0x765   : > { %v9794_v51 = vor.u32 %v11623_v23, %v9793_v48 }
 0x766   : > { %5660 = vmatpush.bf16.msrb.mxu2 %v9346_v31  ;;  %5673 = vmatpush.bf16.msra.mxu3 %v9350_v29  ;;  %v9635_v31 = vld [vmem:[#allocation22 + $0x2f8] sm:$0xf0]  ;;  %v9641_v29 = vld [vmem:[#allocation22 + $0x278] sm:$0xf] }
 0x767   : > { %5686 = vmatpush.bf16.msrb.mxu0 %v9354_v57  ;;  %5699 = vmatpush.bf16.msra.mxu1 %v9358_v15  ;;  %v9634_v57 = vor.u32 %v11586_v19, %v9633_v17  ;;  %v9638_v15 = vor.u32 %v11569_v6, %v9635_v31  ;;  %v9642_v56 = vor.u32 %v11587_v36, %v9641_v29  ;;  %v10065_v6 = vld [vmem:[#allocation22 + $0x5b8] sm:$0xf]  ;;  %v11691_v31 = vld [vmem:[#allocation22 + $0x63c] sm:$0xf0]  ;;  %v11674_v29 = vld [vmem:[#allocation22 + $0x5bc] sm:$0xf] }
 0x768   : > { %v10202_v17 = vor.u32 %v11725_v37, %v10201_v1  ;;  %v10206_v19 = vor.u32 %v11708_v46, %v10203_v0  ;;  %v10067_v36 = vld [vmem:[#allocation22 + $0x640] sm:$0xf0] }
 0x769   : > { %5661 = vmatmul.bf16.vlgmr.msrb.gmra.mxu2 %v14338_v61  ;;  %5674 = vmatmul.bf16.vlgmr.msra.gmra.mxu3 %v14338_v61 }
 0x76a   : > { %5705 = vmatpush.bf16.msra.mxu2 %v10314_v14  ;;  %5718 = vmatpush.bf16.msrb.mxu3 %v10318_v41  ;;  %v9497_v14 = vld [vmem:[#allocation22 + $0x160] sm:$0xf]  ;;  %v11552_v41 = vld [vmem:[#allocation22 + $0x1e4] sm:$0xf0] }
 0x76b   : > { %5731 = vmatpush.bf16.msra.mxu0 %v10322_v62  ;;  %5744 = vmatpush.bf16.msrb.mxu1 %v10326_v16  ;;  %v11535_v62 = vld [vmem:[#allocation22 + $0x164] sm:$0xf]  ;;  %v9499_v16 = vld [vmem:[#allocation22 + $0x1e8] sm:$0xf0]  ;;  %v9498_v53 = vor.u32 %v11552_v41, %v9497_v14  ;;  %v9921_v14 = vld [vmem:[#allocation22 + $0x4a0] sm:$0xf] }
 0x76c   : > { %5687 = vmatmul.bf16.vlgmr.msrb.gmra.mxu0 %v14338_v61  ;;  %5700 = vmatmul.bf16.vlgmr.msra.gmra.mxu1 %v14338_v61  ;;  %v11656_v41 = vld [vmem:[#allocation22 + $0x524] sm:$0xf0] }
 0x76e   : > { %5706 = vmatpush.bf16.msra.mxu2 %v10178_v3  ;;  %5719 = vmatpush.bf16.msrb.mxu3 %v10182_v11  ;;  %v9502_v3 = vor.u32 %v11535_v62, %v9499_v16  ;;  %v11518_v11 = vld [vmem:[#allocation22 + $0xd4] sm:$0xf0]  ;;  %v11639_v62 = vld [vmem:[#allocation22 + $0x4a4] sm:$0xf]  ;;  %v9923_v16 = vld [vmem:[#allocation22 + $0x528] sm:$0xf0] }
 0x76f   : > { %5732 = vmatpush.bf16.msra.mxu0 %v10186_v12  ;;  %5745 = vmatpush.bf16.msrb.mxu1 %v10190_v33  ;;  %v9506_v12 = vor.u32 %v11553_v43, %v9505_v34  ;;  %v9510_v33 = vor.u32 %v11536_v9, %v9507_v32  ;;  %v9362_v59 = vor.u32 %v11518_v11, %v9361_v52  ;;  %v9929_v34 = vld [vmem:[#allocation22 + $0x4a8] sm:$0xf]  ;;  %v11657_v43 = vld [vmem:[#allocation22 + $0x52c] sm:$0xf0]  ;;  %v11640_v9 = vld [vmem:[#allocation22 + $0x4ac] sm:$0xf] }
 0x770   : > { %v9931_v32 = vld [vmem:[#allocation22 + $0x530] sm:$0xf0]  ;;  %v9922_v52 = vor.u32 %v11656_v41, %v9921_v14  ;;  %v11622_v11 = vld [vmem:[#allocation22 + $0x414] sm:$0xf0] }
 0x772   : > { %5707 = vmatpush.bf16.msra.mxu2 %v10042_v20  ;;  %5720 = vmatpush.bf16.msrb.mxu3 %v10046_v30  ;;  %v11741_v20 = vld [vmem:[#allocation22 + $0x7d4] sm:$0xf]  ;;  %v10331_v30 = vld [vmem:[#allocation22 + $0x858] sm:$0xf0] }
 0x773   : > { %5733 = vmatpush.bf16.msra.mxu0 %v10050_v25  ;;  %5746 = vmatpush.bf16.msrb.mxu1 %v10054_v35  ;;  %v9366_v25 = vor.u32 %v11501_v5, %v9363_v27  ;;  %v11759_v35 = vld [vmem:[#allocation22 + $0x85c] sm:$0xf0]  ;;  %v10334_v40 = vor.u32 %v11741_v20, %v10331_v30  ;;  %v9930_v5 = vor.u32 %v11657_v43, %v9929_v34  ;;  %v11760_v43 = vld [vmem:[#allocation22 + $0x864] sm:$0xf0] }
 0x774   : > { %v10338_v42 = vor.u32 %v11759_v35, %v10337_v55  ;;  %v9934_v27 = vor.u32 %v11640_v9, %v9931_v32  ;;  %v9790_v30 = vor.u32 %v11605_v22, %v9787_v49  ;;  %v11588_v35 = vld [vmem:[#allocation22 + $0x304] sm:$0xf0]  ;;  %v10345_v34 = vld [vmem:[#allocation22 + $0x7e0] sm:$0xf]  ;;  %v11743_v9 = vld [vmem:[#allocation22 + $0x7e4] sm:$0xf] }
 0x775   : > { %v10347_v32 = vld [vmem:[#allocation22 + $0x868] sm:$0xf0]  ;;  %v10346_v2 = vor.u32 %v11760_v43, %v10345_v34 }
 0x776   : > { %5708 = vmatpush.bf16.msra.mxu2 %v9906_v60  ;;  %5721 = vmatpush.bf16.msrb.mxu3 %v9910_v10  ;;  %v10193_v60 = vld [vmem:[#allocation22 + $0x6c0] sm:$0xf]  ;;  %v11724_v10 = vld [vmem:[#allocation22 + $0x744] sm:$0xf0]  ;;  %v10350_v18 = vor.u32 %v11743_v9, %v10347_v32 }
 0x777   : > { %5734 = vmatpush.bf16.msra.mxu0 %v9914_v63  ;;  %5747 = vmatpush.bf16.msrb.mxu1 %v9918_v39  ;;  %v11707_v63 = vld [vmem:[#allocation22 + $0x6c4] sm:$0xf]  ;;  %v10195_v39 = vld [vmem:[#allocation22 + $0x748] sm:$0xf0]  ;;  %v10194_v4 = vor.u32 %v11724_v10, %v10193_v60  ;;  %v9659_v10 = vld [vmem:[#allocation22 + $0x310] sm:$0xf0] }
 0x778   : > { %v10198_v7 = vor.u32 %v11707_v63, %v10195_v39  ;;  %v11572_v60 = vld [vmem:[#allocation22 + $0x28c] sm:$0xf]  ;;  %v9513_v63 = vld [vmem:[#allocation22 + $0x170] sm:$0xf]  ;;  %v11554_v39 = vld [vmem:[#allocation22 + $0x1f4] sm:$0xf0] }
 0x779   : > { %v9662_v37 = vor.u32 %v11572_v60, %v9659_v10  ;;  %v9801_v32 = vld [vmem:[#allocation22 + $0x3a0] sm:$0xf] }
 0x77a   : > { %5709 = vmatpush.bf16.msra.mxu2 %v9770_v8  ;;  %5722 = vmatpush.bf16.msrb.mxu3 %v9774_v45  ;;  %v10057_v8 = vld [vmem:[#allocation22 + $0x5b0] sm:$0xf]  ;;  %v11690_v45 = vld [vmem:[#allocation22 + $0x634] sm:$0xf0] }
 0x77b   : > { %5735 = vmatpush.bf16.msra.mxu0 %v9778_v44  ;;  %5748 = vmatpush.bf16.msrb.mxu1 %v9782_v58  ;;  %v11673_v44 = vld [vmem:[#allocation22 + $0x5b4] sm:$0xf]  ;;  %v10059_v58 = vld [vmem:[#allocation22 + $0x638] sm:$0xf0]  ;;  %v10058_v26 = vor.u32 %v11690_v45, %v10057_v8  ;;  %v9521_v8 = vld [vmem:[#allocation22 + $0x178] sm:$0xf] }
 0x77c   : > { %v10062_v13 = vor.u32 %v11673_v44, %v10059_v58  ;;  %v11555_v45 = vld [vmem:[#allocation22 + $0x1fc] sm:$0xf0]  ;;  %v9514_v58 = vor.u32 %v11554_v39, %v9513_v63 }
 0x77d   : > { %v9377_v44 = vld [vmem:[#allocation22 + $0x60] sm:$0xf]  ;;  %v9522_v14 = vor.u32 %v11555_v45, %v9521_v8 }
 0x77e   : > { %5710 = vmatpush.bf16.msra.mxu2 %v9634_v57  ;;  %5723 = vmatpush.bf16.msrb.mxu3 %v9638_v15 }
 0x77f   : > { %5736 = vmatpush.bf16.msra.mxu0 %v9642_v56  ;;  %5749 = vmatpush.bf16.msrb.mxu1 %v9646_v50  ;;  %v10066_v56 = vor.u32 %v11691_v31, %v10065_v6  ;;  %v10070_v50 = vor.u32 %v11674_v29, %v10067_v36  ;;  %v11520_v36 = vld [vmem:[#allocation22 + $0xe4] sm:$0xf0] }
 0x782   : > { %5711 = vmatpush.bf16.msra.mxu2 %v9498_v53  ;;  %5724 = vmatpush.bf16.msrb.mxu3 %v9502_v3  ;;  %v9926_v53 = vor.u32 %v11639_v62, %v9923_v16  ;;  %v9785_v3 = vld [vmem:[#allocation22 + $0x390] sm:$0xf]  ;;  %v11504_v62 = vld [vmem:[#allocation22 + $0x6c] sm:$0xf]  ;;  %v9387_v16 = vld [vmem:[#allocation22 + $0xf0] sm:$0xf0] }
 0x783   : > { %5737 = vmatpush.bf16.msra.mxu0 %v9506_v12  ;;  %5750 = vmatpush.bf16.msrb.mxu1 %v9510_v33  ;;  %v9786_v20 = vor.u32 %v11622_v11, %v9785_v3  ;;  %v11761_v11 = vld [vmem:[#allocation22 + $0x86c] sm:$0xf0]  ;;  %v9390_v49 = vor.u32 %v11504_v62, %v9387_v16  ;;  %v14384_v62 = vld [vmem:[#allocation24] sm:$0xff] }
 0x786   : > { %5712 = vmatpush.bf16.msra.mxu2 %v9362_v59  ;;  %5725 = vmatpush.bf16.msrb.mxu3 %v9366_v25  ;;  %v14364_v57 = vpop.f32.mrf.mxu0  ;;  %v14366_v15 = vpop.f32.mrf.mxu1  ;;  %v9649_v25 = vld [vmem:[#allocation22 + $0x280] sm:$0xf] }
 0x787   : > { %5738 = vmatpush.bf16.msra.mxu0 %v9370_v38  ;;  %5751 = vmatpush.bf16.msrb.mxu1 %v9374_v28  ;;  %v11571_v38 = vld [vmem:[#allocation22 + $0x284] sm:$0xf]  ;;  %v9651_v28 = vld [vmem:[#allocation22 + $0x308] sm:$0xf0] }
 0x789   : > { %5713 = vmatmul.bf16.vlgmr.msra.gmra.mxu2 %v14338_v61  ;;  %5726 = vmatmul.bf16.vlgmr.msrb.gmra.mxu3 %v14338_v61 }
 0x78a   : > { %5757 = vmatpush.bf16.msrb.mxu2 %v10330_v47  ;;  %5770 = vmatpush.bf16.msra.mxu3 %v10334_v40  ;;  %v9657_v47 = vld [vmem:[#allocation22 + $0x288] sm:$0xf]  ;;  %v11589_v40 = vld [vmem:[#allocation22 + $0x30c] sm:$0xf0] }
 0x78b   : > { %5783 = vmatpush.bf16.msrb.mxu0 %v10338_v42  ;;  %5796 = vmatpush.bf16.msra.mxu1 %v10342_v54  ;;  %v14368_v12 = vpop.f32.mrf.mxu2  ;;  %v14370_v33 = vpop.f32.mrf.mxu3  ;;  %v9650_v42 = vor.u32 %v11588_v35, %v9649_v25  ;;  %v9654_v54 = vor.u32 %v11571_v38, %v9651_v28  ;;  %v9658_v1 = vor.u32 %v11589_v40, %v9657_v47  ;;  %v11709_v25 = vld [vmem:[#allocation22 + $0x6d4] sm:$0xf]  ;;  %v10211_v35 = vld [vmem:[#allocation22 + $0x758] sm:$0xf0]  ;;  %v11727_v28 = vld [vmem:[#allocation22 + $0x75c] sm:$0xf0] }
 0x78c   : > { %5739 = vmatmul.bf16.vlgmr.msra.gmra.mxu0 %v14338_v61  ;;  %5752 = vmatmul.bf16.vlgmr.msrb.gmra.mxu1 %v14338_v61  ;;  %v11710_v47 = vld [vmem:[#allocation22 + $0x6dc] sm:$0xf]  ;;  %v10219_v40 = vld [vmem:[#allocation22 + $0x760] sm:$0xf0]  ;;  %v10214_v10 = vor.u32 %v11709_v25, %v10211_v35 }
 0x78d   : > { %v10222_v39 = vor.u32 %v11710_v47, %v10219_v40  ;;  %v9673_v47 = vld [vmem:[#allocation22 + $0x298] sm:$0xf]  ;;  %v11591_v40 = vld [vmem:[#allocation22 + $0x31c] sm:$0xf0] }
 0x78e   : > { %5758 = vmatpush.bf16.msrb.mxu2 %v10194_v4  ;;  %5771 = vmatpush.bf16.msra.mxu3 %v10198_v7  ;;  %v5482_v55 = vpop.f32.mrf.mxu0  ;;  %v5495_v59 = vpop.f32.mrf.mxu1  ;;  %v11537_v4 = vld [vmem:[#allocation22 + $0x174] sm:$0xf]  ;;  %v9515_v7 = vld [vmem:[#allocation22 + $0x1f8] sm:$0xf0] }
 0x78f   : > { %5784 = vmatpush.bf16.msrb.mxu0 %v10202_v17  ;;  %5797 = vmatpush.bf16.msra.mxu1 %v10206_v19  ;;  %v11538_v17 = vld [vmem:[#allocation22 + $0x17c] sm:$0xf]  ;;  %v9523_v19 = vld [vmem:[#allocation22 + $0x200] sm:$0xf0]  ;;  %v9518_v6 = vor.u32 %v11537_v4, %v9515_v7  ;;  %v11676_v4 = vld [vmem:[#allocation22 + $0x5cc] sm:$0xf] }
 0x790   : > { %v9526_v41 = vor.u32 %v11538_v17, %v9523_v19  ;;  %v10083_v7 = vld [vmem:[#allocation22 + $0x650] sm:$0xf0] }
 0x792   : > { %5759 = vmatpush.bf16.msrb.mxu2 %v10058_v26  ;;  %5772 = vmatpush.bf16.msra.mxu3 %v10062_v13  ;;  %v11503_v26 = vld [vmem:[#allocation22 + $0x64] sm:$0xf]  ;;  %v9379_v13 = vld [vmem:[#allocation22 + $0xe8] sm:$0xf0] }
 0x793   : > { %5785 = vmatpush.bf16.msrb.mxu0 %v10066_v56  ;;  %5798 = vmatpush.bf16.msra.mxu1 %v10070_v50  ;;  %v5456_v46 = vpop.f32.mrf.mxu2  ;;  %v5469_v0 = vpop.f32.mrf.mxu3  ;;  %v9385_v56 = vld [vmem:[#allocation22 + $0x68] sm:$0xf]  ;;  %v11521_v50 = vld [vmem:[#allocation22 + $0xec] sm:$0xf0]  ;;  %v9382_v3 = vor.u32 %v11503_v26, %v9379_v13  ;;  %v11641_v26 = vld [vmem:[#allocation22 + $0x4b4] sm:$0xf] }
 0x794   : > { %v9386_v22 = vor.u32 %v11521_v50, %v9385_v56  ;;  %v10081_v46 = vld [vmem:[#allocation22 + $0x5c8] sm:$0xf]  ;;  %v11693_v0 = vld [vmem:[#allocation22 + $0x64c] sm:$0xf0]  ;;  %v9939_v13 = vld [vmem:[#allocation22 + $0x538] sm:$0xf0] }
 0x795   : > { %v11642_v56 = vld [vmem:[#allocation22 + $0x4bc] sm:$0xf]  ;;  %v9947_v50 = vld [vmem:[#allocation22 + $0x540] sm:$0xf0]  ;;  %v9942_v9 = vor.u32 %v11641_v26, %v9939_v13  ;;  %v9393_v13 = vld [vmem:[#allocation22 + $0x70] sm:$0xf] }
 0x796   : > { %5760 = vmatpush.bf16.msrb.mxu2 %v9922_v52  ;;  %5773 = vmatpush.bf16.msra.mxu3 %v9926_v53  ;;  %v14372_v31 = vpop.f32.mrf.mxu0  ;;  %v14374_v29 = vpop.f32.mrf.mxu1  ;;  %v10353_v52 = vld [vmem:[#allocation22 + $0x7e8] sm:$0xf]  ;;  %v9378_v53 = vor.u32 %v11520_v36, %v9377_v44  ;;  %v9937_v44 = vld [vmem:[#allocation22 + $0x4b0] sm:$0xf]  ;;  %v10086_v36 = vor.u32 %v11676_v4, %v10083_v7  ;;  %v9674_v4 = vor.u32 %v11591_v40, %v9673_v47  ;;  %v11711_v40 = vld [vmem:[#allocation22 + $0x6e4] sm:$0xf] }
 0x797   : > { %5786 = vmatpush.bf16.msrb.mxu0 %v9930_v5  ;;  %5799 = vmatpush.bf16.msra.mxu1 %v9934_v27  ;;  %v11744_v5 = vld [vmem:[#allocation22 + $0x7ec] sm:$0xf]  ;;  %v10355_v27 = vld [vmem:[#allocation22 + $0x870] sm:$0xf0]  ;;  %v10354_v55 = vor.u32 %v11761_v11, %v10353_v52  ;;  %v11624_v52 = vld [vmem:[#allocation22 + $0x424] sm:$0xf0] }
 0x798   : > { %v10358_v59 = vor.u32 %v11744_v5, %v10355_v27  ;;  %v11607_v11 = vld [vmem:[#allocation22 + $0x3a4] sm:$0xf]  ;;  %v9803_v5 = vld [vmem:[#allocation22 + $0x428] sm:$0xf0]  ;;  %v9809_v27 = vld [vmem:[#allocation22 + $0x3a8] sm:$0xf] }
 0x799   : > { %v11728_v47 = vld [vmem:[#allocation22 + $0x764] sm:$0xf0] }
 0x79a   : > { %5761 = vmatpush.bf16.msrb.mxu2 %v9786_v20  ;;  %5774 = vmatpush.bf16.msra.mxu3 %v9790_v30  ;;  %v10209_v20 = vld [vmem:[#allocation22 + $0x6d0] sm:$0xf]  ;;  %v11726_v30 = vld [vmem:[#allocation22 + $0x754] sm:$0xf0] }
 0x79b   : > { %5787 = vmatpush.bf16.msrb.mxu0 %v9794_v51  ;;  %5800 = vmatpush.bf16.msra.mxu1 %v9798_v21  ;;  %v14376_v48 = vpop.f32.mrf.mxu2  ;;  %v14378_v23 = vpop.f32.mrf.mxu3  ;;  %v10217_v51 = vld [vmem:[#allocation22 + $0x6d8] sm:$0xf]  ;;  %v10210_v60 = vor.u32 %v11726_v30, %v10209_v20  ;;  %v9802_v20 = vor.u32 %v11624_v52, %v9801_v32  ;;  %v9806_v30 = vor.u32 %v11607_v11, %v9803_v5  ;;  %v9395_v32 = vld [vmem:[#allocation22 + $0xf8] sm:$0xf0]  ;;  %v9403_v11 = vld [vmem:[#allocation22 + $0x100] sm:$0xf0] }
 0x79c   : > { %v10218_v63 = vor.u32 %v11727_v28, %v10217_v51  ;;  %v9667_v28 = vld [vmem:[#allocation22 + $0x318] sm:$0xf0]  ;;  %v9401_v52 = vld [vmem:[#allocation22 + $0x78] sm:$0xf] }
 0x79d   : > { %v11762_v5 = vld [vmem:[#allocation22 + $0x874] sm:$0xf0] }
 0x79e   : > { %5762 = vmatpush.bf16.msrb.mxu2 %v9650_v42  ;;  %5775 = vmatpush.bf16.msra.mxu3 %v9654_v54  ;;  %v5534_v21 = vpop.f32.mrf.mxu0  ;;  %v5547_v38 = vpop.f32.mrf.mxu1  ;;  %v10073_v42 = vld [vmem:[#allocation22 + $0x5c0] sm:$0xf]  ;;  %v11692_v54 = vld [vmem:[#allocation22 + $0x644] sm:$0xf0] }
 0x79f   : > { %5788 = vmatpush.bf16.msrb.mxu0 %v9658_v1  ;;  %5801 = vmatpush.bf16.msra.mxu1 %v9662_v37  ;;  %v11675_v1 = vld [vmem:[#allocation22 + $0x5c4] sm:$0xf]  ;;  %v10075_v37 = vld [vmem:[#allocation22 + $0x648] sm:$0xf0]  ;;  %v10074_v17 = vor.u32 %v11692_v54, %v10073_v42  ;;  %v11573_v38 = vld [vmem:[#allocation22 + $0x294] sm:$0xf] }
 0x7a0   : > { %v10078_v19 = vor.u32 %v11675_v1, %v10075_v37  ;;  %v4018_v54 = vperm.slane %v14384_v62, 1  ;;  %v9670_v37 = vor.u32 %v11573_v38, %v9667_v28  ;;  %v11778_v38 = vld [vmem:[#allocation25 + $0x78] sm:$0xff] }
 0x7a1   : > { %v10225_v28 = vld [vmem:[#allocation22 + $0x6e0] sm:$0xf] }
 0x7a2   : > { %5763 = vmatpush.bf16.msrb.mxu2 %v9514_v58  ;;  %5776 = vmatpush.bf16.msra.mxu3 %v9518_v6  ;;  %v11658_v58 = vld [vmem:[#allocation22 + $0x534] sm:$0xf0]  ;;  %v10082_v6 = vor.u32 %v11693_v0, %v10081_v46  ;;  %v9529_v46 = vld [vmem:[#allocation22 + $0x180] sm:$0xf]  ;;  %v11556_v0 = vld [vmem:[#allocation22 + $0x204] sm:$0xf0] }
 0x7a3   : > { %5789 = vmatpush.bf16.msrb.mxu0 %v9522_v14  ;;  %5802 = vmatpush.bf16.msra.mxu1 %v9526_v41  ;;  %v5508_v8 = vpop.f32.mrf.mxu2  ;;  %v5521_v45 = vpop.f32.mrf.mxu3  ;;  %v9945_v14 = vld [vmem:[#allocation22 + $0x4b8] sm:$0xf]  ;;  %v11659_v41 = vld [vmem:[#allocation22 + $0x53c] sm:$0xf0]  ;;  %v9938_v43 = vor.u32 %v11658_v58, %v9937_v44  ;;  %v9539_v44 = vld [vmem:[#allocation22 + $0x210] sm:$0xf0] }
 0x7a4   : > { %v11539_v8 = vld [vmem:[#allocation22 + $0x184] sm:$0xf]  ;;  %v9531_v45 = vld [vmem:[#allocation22 + $0x208] sm:$0xf0] }
 0x7a5   : > { %v9534_v26 = vor.u32 %v11539_v8, %v9531_v45 }
 0x7a6   : > { %5764 = vmatpush.bf16.msrb.mxu2 %v9378_v53  ;;  %5777 = vmatpush.bf16.msra.mxu3 %v9382_v3  ;;  %v9946_v53 = vor.u32 %v11659_v41, %v9945_v14  ;;  %v9950_v3 = vor.u32 %v11642_v56, %v9947_v50  ;;  %v11522_v14 = vld [vmem:[#allocation22 + $0xf4] sm:$0xf0]  ;;  %v11505_v41 = vld [vmem:[#allocation22 + $0x74] sm:$0xf] }
 0x7a7   : > { %5790 = vmatpush.bf16.msrb.mxu0 %v9386_v22  ;;  %5803 = vmatpush.bf16.msra.mxu1 %v9390_v49  ;;  %v11625_v22 = vld [vmem:[#allocation22 + $0x42c] sm:$0xf0]  ;;  %v11608_v49 = vld [vmem:[#allocation22 + $0x3ac] sm:$0xf] }
 0x7a8   : > { %v9810_v25 = vor.u32 %v11625_v22, %v9809_v27  ;;  %v11745_v27 = vld [vmem:[#allocation22 + $0x7f4] sm:$0xf]  ;;  %v10363_v22 = vld [vmem:[#allocation22 + $0x878] sm:$0xf0] }
 0x7a9   : > { %5765 = vmatmul.bf16.vlgmr.msrb.gmra.mxu2 %v14338_v61  ;;  %5778 = vmatmul.bf16.vlgmr.msra.gmra.mxu3 %v14338_v61  ;;  %v14386_v16 = vpop.f32.mrf.mxu0  ;;  %v14388_v34 = vpop.f32.mrf.mxu1 }
 0x7aa   : > { %5809 = vmatpush.bf16.msra.mxu2 %v10346_v2  ;;  %5822 = vmatpush.bf16.msrb.mxu3 %v10350_v18  ;;  %v9811_v2 = vld [vmem:[#allocation22 + $0x430] sm:$0xf0]  ;;  %v4017_v18 = vperm.slane %v14384_v62, 0 }
 0x7ab   : > { %5835 = vmatpush.bf16.msra.mxu0 %v10354_v55  ;;  %5848 = vmatpush.bf16.msrb.mxu1 %v10358_v59  ;;  %v9665_v55 = vld [vmem:[#allocation22 + $0x290] sm:$0xf]  ;;  %v11590_v59 = vld [vmem:[#allocation22 + $0x314] sm:$0xf0]  ;;  %v9814_v35 = vor.u32 %v11608_v49, %v9811_v2  ;;  %v9394_v2 = vor.u32 %v11522_v14, %v9393_v13  ;;  %v9955_v13 = vld [vmem:[#allocation22 + $0x548] sm:$0xf0] }
 0x7ac   : > { %5791 = vmatmul.bf16.vlgmr.msrb.gmra.mxu0 %v14338_v61  ;;  %5804 = vmatmul.bf16.vlgmr.msra.gmra.mxu1 %v14338_v61  ;;  %v14391_v51 = vpop.f32.mrf.mxu2  ;;  %v14393_v21 = vpop.f32.mrf.mxu3  ;;  %v14396_v42 = vadd.f32 %v14368_v12, %v4017_v18  ;;  %v9666_v1 = vor.u32 %v11590_v59, %v9665_v55  ;;  %v11540_v12 = vld [vmem:[#allocation22 + $0x18c] sm:$0xf]  ;;  %v9398_v18 = vor.u32 %v11505_v41, %v9395_v32  ;;  %v11767_v32 = vld [vmem:[#allocation25 + $0x20] sm:$0xff] }
 0x7ad   : > { %v9542_v50 = vor.u32 %v11540_v12, %v9539_v44  ;;  %v11768_v12 = vld [vmem:[#allocation25 + $0x28] sm:$0xff] }
 0x7ae   : > { %5810 = vmatpush.bf16.msra.mxu2 %v10210_v60  ;;  %5823 = vmatpush.bf16.msrb.mxu3 %v10214_v10  ;;  %v11574_v60 = vld [vmem:[#allocation22 + $0x29c] sm:$0xf]  ;;  %v9675_v10 = vld [vmem:[#allocation22 + $0x320] sm:$0xf0]  ;;  %v5921_v58 = vmul.f32 0.044715, %v14396_v42 }
 0x7af   : > { %5836 = vmatpush.bf16.msra.mxu0 %v10218_v63  ;;  %5849 = vmatpush.bf16.msrb.mxu1 %v10222_v39  ;;  %v9678_v7 = vor.u32 %v11574_v60, %v9675_v10  ;;  %v10227_v60 = vld [vmem:[#allocation22 + $0x768] sm:$0xf0] }
 0x7b0   : > { %v5955_v55 = vmul.f32 %v5921_v58, %v14396_v42  ;;  %v11776_v44 = vld [vmem:[#allocation25 + $0x68] sm:$0xff]  ;;  %v9953_v58 = vld [vmem:[#allocation22 + $0x4c0] sm:$0xf] }
 0x7b1   : > { %v5586_v63 = vpop.f32.mrf.mxu0  ;;  %v5599_v39 = vpop.f32.mrf.mxu1 }
 0x7b2   : > { %5811 = vmatpush.bf16.msra.mxu2 %v10074_v17  ;;  %5824 = vmatpush.bf16.msrb.mxu3 %v10078_v19  ;;  %v9537_v17 = vld [vmem:[#allocation22 + $0x188] sm:$0xf]  ;;  %v11557_v19 = vld [vmem:[#allocation22 + $0x20c] sm:$0xf0]  ;;  %v10226_v63 = vor.u32 %v11728_v47, %v10225_v28  ;;  %v10230_v39 = vor.u32 %v11711_v40, %v10227_v60  ;;  %v4021_v28 = vperm.slane %v14384_v62, 4  ;;  %v4022_v40 = vperm.slane %v14384_v62, 5 }
 0x7b3   : > { %5837 = vmatpush.bf16.msra.mxu0 %v10082_v6  ;;  %5850 = vmatpush.bf16.msrb.mxu1 %v10086_v36  ;;  %v14401_v6 = vadd.f32 %v14370_v33, %v4018_v54  ;;  %v9530_v36 = vor.u32 %v11556_v0, %v9529_v46  ;;  %v9538_v56 = vor.u32 %v11557_v19, %v9537_v17  ;;  %v10361_v33 = vld [vmem:[#allocation22 + $0x7f0] sm:$0xf]  ;;  %v11694_v0 = vld [vmem:[#allocation22 + $0x654] sm:$0xf0] }
 0x7b4   : > { %v10362_v59 = vor.u32 %v11762_v5, %v10361_v33  ;;  %v5989_v54 = vmul.f32 %v5955_v55, %v14396_v42  ;;  %v10089_v46 = vld [vmem:[#allocation22 + $0x5d0] sm:$0xf]  ;;  %v9819_v33 = vld [vmem:[#allocation22 + $0x438] sm:$0xf0] }
 0x7b5   : > { %v5922_v49 = vmul.f32 0.044715, %v14401_v6  ;;  %v10090_v17 = vor.u32 %v11694_v0, %v10089_v46  ;;  %v11558_v46 = vld [vmem:[#allocation22 + $0x214] sm:$0xf0]  ;;  %v11541_v0 = vld [vmem:[#allocation22 + $0x194] sm:$0xf] }
 0x7b6   : > { %5812 = vmatpush.bf16.msra.mxu2 %v9938_v43  ;;  %5825 = vmatpush.bf16.msrb.mxu3 %v9942_v9  ;;  %v5560_v43 = vpop.f32.mrf.mxu2  ;;  %v5573_v9 = vpop.f32.mrf.mxu3  ;;  %v6023_v45 = vadd.f32 %v5989_v54, %v14396_v42 }
 0x7b7   : > { %5838 = vmatpush.bf16.msra.mxu0 %v9946_v53  ;;  %5851 = vmatpush.bf16.msrb.mxu1 %v9950_v3  ;;  %v11523_v53 = vld [vmem:[#allocation22 + $0xfc] sm:$0xf0]  ;;  %v11506_v3 = vld [vmem:[#allocation22 + $0x7c] sm:$0xf]  ;;  %v5956_v10 = vmul.f32 %v5922_v49, %v14401_v6 }
 0x7b8   : > { %v6057_v41 = vmul.f32 0.7978846, %v6023_v45 }
 0x7b9   : > { %v5990_v8 = vmul.f32 %v5956_v10, %v14401_v6 }
 0x7ba   : > { %5813 = vmatpush.bf16.msra.mxu2 %v9802_v20  ;;  %5826 = vmatpush.bf16.msrb.mxu3 %v9806_v30  ;;  %v9402_v20 = vor.u32 %v11523_v53, %v9401_v52  ;;  %v9406_v30 = vor.u32 %v11506_v3, %v9403_v11  ;;  %v11775_v52 = vld [vmem:[#allocation25 + $0x60] sm:$0xff]  ;;  %v9817_v53 = vld [vmem:[#allocation22 + $0x3b0] sm:$0xf]  ;;  %v11626_v3 = vld [vmem:[#allocation22 + $0x434] sm:$0xf0]  ;;  %12343 = vtanh.f32 %v6057_v41 }
 0x7bb   : > { %5839 = vmatpush.bf16.msra.mxu0 %v9810_v25  ;;  %5852 = vmatpush.bf16.msrb.mxu1 %v9814_v35  ;;  %v10366_v25 = vor.u32 %v11745_v27, %v10363_v22  ;;  %v11770_v35 = vld [vmem:[#allocation25 + $0x38] sm:$0xff]  ;;  %v6024_v14 = vadd.f32 %v5990_v8, %v14401_v6  ;;  %v11609_v11 = vld [vmem:[#allocation22 + $0x3b4] sm:$0xf]  ;;  %v4019_v27 = vperm.slane %v14384_v62, 2  ;;  %v9818_v22 = vor.u32 %v11626_v3, %v9817_v53  ;;  %v9411_v41 = vld [vmem:[#allocation22 + $0x108] sm:$0xf0] }
 0x7bc   : > { %v9822_v49 = vor.u32 %v11609_v11, %v9819_v33  ;;  %v14433_v8 = vadd.f32 %v14376_v48, %v4021_v28  ;;  %v11507_v48 = vld [vmem:[#allocation22 + $0x84] sm:$0xf]  ;;  %v5887_v33 = vmul.f32 0.5, %v14396_v42 }
 0x7bd   : > { %v6058_v5 = vmul.f32 0.7978846, %v6024_v14  ;;  %v14426_v47 = vadd.f32 %v14364_v57, %v4019_v27  ;;  %v11524_v14 = vld [vmem:[#allocation22 + $0x104] sm:$0xf0]  ;;  %v9414_v3 = vor.u32 %v11507_v48, %v9411_v41 }
 0x7be   : > { %5814 = vmatpush.bf16.msra.mxu2 %v9666_v1  ;;  %5827 = vmatpush.bf16.msrb.mxu3 %v9670_v37  ;;  %v11769_v1 = vld [vmem:[#allocation25 + $0x30] sm:$0xff]  ;;  %v11763_v27 = vld [vmem:[#allocation25] sm:$0xff] }
 0x7bf   : > { %5840 = vmatpush.bf16.msra.mxu0 %v9674_v4  ;;  %5853 = vmatpush.bf16.msrb.mxu1 %v9678_v7  ;;  %v11777_v37 = vld [vmem:[#allocation25 + $0x70] sm:$0xff]  ;;  %v10091_v7 = vld [vmem:[#allocation22 + $0x658] sm:$0xf0]  ;;  %12345 = vtanh.f32 %v6058_v5  ;;  %v5888_v5 = vmul.f32 0.5, %v14401_v6  ;;  %v11799_v48 = vld [vmem:[#allocation25 + $0x120] sm:$0xff] }
 0x7c0   : > { %v11677_v4 = vld [vmem:[#allocation22 + $0x5d4] sm:$0xf]  ;;  %v12344_v57 = vpop.eup %12343  ;;  %v11807_v41 = vld [vmem:[#allocation25 + $0x160] sm:$0xff] }
 0x7c1   : > { %v10094_v19 = vor.u32 %v11677_v4, %v10091_v7  ;;  %v9547_v4 = vld [vmem:[#allocation22 + $0x218] sm:$0xf0] }
 0x7c2   : > { %5815 = vmatpush.bf16.msra.mxu2 %v9530_v36  ;;  %5828 = vmatpush.bf16.msrb.mxu3 %v9534_v26  ;;  %v11660_v36 = vld [vmem:[#allocation22 + $0x544] sm:$0xf0]  ;;  %v11643_v26 = vld [vmem:[#allocation22 + $0x4c4] sm:$0xf] }
 0x7c3   : > { %5841 = vmatpush.bf16.msra.mxu0 %v9538_v56  ;;  %5854 = vmatpush.bf16.msrb.mxu1 %v9542_v50  ;;  %v9954_v43 = vor.u32 %v11660_v36, %v9953_v58  ;;  %v9958_v9 = vor.u32 %v11643_v26, %v9955_v13  ;;  %v11764_v58 = vld [vmem:[#allocation25 + $0x8] sm:$0xff]  ;;  %v9409_v26 = vld [vmem:[#allocation22 + $0x80] sm:$0xf] }
 0x7c4   : > { %v11772_v36 = vld [vmem:[#allocation25 + $0x48] sm:$0xff]  ;;  %v9410_v53 = vor.u32 %v11524_v14, %v9409_v26 }
 0x7c5   : > { %v12346_v45 = vpop.eup %12345 }
 0x7c6   : > { %5816 = vmatpush.bf16.msra.mxu2 %v9394_v2  ;;  %5829 = vmatpush.bf16.msrb.mxu3 %v9398_v18  ;;  %v11766_v2 = vld [vmem:[#allocation25 + $0x18] sm:$0xff] }
 0x7c7   : > { %5842 = vmatpush.bf16.msra.mxu0 %v9402_v20  ;;  %5855 = vmatpush.bf16.msrb.mxu1 %v9406_v30  ;;  %v11774_v18 = vld [vmem:[#allocation25 + $0x58] sm:$0xff] }
 0x7c8   : > { %v9681_v20 = vld [vmem:[#allocation22 + $0x2a0] sm:$0xf] }
 0x7c9   : > { %5817 = vmatmul.bf16.vlgmr.msra.gmra.mxu2 %v14338_v61  ;;  %5830 = vmatmul.bf16.vlgmr.msrb.gmra.mxu3 %v14338_v61  ;;  %v14414_v56 = vpop.f32.mrf.mxu0  ;;  %v14416_v50 = vpop.f32.mrf.mxu1 }
 0x7ca   : > { %5861 = vmatpush.bf16.msrb.mxu2 %v10362_v59  ;;  %5874 = vmatpush.bf16.msra.mxu3 %v10366_v25  ;;  %v11592_v59 = vld [vmem:[#allocation22 + $0x324] sm:$0xf0]  ;;  %v11575_v25 = vld [vmem:[#allocation22 + $0x2a4] sm:$0xf] }
 0x7cb   : > { %8407 = vmatpush.bf16.msrb.mxu0 %v11770_v35  ;;  %8420 = vmatpush.bf16.msra.mxu1 %v11778_v38  ;;  %v9683_v35 = vld [vmem:[#allocation22 + $0x328] sm:$0xf0]  ;;  %v4020_v38 = vperm.slane %v14384_v62, 3  ;;  %v9682_v54 = vor.u32 %v11592_v59, %v9681_v20  ;;  %v11802_v59 = vld [vmem:[#allocation25 + $0x138] sm:$0xff] }
 0x7cc   : > { %5843 = vmatmul.bf16.vlgmr.msra.gmra.mxu0 %v14338_v61  ;;  %5856 = vmatmul.bf16.vlgmr.msrb.gmra.mxu1 %v14338_v61  ;;  %v14419_v30 = vpop.f32.mrf.mxu2  ;;  %v14421_v55 = vpop.f32.mrf.mxu3 }
 0x7cd   : > { %v14430_v7 = vadd.f32 %v14366_v15, %v4020_v38 }
 0x7ce   : > { %5862 = vmatpush.bf16.msrb.mxu2 %v10226_v63  ;;  %5875 = vmatpush.bf16.msra.mxu3 %v10230_v39  ;;  %v9686_v63 = vor.u32 %v11575_v25, %v9683_v35  ;;  %v11765_v39 = vld [vmem:[#allocation25 + $0x10] sm:$0xff]  ;;  %v11810_v25 = vld [vmem:[#allocation25 + $0x178] sm:$0xff] }
 0x7cf   : > { %8408 = vmatpush.bf16.msrb.mxu0 %v11769_v1  ;;  %8421 = vmatpush.bf16.msra.mxu1 %v11777_v37  ;;  %v11773_v1 = vld [vmem:[#allocation25 + $0x50] sm:$0xff] }
 0x7d0   : > { %v9545_v37 = vld [vmem:[#allocation22 + $0x190] sm:$0xf] }
 0x7d1   : > { %v5638_v60 = vpop.f32.mrf.mxu0  ;;  %v5651_v10 = vpop.f32.mrf.mxu1 }
 0x7d2   : > { %5863 = vmatpush.bf16.msrb.mxu2 %v10090_v17  ;;  %5876 = vmatpush.bf16.msra.mxu3 %v10094_v19  ;;  %v5923_v17 = vmul.f32 0.044715, %v14426_v47  ;;  %v14437_v19 = vadd.f32 %v14378_v23, %v4022_v40  ;;  %v6125_v23 = vadd.f32 1.0, %v12344_v57  ;;  %v11785_v40 = vld [vmem:[#allocation25 + $0xb0] sm:$0xff]  ;;  %v11792_v57 = vld [vmem:[#allocation25 + $0xe8] sm:$0xff] }
 0x7d3   : > { %8409 = vmatpush.bf16.msrb.mxu0 %v11768_v12  ;;  %8422 = vmatpush.bf16.msra.mxu1 %v11776_v44  ;;  %v9546_v12 = vor.u32 %v11558_v46, %v9545_v37  ;;  %v9550_v44 = vor.u32 %v11541_v0, %v9547_v4  ;;  %v11793_v60 = vld [vmem:[#allocation25 + $0xf0] sm:$0xff]  ;;  %v11784_v4 = vld [vmem:[#allocation25 + $0xa8] sm:$0xff] }
 0x7d4   : > { %v5612_v15 = vpop.f32.mrf.mxu2  ;;  %v5625_v13 = vpop.f32.mrf.mxu3  ;;  %v5957_v11 = vmul.f32 %v5923_v17, %v14426_v47  ;;  %v6159_v35 = vmul.f32 %v6125_v23, %v5887_v33  ;;  %v11800_v17 = vld [vmem:[#allocation25 + $0x128] sm:$0xff]  ;;  %v11790_v23 = vld [vmem:[#allocation25 + $0xd8] sm:$0xff]  ;;  %v4024_v33 = vperm.slane %v14384_v62, 7 }
 0x7d5   : > { %v11783_v15 = vld [vmem:[#allocation25 + $0xa0] sm:$0xff] }
 0x7d6   : > { %5864 = vmatpush.bf16.msrb.mxu2 %v9954_v43  ;;  %5877 = vmatpush.bf16.msra.mxu3 %v9958_v9  ;;  %v5924_v43 = vmul.f32 0.044715, %v14430_v7  ;;  %v5925_v9 = vmul.f32 0.044715, %v14433_v8  ;;  %v5991_v42 = vmul.f32 %v5957_v11, %v14426_v47  ;;  %v11791_v13 = vld [vmem:[#allocation25 + $0xe0] sm:$0xff] }
 0x7d7   : > { %8410 = vmatpush.bf16.msrb.mxu0 %v11767_v32  ;;  %8423 = vmatpush.bf16.msra.mxu1 %v11775_v52  ;;  %v6126_v32 = vadd.f32 1.0, %v12346_v45  ;;  %v5926_v52 = vmul.f32 0.044715, %v14437_v19 }
 0x7d8   : > { %v5959_v20 = vmul.f32 %v5925_v9, %v14433_v8  ;;  %v6025_v46 = vadd.f32 %v5991_v42, %v14426_v47  ;;  %v11782_v9 = vld [vmem:[#allocation25 + $0x98] sm:$0xff] }
 0x7d9   : > { %v6160_v38 = vmul.f32 %v6126_v32, %v5888_v5  ;;  %v5960_v28 = vmul.f32 %v5926_v52, %v14437_v19  ;;  %v4023_v32 = vperm.slane %v14384_v62, 6  ;;  %v11798_v52 = vld [vmem:[#allocation25 + $0x118] sm:$0xff]  ;;  %v14468_v5 = vld [vmem:[#allocation24 + $0x8] sm:$0xff]  ;;  %v11797_v62 = vld [vmem:[#allocation25 + $0x110] sm:$0xff] }
 0x7da   : > { %5865 = vmatpush.bf16.msrb.mxu2 %v9818_v22  ;;  %5878 = vmatpush.bf16.msra.mxu3 %v9822_v49  ;;  %v11771_v22 = vld [vmem:[#allocation25 + $0x40] sm:$0xff]  ;;  %v5958_v49 = vmul.f32 %v5924_v43, %v14430_v7  ;;  %v5993_v10 = vmul.f32 %v5959_v20, %v14433_v8  ;;  %v11789_v20 = vld [vmem:[#allocation25 + $0xd0] sm:$0xff] }
 0x7db   : > { %8411 = vmatpush.bf16.msrb.mxu0 %v11766_v2  ;;  %8424 = vmatpush.bf16.msra.mxu1 %v11774_v18  ;;  %v11786_v2 = vld [vmem:[#allocation25 + $0xb8] sm:$0xff]  ;;  %v5994_v37 = vmul.f32 %v5960_v28, %v14437_v19  ;;  %v14476_v28 = vadd.f32 %v14374_v29, %v4024_v33 }
 0x7dc   : > { %v11794_v18 = vld [vmem:[#allocation25 + $0xf8] sm:$0xff]  ;;  %v5992_v6 = vmul.f32 %v5958_v49, %v14430_v7  ;;  %v6027_v45 = vadd.f32 %v5993_v10, %v14433_v8  ;;  %v11788_v10 = vld [vmem:[#allocation25 + $0xc8] sm:$0xff] }
 0x7de   : > { %5866 = vmatpush.bf16.msrb.mxu2 %v9682_v54  ;;  %5879 = vmatpush.bf16.msra.mxu3 %v9686_v63  ;;  %v6193_v54 = vpack.c.bf16 %v6159_v35, %v6159_v35  ;;  %v6194_v63 = vpack.c.bf16 %v6160_v38, %v6160_v38  ;;  %v6026_v0 = vadd.f32 %v5992_v6, %v14430_v7  ;;  %v6061_v14 = vmul.f32 0.7978846, %v6027_v45  ;;  %v11805_v35 = vld [vmem:[#allocation25 + $0x150] sm:$0xff] }
 0x7df   : > { %8412 = vmatpush.bf16.msrb.mxu0 %v11765_v39  ;;  %8425 = vmatpush.bf16.msra.mxu1 %v11773_v1  ;;  %v11801_v39 = vld [vmem:[#allocation25 + $0x130] sm:$0xff]  ;;  %v5890_v45 = vmul.f32 0.5, %v14430_v7  ;;  %v11826_v7 = vld [vmem:[#allocation25 + $0x1f8] sm:$0xff] }
 0x7e0   : > { %v11809_v1 = vld [vmem:[#allocation25 + $0x170] sm:$0xff] }
 0x7e2   : > { %5867 = vmatpush.bf16.msrb.mxu2 %v9546_v12  ;;  %5880 = vmatpush.bf16.msra.mxu3 %v9550_v44  ;;  %v11808_v12 = vld [vmem:[#allocation25 + $0x168] sm:$0xff]  ;;  %v6028_v44 = vadd.f32 %v5994_v37, %v14437_v19  ;;  %v5928_v37 = vmul.f32 0.044715, %v14476_v28 }
 0x7e3   : > { %8413 = vmatpush.bf16.msrb.mxu0 %v11764_v58  ;;  %8426 = vmatpush.bf16.msra.mxu1 %v11772_v36  ;;  %v6059_v58 = vmul.f32 0.7978846, %v6025_v46 }
 0x7e4   : > { %v6062_v43 = vmul.f32 0.7978846, %v6028_v44  ;;  %v11787_v44 = vld [vmem:[#allocation25 + $0xc0] sm:$0xff] }
 0x7e5   : > { %12347 = vtanh.f32 %v6059_v58 }
 0x7e6   : > { %5868 = vmatpush.bf16.msrb.mxu2 %v9410_v53  ;;  %5881 = vmatpush.bf16.msra.mxu3 %v9414_v3  ;;  %v11806_v53 = vld [vmem:[#allocation25 + $0x158] sm:$0xff] }
 0x7e7   : > { %8414 = vmatpush.bf16.msrb.mxu0 %v11763_v27  ;;  %8427 = vmatpush.bf16.msra.mxu1 %v11771_v22  ;;  %v4025_v27 = vperm.slane %v14468_v5, 0  ;;  %v4026_v22 = vperm.slane %v14468_v5, 1 }
 0x7e9   : > { %5869 = vmatmul.bf16.vlgmr.msrb.gmra.mxu2 %v14338_v61  ;;  %5882 = vmatmul.bf16.vlgmr.msra.gmra.mxu3 %v14338_v61  ;;  %v6060_v61 = vmul.f32 0.7978846, %v6026_v0  ;;  %v14458_v36 = vpop.f32.mrf.mxu0  ;;  %v14460_v26 = vpop.f32.mrf.mxu1  ;;  %v14479_v6 = vadd.f32 %v14391_v51, %v4025_v27 }
 0x7ea   : > { %8433 = vmatpush.bf16.msra.mxu2 %v11786_v2  ;;  %8446 = vmatpush.bf16.msrb.mxu3 %v11794_v18  ;;  %v11781_v18 = vld [vmem:[#allocation25 + $0x90] sm:$0xff] }
 0x7eb   : > { %8459 = vmatpush.bf16.msra.mxu0 %v11802_v59  ;;  %8472 = vmatpush.bf16.msrb.mxu1 %v11810_v25  ;;  %12349 = vtanh.f32 %v6060_v61  ;;  %v12348_v59 = vpop.eup %12347  ;;  %v14473_v25 = vadd.f32 %v14372_v31, %v4023_v32  ;;  %v11780_v31 = vld [vmem:[#allocation25 + $0x88] sm:$0xff]  ;;  %v5929_v0 = vmul.f32 0.044715, %v14479_v6  ;;  %v5891_v61 = vmul.f32 0.5, %v14433_v8  ;;  %v11842_v32 = vld [vmem:[#allocation25 + $0x278] sm:$0xff] }
 0x7ec   : > { %8415 = vmatmul.bf16.vlgmr.msrb.gmra.mxu0 %v6193_v54  ;;  %8428 = vmatmul.bf16.vlgmr.msra.gmra.mxu1 %v6194_v63  ;;  %12351 = vtanh.f32 %v6061_v14  ;;  %v14463_v3 = vpop.f32.mrf.mxu2  ;;  %v14465_v11 = vpop.f32.mrf.mxu3  ;;  %v11796_v63 = vld [vmem:[#allocation25 + $0x108] sm:$0xff]  ;;  %v6127_v51 = vadd.f32 1.0, %v12348_v59  ;;  %v11803_v14 = vld [vmem:[#allocation25 + $0x140] sm:$0xff] }
 0x7ed   : > { %12353 = vtanh.f32 %v6062_v43  ;;  %v5927_v54 = vmul.f32 0.044715, %v14473_v25 }
 0x7ee   : > { %8434 = vmatpush.bf16.msra.mxu2 %v11785_v40  ;;  %8447 = vmatpush.bf16.msrb.mxu3 %v11793_v60  ;;  %v14482_v60 = vadd.f32 %v14393_v21, %v4026_v22 }
 0x7ef   : > { %8460 = vmatpush.bf16.msra.mxu0 %v11801_v39  ;;  %8473 = vmatpush.bf16.msrb.mxu1 %v11809_v1  ;;  %v11804_v39 = vld [vmem:[#allocation25 + $0x148] sm:$0xff]  ;;  %v5961_v58 = vmul.f32 %v5927_v54, %v14473_v25 }
 0x7f1   : > { %v5690_v49 = vpop.f32.mrf.mxu0  ;;  %v5703_v2 = vpop.f32.mrf.mxu1 }
 0x7f2   : > { %8435 = vmatpush.bf16.msra.mxu2 %v11784_v4  ;;  %8448 = vmatpush.bf16.msrb.mxu3 %v11792_v57  ;;  %v12350_v38 = vpop.eup %12349  ;;  %v5889_v57 = vmul.f32 0.5, %v14426_v47  ;;  %v5962_v47 = vmul.f32 %v5928_v37, %v14476_v28  ;;  %v11817_v49 = vld [vmem:[#allocation25 + $0x1b0] sm:$0xff] }
 0x7f3   : > { %8461 = vmatpush.bf16.msra.mxu0 %v11800_v17  ;;  %8474 = vmatpush.bf16.msrb.mxu1 %v11808_v12  ;;  %v12352_v42 = vpop.eup %12351  ;;  %v6128_v46 = vadd.f32 1.0, %v12350_v38  ;;  %v5930_v17 = vmul.f32 0.044715, %v14482_v60  ;;  %v11779_v12 = vld [vmem:[#allocation25 + $0x80] sm:$0xff]  ;;  %v11825_v2 = vld [vmem:[#allocation25 + $0x1f0] sm:$0xff] }
 0x7f4   : > { %v12354_v40 = vpop.eup %12353  ;;  %v5664_v29 = vpop.f32.mrf.mxu2  ;;  %v6129_v21 = vadd.f32 1.0, %v12352_v42  ;;  %v5996_v33 = vmul.f32 %v5962_v47, %v14476_v28  ;;  %v4028_v47 = vperm.slane %v14468_v5, 3 }
 0x7f5   : > { %v5677_v1 = vpop.f32.mrf.mxu3  ;;  %v6130_v4 = vadd.f32 1.0, %v12354_v40  ;;  %v6162_v43 = vmul.f32 %v6128_v46, %v5890_v45  ;;  %v5964_v8 = vmul.f32 %v5930_v17, %v14482_v60  ;;  %v11839_v45 = vld [vmem:[#allocation25 + $0x260] sm:$0xff] }
 0x7f6   : > { %8436 = vmatpush.bf16.msra.mxu2 %v11783_v15  ;;  %8449 = vmatpush.bf16.msrb.mxu3 %v11791_v13  ;;  %v5892_v15 = vmul.f32 0.5, %v14437_v19  ;;  %v11795_v13 = vld [vmem:[#allocation25 + $0x100] sm:$0xff]  ;;  %v5995_v19 = vmul.f32 %v5961_v58, %v14473_v25  ;;  %v6030_v40 = vadd.f32 %v5996_v33, %v14476_v28  ;;  %v4027_v58 = vperm.slane %v14468_v5, 2 }
 0x7f7   : > { %8462 = vmatpush.bf16.msra.mxu0 %v11799_v48  ;;  %8475 = vmatpush.bf16.msrb.mxu1 %v11807_v41  ;;  %v11818_v48 = vld [vmem:[#allocation25 + $0x1b8] sm:$0xff]  ;;  %v6161_v41 = vmul.f32 %v6127_v51, %v5889_v57  ;;  %v6196_v22 = vpack.c.bf16 %v6162_v43, %v6162_v43  ;;  %v5998_v38 = vmul.f32 %v5964_v8, %v14482_v60  ;;  %v11831_v57 = vld [vmem:[#allocation25 + $0x220] sm:$0xff]  ;;  %v11837_v8 = vld [vmem:[#allocation25 + $0x250] sm:$0xff] }
 0x7f8   : > { %v6029_v42 = vadd.f32 %v5995_v19, %v14473_v25  ;;  %v6064_v37 = vmul.f32 0.7978846, %v6030_v40  ;;  %v14520_v33 = vadd.f32 %v14388_v34, %v4028_v47 }
 0x7f9   : > { %v6195_v27 = vpack.c.bf16 %v6161_v41, %v6161_v41  ;;  %v6032_v29 = vadd.f32 %v5998_v38, %v14482_v60 }
 0x7fa   : > { %8437 = vmatpush.bf16.msra.mxu2 %v11782_v9  ;;  %8450 = vmatpush.bf16.msrb.mxu3 %v11790_v23  ;;  %v5963_v9 = vmul.f32 %v5929_v0, %v14479_v6  ;;  %v11834_v23 = vld [vmem:[#allocation25 + $0x238] sm:$0xff]  ;;  %v6063_v1 = vmul.f32 0.7978846, %v6029_v42  ;;  %v11815_v0 = vld [vmem:[#allocation25 + $0x1a0] sm:$0xff]  ;;  %v5932_v38 = vmul.f32 0.044715, %v14520_v33 }
 0x7fb   : > { %8463 = vmatpush.bf16.msra.mxu0 %v11798_v52  ;;  %8476 = vmatpush.bf16.msrb.mxu1 %v11806_v53  ;;  %v6163_v52 = vmul.f32 %v6129_v21, %v5891_v61  ;;  %v6164_v53 = vmul.f32 %v6130_v4, %v5892_v15  ;;  %v11823_v21 = vld [vmem:[#allocation25 + $0x1e0] sm:$0xff]  ;;  %v6066_v17 = vmul.f32 0.7978846, %v6032_v29  ;;  %v11830_v61 = vld [vmem:[#allocation25 + $0x218] sm:$0xff] }
 0x7fc   : > { %12355 = vtanh.f32 %v6063_v1  ;;  %v11838_v15 = vld [vmem:[#allocation25 + $0x258] sm:$0xff]  ;;  %v11819_v29 = vld [vmem:[#allocation25 + $0x1c0] sm:$0xff] }
 0x7fd   : > { %v6198_v59 = vpack.c.bf16 %v6164_v53, %v6164_v53  ;;  %12357 = vtanh.f32 %v6064_v37  ;;  %v11829_v53 = vld [vmem:[#allocation25 + $0x210] sm:$0xff]  ;;  %v5895_v37 = vmul.f32 0.5, %v14479_v6 }
 0x7fe   : > { %8438 = vmatpush.bf16.msra.mxu2 %v11781_v18  ;;  %8451 = vmatpush.bf16.msrb.mxu3 %v11789_v20  ;;  %v5997_v18 = vmul.f32 %v5963_v9, %v14479_v6  ;;  %v6197_v20 = vpack.c.bf16 %v6163_v52, %v6163_v52  ;;  %v11813_v9 = vld [vmem:[#allocation25 + $0x190] sm:$0xff]  ;;  %v14517_v52 = vadd.f32 %v14386_v16, %v4027_v58  ;;  %v11812_v16 = vld [vmem:[#allocation25 + $0x188] sm:$0xff]  ;;  %v11874_v58 = vld [vmem:[#allocation25 + $0x378] sm:$0xff] }
 0x7ff   : > { %8464 = vmatpush.bf16.msra.mxu0 %v11797_v62  ;;  %8477 = vmatpush.bf16.msrb.mxu1 %v11805_v35  ;;  %v11833_v62 = vld [vmem:[#allocation25 + $0x230] sm:$0xff] }
 0x800   : > { %v11841_v35 = vld [vmem:[#allocation25 + $0x270] sm:$0xff]  ;;  %v6031_v54 = vadd.f32 %v5997_v18, %v14479_v6  ;;  %v11820_v18 = vld [vmem:[#allocation25 + $0x1c8] sm:$0xff] }
 0x802   : > { %8439 = vmatpush.bf16.msra.mxu2 %v11780_v31  ;;  %8452 = vmatpush.bf16.msrb.mxu3 %v11788_v10  ;;  %v11816_v31 = vld [vmem:[#allocation25 + $0x1a8] sm:$0xff]  ;;  %v6065_v4 = vmul.f32 0.7978846, %v6031_v54  ;;  %v5894_v54 = vmul.f32 0.5, %v14476_v28  ;;  %v11858_v28 = vld [vmem:[#allocation25 + $0x2f8] sm:$0xff] }
 0x803   : > { %8465 = vmatpush.bf16.msra.mxu0 %v11796_v63  ;;  %8478 = vmatpush.bf16.msrb.mxu1 %v11804_v39  ;;  %v11824_v10 = vld [vmem:[#allocation25 + $0x1e8] sm:$0xff] }
 0x804   : > { %v11832_v63 = vld [vmem:[#allocation25 + $0x228] sm:$0xff]  ;;  %12359 = vtanh.f32 %v6065_v4  ;;  %v11835_v4 = vld [vmem:[#allocation25 + $0x240] sm:$0xff] }
 0x805   : > { %v11840_v39 = vld [vmem:[#allocation25 + $0x268] sm:$0xff]  ;;  %12361 = vtanh.f32 %v6066_v17 }
 0x806   : > { %8440 = vmatpush.bf16.msra.mxu2 %v11779_v12  ;;  %8453 = vmatpush.bf16.msrb.mxu3 %v11787_v44  ;;  %v11814_v12 = vld [vmem:[#allocation25 + $0x198] sm:$0xff] }
 0x807   : > { %8466 = vmatpush.bf16.msra.mxu0 %v11795_v13  ;;  %8479 = vmatpush.bf16.msrb.mxu1 %v11803_v14  ;;  %v11822_v44 = vld [vmem:[#allocation25 + $0x1d8] sm:$0xff] }
 0x809   : > { %8441 = vmatmul.bf16.vlgmr.msra.gmra.mxu2 %v6195_v27  ;;  %8454 = vmatmul.bf16.vlgmr.msrb.gmra.mxu3 %v6196_v22  ;;  %v14504_v51 = vpop.f32.mrf.mxu0  ;;  %v14506_v46 = vpop.f32.mrf.mxu1 }
 0x80a   : > { %8485 = vmatpush.bf16.msrb.mxu2 %v11818_v48  ;;  %8498 = vmatpush.bf16.msra.mxu3 %v11826_v7  ;;  %v4029_v48 = vperm.slane %v14468_v5, 4  ;;  %v4030_v7 = vperm.slane %v14468_v5, 5 }
 0x80b   : > { %8511 = vmatpush.bf16.msrb.mxu0 %v11834_v23  ;;  %8524 = vmatpush.bf16.msra.mxu1 %v11842_v32  ;;  %v11821_v23 = vld [vmem:[#allocation25 + $0x1d0] sm:$0xff]  ;;  %v12356_v32 = vpop.eup %12355 }
 0x80c   : > { %8467 = vmatmul.bf16.vlgmr.msra.gmra.mxu0 %v6197_v20  ;;  %8480 = vmatmul.bf16.vlgmr.msrb.gmra.mxu1 %v6198_v59  ;;  %v14509_v13 = vpop.f32.mrf.mxu2  ;;  %v14511_v14 = vpop.f32.mrf.mxu3  ;;  %v14523_v22 = vadd.f32 %v14419_v30, %v4029_v48  ;;  %v5931_v20 = vmul.f32 0.044715, %v14517_v52  ;;  %v11828_v59 = vld [vmem:[#allocation25 + $0x208] sm:$0xff]  ;;  %v6131_v30 = vadd.f32 1.0, %v12356_v32 }
 0x80d   : > { %v12358_v19 = vpop.eup %12357 }
 0x80e   : > { %8486 = vmatpush.bf16.msrb.mxu2 %v11817_v49  ;;  %8499 = vmatpush.bf16.msra.mxu3 %v11825_v2  ;;  %v12360_v27 = vpop.eup %12359  ;;  %v14526_v2 = vadd.f32 %v14421_v55, %v4030_v7  ;;  %v6132_v42 = vadd.f32 1.0, %v12358_v19  ;;  %v5933_v40 = vmul.f32 0.044715, %v14523_v22  ;;  %v5965_v1 = vmul.f32 %v5931_v20, %v14517_v52 }
 0x80f   : > { %8512 = vmatpush.bf16.msrb.mxu0 %v11833_v62  ;;  %8525 = vmatpush.bf16.msra.mxu1 %v11841_v35  ;;  %v12362_v49 = vpop.eup %12361  ;;  %v11836_v62 = vld [vmem:[#allocation25 + $0x248] sm:$0xff]  ;;  %v6133_v55 = vadd.f32 1.0, %v12360_v27 }
 0x810   : > { %v6166_v17 = vmul.f32 %v6132_v42, %v5894_v54  ;;  %v11871_v54 = vld [vmem:[#allocation25 + $0x360] sm:$0xff] }
 0x811   : > { %v5742_v41 = vpop.f32.mrf.mxu0  ;;  %v5755_v43 = vpop.f32.mrf.mxu1 }
 0x812   : > { %8487 = vmatpush.bf16.msrb.mxu2 %v11816_v31  ;;  %8500 = vmatpush.bf16.msra.mxu3 %v11824_v10  ;;  %v6134_v31 = vadd.f32 1.0, %v12362_v49  ;;  %v5893_v10 = vmul.f32 0.5, %v14473_v25  ;;  %v5966_v25 = vmul.f32 %v5932_v38, %v14520_v33  ;;  %v6200_v7 = vpack.c.bf16 %v6166_v17, %v6166_v17  ;;  %v11849_v41 = vld [vmem:[#allocation25 + $0x2b0] sm:$0xff] }
 0x813   : > { %8513 = vmatpush.bf16.msrb.mxu0 %v11832_v63  ;;  %8526 = vmatpush.bf16.msra.mxu1 %v11840_v39  ;;  %v5934_v63 = vmul.f32 0.044715, %v14526_v2  ;;  %v11811_v39 = vld [vmem:[#allocation25 + $0x180] sm:$0xff]  ;;  %v11857_v43 = vld [vmem:[#allocation25 + $0x2f0] sm:$0xff] }
 0x814   : > { %v5716_v34 = vpop.f32.mrf.mxu2  ;;  %v5729_v35 = vpop.f32.mrf.mxu3  ;;  %v6000_v47 = vmul.f32 %v5966_v25, %v14520_v33  ;;  %v4032_v25 = vperm.slane %v14468_v5, 7 }
 0x815   : > { %v5968_v6 = vmul.f32 %v5934_v63, %v14526_v2 }
 0x816   : > { %8488 = vmatpush.bf16.msrb.mxu2 %v11815_v0  ;;  %8501 = vmatpush.bf16.msra.mxu3 %v11823_v21  ;;  %v5896_v0 = vmul.f32 0.5, %v14482_v60  ;;  %v11827_v21 = vld [vmem:[#allocation25 + $0x200] sm:$0xff]  ;;  %v5999_v60 = vmul.f32 %v5965_v1, %v14517_v52  ;;  %v6034_v49 = vadd.f32 %v6000_v47, %v14520_v33  ;;  %v4031_v1 = vperm.slane %v14468_v5, 6  ;;  %v11861_v5 = vld [vmem:[#allocation25 + $0x310] sm:$0xff] }
 0x817   : > { %8514 = vmatpush.bf16.msrb.mxu0 %v11831_v57  ;;  %8527 = vmatpush.bf16.msra.mxu1 %v11839_v45  ;;  %v11850_v57 = vld [vmem:[#allocation25 + $0x2b8] sm:$0xff]  ;;  %v6165_v45 = vmul.f32 %v6131_v30, %v5893_v10  ;;  %v6002_v19 = vmul.f32 %v5968_v6, %v14526_v2  ;;  %v11863_v10 = vld [vmem:[#allocation25 + $0x320] sm:$0xff]  ;;  %v11869_v6 = vld [vmem:[#allocation25 + $0x350] sm:$0xff]  ;;  %v14566_v47 = vadd.f32 %v14416_v50, %v4032_v25 }
 0x818   : > { %v6033_v27 = vadd.f32 %v5999_v60, %v14517_v52  ;;  %v6068_v38 = vmul.f32 0.7978846, %v6034_v49 }
 0x819   : > { %v6199_v48 = vpack.c.bf16 %v6165_v45, %v6165_v45  ;;  %v6036_v34 = vadd.f32 %v6002_v19, %v14526_v2  ;;  %v5936_v19 = vmul.f32 0.044715, %v14566_v47 }
 0x81a   : > { %8489 = vmatpush.bf16.msrb.mxu2 %v11814_v12  ;;  %8502 = vmatpush.bf16.msra.mxu3 %v11822_v44  ;;  %v5967_v12 = vmul.f32 %v5933_v40, %v14523_v22  ;;  %v11866_v44 = vld [vmem:[#allocation25 + $0x338] sm:$0xff]  ;;  %v6067_v35 = vmul.f32 0.7978846, %v6033_v27  ;;  %v11847_v40 = vld [vmem:[#allocation25 + $0x2a0] sm:$0xff] }
 0x81b   : > { %8515 = vmatpush.bf16.msrb.mxu0 %v11830_v61  ;;  %8528 = vmatpush.bf16.msra.mxu1 %v11838_v15  ;;  %v6167_v61 = vmul.f32 %v6133_v55, %v5895_v37  ;;  %v6168_v15 = vmul.f32 %v6134_v31, %v5896_v0  ;;  %v11855_v55 = vld [vmem:[#allocation25 + $0x2e0] sm:$0xff]  ;;  %v6070_v63 = vmul.f32 0.7978846, %v6036_v34  ;;  %v11862_v37 = vld [vmem:[#allocation25 + $0x318] sm:$0xff] }
 0x81c   : > { %12363 = vtanh.f32 %v6067_v35  ;;  %v11870_v0 = vld [vmem:[#allocation25 + $0x358] sm:$0xff]  ;;  %v11851_v34 = vld [vmem:[#allocation25 + $0x2c0] sm:$0xff] }
 0x81d   : > { %v6202_v32 = vpack.c.bf16 %v6168_v15, %v6168_v15  ;;  %12365 = vtanh.f32 %v6068_v38  ;;  %v14563_v15 = vadd.f32 %v14414_v56, %v4031_v1  ;;  %v11844_v56 = vld [vmem:[#allocation25 + $0x288] sm:$0xff]  ;;  %v5899_v38 = vmul.f32 0.5, %v14523_v22  ;;  %v11906_v1 = vld [vmem:[#allocation25 + $0x478] sm:$0xff] }
 0x81e   : > { %8490 = vmatpush.bf16.msrb.mxu2 %v11813_v9  ;;  %8503 = vmatpush.bf16.msra.mxu3 %v11821_v23  ;;  %v6001_v9 = vmul.f32 %v5967_v12, %v14523_v22  ;;  %v6201_v23 = vpack.c.bf16 %v6167_v61, %v6167_v61 }
 0x81f   : > { %8516 = vmatpush.bf16.msrb.mxu0 %v11829_v53  ;;  %8529 = vmatpush.bf16.msra.mxu1 %v11837_v8  ;;  %v11865_v53 = vld [vmem:[#allocation25 + $0x330] sm:$0xff] }
 0x820   : > { %v11873_v8 = vld [vmem:[#allocation25 + $0x370] sm:$0xff]  ;;  %v6035_v20 = vadd.f32 %v6001_v9, %v14523_v22  ;;  %v11852_v9 = vld [vmem:[#allocation25 + $0x2c8] sm:$0xff] }
 0x822   : > { %8491 = vmatpush.bf16.msrb.mxu2 %v11812_v16  ;;  %8504 = vmatpush.bf16.msra.mxu3 %v11820_v18  ;;  %v11848_v16 = vld [vmem:[#allocation25 + $0x2a8] sm:$0xff]  ;;  %v6069_v31 = vmul.f32 0.7978846, %v6035_v20  ;;  %v12364_v61 = vpop.eup %12363  ;;  %v5898_v20 = vmul.f32 0.5, %v14520_v33  ;;  %v11890_v33 = vld [vmem:[#allocation25 + $0x3f8] sm:$0xff] }
 0x823   : > { %8517 = vmatpush.bf16.msrb.mxu0 %v11828_v59  ;;  %8530 = vmatpush.bf16.msra.mxu1 %v11836_v62  ;;  %v11856_v18 = vld [vmem:[#allocation25 + $0x2e8] sm:$0xff]  ;;  %v12366_v60 = vpop.eup %12365 }
 0x824   : > { %v11864_v59 = vld [vmem:[#allocation25 + $0x328] sm:$0xff]  ;;  %12367 = vtanh.f32 %v6069_v31  ;;  %v6136_v27 = vadd.f32 1.0, %v12366_v60  ;;  %v11867_v31 = vld [vmem:[#allocation25 + $0x340] sm:$0xff] }
 0x825   : > { %v11872_v62 = vld [vmem:[#allocation25 + $0x368] sm:$0xff]  ;;  %12369 = vtanh.f32 %v6070_v63 }
 0x826   : > { %8492 = vmatpush.bf16.msrb.mxu2 %v11811_v39  ;;  %8505 = vmatpush.bf16.msra.mxu3 %v11819_v29  ;;  %v11846_v39 = vld [vmem:[#allocation25 + $0x298] sm:$0xff]  ;;  %v6170_v63 = vmul.f32 %v6136_v27, %v5898_v20  ;;  %v11903_v20 = vld [vmem:[#allocation25 + $0x460] sm:$0xff] }
 0x827   : > { %8518 = vmatpush.bf16.msrb.mxu0 %v11827_v21  ;;  %8531 = vmatpush.bf16.msra.mxu1 %v11835_v4  ;;  %v11854_v29 = vld [vmem:[#allocation25 + $0x2d8] sm:$0xff] }
 0x829   : > { %8493 = vmatmul.bf16.vlgmr.msrb.gmra.mxu2 %v6199_v48  ;;  %8506 = vmatmul.bf16.vlgmr.msra.gmra.mxu3 %v6200_v7  ;;  %v14548_v30 = vpop.f32.mrf.mxu0  ;;  %v14550_v42 = vpop.f32.mrf.mxu1 }
 0x82a   : > { %8537 = vmatpush.bf16.msra.mxu2 %v11850_v57  ;;  %8550 = vmatpush.bf16.msrb.mxu3 %v11858_v28  ;;  %v14558_v57 = vld [vmem:[#allocation24 + $0x10] sm:$0xff]  ;;  %v12368_v48 = vpop.eup %12367 }
 0x82b   : > { %8563 = vmatpush.bf16.msra.mxu0 %v11866_v44  ;;  %8576 = vmatpush.bf16.msrb.mxu1 %v11874_v58  ;;  %v4033_v28 = vperm.slane %v14558_v57, 0  ;;  %v4034_v45 = vperm.slane %v14558_v57, 1  ;;  %v11845_v44 = vld [vmem:[#allocation25 + $0x290] sm:$0xff] }
 0x82c   : > { %8519 = vmatmul.bf16.vlgmr.msrb.gmra.mxu0 %v6201_v23  ;;  %8532 = vmatmul.bf16.vlgmr.msra.gmra.mxu1 %v6202_v32  ;;  %v14553_v21 = vpop.f32.mrf.mxu2  ;;  %v14555_v4 = vpop.f32.mrf.mxu3  ;;  %v11853_v58 = vld [vmem:[#allocation25 + $0x2d0] sm:$0xff]  ;;  %v5935_v23 = vmul.f32 0.044715, %v14563_v15  ;;  %v11860_v32 = vld [vmem:[#allocation25 + $0x308] sm:$0xff] }
 0x82d   : > { %v14569_v7 = vadd.f32 %v14463_v3, %v4033_v28  ;;  %v6135_v3 = vadd.f32 1.0, %v12364_v61 }
 0x82e   : > { %8538 = vmatpush.bf16.msra.mxu2 %v11849_v41  ;;  %8551 = vmatpush.bf16.msrb.mxu3 %v11857_v43  ;;  %v12370_v41 = vpop.eup %12369  ;;  %v14572_v43 = vadd.f32 %v14465_v11, %v4034_v45  ;;  %v6137_v11 = vadd.f32 1.0, %v12368_v48  ;;  %v5969_v35 = vmul.f32 %v5935_v23, %v14563_v15  ;;  %v6204_v45 = vpack.c.bf16 %v6170_v63, %v6170_v63 }
 0x82f   : > { %8564 = vmatpush.bf16.msra.mxu0 %v11865_v53  ;;  %8577 = vmatpush.bf16.msrb.mxu1 %v11873_v8  ;;  %v11868_v53 = vld [vmem:[#allocation25 + $0x348] sm:$0xff]  ;;  %v5937_v49 = vmul.f32 0.044715, %v14569_v7 }
 0x831   : > { %v5794_v17 = vpop.f32.mrf.mxu0  ;;  %v5807_v12 = vpop.f32.mrf.mxu1 }
 0x832   : > { %8539 = vmatpush.bf16.msra.mxu2 %v11848_v16  ;;  %8552 = vmatpush.bf16.msrb.mxu3 %v11856_v18  ;;  %v6138_v16 = vadd.f32 1.0, %v12370_v41  ;;  %v5897_v18 = vmul.f32 0.5, %v14517_v52  ;;  %v5970_v52 = vmul.f32 %v5936_v19, %v14566_v47  ;;  %v11881_v17 = vld [vmem:[#allocation25 + $0x3b0] sm:$0xff] }
 0x833   : > { %8565 = vmatpush.bf16.msra.mxu0 %v11864_v59  ;;  %8578 = vmatpush.bf16.msrb.mxu1 %v11872_v62  ;;  %v5938_v59 = vmul.f32 0.044715, %v14572_v43  ;;  %v11843_v62 = vld [vmem:[#allocation25 + $0x280] sm:$0xff]  ;;  %v11889_v12 = vld [vmem:[#allocation25 + $0x3f0] sm:$0xff] }
 0x834   : > { %v5768_v50 = vpop.f32.mrf.mxu2  ;;  %v5781_v8 = vpop.f32.mrf.mxu3  ;;  %v6004_v25 = vmul.f32 %v5970_v52, %v14566_v47  ;;  %v4036_v52 = vperm.slane %v14558_v57, 3 }
 0x835   : > { %v5972_v22 = vmul.f32 %v5938_v59, %v14572_v43 }
 0x836   : > { %8540 = vmatpush.bf16.msra.mxu2 %v11847_v40  ;;  %8553 = vmatpush.bf16.msrb.mxu3 %v11855_v55  ;;  %v5900_v40 = vmul.f32 0.5, %v14526_v2  ;;  %v11859_v55 = vld [vmem:[#allocation25 + $0x300] sm:$0xff]  ;;  %v6003_v2 = vmul.f32 %v5969_v35, %v14563_v15  ;;  %v6038_v41 = vadd.f32 %v6004_v25, %v14566_v47  ;;  %v4035_v35 = vperm.slane %v14558_v57, 2 }
 0x837   : > { %8566 = vmatpush.bf16.msra.mxu0 %v11863_v10  ;;  %8579 = vmatpush.bf16.msrb.mxu1 %v11871_v54  ;;  %v11882_v10 = vld [vmem:[#allocation25 + $0x3b8] sm:$0xff]  ;;  %v6169_v54 = vmul.f32 %v6135_v3, %v5897_v18  ;;  %v6006_v60 = vmul.f32 %v5972_v22, %v14572_v43  ;;  %v11895_v18 = vld [vmem:[#allocation25 + $0x420] sm:$0xff]  ;;  %v11901_v22 = vld [vmem:[#allocation25 + $0x450] sm:$0xff]  ;;  %v14610_v25 = vadd.f32 %v14460_v26, %v4036_v52 }
 0x838   : > { %v6037_v48 = vadd.f32 %v6003_v2, %v14563_v15  ;;  %v6072_v19 = vmul.f32 0.7978846, %v6038_v41 }
 0x839   : > { %v6203_v28 = vpack.c.bf16 %v6169_v54, %v6169_v54  ;;  %v6040_v50 = vadd.f32 %v6006_v60, %v14572_v43  ;;  %v5940_v60 = vmul.f32 0.044715, %v14610_v25 }
 0x83a   : > { %8541 = vmatpush.bf16.msra.mxu2 %v11846_v39  ;;  %8554 = vmatpush.bf16.msrb.mxu3 %v11854_v29  ;;  %v5971_v39 = vmul.f32 %v5937_v49, %v14569_v7  ;;  %v11898_v29 = vld [vmem:[#allocation25 + $0x438] sm:$0xff]  ;;  %v6071_v8 = vmul.f32 0.7978846, %v6037_v48  ;;  %v11879_v49 = vld [vmem:[#allocation25 + $0x3a0] sm:$0xff] }
 0x83b   : > { %8567 = vmatpush.bf16.msra.mxu0 %v11862_v37  ;;  %8580 = vmatpush.bf16.msrb.mxu1 %v11870_v0  ;;  %v6171_v37 = vmul.f32 %v6137_v11, %v5899_v38  ;;  %v6172_v0 = vmul.f32 %v6138_v16, %v5900_v40  ;;  %v11887_v11 = vld [vmem:[#allocation25 + $0x3e0] sm:$0xff]  ;;  %v6074_v59 = vmul.f32 0.7978846, %v6040_v50  ;;  %v11894_v38 = vld [vmem:[#allocation25 + $0x418] sm:$0xff] }
 0x83c   : > { %12371 = vtanh.f32 %v6071_v8  ;;  %v11902_v40 = vld [vmem:[#allocation25 + $0x458] sm:$0xff]  ;;  %v11883_v50 = vld [vmem:[#allocation25 + $0x3c0] sm:$0xff] }
 0x83d   : > { %v6206_v61 = vpack.c.bf16 %v6172_v0, %v6172_v0  ;;  %12373 = vtanh.f32 %v6072_v19  ;;  %v11893_v0 = vld [vmem:[#allocation25 + $0x410] sm:$0xff]  ;;  %v5903_v19 = vmul.f32 0.5, %v14569_v7 }
 0x83e   : > { %8542 = vmatpush.bf16.msra.mxu2 %v11845_v44  ;;  %8555 = vmatpush.bf16.msrb.mxu3 %v11853_v58  ;;  %v6005_v44 = vmul.f32 %v5971_v39, %v14569_v7  ;;  %v6205_v58 = vpack.c.bf16 %v6171_v37, %v6171_v37  ;;  %v11877_v39 = vld [vmem:[#allocation25 + $0x390] sm:$0xff]  ;;  %v14607_v37 = vadd.f32 %v14458_v36, %v4035_v35  ;;  %v11876_v36 = vld [vmem:[#allocation25 + $0x388] sm:$0xff]  ;;  %v11938_v35 = vld [vmem:[#allocation25 + $0x578] sm:$0xff] }
 0x83f   : > { %8568 = vmatpush.bf16.msra.mxu0 %v11861_v5  ;;  %8581 = vmatpush.bf16.msrb.mxu1 %v11869_v6  ;;  %v11897_v5 = vld [vmem:[#allocation25 + $0x430] sm:$0xff] }
 0x840   : > { %v11905_v6 = vld [vmem:[#allocation25 + $0x470] sm:$0xff]  ;;  %v6039_v23 = vadd.f32 %v6005_v44, %v14569_v7  ;;  %v11884_v44 = vld [vmem:[#allocation25 + $0x3c8] sm:$0xff] }
 0x842   : > { %8543 = vmatpush.bf16.msra.mxu2 %v11844_v56  ;;  %8556 = vmatpush.bf16.msrb.mxu3 %v11852_v9  ;;  %v11880_v56 = vld [vmem:[#allocation25 + $0x3a8] sm:$0xff]  ;;  %v6073_v16 = vmul.f32 0.7978846, %v6039_v23  ;;  %v5902_v23 = vmul.f32 0.5, %v14566_v47  ;;  %v11922_v47 = vld [vmem:[#allocation25 + $0x4f8] sm:$0xff] }
 0x843   : > { %8569 = vmatpush.bf16.msra.mxu0 %v11860_v32  ;;  %8582 = vmatpush.bf16.msrb.mxu1 %v11868_v53  ;;  %v11888_v9 = vld [vmem:[#allocation25 + $0x3e8] sm:$0xff] }
 0x844   : > { %v11896_v32 = vld [vmem:[#allocation25 + $0x428] sm:$0xff]  ;;  %12375 = vtanh.f32 %v6073_v16  ;;  %v11899_v16 = vld [vmem:[#allocation25 + $0x440] sm:$0xff] }
 0x845   : > { %v11904_v53 = vld [vmem:[#allocation25 + $0x468] sm:$0xff]  ;;  %12377 = vtanh.f32 %v6074_v59 }
 0x846   : > { %8544 = vmatpush.bf16.msra.mxu2 %v11843_v62  ;;  %8557 = vmatpush.bf16.msrb.mxu3 %v11851_v34  ;;  %v11878_v62 = vld [vmem:[#allocation25 + $0x398] sm:$0xff] }
 0x847   : > { %8570 = vmatpush.bf16.msra.mxu0 %v11859_v55  ;;  %8583 = vmatpush.bf16.msrb.mxu1 %v11867_v31  ;;  %v11886_v34 = vld [vmem:[#allocation25 + $0x3d8] sm:$0xff] }
 0x849   : > { %8545 = vmatmul.bf16.vlgmr.msra.gmra.mxu2 %v6203_v28  ;;  %8558 = vmatmul.bf16.vlgmr.msrb.gmra.mxu3 %v6204_v45  ;;  %v14594_v3 = vpop.f32.mrf.mxu0  ;;  %v14596_v27 = vpop.f32.mrf.mxu1 }
 0x84a   : > { %8589 = vmatpush.bf16.msrb.mxu2 %v11882_v10  ;;  %8602 = vmatpush.bf16.msra.mxu3 %v11890_v33  ;;  %v4037_v10 = vperm.slane %v14558_v57, 4  ;;  %v4038_v33 = vperm.slane %v14558_v57, 5 }
 0x84b   : > { %8615 = vmatpush.bf16.msrb.mxu0 %v11898_v29  ;;  %8628 = vmatpush.bf16.msra.mxu1 %v11906_v1  ;;  %v11885_v29 = vld [vmem:[#allocation25 + $0x3d0] sm:$0xff]  ;;  %v12372_v1 = vpop.eup %12371 }
 0x84c   : > { %8571 = vmatmul.bf16.vlgmr.msra.gmra.mxu0 %v6205_v58  ;;  %8584 = vmatmul.bf16.vlgmr.msrb.gmra.mxu1 %v6206_v61  ;;  %v14599_v55 = vpop.f32.mrf.mxu2  ;;  %v14601_v31 = vpop.f32.mrf.mxu3  ;;  %v14613_v45 = vadd.f32 %v14509_v13, %v4037_v10  ;;  %v5939_v58 = vmul.f32 0.044715, %v14607_v37  ;;  %v11892_v61 = vld [vmem:[#allocation25 + $0x408] sm:$0xff]  ;;  %v6139_v13 = vadd.f32 1.0, %v12372_v1 }
 0x84d   : > { %v12374_v2 = vpop.eup %12373 }
 0x84e   : > { %8590 = vmatpush.bf16.msrb.mxu2 %v11881_v17  ;;  %8603 = vmatpush.bf16.msra.mxu3 %v11889_v12  ;;  %v12376_v28 = vpop.eup %12375  ;;  %v14616_v12 = vadd.f32 %v14511_v14, %v4038_v33  ;;  %v6140_v48 = vadd.f32 1.0, %v12374_v2  ;;  %v5941_v41 = vmul.f32 0.044715, %v14613_v45  ;;  %v5973_v8 = vmul.f32 %v5939_v58, %v14607_v37 }
 0x84f   : > { %8616 = vmatpush.bf16.msrb.mxu0 %v11897_v5  ;;  %8629 = vmatpush.bf16.msra.mxu1 %v11905_v6  ;;  %v12378_v17 = vpop.eup %12377  ;;  %v11900_v5 = vld [vmem:[#allocation25 + $0x448] sm:$0xff]  ;;  %v6141_v14 = vadd.f32 1.0, %v12376_v28 }
 0x850   : > { %v6174_v59 = vmul.f32 %v6140_v48, %v5902_v23 }
 0x851   : > { %v5846_v54 = vpop.f32.mrf.mxu0  ;;  %v5859_v63 = vpop.f32.mrf.mxu1 }
 0x852   : > { %8591 = vmatpush.bf16.msrb.mxu2 %v11880_v56  ;;  %8604 = vmatpush.bf16.msra.mxu3 %v11888_v9  ;;  %v6142_v56 = vadd.f32 1.0, %v12378_v17  ;;  %v5901_v9 = vmul.f32 0.5, %v14563_v15  ;;  %v5974_v15 = vmul.f32 %v5940_v60, %v14610_v25  ;;  %v6208_v33 = vpack.c.bf16 %v6174_v59, %v6174_v59  ;;  %v11913_v54 = vld [vmem:[#allocation25 + $0x4b0] sm:$0xff] }
 0x853   : > { %8617 = vmatpush.bf16.msrb.mxu0 %v11896_v32  ;;  %8630 = vmatpush.bf16.msra.mxu1 %v11904_v53  ;;  %v5942_v32 = vmul.f32 0.044715, %v14616_v12  ;;  %v11875_v53 = vld [vmem:[#allocation25 + $0x380] sm:$0xff]  ;;  %v11921_v63 = vld [vmem:[#allocation25 + $0x4f0] sm:$0xff] }
 0x854   : > { %v5820_v26 = vpop.f32.mrf.mxu2  ;;  %v5833_v6 = vpop.f32.mrf.mxu3  ;;  %v6008_v52 = vmul.f32 %v5974_v15, %v14610_v25  ;;  %v11934_v15 = vld [vmem:[#allocation25 + $0x558] sm:$0xff] }
 0x855   : > { %v5976_v7 = vmul.f32 %v5942_v32, %v14616_v12  ;;  %v12270_v26 = vld [vmem:[#allocation27] ss:$0 sm:$0xff]  ;;  %v14646_v59 = vld [vmem:[#allocation24 + $0x18] sm:$0xff] }
 0x856   : > { %8592 = vmatpush.bf16.msrb.mxu2 %v11879_v49  ;;  %8605 = vmatpush.bf16.msra.mxu3 %v11887_v11  ;;  %v5904_v49 = vmul.f32 0.5, %v14572_v43  ;;  %v11891_v11 = vld [vmem:[#allocation25 + $0x400] sm:$0xff]  ;;  %v6007_v43 = vmul.f32 %v5973_v8, %v14607_v37  ;;  %v6042_v17 = vadd.f32 %v6008_v52, %v14610_v25 }
 0x857   : > { %8618 = vmatpush.bf16.msrb.mxu0 %v11895_v18  ;;  %8631 = vmatpush.bf16.msra.mxu1 %v11903_v20  ;;  %v11914_v18 = vld [vmem:[#allocation25 + $0x4b8] sm:$0xff]  ;;  %v6173_v20 = vmul.f32 %v6139_v13, %v5901_v9  ;;  %v6010_v2 = vmul.f32 %v5976_v7, %v14616_v12  ;;  %v11927_v32 = vld [vmem:[#allocation25 + $0x520] sm:$0xff]  ;;  %v11917_v7 = vld [vmem:[#allocation25 + $0x4d0] sm:$0xff] }
 0x858   : > { %v6041_v28 = vadd.f32 %v6007_v43, %v14607_v37  ;;  %v6076_v13 = vmul.f32 0.7978846, %v6042_v17 }
 0x859   : > { %v6207_v10 = vpack.c.bf16 %v6173_v20, %v6173_v20  ;;  %v6044_v6 = vadd.f32 %v6010_v2, %v14616_v12  ;;  %v4040_v20 = vperm.slane %v14558_v57, 7  ;;  %v11924_v2 = vld [vmem:[#allocation25 + $0x508] sm:$0xff] }
 0x85a   : > { %8593 = vmatpush.bf16.msrb.mxu2 %v11878_v62  ;;  %8606 = vmatpush.bf16.msra.mxu3 %v11886_v34  ;;  %v5975_v62 = vmul.f32 %v5941_v41, %v14613_v45  ;;  %v11930_v34 = vld [vmem:[#allocation25 + $0x538] sm:$0xff]  ;;  %v6075_v60 = vmul.f32 0.7978846, %v6041_v28  ;;  %v11932_v28 = vld [vmem:[#allocation25 + $0x548] sm:$0xff] }
 0x85b   : > { %8619 = vmatpush.bf16.msrb.mxu0 %v11894_v38  ;;  %8632 = vmatpush.bf16.msra.mxu1 %v11902_v40  ;;  %v6175_v38 = vmul.f32 %v6141_v14, %v5903_v19  ;;  %v6176_v40 = vmul.f32 %v6142_v56, %v5904_v49  ;;  %v11911_v14 = vld [vmem:[#allocation25 + $0x4a0] sm:$0xff]  ;;  %v11910_v19 = vld [vmem:[#allocation25 + $0x498] sm:$0xff] }
 0x85c   : > { %v11919_v56 = vld [vmem:[#allocation25 + $0x4e0] sm:$0xff]  ;;  %12379 = vtanh.f32 %v6075_v60  ;;  %v11918_v49 = vld [vmem:[#allocation25 + $0x4d8] sm:$0xff] }
 0x85d   : > { %v6210_v1 = vpack.c.bf16 %v6176_v40, %v6176_v40  ;;  %12381 = vtanh.f32 %v6076_v13  ;;  %v11909_v40 = vld [vmem:[#allocation25 + $0x490] sm:$0xff]  ;;  %v11907_v60 = vld [vmem:[#allocation25 + $0x480] sm:$0xff] }
 0x85e   : > { %8594 = vmatpush.bf16.msrb.mxu2 %v11877_v39  ;;  %8607 = vmatpush.bf16.msra.mxu3 %v11885_v29  ;;  %v6009_v39 = vmul.f32 %v5975_v62, %v14613_v45  ;;  %v6209_v29 = vpack.c.bf16 %v6175_v38, %v6175_v38  ;;  %v4041_v62 = vperm.slane %v14646_v59, 0  ;;  %v11915_v13 = vld [vmem:[#allocation25 + $0x4c0] sm:$0xff] }
 0x85f   : > { %8620 = vmatpush.bf16.msrb.mxu0 %v11893_v0  ;;  %8633 = vmatpush.bf16.msra.mxu1 %v11901_v22  ;;  %v11929_v0 = vld [vmem:[#allocation25 + $0x530] sm:$0xff] }
 0x860   : > { %v11937_v22 = vld [vmem:[#allocation25 + $0x570] sm:$0xff]  ;;  %v6043_v58 = vadd.f32 %v6009_v39, %v14613_v45  ;;  %v14657_v39 = vadd.f32 %v14553_v21, %v4041_v62 }
 0x862   : > { %8595 = vmatpush.bf16.msrb.mxu2 %v11876_v36  ;;  %8608 = vmatpush.bf16.msra.mxu3 %v11884_v44  ;;  %v11912_v36 = vld [vmem:[#allocation25 + $0x4a8] sm:$0xff]  ;;  %v6077_v9 = vmul.f32 0.7978846, %v6043_v58  ;;  %v12380_v43 = vpop.eup %12379  ;;  %v5945_v58 = vmul.f32 0.044715, %v14657_v39 }
 0x863   : > { %8621 = vmatpush.bf16.msrb.mxu0 %v11892_v61  ;;  %8634 = vmatpush.bf16.msra.mxu1 %v11900_v5  ;;  %v11920_v44 = vld [vmem:[#allocation25 + $0x4e8] sm:$0xff]  ;;  %v6143_v21 = vadd.f32 1.0, %v12380_v43  ;;  %v11961_v43 = vld [vmem:[#allocation25 + $0x630] sm:$0xff] }
 0x864   : > { %v11928_v61 = vld [vmem:[#allocation25 + $0x528] sm:$0xff]  ;;  %12383 = vtanh.f32 %v6077_v9  ;;  %v11931_v9 = vld [vmem:[#allocation25 + $0x540] sm:$0xff] }
 0x865   : > { %v11936_v5 = vld [vmem:[#allocation25 + $0x568] sm:$0xff] }
 0x866   : > { %8596 = vmatpush.bf16.msrb.mxu2 %v11875_v53  ;;  %8609 = vmatpush.bf16.msra.mxu3 %v11883_v50  ;;  %v11935_v53 = vld [vmem:[#allocation25 + $0x560] sm:$0xff]  ;;  %v6078_v50 = vmul.f32 0.7978846, %v6044_v6 }
 0x867   : > { %8622 = vmatpush.bf16.msrb.mxu0 %v11891_v11  ;;  %8635 = vmatpush.bf16.msra.mxu1 %v11899_v16  ;;  %v4039_v11 = vperm.slane %v14558_v57, 6  ;;  %v11926_v16 = vld [vmem:[#allocation25 + $0x518] sm:$0xff]  ;;  %v11925_v57 = vld [vmem:[#allocation25 + $0x510] sm:$0xff] }
 0x868   : > { %12385 = vtanh.f32 %v6078_v50  ;;  %v5979_v50 = vmul.f32 %v5945_v58, %v14657_v39  ;;  %v11951_v58 = vld [vmem:[#allocation25 + $0x5e0] sm:$0xff] }
 0x869   : > { %8597 = vmatmul.bf16.vlgmr.msrb.gmra.mxu2 %v6207_v10  ;;  %8610 = vmatmul.bf16.vlgmr.msra.gmra.mxu3 %v6208_v33  ;;  %v8416_v48 = vpop.f32.mrf.mxu0  ;;  %v8429_v41 = vpop.f32.mrf.mxu1  ;;  %v14651_v52 = vadd.f32 %v14504_v51, %v4039_v11  ;;  %v11933_v10 = vld [vmem:[#allocation25 + $0x550] sm:$0xff]  ;;  %v11908_v51 = vld [vmem:[#allocation25 + $0x488] sm:$0xff] }
 0x86a   : > { %8641 = vmatpush.bf16.msra.mxu2 %v11914_v18  ;;  %8654 = vmatpush.bf16.msrb.mxu3 %v11922_v47  ;;  %v8417_v23 = vadd.f32 %v12270_v26, %v8416_v48  ;;  %v12382_v33 = vpop.eup %12381  ;;  %v5906_v26 = vmul.f32 0.5, %v14610_v25  ;;  %v11954_v25 = vld [vmem:[#allocation25 + $0x5f8] sm:$0xff] }
 0x86b   : > { %8667 = vmatpush.bf16.msra.mxu0 %v11930_v34  ;;  %8680 = vmatpush.bf16.msrb.mxu1 %v11938_v35  ;;  %v4042_v34 = vperm.slane %v14646_v59, 1 }
 0x86c   : > { %8623 = vmatmul.bf16.vlgmr.msrb.gmra.mxu0 %v6209_v29  ;;  %8636 = vmatmul.bf16.vlgmr.msra.gmra.mxu1 %v6210_v1  ;;  %v14638_v8 = vadd.f32 %v8429_v41, %v8417_v23  ;;  %v14641_v18 = vpop.f32.mrf.mxu2  ;;  %v14643_v47 = vpop.f32.mrf.mxu3  ;;  %v5907_v41 = vmul.f32 0.5, %v14613_v45  ;;  %v11946_v23 = vld [vmem:[#allocation25 + $0x5b8] sm:$0xff] }
 0x86d   : > { %v14660_v1 = vadd.f32 %v14555_v4, %v4042_v34  ;;  %v11945_v34 = vld [vmem:[#allocation25 + $0x5b0] sm:$0xff] }
 0x86e   : > { %8642 = vmatpush.bf16.msra.mxu2 %v11913_v54  ;;  %8655 = vmatpush.bf16.msrb.mxu3 %v11921_v63  ;;  %v14654_v54 = vadd.f32 %v14506_v46, %v4040_v20  ;;  %v12384_v63 = vpop.eup %12383 }
 0x86f   : > { %8668 = vmatpush.bf16.msra.mxu0 %v11929_v0  ;;  %8681 = vmatpush.bf16.msrb.mxu1 %v11937_v22  ;;  %v12386_v29 = vpop.eup %12385  ;;  %v11916_v0 = vld [vmem:[#allocation25 + $0x4c8] sm:$0xff]  ;;  %v5943_v22 = vmul.f32 0.044715, %v14651_v52  ;;  %v6145_v4 = vadd.f32 1.0, %v12384_v63  ;;  %v5946_v6 = vmul.f32 0.044715, %v14660_v1 }
 0x871   : > { %v8418_v35 = vpop.f32.mrf.mxu0  ;;  %v8431_v38 = vpop.f32.mrf.mxu1  ;;  %v5977_v48 = vmul.f32 %v5943_v22, %v14651_v52  ;;  %v6179_v11 = vmul.f32 %v6145_v4, %v5907_v41  ;;  %v5980_v45 = vmul.f32 %v5946_v6, %v14660_v1  ;;  %v11960_v22 = vld [vmem:[#allocation25 + $0x628] sm:$0xff]  ;;  %v11942_v6 = vld [vmem:[#allocation25 + $0x598] sm:$0xff] }
 0x872   : > { %8643 = vmatpush.bf16.msra.mxu2 %v11912_v36  ;;  %8656 = vmatpush.bf16.msrb.mxu3 %v11920_v44  ;;  %v5944_v36 = vmul.f32 0.044715, %v14654_v54  ;;  %v6144_v44 = vadd.f32 1.0, %v12382_v33  ;;  %v11953_v35 = vld [vmem:[#allocation25 + $0x5f0] sm:$0xff]  ;;  %v6013_v38 = vmul.f32 %v5979_v50, %v14657_v39  ;;  %v11966_v41 = vld [vmem:[#allocation25 + $0x658] sm:$0xff] }
 0x873   : > { %8669 = vmatpush.bf16.msra.mxu0 %v11928_v61  ;;  %8682 = vmatpush.bf16.msrb.mxu1 %v11936_v5  ;;  %v6146_v61 = vadd.f32 1.0, %v12386_v29  ;;  %v5905_v5 = vmul.f32 0.5, %v14607_v37  ;;  %v11944_v29 = vld [vmem:[#allocation25 + $0x5a8] sm:$0xff] }
 0x874   : > { %v5872_v46 = vpop.f32.mrf.mxu2  ;;  %v5885_v17 = vpop.f32.mrf.mxu3  ;;  %v5978_v37 = vmul.f32 %v5944_v36, %v14654_v54 }
 0x876   : > { %8644 = vmatpush.bf16.msra.mxu2 %v11911_v14  ;;  %8657 = vmatpush.bf16.msrb.mxu3 %v11919_v56  ;;  %v5908_v14 = vmul.f32 0.5, %v14616_v12  ;;  %v11923_v56 = vld [vmem:[#allocation25 + $0x500] sm:$0xff]  ;;  %v6011_v12 = vmul.f32 %v5977_v48, %v14651_v52  ;;  %v11958_v48 = vld [vmem:[#allocation25 + $0x618] sm:$0xff] }
 0x877   : > { %8670 = vmatpush.bf16.msra.mxu0 %v11927_v32  ;;  %8683 = vmatpush.bf16.msrb.mxu1 %v11935_v53  ;;  %v6177_v32 = vmul.f32 %v6143_v21, %v5905_v5  ;;  %v6178_v53 = vmul.f32 %v6144_v44, %v5906_v26  ;;  %v11943_v44 = vld [vmem:[#allocation25 + $0x5a0] sm:$0xff] }
 0x878   : > { %v6045_v33 = vadd.f32 %v6011_v12, %v14651_v52  ;;  %v11967_v5 = vld [vmem:[#allocation25 + $0x660] sm:$0xff]  ;;  %v11965_v12 = vld [vmem:[#allocation25 + $0x650] sm:$0xff] }
 0x879   : > { %v6211_v20 = vpack.c.bf16 %v6177_v32, %v6177_v32  ;;  %v6212_v62 = vpack.c.bf16 %v6178_v53, %v6178_v53 }
 0x87a   : > { %8645 = vmatpush.bf16.msra.mxu2 %v11910_v19  ;;  %8658 = vmatpush.bf16.msrb.mxu3 %v11918_v49  ;;  %v11962_v19 = vld [vmem:[#allocation25 + $0x638] sm:$0xff]  ;;  %v6079_v46 = vmul.f32 0.7978846, %v6045_v33 }
 0x87b   : > { %8671 = vmatpush.bf16.msra.mxu0 %v11926_v16  ;;  %8684 = vmatpush.bf16.msrb.mxu1 %v11934_v15  ;;  %v11970_v49 = vld [vmem:[#allocation25 + $0x678] sm:$0xff]  ;;  %v6180_v16 = vmul.f32 %v6146_v61, %v5908_v14  ;;  %v6012_v15 = vmul.f32 %v5978_v37, %v14654_v54  ;;  %v11959_v61 = vld [vmem:[#allocation25 + $0x620] sm:$0xff] }
 0x87c   : > { %12387 = vtanh.f32 %v6079_v46  ;;  %v11939_v46 = vld [vmem:[#allocation25 + $0x580] sm:$0xff] }
 0x87d   : > { %v6046_v63 = vadd.f32 %v6012_v15, %v14654_v54 }
 0x87e   : > { %8646 = vmatpush.bf16.msra.mxu2 %v11909_v40  ;;  %8659 = vmatpush.bf16.msrb.mxu3 %v11917_v7  ;;  %v6213_v40 = vpack.c.bf16 %v6179_v11, %v6179_v11  ;;  %v6214_v7 = vpack.c.bf16 %v6180_v16, %v6180_v16 }
 0x87f   : > { %8672 = vmatpush.bf16.msra.mxu0 %v11925_v57  ;;  %8685 = vmatpush.bf16.msrb.mxu1 %v11933_v10  ;;  %v11969_v57 = vld [vmem:[#allocation25 + $0x670] sm:$0xff]  ;;  %v6014_v10 = vmul.f32 %v5980_v45, %v14660_v1  ;;  %v6080_v17 = vmul.f32 0.7978846, %v6046_v63 }
 0x880   : > { %v11957_v45 = vld [vmem:[#allocation25 + $0x610] sm:$0xff] }
 0x881   : > { %12389 = vtanh.f32 %v6080_v17  ;;  %v11947_v17 = vld [vmem:[#allocation25 + $0x5c0] sm:$0xff] }
 0x882   : > { %8647 = vmatpush.bf16.msra.mxu2 %v11908_v51  ;;  %8660 = vmatpush.bf16.msrb.mxu3 %v11916_v0  ;;  %v11952_v51 = vld [vmem:[#allocation25 + $0x5e8] sm:$0xff]  ;;  %v6047_v0 = vadd.f32 %v6013_v38, %v14657_v39  ;;  %v12388_v11 = vpop.eup %12387 }
 0x883   : > { %8673 = vmatpush.bf16.msra.mxu0 %v11924_v2  ;;  %8686 = vmatpush.bf16.msrb.mxu1 %v11932_v28  ;;  %v11968_v2 = vld [vmem:[#allocation25 + $0x668] sm:$0xff]  ;;  %v6048_v28 = vadd.f32 %v6014_v10, %v14660_v1  ;;  %v6147_v63 = vadd.f32 1.0, %v12388_v11 }
 0x884   : > { %v6081_v4 = vmul.f32 0.7978846, %v6047_v0 }
 0x885   : > { %v6082_v26 = vmul.f32 0.7978846, %v6048_v28 }
 0x886   : > { %8648 = vmatpush.bf16.msra.mxu2 %v11907_v60  ;;  %8661 = vmatpush.bf16.msrb.mxu3 %v11915_v13  ;;  %v11950_v60 = vld [vmem:[#allocation25 + $0x5d8] sm:$0xff]  ;;  %v4043_v13 = vperm.slane %v14646_v59, 2  ;;  %12391 = vtanh.f32 %v6081_v4  ;;  %v11963_v4 = vld [vmem:[#allocation25 + $0x640] sm:$0xff] }
 0x887   : > { %8674 = vmatpush.bf16.msra.mxu0 %v11923_v56  ;;  %8687 = vmatpush.bf16.msrb.mxu1 %v11931_v9  ;;  %v4044_v9 = vperm.slane %v14646_v59, 3  ;;  %12393 = vtanh.f32 %v6082_v26 }
 0x888   : > { %v14688_v16 = vadd.f32 %v14548_v30, %v4043_v13  ;;  %v11940_v30 = vld [vmem:[#allocation25 + $0x588] sm:$0xff]  ;;  %v12002_v13 = vld [vmem:[#allocation25 + $0x778] sm:$0xff] }
 0x889   : > { %8649 = vmatmul.bf16.vlgmr.msra.gmra.mxu2 %v6211_v20  ;;  %8662 = vmatmul.bf16.vlgmr.msrb.gmra.mxu3 %v6212_v62  ;;  %v8468_v36 = vpop.f32.mrf.mxu0  ;;  %v8481_v21 = vpop.f32.mrf.mxu1  ;;  %v14691_v15 = vadd.f32 %v14550_v42, %v4044_v9  ;;  %v11956_v42 = vld [vmem:[#allocation25 + $0x608] sm:$0xff] }
 0x88a   : > { %8693 = vmatpush.bf16.msrb.mxu2 %v11946_v23  ;;  %8706 = vmatpush.bf16.msra.mxu3 %v11954_v25  ;;  %v4045_v23 = vperm.slane %v14646_v59, 4  ;;  %v4046_v25 = vperm.slane %v14646_v59, 5 }
 0x88b   : > { %8719 = vmatpush.bf16.msrb.mxu0 %v11962_v19  ;;  %8732 = vmatpush.bf16.msra.mxu1 %v11970_v49  ;;  %v11941_v19 = vld [vmem:[#allocation25 + $0x590] sm:$0xff] }
 0x88c   : > { %8675 = vmatmul.bf16.vlgmr.msra.gmra.mxu0 %v6213_v40  ;;  %8688 = vmatmul.bf16.vlgmr.msrb.gmra.mxu1 %v6214_v7  ;;  %v8442_v14 = vpop.f32.mrf.mxu2  ;;  %v8455_v56 = vpop.f32.mrf.mxu3  ;;  %v11949_v49 = vld [vmem:[#allocation25 + $0x5d0] sm:$0xff]  ;;  %v14697_v38 = vadd.f32 %v14601_v31, %v4046_v25  ;;  %v11948_v40 = vld [vmem:[#allocation25 + $0x5c8] sm:$0xff] }
 0x88d   : > { %v8443_v37 = vadd.f32 %v8442_v14, %v14638_v8  ;;  %v12390_v8 = vpop.eup %12389 }
 0x88e   : > { %8694 = vmatpush.bf16.msrb.mxu2 %v11945_v34  ;;  %8707 = vmatpush.bf16.msra.mxu3 %v11953_v35  ;;  %v12392_v62 = vpop.eup %12391  ;;  %v14694_v34 = vadd.f32 %v14599_v55, %v4045_v23  ;;  %v5948_v55 = vmul.f32 0.044715, %v14691_v15  ;;  %v5950_v28 = vmul.f32 0.044715, %v14697_v38  ;;  %v11985_v23 = vld [vmem:[#allocation25 + $0x6f0] sm:$0xff] }
 0x88f   : > { %8720 = vmatpush.bf16.msrb.mxu0 %v11961_v43  ;;  %8733 = vmatpush.bf16.msra.mxu1 %v11969_v57  ;;  %v8456_v32 = vadd.f32 %v8455_v56, %v8443_v37  ;;  %v12394_v35 = vpop.eup %12393  ;;  %v5947_v43 = vmul.f32 0.044715, %v14688_v16  ;;  %v11964_v57 = vld [vmem:[#allocation25 + $0x648] sm:$0xff]  ;;  %v11977_v37 = vld [vmem:[#allocation25 + $0x6b0] sm:$0xff] }
 0x890   : > { %v5949_v31 = vmul.f32 0.044715, %v14694_v34  ;;  %v6150_v0 = vadd.f32 1.0, %v12394_v35  ;;  %v12000_v35 = vld [vmem:[#allocation25 + $0x768] sm:$0xff] }
 0x891   : > { %v8470_v53 = vpop.f32.mrf.mxu0  ;;  %v8483_v50 = vpop.f32.mrf.mxu1  ;;  %v8469_v20 = vadd.f32 %v8468_v36, %v8456_v32  ;;  %v5981_v36 = vmul.f32 %v5947_v43, %v14688_v16 }
 0x892   : > { %8695 = vmatpush.bf16.msrb.mxu2 %v11944_v29  ;;  %8708 = vmatpush.bf16.msra.mxu3 %v11952_v51  ;;  %v6148_v29 = vadd.f32 1.0, %v12390_v8  ;;  %v6149_v51 = vadd.f32 1.0, %v12392_v62  ;;  %v11993_v50 = vld [vmem:[#allocation25 + $0x730] sm:$0xff]  ;;  %v11984_v8 = vld [vmem:[#allocation25 + $0x6e8] sm:$0xff] }
 0x893   : > { %8721 = vmatpush.bf16.msrb.mxu0 %v11960_v22  ;;  %8734 = vmatpush.bf16.msra.mxu1 %v11968_v2  ;;  %v14699_v7 = vadd.f32 %v8481_v21, %v8469_v20  ;;  %v5909_v22 = vmul.f32 0.5, %v14651_v52  ;;  %v5910_v2 = vmul.f32 0.5, %v14654_v54  ;;  %v5911_v21 = vmul.f32 0.5, %v14657_v39  ;;  %v11986_v54 = vld [vmem:[#allocation25 + $0x6f8] sm:$0xff]  ;;  %v11992_v62 = vld [vmem:[#allocation25 + $0x728] sm:$0xff] }
 0x894   : > { %v8444_v10 = vpop.f32.mrf.mxu2  ;;  %v8457_v33 = vpop.f32.mrf.mxu3  ;;  %v5982_v52 = vmul.f32 %v5948_v55, %v14691_v15  ;;  %v5984_v39 = vmul.f32 %v5950_v28, %v14697_v38  ;;  %v4048_v28 = vperm.slane %v14646_v59, 7 }
 0x895   : > { %v6182_v26 = vmul.f32 %v6148_v29, %v5910_v2  ;;  %v11975_v10 = vld [vmem:[#allocation25 + $0x6a0] sm:$0xff]  ;;  %v11982_v2 = vld [vmem:[#allocation25 + $0x6d8] sm:$0xff] }
 0x896   : > { %8696 = vmatpush.bf16.msrb.mxu2 %v11943_v44  ;;  %8709 = vmatpush.bf16.msra.mxu3 %v11951_v58  ;;  %v5912_v44 = vmul.f32 0.5, %v14660_v1  ;;  %v11955_v58 = vld [vmem:[#allocation25 + $0x600] sm:$0xff]  ;;  %v6015_v1 = vmul.f32 %v5981_v36, %v14688_v16  ;;  %v6016_v14 = vmul.f32 %v5982_v52, %v14691_v15 }
 0x897   : > { %8722 = vmatpush.bf16.msrb.mxu0 %v11959_v61  ;;  %8735 = vmatpush.bf16.msra.mxu1 %v11967_v5  ;;  %v11978_v61 = vld [vmem:[#allocation25 + $0x6b8] sm:$0xff]  ;;  %v6181_v5 = vmul.f32 %v6147_v63, %v5909_v22  ;;  %v6216_v9 = vpack.c.bf16 %v6182_v26, %v6182_v26  ;;  %v11983_v33 = vld [vmem:[#allocation25 + $0x6e0] sm:$0xff]  ;;  %v11981_v26 = vld [vmem:[#allocation25 + $0x6d0] sm:$0xff] }
 0x898   : > { %v6049_v11 = vadd.f32 %v6015_v1, %v14688_v16  ;;  %v11991_v63 = vld [vmem:[#allocation25 + $0x720] sm:$0xff]  ;;  %v11974_v22 = vld [vmem:[#allocation25 + $0x698] sm:$0xff] }
 0x899   : > { %v6215_v56 = vpack.c.bf16 %v6181_v5, %v6181_v5  ;;  %v11999_v29 = vld [vmem:[#allocation25 + $0x760] sm:$0xff]  ;;  %v11973_v5 = vld [vmem:[#allocation25 + $0x690] sm:$0xff] }
 0x89a   : > { %8697 = vmatpush.bf16.msrb.mxu2 %v11942_v6  ;;  %8710 = vmatpush.bf16.msra.mxu3 %v11950_v60  ;;  %v5983_v6 = vmul.f32 %v5949_v31, %v14694_v34  ;;  %v11994_v60 = vld [vmem:[#allocation25 + $0x738] sm:$0xff] }
 0x89b   : > { %8723 = vmatpush.bf16.msrb.mxu0 %v11958_v48  ;;  %8736 = vmatpush.bf16.msra.mxu1 %v11966_v41  ;;  %v6183_v48 = vmul.f32 %v6149_v51, %v5911_v21  ;;  %v6184_v41 = vmul.f32 %v6150_v0, %v5912_v44  ;;  %v4011_v51 = vld [vmem:[#allocation24 + $0x20] sm:$0x3]  ;;  %v4047_v0 = vperm.slane %v14646_v59, 6 }
 0x89c   : > { %v6017_v25 = vmul.f32 %v5983_v6, %v14694_v34  ;;  %v4049_v44 = vperm.slane %v4011_v51, 0 }
 0x89d   : > { %v6217_v32 = vpack.c.bf16 %v6183_v48, %v6183_v48  ;;  %v6218_v53 = vpack.c.bf16 %v6184_v41, %v6184_v41  ;;  %v14725_v52 = vadd.f32 %v14594_v3, %v4047_v0  ;;  %v11997_v48 = vld [vmem:[#allocation25 + $0x750] sm:$0xff] }
 0x89e   : > { %8698 = vmatpush.bf16.msrb.mxu2 %v11941_v19  ;;  %8711 = vmatpush.bf16.msra.mxu3 %v11949_v49  ;;  %v12001_v19 = vld [vmem:[#allocation25 + $0x770] sm:$0xff]  ;;  %v6018_v49 = vmul.f32 %v5984_v39, %v14697_v38  ;;  %v6051_v20 = vadd.f32 %v6017_v25, %v14694_v34  ;;  %v14731_v41 = vadd.f32 %v14641_v18, %v4049_v44  ;;  %v11988_v18 = vld [vmem:[#allocation25 + $0x708] sm:$0xff] }
 0x89f   : > { %8724 = vmatpush.bf16.msrb.mxu0 %v11957_v45  ;;  %8737 = vmatpush.bf16.msra.mxu1 %v11965_v12  ;;  %v6050_v45 = vadd.f32 %v6016_v14, %v14691_v15  ;;  %v11976_v12 = vld [vmem:[#allocation25 + $0x6a8] sm:$0xff] }
 0x8a0   : > { %v6085_v55 = vmul.f32 0.7978846, %v6051_v20  ;;  %v11996_v25 = vld [vmem:[#allocation25 + $0x748] sm:$0xff] }
 0x8a1   : > { %v6084_v43 = vmul.f32 0.7978846, %v6050_v45 }
 0x8a2   : > { %8699 = vmatpush.bf16.msrb.mxu2 %v11940_v30  ;;  %8712 = vmatpush.bf16.msra.mxu3 %v11948_v40  ;;  %v6052_v30 = vadd.f32 %v6018_v49, %v14697_v38  ;;  %v6083_v40 = vmul.f32 0.7978846, %v6049_v11 }
 0x8a3   : > { %8725 = vmatpush.bf16.msrb.mxu0 %v11956_v42  ;;  %8738 = vmatpush.bf16.msra.mxu1 %v11964_v57 }
 0x8a4   : > { %v6086_v31 = vmul.f32 0.7978846, %v6052_v30  ;;  %12395 = vtanh.f32 %v6083_v40  ;;  %v5915_v40 = vmul.f32 0.5, %v14694_v34 }
 0x8a5   : > { %12397 = vtanh.f32 %v6084_v43  ;;  %v5916_v43 = vmul.f32 0.5, %v14697_v38 }
 0x8a6   : > { %8700 = vmatpush.bf16.msrb.mxu2 %v11939_v46  ;;  %8713 = vmatpush.bf16.msra.mxu3 %v11947_v17  ;;  %12399 = vtanh.f32 %v6085_v55  ;;  %v11990_v46 = vld [vmem:[#allocation25 + $0x718] sm:$0xff] }
 0x8a7   : > { %8726 = vmatpush.bf16.msrb.mxu0 %v11955_v58  ;;  %8739 = vmatpush.bf16.msra.mxu1 %v11963_v4  ;;  %v11998_v17 = vld [vmem:[#allocation25 + $0x758] sm:$0xff]  ;;  %12401 = vtanh.f32 %v6086_v31  ;;  %v4050_v4 = vperm.slane %v4011_v51, 1 }
 0x8a8   : > { %v12034_v31 = vld [vmem:[#allocation25 + $0x878] sm:$0xff] }
 0x8a9   : > { %8701 = vmatmul.bf16.vlgmr.msrb.gmra.mxu2 %v6215_v56  ;;  %8714 = vmatmul.bf16.vlgmr.msra.gmra.mxu3 %v6216_v9  ;;  %v8520_v42 = vpop.f32.mrf.mxu0  ;;  %v8533_v57 = vpop.f32.mrf.mxu1  ;;  %v14734_v1 = vadd.f32 %v14643_v47, %v4050_v4  ;;  %v5951_v56 = vmul.f32 0.044715, %v14725_v52  ;;  %v11980_v9 = vld [vmem:[#allocation25 + $0x6c8] sm:$0xff]  ;;  %v5953_v47 = vmul.f32 0.044715, %v14731_v41  ;;  %v12033_v4 = vld [vmem:[#allocation25 + $0x870] sm:$0xff] }
 0x8aa   : > { %8745 = vmatpush.bf16.msra.mxu2 %v11978_v61  ;;  %8758 = vmatpush.bf16.msrb.mxu3 %v11986_v54  ;;  %v12396_v6 = vpop.eup %12395 }
 0x8ab   : > { %8771 = vmatpush.bf16.msra.mxu0 %v11994_v60  ;;  %8784 = vmatpush.bf16.msrb.mxu1 %v12002_v13  ;;  %v14728_v60 = vadd.f32 %v14596_v27, %v4048_v28  ;;  %v11989_v13 = vld [vmem:[#allocation25 + $0x710] sm:$0xff]  ;;  %v11972_v27 = vld [vmem:[#allocation25 + $0x688] sm:$0xff]  ;;  %v5954_v49 = vmul.f32 0.044715, %v14734_v1  ;;  %v5985_v20 = vmul.f32 %v5951_v56, %v14725_v52 }
 0x8ac   : > { %8727 = vmatmul.bf16.vlgmr.msrb.gmra.mxu0 %v6217_v32  ;;  %8740 = vmatmul.bf16.vlgmr.msra.gmra.mxu1 %v6218_v53  ;;  %v8494_v36 = vpop.f32.mrf.mxu2  ;;  %v8507_v21 = vpop.f32.mrf.mxu3 }
 0x8ad   : > { %v8495_v58 = vadd.f32 %v8494_v36, %v14699_v7  ;;  %v12398_v7 = vpop.eup %12397  ;;  %v6019_v34 = vmul.f32 %v5985_v20, %v14725_v52 }
 0x8ae   : > { %8746 = vmatpush.bf16.msra.mxu2 %v11977_v37  ;;  %8759 = vmatpush.bf16.msrb.mxu3 %v11985_v23  ;;  %v12400_v39 = vpop.eup %12399  ;;  %v5952_v23 = vmul.f32 0.044715, %v14728_v60 }
 0x8af   : > { %8772 = vmatpush.bf16.msra.mxu0 %v11993_v50  ;;  %8785 = vmatpush.bf16.msrb.mxu1 %v12001_v19  ;;  %v8508_v61 = vadd.f32 %v8507_v21, %v8495_v58  ;;  %v12402_v14 = vpop.eup %12401  ;;  %v6151_v50 = vadd.f32 1.0, %v12396_v6  ;;  %v6152_v19 = vadd.f32 1.0, %v12398_v7  ;;  %v6153_v11 = vadd.f32 1.0, %v12400_v39  ;;  %v12025_v58 = vld [vmem:[#allocation25 + $0x830] sm:$0xff] }
 0x8b0   : > { %v6154_v45 = vadd.f32 1.0, %v12402_v14  ;;  %v5986_v30 = vmul.f32 %v5952_v23, %v14728_v60 }
 0x8b1   : > { %v8522_v54 = vpop.f32.mrf.mxu0  ;;  %v8535_v59 = vpop.f32.mrf.mxu1  ;;  %v8521_v3 = vadd.f32 %v8520_v42, %v8508_v61  ;;  %v11987_v42 = vld [vmem:[#allocation25 + $0x700] sm:$0xff]  ;;  %v6187_v51 = vmul.f32 %v6153_v11, %v5915_v40  ;;  %v6053_v61 = vadd.f32 %v6019_v34, %v14725_v52  ;;  %v12021_v40 = vld [vmem:[#allocation25 + $0x810] sm:$0xff] }
 0x8b2   : > { %8747 = vmatpush.bf16.msra.mxu2 %v11976_v12  ;;  %8760 = vmatpush.bf16.msrb.mxu3 %v11984_v8  ;;  %v5913_v12 = vmul.f32 0.5, %v14688_v16  ;;  %v5914_v8 = vmul.f32 0.5, %v14691_v15  ;;  %v5987_v16 = vmul.f32 %v5953_v47, %v14731_v41  ;;  %v12018_v15 = vld [vmem:[#allocation25 + $0x7f8] sm:$0xff]  ;;  %v6188_v0 = vmul.f32 %v6154_v45, %v5916_v43  ;;  %v12029_v43 = vld [vmem:[#allocation25 + $0x850] sm:$0xff] }
 0x8b3   : > { %8773 = vmatpush.bf16.msra.mxu0 %v11992_v62  ;;  %8786 = vmatpush.bf16.msrb.mxu1 %v12000_v35  ;;  %v14737_v37 = vadd.f32 %v8533_v57, %v8521_v3  ;;  %v11971_v62 = vld [vmem:[#allocation25 + $0x680] sm:$0xff]  ;;  %v6020_v38 = vmul.f32 %v5986_v30, %v14728_v60  ;;  %v6221_v21 = vpack.c.bf16 %v6187_v51, %v6187_v51  ;;  %v6087_v7 = vmul.f32 0.7978846, %v6053_v61  ;;  %v12022_v47 = vld [vmem:[#allocation25 + $0x818] sm:$0xff] }
 0x8b4   : > { %v8496_v32 = vpop.f32.mrf.mxu2  ;;  %v8509_v53 = vpop.f32.mrf.mxu3  ;;  %v11979_v35 = vld [vmem:[#allocation25 + $0x6c0] sm:$0xff]  ;;  %v6186_v55 = vmul.f32 %v6152_v19, %v5914_v8  ;;  %v6222_v44 = vpack.c.bf16 %v6188_v0, %v6188_v0 }
 0x8b5   : > { %v11995_v57 = vld [vmem:[#allocation25 + $0x740] sm:$0xff]  ;;  %v6054_v54 = vadd.f32 %v6020_v38, %v14728_v60  ;;  %12403 = vtanh.f32 %v6087_v7  ;;  %v12006_v32 = vld [vmem:[#allocation25 + $0x798] sm:$0xff]  ;;  %v5917_v38 = vmul.f32 0.5, %v14725_v52 }
 0x8b6   : > { %8748 = vmatpush.bf16.msra.mxu2 %v11975_v10  ;;  %8761 = vmatpush.bf16.msrb.mxu3 %v11983_v33  ;;  %v12010_v10 = vld [vmem:[#allocation25 + $0x7b8] sm:$0xff]  ;;  %v6185_v33 = vmul.f32 %v6151_v50, %v5913_v12  ;;  %v6220_v28 = vpack.c.bf16 %v6186_v55, %v6186_v55  ;;  %v12028_v55 = vld [vmem:[#allocation25 + $0x848] sm:$0xff] }
 0x8b7   : > { %8774 = vmatpush.bf16.msra.mxu0 %v11991_v63  ;;  %8787 = vmatpush.bf16.msrb.mxu1 %v11999_v29  ;;  %v5988_v63 = vmul.f32 %v5954_v49, %v14734_v1  ;;  %v12026_v29 = vld [vmem:[#allocation25 + $0x838] sm:$0xff]  ;;  %v6088_v3 = vmul.f32 0.7978846, %v6054_v54 }
 0x8b8   : > { %v12014_v53 = vld [vmem:[#allocation25 + $0x7d8] sm:$0xff] }
 0x8b9   : > { %v6022_v36 = vmul.f32 %v5988_v63, %v14734_v1  ;;  %12405 = vtanh.f32 %v6088_v3  ;;  %v12030_v50 = vld [vmem:[#allocation25 + $0x858] sm:$0xff] }
 0x8ba   : > { %8749 = vmatpush.bf16.msra.mxu2 %v11974_v22  ;;  %8762 = vmatpush.bf16.msrb.mxu3 %v11982_v2  ;;  %v6021_v22 = vmul.f32 %v5987_v16, %v14731_v41  ;;  %v6219_v2 = vpack.c.bf16 %v6185_v33, %v6185_v33  ;;  %v12020_v33 = vld [vmem:[#allocation25 + $0x808] sm:$0xff] }
 0x8bb   : > { %8775 = vmatpush.bf16.msra.mxu0 %v11990_v46  ;;  %8788 = vmatpush.bf16.msrb.mxu1 %v11998_v17  ;;  %v12009_v46 = vld [vmem:[#allocation25 + $0x7b0] sm:$0xff]  ;;  %v6056_v6 = vadd.f32 %v6022_v36, %v14734_v1  ;;  %v12404_v45 = vpop.eup %12403  ;;  %v12019_v36 = vld [vmem:[#allocation25 + $0x800] sm:$0xff] }
 0x8bc   : > { %v12017_v17 = vld [vmem:[#allocation25 + $0x7f0] sm:$0xff]  ;;  %v6055_v59 = vadd.f32 %v6021_v22, %v14731_v41  ;;  %v5918_v22 = vmul.f32 0.5, %v14728_v60 }
 0x8bd   : > { %v6090_v23 = vmul.f32 0.7978846, %v6056_v6 }
 0x8be   : > { %8750 = vmatpush.bf16.msra.mxu2 %v11973_v5  ;;  %8763 = vmatpush.bf16.msrb.mxu3 %v11981_v26  ;;  %v12008_v5 = vld [vmem:[#allocation25 + $0x7a8] sm:$0xff]  ;;  %v6089_v39 = vmul.f32 0.7978846, %v6055_v59 }
 0x8bf   : > { %8776 = vmatpush.bf16.msra.mxu0 %v11989_v13  ;;  %8789 = vmatpush.bf16.msrb.mxu1 %v11997_v48  ;;  %v12016_v26 = vld [vmem:[#allocation25 + $0x7e8] sm:$0xff]  ;;  %v12406_v30 = vpop.eup %12405 }
 0x8c0   : > { %v12024_v13 = vld [vmem:[#allocation25 + $0x828] sm:$0xff]  ;;  %12407 = vtanh.f32 %v6089_v39  ;;  %v6156_v51 = vadd.f32 1.0, %v12406_v30 }
 0x8c1   : > { %v12032_v48 = vld [vmem:[#allocation25 + $0x868] sm:$0xff]  ;;  %12409 = vtanh.f32 %v6090_v23 }
 0x8c2   : > { %8751 = vmatpush.bf16.msra.mxu2 %v11972_v27  ;;  %8764 = vmatpush.bf16.msrb.mxu3 %v11980_v9  ;;  %v12007_v27 = vld [vmem:[#allocation25 + $0x7a0] sm:$0xff] }
 0x8c3   : > { %8777 = vmatpush.bf16.msra.mxu0 %v11988_v18  ;;  %8790 = vmatpush.bf16.msrb.mxu1 %v11996_v25  ;;  %v12015_v9 = vld [vmem:[#allocation25 + $0x7e0] sm:$0xff] }
 0x8c4   : > { %v12023_v18 = vld [vmem:[#allocation25 + $0x820] sm:$0xff] }
 0x8c5   : > { %v12031_v25 = vld [vmem:[#allocation25 + $0x860] sm:$0xff] }
 0x8c6   : > { %8752 = vmatpush.bf16.msra.mxu2 %v11971_v62  ;;  %8765 = vmatpush.bf16.msrb.mxu3 %v11979_v35  ;;  %v12005_v62 = vld [vmem:[#allocation25 + $0x790] sm:$0xff] }
 0x8c7   : > { %8778 = vmatpush.bf16.msra.mxu0 %v11987_v42  ;;  %8791 = vmatpush.bf16.msrb.mxu1 %v11995_v57  ;;  %v12013_v35 = vld [vmem:[#allocation25 + $0x7d0] sm:$0xff]  ;;  %v12408_v42 = vpop.eup %12407 }
 0x8c8   : > { %v12410_v16 = vpop.eup %12409  ;;  %v6157_v0 = vadd.f32 1.0, %v12408_v42 }
 0x8c9   : > { %8753 = vmatmul.bf16.vlgmr.msra.gmra.mxu2 %v6219_v2  ;;  %8766 = vmatmul.bf16.vlgmr.msrb.gmra.mxu3 %v6220_v28  ;;  %v8572_v14 = vpop.f32.mrf.mxu0  ;;  %v8585_v56 = vpop.f32.mrf.mxu1  ;;  %v6158_v34 = vadd.f32 1.0, %v12410_v16  ;;  %v5919_v2 = vmul.f32 0.5, %v14731_v41  ;;  %v5920_v28 = vmul.f32 0.5, %v14734_v1 }
 0x8ca   : > { %8797 = vmatpush.bf16.msrb.mxu2 %v12010_v10  ;;  %8810 = vmatpush.bf16.msra.mxu3 %v12018_v15  ;;  %v12004_v10 = vld [vmem:[#allocation25 + $0x788] sm:$0xff] }
 0x8cb   : > { %8823 = vmatpush.bf16.msrb.mxu0 %v12026_v29  ;;  %8836 = vmatpush.bf16.msra.mxu1 %v12034_v31  ;;  %v6155_v31 = vadd.f32 1.0, %v12404_v45  ;;  %v6192_v61 = vmul.f32 %v6158_v34, %v5920_v28 }
 0x8cc   : > { %8779 = vmatmul.bf16.vlgmr.msra.gmra.mxu0 %v6221_v21  ;;  %8792 = vmatmul.bf16.vlgmr.msrb.gmra.mxu1 %v6222_v44  ;;  %v8546_v19 = vpop.f32.mrf.mxu2  ;;  %v8559_v49 = vpop.f32.mrf.mxu3  ;;  %v12027_v21 = vld [vmem:[#allocation25 + $0x840] sm:$0xff] }
 0x8cd   : > { %v8547_v11 = vadd.f32 %v8546_v19, %v14737_v37  ;;  %v12012_v37 = vld [vmem:[#allocation25 + $0x7c8] sm:$0xff]  ;;  %v6189_v44 = vmul.f32 %v6155_v31, %v5917_v38  ;;  %v6226_v1 = vpack.c.bf16 %v6192_v61, %v6192_v61 }
 0x8ce   : > { %8798 = vmatpush.bf16.msrb.mxu2 %v12009_v46  ;;  %8811 = vmatpush.bf16.msra.mxu3 %v12017_v17  ;;  %v12003_v46 = vld [vmem:[#allocation25 + $0x780] sm:$0xff] }
 0x8cf   : > { %8824 = vmatpush.bf16.msrb.mxu0 %v12025_v58  ;;  %8837 = vmatpush.bf16.msra.mxu1 %v12033_v4  ;;  %v8560_v12 = vadd.f32 %v8559_v49, %v8547_v11  ;;  %v12011_v17 = vld [vmem:[#allocation25 + $0x7c0] sm:$0xff]  ;;  %v6190_v58 = vmul.f32 %v6156_v51, %v5918_v22  ;;  %v6191_v4 = vmul.f32 %v6157_v0, %v5919_v2 }
 0x8d0   : > { %v6223_v52 = vpack.c.bf16 %v6189_v44, %v6189_v44 }
 0x8d1   : > { %v8574_v8 = vpop.f32.mrf.mxu0  ;;  %v8587_v20 = vpop.f32.mrf.mxu1  ;;  %v8573_v57 = vadd.f32 %v8572_v14, %v8560_v12  ;;  %v6224_v60 = vpack.c.bf16 %v6190_v58, %v6190_v58  ;;  %v6225_v41 = vpack.c.bf16 %v6191_v4, %v6191_v4 }
 0x8d2   : > { %8799 = vmatpush.bf16.msrb.mxu2 %v12008_v5  ;;  %8812 = vmatpush.bf16.msra.mxu3 %v12016_v26 }
 0x8d3   : > { %8825 = vmatpush.bf16.msrb.mxu0 %v12024_v13  ;;  %8838 = vmatpush.bf16.msra.mxu1 %v12032_v48  ;;  %v8586_v15 = vadd.f32 %v8585_v56, %v8573_v57 }
 0x8d4   : > { %v8548_v63 = vpop.f32.mrf.mxu2  ;;  %v8561_v29 = vpop.f32.mrf.mxu3 }
 0x8d6   : > { %8800 = vmatpush.bf16.msrb.mxu2 %v12007_v27  ;;  %8813 = vmatpush.bf16.msra.mxu3 %v12015_v9 }
 0x8d7   : > { %8826 = vmatpush.bf16.msrb.mxu0 %v12023_v18  ;;  %8839 = vmatpush.bf16.msra.mxu1 %v12031_v25 }
 0x8da   : > { %8801 = vmatpush.bf16.msrb.mxu2 %v12006_v32  ;;  %8814 = vmatpush.bf16.msra.mxu3 %v12014_v53 }
 0x8db   : > { %8827 = vmatpush.bf16.msrb.mxu0 %v12022_v47  ;;  %8840 = vmatpush.bf16.msra.mxu1 %v12030_v50 }
 0x8de   : > { %8802 = vmatpush.bf16.msrb.mxu2 %v12005_v62  ;;  %8815 = vmatpush.bf16.msra.mxu3 %v12013_v35 }
 0x8df   : > { %8828 = vmatpush.bf16.msrb.mxu0 %v12021_v40  ;;  %8841 = vmatpush.bf16.msra.mxu1 %v12029_v43 }
 0x8e2   : > { %8803 = vmatpush.bf16.msrb.mxu2 %v12004_v10  ;;  %8816 = vmatpush.bf16.msra.mxu3 %v12012_v37 }
 0x8e3   : > { %8829 = vmatpush.bf16.msrb.mxu0 %v12020_v33  ;;  %8842 = vmatpush.bf16.msra.mxu1 %v12028_v55 }
 0x8e6   : > { %8804 = vmatpush.bf16.msrb.mxu2 %v12003_v46  ;;  %8817 = vmatpush.bf16.msra.mxu3 %v12011_v17 }
 0x8e7   : > { %8830 = vmatpush.bf16.msrb.mxu0 %v12019_v36  ;;  %8843 = vmatpush.bf16.msra.mxu1 %v12027_v21 }
 0x8e9   : > { %8805 = vmatmul.bf16.vlgmr.msrb.gmra.mxu2 %v6223_v52  ;;  %8818 = vmatmul.bf16.vlgmr.msra.gmra.mxu3 %v6224_v60  ;;  %v8624_v54 = vpop.f32.mrf.mxu0  ;;  %v8637_v59 = vpop.f32.mrf.mxu1 }
 0x8ea   : > { %8831 = vmatmul.bf16.vlgmr.msrb.gmra.mxu0 %v6225_v41  ;;  %8844 = vmatmul.bf16.vlgmr.msra.gmra.mxu1 %v6226_v1 }
 0x8ec   : > { %v8598_v5 = vpop.f32.mrf.mxu2  ;;  %v8611_v26 = vpop.f32.mrf.mxu3 }
 0x8ed   : > { %v8599_v6 = vadd.f32 %v8598_v5, %v8586_v15 }
 0x8ef   : > { %v8612_v13 = vadd.f32 %v8611_v26, %v8599_v6 }
 0x8f1   : > { %v8626_v48 = vpop.f32.mrf.mxu0  ;;  %v8639_v7 = vpop.f32.mrf.mxu1  ;;  %v8625_v3 = vadd.f32 %v8624_v54, %v8612_v13 }
 0x8f3   : > { %v8638_v39 = vadd.f32 %v8637_v59, %v8625_v3 }
 0x8f4   : > { %v8600_v14 = vpop.f32.mrf.mxu2  ;;  %v8613_v56 = vpop.f32.mrf.mxu3 }
 0x909   : > { %v8676_v27 = vpop.f32.mrf.mxu0  ;;  %v8689_v9 = vpop.f32.mrf.mxu1 }
 0x90c   : > { %v8650_v23 = vpop.f32.mrf.mxu2  ;;  %v8663_v18 = vpop.f32.mrf.mxu3 }
 0x90d   : > { %v8651_v25 = vadd.f32 %v8650_v23, %v8638_v39 }
 0x90f   : > { %v8664_v32 = vadd.f32 %v8663_v18, %v8651_v25 }
 0x911   : > { %v8678_v53 = vpop.f32.mrf.mxu0  ;;  %v8691_v47 = vpop.f32.mrf.mxu1  ;;  %v8677_v50 = vadd.f32 %v8676_v27, %v8664_v32 }
 0x913   : > { %v8690_v19 = vadd.f32 %v8689_v9, %v8677_v50 }
 0x914   : > { %v8652_v49 = vpop.f32.mrf.mxu2  ;;  %v8665_v11 = vpop.f32.mrf.mxu3 }
 0x929   : > { %v8728_v45 = vpop.f32.mrf.mxu0  ;;  %v8741_v12 = vpop.f32.mrf.mxu1 }
 0x92c   : > { %v8702_v8 = vpop.f32.mrf.mxu2  ;;  %v8715_v20 = vpop.f32.mrf.mxu3 }
 0x92d   : > { %v8703_v10 = vadd.f32 %v8702_v8, %v8690_v19 }
 0x92f   : > { %v8716_v33 = vadd.f32 %v8715_v20, %v8703_v10 }
 0x931   : > { %v8730_v62 = vpop.f32.mrf.mxu0  ;;  %v8743_v35 = vpop.f32.mrf.mxu1  ;;  %v8729_v29 = vadd.f32 %v8728_v45, %v8716_v33 }
 0x933   : > { %v8742_v31 = vadd.f32 %v8741_v12, %v8729_v29 }
 0x934   : > { %v8704_v30 = vpop.f32.mrf.mxu2  ;;  %v8717_v40 = vpop.f32.mrf.mxu3 }
 0x949   : > { %v8780_v43 = vpop.f32.mrf.mxu0  ;;  %v8793_v42 = vpop.f32.mrf.mxu1 }
 0x94c   : > { %v8754_v57 = vpop.f32.mrf.mxu2  ;;  %v8767_v16 = vpop.f32.mrf.mxu3 }
 0x94d   : > { %v8755_v51 = vadd.f32 %v8754_v57, %v8742_v31 }
 0x94f   : > { %v8768_v0 = vadd.f32 %v8767_v16, %v8755_v51 }
 0x951   : > { %v8782_v37 = vpop.f32.mrf.mxu0  ;;  %v8795_v15 = vpop.f32.mrf.mxu1  ;;  %v8781_v34 = vadd.f32 %v8780_v43, %v8768_v0 }
 0x953   : > { %v8794_v2 = vadd.f32 %v8793_v42, %v8781_v34 }
 0x954   : > { %v8756_v55 = vpop.f32.mrf.mxu2  ;;  %v8769_v63 = vpop.f32.mrf.mxu3 }
 0x967   : > { %v8832_v38 = vpop.f32.mrf.mxu0  ;;  %v8845_v22 = vpop.f32.mrf.mxu1 }
 0x96c   : > { %v8806_v28 = vpop.f32.mrf.mxu2  ;;  %v8819_v46 = vpop.f32.mrf.mxu3 }
 0x96d   : > { %v8807_v17 = vadd.f32 %v8806_v28, %v8794_v2 }
 0x96f   : > { %v8820_v36 = vadd.f32 %v8819_v46, %v8807_v17  ;;  %v8834_v21 = vpop.f32.mrf.mxu0  ;;  %v8847_v44 = vpop.f32.mrf.mxu1 }
 0x971   : > { %v8833_v58 = vadd.f32 %v8832_v38, %v8820_v36 }
 0x973   : > { %v8846_v4 = vadd.f32 %v8845_v22, %v8833_v58 }
 0x974   : > { %v8808_v61 = vpop.f32.mrf.mxu2  ;;  %v8821_v52 = vpop.f32.mrf.mxu3 }
 0x975   : > { %v8849_v60 = vadd.f32 %v8846_v4, %v14315_v24 }
 0x977   : > { %8850 = vst [vmem:[%s738_s21] sm:$0xff] %v8849_v60 }
 0x978   : > { %12889 = shalt.err (!%p12886_p13)
}
 0x979   : > { %12093 = dma.vmem_to_hbm [thread:$0]  (%p13243_p0), %s8866_s0, 128, %s8868_s28, %s8852_s3  }
 0x97a PF: > { %s14873_s4 = sld [smem:[#allocation38_spill]]  ;;  %p12143_p2 = pnand %p9099_p6, %p13250_p5 }
 0x97c   : > { %p12144_p4 = pneg %p12143_p2 }
 0x980   : > { %s8879_s27 = sand.u32 1, %s14873_s4  }
 0x981   : > { %s8880_s25 = scalar_lea.sflag [#allocation6], %s8879_s27 }
 0x982   : > { %12947 = dma.done.wait (%p12144_p4), %s8880_s25, 128  }
 0x983   : > { %12949 = vsyncadd (%p12144_p4), %s8880_s25, 4294967168  ;;  %s38_s23 = sadd.s32 1, %s12972_s23   ;;  %s14874_s18 = sld [smem:[#allocation39_spill]] }
 0x984   : > { %p35_p7 = scmp.ge.s32.totalorder %s38_s23, 4   ;;  %s14875_s19 = smov %s12960_s20 }
 0x985   : > { %s14876_s20 = smov %s13248_s15  ;;  %s14877_s21 = smov %s12968_s22 }
 0x986   : > { %s14878_s22 = smov %s14880_s30  ;;  %37 = sbr.rel (!%p35_p7) target bundleno = 21 (0x15), region = 186 }
 0x98b   :  { %8886 = vsyncpa [#allocation5], 1 }
 0x98c   :  { %8888 = vsyncpa [#allocation5 + $0x1], 1 }
 0x98d   :  { %8889 = vsyncpa [#allocation8], 1 }
 0x98e   :  { %8890 = vsyncpa [#allocation11], 1 }
 0x98f   :  { %8891 = vsyncpa [#allocation14], 1 }
 0x990   :  { %8892 = vsyncpa [#allocation17], 1 }
 0x991   :  { %8893 = vsyncpa [#allocation20], 1 }
 0x992   :  { %8894 = vsyncpa [#allocation23], 1 }
 0x993   :  { %8895 = vsyncpa [#allocation26], 1 }
 0x994   :  { %8896 = vsyncpa [#allocation6], 1 }
 0x995   :  { %8898 = vsyncpa [#allocation6 + $0x1], 1 }

</bundles_post_ra>
